<compile_context>
chip_gen: v5e
topology: v5e:2x2
jax: 0.10.0
libtpu: 0.0.40
codegen_flags: <defaults>
</compile_context>

<pallas_src>
import functools

import jax
import jax.numpy as jnp
from jax import lax
from jax.experimental import pallas as pl
from jax.experimental.pallas import tpu as pltpu


def _mha_kernel(x_ref, wqkv_ref, wp_ref, bp_ref, o_ref, qkv_ref, cat_ref,
                *, num_heads, head_size):
    # x_ref: (T, C) bf16 (batch dim squeezed by BlockSpec)
    T = x_ref.shape[0]
    HD = num_heads * head_size

    # Fused QKV projection: (T, C) @ (C, 3*HD) -> (T, 3*HD), f32 acc on MXU,
    # staged through VMEM scratch as bf16.  Scale 1/sqrt(Dh) is folded into
    # the Q columns host-side.
    qkv_ref[...] = jnp.dot(
        x_ref[...], wqkv_ref[...],
        preferred_element_type=jnp.float32).astype(jnp.bfloat16)

    # Additive causal-mask bias, computed once per grid step (hoisted out of
    # the per-head loop).  Large finite negative avoids NaNs on any all-masked
    # row reuse.
    row = lax.broadcasted_iota(jnp.int32, (T, T), 0)
    col = lax.broadcasted_iota(jnp.int32, (T, T), 1)
    mask_bias = jnp.where(col <= row, 0.0, -1e30).astype(jnp.float32)

    for h in range(num_heads):                       # static loop (H = 6)
        s = h * head_size
        q = qkv_ref[:, s:s + head_size]              # (T, Dh) bf16, pre-scaled
        k = qkv_ref[:, HD + s:HD + s + head_size]    # (T, Dh) bf16
        v = qkv_ref[:, 2 * HD + s:2 * HD + s + head_size]

        # att[i, j] = sum_d q[i, d] * k[j, d]   (contract last dims, no k.T)
        att = lax.dot_general(
            q, k, dimension_numbers=(((1,), (1,)), ((), ())),
            preferred_element_type=jnp.float32)      # (T, T) f32
        att = att + mask_bias

        # Online-free softmax (full T x T fits easily at T=128).
        m = jnp.max(att, axis=-1, keepdims=True)
        p = jnp.exp(att - m)                         # (T, T) f32, unnormalized
        denom = jnp.sum(p, axis=-1, keepdims=True)   # (T, 1)
        inv = pl.reciprocal(denom, approx=True)      # EUP, ~free

        # p @ v with bf16 operands, f32 accumulation; normalize the small
        # (T, Dh) result instead of the (T, T) probability matrix.
        pv = jnp.dot(p.astype(jnp.bfloat16), v,
                     preferred_element_type=jnp.float32)     # (T, Dh) f32
        cat_ref[:, s:s + head_size] = (pv * inv).astype(jnp.bfloat16)

    # Output projection: (T, HD) @ (HD, C) + bias, f32 accumulate, f32 output.
    proj = jnp.dot(cat_ref[...], wp_ref[...],
                   preferred_element_type=jnp.float32)
    o_ref[...] = proj + bp_ref[...]


def multi_head_attention(x, wqkv, wp_t, bp, *, num_heads, head_size):
    """x: (B, T, C) f32.  wqkv: (C, 3*H*Dh) (Q cols pre-scaled).
    wp_t: (H*Dh, C).  bp: (1, C) f32.  Returns (B, T, C) f32."""
    B, T, C = x.shape
    HD = num_heads * head_size

    # bf16 operands for the MXU (f32 accumulation inside the kernel).
    x_bf = x.astype(jnp.bfloat16)
    wqkv_bf = wqkv.astype(jnp.bfloat16)
    wp_bf = wp_t.astype(jnp.bfloat16)
    bp_f32 = bp.astype(jnp.float32)

    kernel = functools.partial(_mha_kernel, num_heads=num_heads,
                               head_size=head_size)
    return pl.pallas_call(
        kernel,
        out_shape=jax.ShapeDtypeStruct((B, T, C), jnp.float32),
        grid=(B,),
        in_specs=[
            pl.BlockSpec((None, T, C), lambda b: (b, 0, 0)),   # x, batch squeezed
            pl.BlockSpec((C, 3 * HD), lambda b: (0, 0)),       # fused QKV weight
            pl.BlockSpec((HD, C), lambda b: (0, 0)),           # output proj weight
            pl.BlockSpec((1, C), lambda b: (0, 0)),            # output proj bias
        ],
        out_specs=pl.BlockSpec((None, T, C), lambda b: (b, 0, 0)),
        scratch_shapes=[
            pltpu.VMEM((T, 3 * HD), jnp.bfloat16),             # fused QKV stage
            pltpu.VMEM((T, HD), jnp.bfloat16),                 # concat(heads) stage
        ],
        compiler_params=pltpu.CompilerParams(
            dimension_semantics=("parallel",)),
    )(x_bf, wqkv_bf, wp_bf, bp_f32)


def _reference(x, wq_flat, wk_flat, wv_flat, wp_t, bp, *, num_heads, head_size):
    """Plain-JAX f32 reference mirroring the PyTorch forward (eval mode)."""
    B, T, C = x.shape
    scale = head_size ** -0.5
    q = (x @ wq_flat).reshape(B, T, num_heads, head_size)
    k = (x @ wk_flat).reshape(B, T, num_heads, head_size)
    v = (x @ wv_flat).reshape(B, T, num_heads, head_size)
    att = jnp.einsum('bthd,bshd->bhts', q, k) * scale
    mask = jnp.tril(jnp.ones((T, T), dtype=bool))
    att = jnp.where(mask[None, None], att, -jnp.inf)
    p = jax.nn.softmax(att, axis=-1)
    out = jnp.einsum('bhts,bshd->bthd', p, v).reshape(B, T, num_heads * head_size)
    return out @ wp_t + bp


if __name__ == "__main__":
    # Module constants: number_of_embeddings=384, number_of_heads=6 -> head_size=64.
    B, T = 2, 128                       # T <= block_size (256)
    C = 384
    H = 6
    Dh = C // H                         # 64
    HD = H * Dh
    scale = Dh ** -0.5

    key = jax.random.PRNGKey(0)
    kx, kq, kk, kv, kp, kb = jax.random.split(key, 6)

    x = jax.random.normal(kx, (B, T, C), dtype=jnp.float32)

    # nn.Linear default init: U(-1/sqrt(fan_in), 1/sqrt(fan_in))
    bound_in = 1.0 / (C ** 0.5)
    # Per-head weights (H, Dh, C) -> packed transposed (C, H*Dh)
    wq = jax.random.uniform(kq, (H, Dh, C), jnp.float32, -bound_in, bound_in)
    wk = jax.random.uniform(kk, (H, Dh, C), jnp.float32, -bound_in, bound_in)
    wv = jax.random.uniform(kv, (H, Dh, C), jnp.float32, -bound_in, bound_in)
    wq_flat = jnp.transpose(wq, (2, 0, 1)).reshape(C, HD)
    wk_flat = jnp.transpose(wk, (2, 0, 1)).reshape(C, HD)
    wv_flat = jnp.transpose(wv, (2, 0, 1)).reshape(C, HD)

    bound_p = 1.0 / (HD ** 0.5)
    wp = jax.random.uniform(kp, (C, HD), jnp.float32, -bound_p, bound_p)  # (out, in)
    bp = jax.random.uniform(kb, (C,), jnp.float32, -bound_p, bound_p)
    wp_t = wp.T                                   # (H*Dh, C)
    bp_row = bp.reshape(1, C)

    # Fused QKV weight with the attention scale folded into the Q columns.
    wqkv = jnp.concatenate([wq_flat * scale, wk_flat, wv_flat], axis=1)  # (C, 3*HD)

    out = multi_head_attention(x, wqkv, wp_t, bp_row, num_heads=H, head_size=Dh)
    out = jax.block_until_ready(out)

    ref = _reference(x, wq_flat, wk_flat, wv_flat, wp_t, bp_row,
                     num_heads=H, head_size=Dh)
    # bf16 operands + approx reciprocal => looser tolerance than pure-f32.
    assert jnp.allclose(out, ref, atol=5e-2, rtol=5e-2), "mismatch vs reference"
    assert not jnp.any(jnp.isnan(out)), "NaN in output"

    print("KERNEL_OK")
</pallas_src>

<mosaic_0001>
module attributes {stable_mosaic.version = 11 : i64} {
  func.func @_mha_kernel(%arg0: i32, %arg1: memref<1x128x384xbf16, #tpu.memory_space<vmem>>, %arg2: memref<384x1152xbf16, #tpu.memory_space<vmem>>, %arg3: memref<384x384xbf16, #tpu.memory_space<vmem>>, %arg4: memref<1x384xf32, #tpu.memory_space<vmem>>, %arg5: memref<1x128x384xf32, #tpu.memory_space<vmem>>, %arg6: memref<128x1152xbf16, #tpu.memory_space<vmem>>, %arg7: memref<128x384xbf16, #tpu.memory_space<vmem>>) attributes {dimension_semantics = [#tpu.dimension_semantics<parallel>], iteration_bounds = array<i64: 2>, scalar_prefetch = 0 : i64, scratch_operands = 2 : i64, tpu.core_type = #tpu.core_type<tc>, window_params = [{transform_indices = @transform_0, window_bounds = array<i64: 1, 128, 384>}, {pipeline_mode = #tpu.pipeline_mode<synchronous>, transform_indices = @transform_1, window_bounds = array<i64: 384, 1152>}, {pipeline_mode = #tpu.pipeline_mode<synchronous>, transform_indices = @transform_2, window_bounds = array<i64: 384, 384>}, {pipeline_mode = #tpu.pipeline_mode<synchronous>, transform_indices = @transform_3, window_bounds = array<i64: 1, 384>}, {transform_indices = @transform_4, window_bounds = array<i64: 1, 128, 384>}]} {
    %c0 = arith.constant 0 : index
    %c0_0 = arith.constant 0 : index
    %c0_1 = arith.constant 0 : index
    %0 = vector.load %arg1[%c0, %c0_0, %c0_1] : memref<1x128x384xbf16, #tpu.memory_space<vmem>>, vector<1x128x384xbf16>
    %1 = vector.shape_cast %0 : vector<1x128x384xbf16> to vector<128x384xbf16>
    %c0_2 = arith.constant 0 : index
    %c0_3 = arith.constant 0 : index
    %2 = vector.load %arg2[%c0_2, %c0_3] : memref<384x1152xbf16, #tpu.memory_space<vmem>>, vector<384x1152xbf16>
    %cst = arith.constant dense<0.000000e+00> : vector<128x1152xf32>
    %3 = tpu.matmul %1, %2, %cst {dimension_numbers = #tpu.dot_dimension_numbers<[1], [0], [0], [1], [0, 0, 1, 1], [], []>} : vector<128x384xbf16>, vector<384x1152xbf16>, vector<128x1152xf32> -> vector<128x1152xf32>
    %4 = arith.truncf %3 : vector<128x1152xf32> to vector<128x1152xbf16>
    %c0_4 = arith.constant 0 : index
    %c0_5 = arith.constant 0 : index
    %5 = vector.load %arg6[%c0_4, %c0_5] : memref<128x1152xbf16, #tpu.memory_space<vmem>>, vector<128x1152xbf16>
    tpu.vector_store %arg6[%c0_4, %c0_5], %4 {strides = array<i32>} : memref<128x1152xbf16, #tpu.memory_space<vmem>>, vector<128x1152xbf16>,
    %6 = tpu.iota {dimensions = array<i32: 0>} : vector<128x128xi32>
    %7 = tpu.iota {dimensions = array<i32: 1>} : vector<128x128xi32>
    %8 = arith.cmpi sle, %7, %6 : vector<128x128xi32>
    %cst_6 = arith.constant 0.000000e+00 : f32
    %cst_7 = arith.constant -1.000000e+30 : f32
    %9 = vector.broadcast %cst_6 : f32 to vector<128x128xf32>
    %10 = vector.broadcast %cst_7 : f32 to vector<128x128xf32>
    %11 = arith.select %8, %9, %10 : vector<128x128xi1>, vector<128x128xf32>
    %c0_8 = arith.constant 0 : index
    %c0_9 = arith.constant 0 : index
    %12 = vector.load %arg6[%c0_8, %c0_9] : memref<128x1152xbf16, #tpu.memory_space<vmem>>, vector<128x64xbf16>
    %c0_10 = arith.constant 0 : index
    %c384 = arith.constant 384 : index
    %13 = vector.load %arg6[%c0_10, %c384] : memref<128x1152xbf16, #tpu.memory_space<vmem>>, vector<128x64xbf16>
    %c0_11 = arith.constant 0 : index
    %c768 = arith.constant 768 : index
    %14 = vector.load %arg6[%c0_11, %c768] : memref<128x1152xbf16, #tpu.memory_space<vmem>>, vector<128x64xbf16>
    %cst_12 = arith.constant dense<0.000000e+00> : vector<128x128xf32>
    %15 = tpu.matmul %12, %13, %cst_12 {dimension_numbers = #tpu.dot_dimension_numbers<[1], [1], [0], [0], [0, 0, 1, 0], [], []>} : vector<128x64xbf16>, vector<128x64xbf16>, vector<128x128xf32> -> vector<128x128xf32>
    %16 = arith.addf %15, %11 : vector<128x128xf32>
    %cst_13 = arith.constant dense<0xFF800000> : vector<128xf32>
    %17 = vector.multi_reduction <maximumf>, %16, %cst_13 [1] : vector<128x128xf32> to vector<128xf32>
    %18 = vector.shape_cast %17 : vector<128xf32> to vector<128x1xf32>
    %19 = vector.broadcast %18 : vector<128x1xf32> to vector<128x128xf32>
    %20 = arith.subf %16, %19 : vector<128x128xf32>
    %21 = math.exp %20 : vector<128x128xf32>
    %cst_14 = arith.constant dense<0.000000e+00> : vector<128xf32>
    %22 = vector.multi_reduction <add>, %21, %cst_14 [1] : vector<128x128xf32> to vector<128xf32>
    %23 = vector.shape_cast %22 : vector<128xf32> to vector<128x1xf32>
    %24 = tpu.reciprocal %23 {approx = true} : vector<128x1xf32> -> vector<128x1xf32>
    %25 = arith.truncf %21 : vector<128x128xf32> to vector<128x128xbf16>
    %cst_15 = arith.constant dense<0.000000e+00> : vector<128x64xf32>
    %26 = tpu.matmul %25, %14, %cst_15 {dimension_numbers = #tpu.dot_dimension_numbers<[1], [0], [0], [1], [0, 0, 1, 1], [], []>} : vector<128x128xbf16>, vector<128x64xbf16>, vector<128x64xf32> -> vector<128x64xf32>
    %27 = vector.broadcast %24 : vector<128x1xf32> to vector<128x64xf32>
    %28 = arith.mulf %26, %27 : vector<128x64xf32>
    %29 = arith.truncf %28 : vector<128x64xf32> to vector<128x64xbf16>
    %c0_16 = arith.constant 0 : index
    %c0_17 = arith.constant 0 : index
    %30 = vector.load %arg7[%c0_16, %c0_17] : memref<128x384xbf16, #tpu.memory_space<vmem>>, vector<128x64xbf16>
    tpu.vector_store %arg7[%c0_16, %c0_17], %29 {strides = array<i32>} : memref<128x384xbf16, #tpu.memory_space<vmem>>, vector<128x64xbf16>,
    %c0_18 = arith.constant 0 : index
    %c64 = arith.constant 64 : index
    %31 = vector.load %arg6[%c0_18, %c64] : memref<128x1152xbf16, #tpu.memory_space<vmem>>, vector<128x64xbf16>
    %c0_19 = arith.constant 0 : index
    %c448 = arith.constant 448 : index
    %32 = vector.load %arg6[%c0_19, %c448] : memref<128x1152xbf16, #tpu.memory_space<vmem>>, vector<128x64xbf16>
    %c0_20 = arith.constant 0 : index
    %c832 = arith.constant 832 : index
    %33 = vector.load %arg6[%c0_20, %c832] : memref<128x1152xbf16, #tpu.memory_space<vmem>>, vector<128x64xbf16>
    %cst_21 = arith.constant dense<0.000000e+00> : vector<128x128xf32>
    %34 = tpu.matmul %31, %32, %cst_21 {dimension_numbers = #tpu.dot_dimension_numbers<[1], [1], [0], [0], [0, 0, 1, 0], [], []>} : vector<128x64xbf16>, vector<128x64xbf16>, vector<128x128xf32> -> vector<128x128xf32>
    %35 = arith.addf %34, %11 : vector<128x128xf32>
    %cst_22 = arith.constant dense<0xFF800000> : vector<128xf32>
    %36 = vector.multi_reduction <maximumf>, %35, %cst_22 [1] : vector<128x128xf32> to vector<128xf32>
    %37 = vector.shape_cast %36 : vector<128xf32> to vector<128x1xf32>
    %38 = vector.broadcast %37 : vector<128x1xf32> to vector<128x128xf32>
    %39 = arith.subf %35, %38 : vector<128x128xf32>
    %40 = math.exp %39 : vector<128x128xf32>
    %cst_23 = arith.constant dense<0.000000e+00> : vector<128xf32>
    %41 = vector.multi_reduction <add>, %40, %cst_23 [1] : vector<128x128xf32> to vector<128xf32>
    %42 = vector.shape_cast %41 : vector<128xf32> to vector<128x1xf32>
    %43 = tpu.reciprocal %42 {approx = true} : vector<128x1xf32> -> vector<128x1xf32>
    %44 = arith.truncf %40 : vector<128x128xf32> to vector<128x128xbf16>
    %cst_24 = arith.constant dense<0.000000e+00> : vector<128x64xf32>
    %45 = tpu.matmul %44, %33, %cst_24 {dimension_numbers = #tpu.dot_dimension_numbers<[1], [0], [0], [1], [0, 0, 1, 1], [], []>} : vector<128x128xbf16>, vector<128x64xbf16>, vector<128x64xf32> -> vector<128x64xf32>
    %46 = vector.broadcast %43 : vector<128x1xf32> to vector<128x64xf32>
    %47 = arith.mulf %45, %46 : vector<128x64xf32>
    %48 = arith.truncf %47 : vector<128x64xf32> to vector<128x64xbf16>
    %c0_25 = arith.constant 0 : index
    %c64_26 = arith.constant 64 : index
    %49 = vector.load %arg7[%c0_25, %c64_26] : memref<128x384xbf16, #tpu.memory_space<vmem>>, vector<128x64xbf16>
    tpu.vector_store %arg7[%c0_25, %c64_26], %48 {strides = array<i32>} : memref<128x384xbf16, #tpu.memory_space<vmem>>, vector<128x64xbf16>,
    %c0_27 = arith.constant 0 : index
    %c128 = arith.constant 128 : index
    %50 = vector.load %arg6[%c0_27, %c128] : memref<128x1152xbf16, #tpu.memory_space<vmem>>, vector<128x64xbf16>
    %c0_28 = arith.constant 0 : index
    %c512 = arith.constant 512 : index
    %51 = vector.load %arg6[%c0_28, %c512] : memref<128x1152xbf16, #tpu.memory_space<vmem>>, vector<128x64xbf16>
    %c0_29 = arith.constant 0 : index
    %c896 = arith.constant 896 : index
    %52 = vector.load %arg6[%c0_29, %c896] : memref<128x1152xbf16, #tpu.memory_space<vmem>>, vector<128x64xbf16>
    %cst_30 = arith.constant dense<0.000000e+00> : vector<128x128xf32>
    %53 = tpu.matmul %50, %51, %cst_30 {dimension_numbers = #tpu.dot_dimension_numbers<[1], [1], [0], [0], [0, 0, 1, 0], [], []>} : vector<128x64xbf16>, vector<128x64xbf16>, vector<128x128xf32> -> vector<128x128xf32>
    %54 = arith.addf %53, %11 : vector<128x128xf32>
    %cst_31 = arith.constant dense<0xFF800000> : vector<128xf32>
    %55 = vector.multi_reduction <maximumf>, %54, %cst_31 [1] : vector<128x128xf32> to vector<128xf32>
    %56 = vector.shape_cast %55 : vector<128xf32> to vector<128x1xf32>
    %57 = vector.broadcast %56 : vector<128x1xf32> to vector<128x128xf32>
    %58 = arith.subf %54, %57 : vector<128x128xf32>
    %59 = math.exp %58 : vector<128x128xf32>
    %cst_32 = arith.constant dense<0.000000e+00> : vector<128xf32>
    %60 = vector.multi_reduction <add>, %59, %cst_32 [1] : vector<128x128xf32> to vector<128xf32>
    %61 = vector.shape_cast %60 : vector<128xf32> to vector<128x1xf32>
    %62 = tpu.reciprocal %61 {approx = true} : vector<128x1xf32> -> vector<128x1xf32>
    %63 = arith.truncf %59 : vector<128x128xf32> to vector<128x128xbf16>
    %cst_33 = arith.constant dense<0.000000e+00> : vector<128x64xf32>
    %64 = tpu.matmul %63, %52, %cst_33 {dimension_numbers = #tpu.dot_dimension_numbers<[1], [0], [0], [1], [0, 0, 1, 1], [], []>} : vector<128x128xbf16>, vector<128x64xbf16>, vector<128x64xf32> -> vector<128x64xf32>
    %65 = vector.broadcast %62 : vector<128x1xf32> to vector<128x64xf32>
    %66 = arith.mulf %64, %65 : vector<128x64xf32>
    %67 = arith.truncf %66 : vector<128x64xf32> to vector<128x64xbf16>
    %c0_34 = arith.constant 0 : index
    %c128_35 = arith.constant 128 : index
    %68 = vector.load %arg7[%c0_34, %c128_35] : memref<128x384xbf16, #tpu.memory_space<vmem>>, vector<128x64xbf16>
    tpu.vector_store %arg7[%c0_34, %c128_35], %67 {strides = array<i32>} : memref<128x384xbf16, #tpu.memory_space<vmem>>, vector<128x64xbf16>,
    %c0_36 = arith.constant 0 : index
    %c192 = arith.constant 192 : index
    %69 = vector.load %arg6[%c0_36, %c192] : memref<128x1152xbf16, #tpu.memory_space<vmem>>, vector<128x64xbf16>
    %c0_37 = arith.constant 0 : index
    %c576 = arith.constant 576 : index
    %70 = vector.load %arg6[%c0_37, %c576] : memref<128x1152xbf16, #tpu.memory_space<vmem>>, vector<128x64xbf16>
    %c0_38 = arith.constant 0 : index
    %c960 = arith.constant 960 : index
    %71 = vector.load %arg6[%c0_38, %c960] : memref<128x1152xbf16, #tpu.memory_space<vmem>>, vector<128x64xbf16>
    %cst_39 = arith.constant dense<0.000000e+00> : vector<128x128xf32>
    %72 = tpu.matmul %69, %70, %cst_39 {dimension_numbers = #tpu.dot_dimension_numbers<[1], [1], [0], [0], [0, 0, 1, 0], [], []>} : vector<128x64xbf16>, vector<128x64xbf16>, vector<128x128xf32> -> vector<128x128xf32>
    %73 = arith.addf %72, %11 : vector<128x128xf32>
    %cst_40 = arith.constant dense<0xFF800000> : vector<128xf32>
    %74 = vector.multi_reduction <maximumf>, %73, %cst_40 [1] : vector<128x128xf32> to vector<128xf32>
    %75 = vector.shape_cast %74 : vector<128xf32> to vector<128x1xf32>
    %76 = vector.broadcast %75 : vector<128x1xf32> to vector<128x128xf32>
    %77 = arith.subf %73, %76 : vector<128x128xf32>
    %78 = math.exp %77 : vector<128x128xf32>
    %cst_41 = arith.constant dense<0.000000e+00> : vector<128xf32>
    %79 = vector.multi_reduction <add>, %78, %cst_41 [1] : vector<128x128xf32> to vector<128xf32>
    %80 = vector.shape_cast %79 : vector<128xf32> to vector<128x1xf32>
    %81 = tpu.reciprocal %80 {approx = true} : vector<128x1xf32> -> vector<128x1xf32>
    %82 = arith.truncf %78 : vector<128x128xf32> to vector<128x128xbf16>
    %cst_42 = arith.constant dense<0.000000e+00> : vector<128x64xf32>
    %83 = tpu.matmul %82, %71, %cst_42 {dimension_numbers = #tpu.dot_dimension_numbers<[1], [0], [0], [1], [0, 0, 1, 1], [], []>} : vector<128x128xbf16>, vector<128x64xbf16>, vector<128x64xf32> -> vector<128x64xf32>
    %84 = vector.broadcast %81 : vector<128x1xf32> to vector<128x64xf32>
    %85 = arith.mulf %83, %84 : vector<128x64xf32>
    %86 = arith.truncf %85 : vector<128x64xf32> to vector<128x64xbf16>
    %c0_43 = arith.constant 0 : index
    %c192_44 = arith.constant 192 : index
    %87 = vector.load %arg7[%c0_43, %c192_44] : memref<128x384xbf16, #tpu.memory_space<vmem>>, vector<128x64xbf16>
    tpu.vector_store %arg7[%c0_43, %c192_44], %86 {strides = array<i32>} : memref<128x384xbf16, #tpu.memory_space<vmem>>, vector<128x64xbf16>,
    %c0_45 = arith.constant 0 : index
    %c256 = arith.constant 256 : index
    %88 = vector.load %arg6[%c0_45, %c256] : memref<128x1152xbf16, #tpu.memory_space<vmem>>, vector<128x64xbf16>
    %c0_46 = arith.constant 0 : index
    %c640 = arith.constant 640 : index
    %89 = vector.load %arg6[%c0_46, %c640] : memref<128x1152xbf16, #tpu.memory_space<vmem>>, vector<128x64xbf16>
    %c0_47 = arith.constant 0 : index
    %c1024 = arith.constant 1024 : index
    %90 = vector.load %arg6[%c0_47, %c1024] : memref<128x1152xbf16, #tpu.memory_space<vmem>>, vector<128x64xbf16>
    %cst_48 = arith.constant dense<0.000000e+00> : vector<128x128xf32>
    %91 = tpu.matmul %88, %89, %cst_48 {dimension_numbers = #tpu.dot_dimension_numbers<[1], [1], [0], [0], [0, 0, 1, 0], [], []>} : vector<128x64xbf16>, vector<128x64xbf16>, vector<128x128xf32> -> vector<128x128xf32>
    %92 = arith.addf %91, %11 : vector<128x128xf32>
    %cst_49 = arith.constant dense<0xFF800000> : vector<128xf32>
    %93 = vector.multi_reduction <maximumf>, %92, %cst_49 [1] : vector<128x128xf32> to vector<128xf32>
    %94 = vector.shape_cast %93 : vector<128xf32> to vector<128x1xf32>
    %95 = vector.broadcast %94 : vector<128x1xf32> to vector<128x128xf32>
    %96 = arith.subf %92, %95 : vector<128x128xf32>
    %97 = math.exp %96 : vector<128x128xf32>
    %cst_50 = arith.constant dense<0.000000e+00> : vector<128xf32>
    %98 = vector.multi_reduction <add>, %97, %cst_50 [1] : vector<128x128xf32> to vector<128xf32>
    %99 = vector.shape_cast %98 : vector<128xf32> to vector<128x1xf32>
    %100 = tpu.reciprocal %99 {approx = true} : vector<128x1xf32> -> vector<128x1xf32>
    %101 = arith.truncf %97 : vector<128x128xf32> to vector<128x128xbf16>
    %cst_51 = arith.constant dense<0.000000e+00> : vector<128x64xf32>
    %102 = tpu.matmul %101, %90, %cst_51 {dimension_numbers = #tpu.dot_dimension_numbers<[1], [0], [0], [1], [0, 0, 1, 1], [], []>} : vector<128x128xbf16>, vector<128x64xbf16>, vector<128x64xf32> -> vector<128x64xf32>
    %103 = vector.broadcast %100 : vector<128x1xf32> to vector<128x64xf32>
    %104 = arith.mulf %102, %103 : vector<128x64xf32>
    %105 = arith.truncf %104 : vector<128x64xf32> to vector<128x64xbf16>
    %c0_52 = arith.constant 0 : index
    %c256_53 = arith.constant 256 : index
    %106 = vector.load %arg7[%c0_52, %c256_53] : memref<128x384xbf16, #tpu.memory_space<vmem>>, vector<128x64xbf16>
    tpu.vector_store %arg7[%c0_52, %c256_53], %105 {strides = array<i32>} : memref<128x384xbf16, #tpu.memory_space<vmem>>, vector<128x64xbf16>,
    %c0_54 = arith.constant 0 : index
    %c320 = arith.constant 320 : index
    %107 = vector.load %arg6[%c0_54, %c320] : memref<128x1152xbf16, #tpu.memory_space<vmem>>, vector<128x64xbf16>
    %c0_55 = arith.constant 0 : index
    %c704 = arith.constant 704 : index
    %108 = vector.load %arg6[%c0_55, %c704] : memref<128x1152xbf16, #tpu.memory_space<vmem>>, vector<128x64xbf16>
    %c0_56 = arith.constant 0 : index
    %c1088 = arith.constant 1088 : index
    %109 = vector.load %arg6[%c0_56, %c1088] : memref<128x1152xbf16, #tpu.memory_space<vmem>>, vector<128x64xbf16>
    %cst_57 = arith.constant dense<0.000000e+00> : vector<128x128xf32>
    %110 = tpu.matmul %107, %108, %cst_57 {dimension_numbers = #tpu.dot_dimension_numbers<[1], [1], [0], [0], [0, 0, 1, 0], [], []>} : vector<128x64xbf16>, vector<128x64xbf16>, vector<128x128xf32> -> vector<128x128xf32>
    %111 = arith.addf %110, %11 : vector<128x128xf32>
    %cst_58 = arith.constant dense<0xFF800000> : vector<128xf32>
    %112 = vector.multi_reduction <maximumf>, %111, %cst_58 [1] : vector<128x128xf32> to vector<128xf32>
    %113 = vector.shape_cast %112 : vector<128xf32> to vector<128x1xf32>
    %114 = vector.broadcast %113 : vector<128x1xf32> to vector<128x128xf32>
    %115 = arith.subf %111, %114 : vector<128x128xf32>
    %116 = math.exp %115 : vector<128x128xf32>
    %cst_59 = arith.constant dense<0.000000e+00> : vector<128xf32>
    %117 = vector.multi_reduction <add>, %116, %cst_59 [1] : vector<128x128xf32> to vector<128xf32>
    %118 = vector.shape_cast %117 : vector<128xf32> to vector<128x1xf32>
    %119 = tpu.reciprocal %118 {approx = true} : vector<128x1xf32> -> vector<128x1xf32>
    %120 = arith.truncf %116 : vector<128x128xf32> to vector<128x128xbf16>
    %cst_60 = arith.constant dense<0.000000e+00> : vector<128x64xf32>
    %121 = tpu.matmul %120, %109, %cst_60 {dimension_numbers = #tpu.dot_dimension_numbers<[1], [0], [0], [1], [0, 0, 1, 1], [], []>} : vector<128x128xbf16>, vector<128x64xbf16>, vector<128x64xf32> -> vector<128x64xf32>
    %122 = vector.broadcast %119 : vector<128x1xf32> to vector<128x64xf32>
    %123 = arith.mulf %121, %122 : vector<128x64xf32>
    %124 = arith.truncf %123 : vector<128x64xf32> to vector<128x64xbf16>
    %c0_61 = arith.constant 0 : index
    %c320_62 = arith.constant 320 : index
    %125 = vector.load %arg7[%c0_61, %c320_62] : memref<128x384xbf16, #tpu.memory_space<vmem>>, vector<128x64xbf16>
    tpu.vector_store %arg7[%c0_61, %c320_62], %124 {strides = array<i32>} : memref<128x384xbf16, #tpu.memory_space<vmem>>, vector<128x64xbf16>,
    %c0_63 = arith.constant 0 : index
    %c0_64 = arith.constant 0 : index
    %126 = vector.load %arg7[%c0_63, %c0_64] : memref<128x384xbf16, #tpu.memory_space<vmem>>, vector<128x384xbf16>
    %c0_65 = arith.constant 0 : index
    %c0_66 = arith.constant 0 : index
    %127 = vector.load %arg3[%c0_65, %c0_66] : memref<384x384xbf16, #tpu.memory_space<vmem>>, vector<384x384xbf16>
    %cst_67 = arith.constant dense<0.000000e+00> : vector<128x384xf32>
    %128 = tpu.matmul %126, %127, %cst_67 {dimension_numbers = #tpu.dot_dimension_numbers<[1], [0], [0], [1], [0, 0, 1, 1], [], []>} : vector<128x384xbf16>, vector<384x384xbf16>, vector<128x384xf32> -> vector<128x384xf32>
    %c0_68 = arith.constant 0 : index
    %c0_69 = arith.constant 0 : index
    %129 = vector.load %arg4[%c0_68, %c0_69] : memref<1x384xf32, #tpu.memory_space<vmem>>, vector<1x384xf32>
    %130 = vector.broadcast %129 : vector<1x384xf32> to vector<128x384xf32>
    %131 = arith.addf %128, %130 : vector<128x384xf32>
    %c0_70 = arith.constant 0 : index
    %c0_71 = arith.constant 0 : index
    %c0_72 = arith.constant 0 : index
    %132 = vector.load %arg5[%c0_70, %c0_71, %c0_72] : memref<1x128x384xf32, #tpu.memory_space<vmem>>, vector<1x128x384xf32>
    %133 = vector.shape_cast %132 : vector<1x128x384xf32> to vector<128x384xf32>
    %134 = vector.shape_cast %131 : vector<128x384xf32> to vector<1x128x384xf32>
    tpu.vector_store %arg5[%c0_70, %c0_71, %c0_72], %134 {strides = array<i32>} : memref<1x128x384xf32, #tpu.memory_space<vmem>>, vector<1x128x384xf32>,
    return
  }
  func.func @transform_0(%arg0: i32) -> (i32, i32, i32) {
    %c0_i32 = arith.constant 0 : i32
    %c0_i32_0 = arith.constant 0 : i32
    %c0_i32_1 = arith.constant 0 : i32
    return %arg0, %c0_i32, %c0_i32_0 : i32, i32, i32
  }
  func.func @transform_1(%arg0: i32) -> (i32, i32) {
    %c0_i32 = arith.constant 0 : i32
    %c0_i32_0 = arith.constant 0 : i32
    %c0_i32_1 = arith.constant 0 : i32
    return %c0_i32, %c0_i32_0 : i32, i32
  }
  func.func @transform_2(%arg0: i32) -> (i32, i32) {
    %c0_i32 = arith.constant 0 : i32
    %c0_i32_0 = arith.constant 0 : i32
    %c0_i32_1 = arith.constant 0 : i32
    return %c0_i32, %c0_i32_0 : i32, i32
  }
  func.func @transform_3(%arg0: i32) -> (i32, i32) {
    %c0_i32 = arith.constant 0 : i32
    %c0_i32_0 = arith.constant 0 : i32
    %c0_i32_1 = arith.constant 0 : i32
    return %c0_i32, %c0_i32_0 : i32, i32
  }
  func.func @transform_4(%arg0: i32) -> (i32, i32, i32) {
    %c0_i32 = arith.constant 0 : i32
    %c0_i32_0 = arith.constant 0 : i32
    %c0_i32_1 = arith.constant 0 : i32
    return %arg0, %c0_i32, %c0_i32_0 : i32, i32, i32
  }
}

</mosaic_0001>

<bundles_post_ra>
// kernel: tpu_custom_call.1
= control target key start
LH: loop header
LB: loop body
LE: loop exit
PB: predicated region body
PF: predicated region fallthrough
CT: control target
= control target key end

     0   :  { %9 = vsyncpa [#allocation5], 0  ;;  %s13946_s0 = inlined_call_operand.hbm [shape: bf16[2,128,384], index: 0, kind: input, shape index: {}]   ;;  %s13947_s1 = inlined_call_operand.hbm [shape: bf16[384,1152], index: 1, kind: input, shape index: {}]   ;;  %s13948_s2 = inlined_call_operand.hbm [shape: bf16[384,384], index: 2, kind: input, shape index: {}]   ;;  %s13949_s3 = inlined_call_operand.hbm [shape: f32[1,384], index: 3, kind: input, shape index: {}]   ;;  %s13950_s4 = inlined_call_operand.hbm [shape: f32[2,128,384], index: 4, kind: output, shape index: {}]  }
   0x1   :  { %11 = vsyncpa [#allocation5 + $0x1], 0 }
   0x2   :  { %12 = vsyncpa [#allocation8], 0 }
   0x3   :  { %13 = vsyncpa [#allocation11], 0 }
   0x4   :  { %14 = vsyncpa [#allocation6], 0 }
   0x5   :  { %16 = vsyncpa [#allocation6 + $0x1], 0  ;;  %s11103_s15 = smov 0   ;;  %s11105_s16 = smov 0  }
   0x6   :  { %s11107_s17 = smov 0   ;;  %s11109_s18 = smov 0  }
   0x7 LB: > { %s11124_s19 = sadd.s32 4294967295, %s11065_s18   ;;  %s7934_s20 = sadd.s32 4294967294, %s11065_s18   ;;  %s11065_s18 = sphi %s11109_s18, %s14224_s18   ;;  %s11061_s17 = sphi %s11107_s17, %s14223_s17   ;;  %s11057_s16 = sphi %s11105_s16, %s14222_s16   ;;  %s11053_s15 = sphi %s11103_s15, %s14221_s15  }
   0x8   : > { %p42_p0 = scmp.ne.s32.totalorder %s11057_s16, %s11053_s15  ;;  %p43_p1 = scmp.eq.s32.totalorder %s11124_s19, 0 }
   0x9   : > { %p129_p2 = scmp.eq.s32.totalorder %s11124_s19, 1  ;;  %p135_p3 = scmp.eq.s32.totalorder %s7934_s20, 1 }
   0xa   : > { %p11133_p4 = por %p43_p1, %p42_p0  ;;  %p7935_p5 = scmp.ge.s32.totalorder %s11065_s18, 1 }
   0xb   : > { %p11138_p6 = por %p135_p3, %p42_p0  ;;  %p142_p7 = scmp.lt.s32.totalorder %s11065_s18, 3 }
   0xc   : > { %s153_s25 = sshll.u32 %s13947_s1, 4  ;;  %s11067_s27 = smov [#allocation7]   ;;  %s154_s25 = int_to_ptr.hbm [resolvable:$true] %s153_s25 }
   0xd   : > { %p11146_p8 = pnand %p7935_p5, %p142_p7  ;;  %s155_s28 = sshll.u32 %s11067_s27, 4  ;;  %s156_s28 = int_to_ptr.vmem [resolvable:$true] %s155_s28 }
   0xe   : > { %s167_s6 = sshll.u32 %s13948_s2, 4  ;;  %s11068_s7 = smov 576   ;;  %s168_s6 = int_to_ptr.hbm [resolvable:$true] %s167_s6 }
   0xf   : > { %p10417_p9 = pneg %p11146_p8  ;;  %s11069_s8 = smov 36  }
  0x10   : > { %s11070_s9 = smov [#allocation9]   ;;  %s13951_s11 = smov 192  }
  0x11   : > { %p11154_p10 = pnand %p10417_p9, %p43_p1  ;;  %s169_s10 = sshll.u32 %s11070_s9, 4  ;;  %s170_s10 = int_to_ptr.vmem [resolvable:$true] %s169_s10 }
  0x12   : > { %s13952_s12 = smov 12   ;;  %s182_s20 = sshll.u32 %s13949_s3, 4  ;;  %s183_s20 = int_to_ptr.hbm [resolvable:$true] %s182_s20 }
  0x13   : > { %10420 = dma.hbm_to_vmem [thread:$0]  (!%p11154_p10), %s154_s25, 27648, %s156_s28, [#allocation8], %s11068_s7, %s11068_s7, %s11069_s8  }
  0x14   : > { %10423 = dma.hbm_to_vmem [thread:$0]  (!%p11154_p10), %s168_s6, 9216, %s170_s10, [#allocation8], %s13951_s11, %s13951_s11, %s13952_s12  }
  0x15   : > { %s11073_s23 = smov [#allocation10]   ;;  %s11175_s25 = sadd.s32 1, %s11065_s18  }
  0x16   : > { %s184_s24 = sshll.u32 %s11073_s23, 4  ;;  %s26_s27 = ssub.s32 %s11065_s18, %s11175_s25  ;;  %s185_s24 = int_to_ptr.vmem [resolvable:$true] %s184_s24 }
  0x17   : > { %10426 = dma.hbm_to_vmem [thread:$0]  (!%p11154_p10), %s183_s20, 48, %s185_s24, [#allocation11]  }
  0x18   : > { %s29_s28 = sadd.s32 1, %s11061_s17  ;;  %p27_p12 = scmp.eq.s32.totalorder %s26_s27, 0 }
  0x19   : > { %p36_p13 = scmp.ne.s32.totalorder %s11061_s17, %s11057_s16  ;;  %p37_p0 = scmp.eq.s32.totalorder %s11065_s18, 0 }
  0x1a   : > { %p10438_p3 = scmp.lt.s32.totalorder %s11065_s18, 2  ;;  %s195_s6 = sand.u32 1, %s11061_s17  }
  0x1b   : > { %s11185_s30 = scalar_select %p27_p12, %s11061_s17, %s29_s28  }
  0x1c   : > { %p38_p5 = por %p37_p0, %p36_p13  ;;  %p11189_p7 = por %p129_p2, %p36_p13 }
  0x1d   : > { %s10397_s29 = smul.u32 192, %s11065_s18  ;;  %s196_s24 = scalar_lea.sflag [#allocation5], %s195_s6 }
  0x1e   : > { %s10396_s7 = smul.u32 192, %s195_s6  ;;  %p11198_p9 = pnand %p10438_p3, %p38_p5 }
  0x1f   : > { %s204_s10 = scalar_lea.hbm %s13946_s0, %s10397_s29  ;;  %s10968_s9 = scalar_lea.hbm %s13946_s0, 384 }
  0x20   : > { %s205_s14 = sshll.u32 %s204_s10, 4  ;;  %s199_s20 = scalar_lea.vmem [#allocation4], %s10396_s7  ;;  %s206_s14 = int_to_ptr.hbm [resolvable:$true] %s205_s14 }
  0x21   : > { %s207_s23 = sshll.u32 %s199_s20, 4  ;;  %s10961_s27 = sshra.s32 %s206_s14, 4  ;;  %s208_s23 = int_to_ptr.vmem [resolvable:$true] %s207_s23  ;;  %s10962_s27 = int_to_ptr.hbm [resolvable:$true] %s10961_s27 }
  0x22   : > { %s10963_s28 = scalar_lea.hbm %s10962_s27, 192  ;;  %p10965_p10 = pneg %p11198_p9 }
  0x23   : > { %p10964_p2 = scmp.ne.s32.totalorder %s10962_s27, %s10963_s28  ;;  %p10969_p0 = scmp.lt.s32.totalorder %s10962_s27, %s13946_s0 }
  0x24   : > { %p10970_p3 = scmp.lt.s32.totalorder %s10968_s9, %s10963_s28 }
  0x25   : > { %p10966_p12 = pnand %p10965_p10, %p10964_p2 }
  0x26   : > { %p10971_p5 = por %p10970_p3, %p10969_p0 }
  0x27   : > { %p10967_p13 = pneg %p10966_p12 }
  0x29   : > { %p10972_p11 = pnand %p10971_p5, %p10967_p13 }
  0x2b   : > { %10975 = shalt.err (!%p10972_p11)
}
  0x2c   : > { %s14027_s6 = smov 12   ;;  %s14028_s7 = smov 192  }
  0x2d   : > { %10430 = dma.hbm_to_vmem [thread:$0]  (!%p11198_p9), %s206_s14, 3072, %s208_s23, %s196_s24, %s14028_s7, %s14028_s7, %s14027_s6  }
  0x2e   : > { %219 = sbr.rel (%p11146_p8) target bundleno = 2843 (0xb1b), region = 36 }
  0x33   : > { %s11218_s10 = sand.u32 1, %s11057_s16  }
  0x34   : > { %s10398_s11 = smul.u32 192, %s11218_s10  ;;  %s222_s12 = scalar_lea.sflag [#allocation5], %s11218_s10 }
  0x36   : > { %s11222_s20 = scalar_lea.vmem [#allocation4], %s10398_s11 }
  0x37   : > { %11036 = dma.done.wait (%p11133_p4), %s222_s12, 3072  }
  0x38   : > { %11038 = vsyncadd (%p11133_p4), %s222_s12, 4294964224 }
  0x39   : > { %11040 = dma.done.wait (%p43_p1), [#allocation8], 36864  }
  0x3a   : > { %11042 = vsyncadd (%p43_p1), [#allocation8], 4294930432 }
  0x3b   : > { %11044 = dma.done.wait (%p43_p1), [#allocation11], 48  }
  0x3c   : > { %11046 = vsyncadd (%p43_p1), [#allocation11], 4294967248  ;;  %v8295_v0 = vld [vmem:[#allocation7 + $0x1f8] sm:$0xf]  ;;  %v10007_v1 = vld [vmem:[#allocation7 + $0x218] sm:$0xf0] }
  0x3d   : > { %v8583_v2 = vld [vmem:[#allocation7 + $0x438] sm:$0xf]  ;;  %v8296_v3 = vor.u32 %v10007_v1, %v8295_v0  ;;  %v10079_v4 = vld [vmem:[#allocation7 + $0x458] sm:$0xf0]  ;;  %v8297_v10 = vld [vmem:[#allocation7 + $0x21c] sm:$0xf0] }
  0x3e   : > { %v8871_v5 = vld [vmem:[#allocation7 + $0x678] sm:$0xf]  ;;  %v10151_v6 = vld [vmem:[#allocation7 + $0x698] sm:$0xf0]  ;;  %v8584_v7 = vor.u32 %v10079_v4, %v8583_v2  ;;  %v8259_v11 = vld [vmem:[#allocation7 + $0x1b0] sm:$0xf] }
  0x3f   : > { %v8872_v8 = vor.u32 %v10151_v6, %v8871_v5  ;;  %v10003_v9 = vld [vmem:[#allocation7 + $0x1fc] sm:$0xf]  ;;  %1770 = vmatpush.bf16.msra.mxu0 %v8296_v3  ;;  %v9998_v13 = vld [vmem:[#allocation7 + $0x1d0] sm:$0xf0]  ;;  %v8547_v14 = vld [vmem:[#allocation7 + $0x3f0] sm:$0xf] }
  0x40   : > { %v8300_v12 = vor.u32 %v10003_v9, %v8297_v10  ;;  %v10070_v15 = vld [vmem:[#allocation7 + $0x410] sm:$0xf0]  ;;  %1819 = vmatpush.bf16.msra.mxu1 %v8584_v7  ;;  %v8260_v16 = vor.u32 %v9998_v13, %v8259_v11  ;;  %v8835_v18 = vld [vmem:[#allocation7 + $0x630] sm:$0xf]  ;;  %v8261_v22 = vld [vmem:[#allocation7 + $0x1d4] sm:$0xf0] }
  0x41   : > { %1868 = vmatpush.bf16.msra.mxu2 %v8872_v8  ;;  %v8548_v17 = vor.u32 %v10070_v15, %v8547_v14  ;;  %v10142_v19 = vld [vmem:[#allocation7 + $0x650] sm:$0xf0]  ;;  %v8223_v23 = vld [vmem:[#allocation7 + $0x168] sm:$0xf]  ;;  %v9989_v24 = vld [vmem:[#allocation7 + $0x188] sm:$0xf0] }
  0x42   : > { %v9994_v20 = vld [vmem:[#allocation7 + $0x1b4] sm:$0xf]  ;;  %1917 = vmatpush.bf16.msra.mxu3 %v8300_v12  ;;  %v8836_v21 = vor.u32 %v10142_v19, %v8835_v18  ;;  %v8511_v26 = vld [vmem:[#allocation7 + $0x3a8] sm:$0xf]  ;;  %v10061_v27 = vld [vmem:[#allocation7 + $0x3c8] sm:$0xf0]  ;;  %v8224_v29 = vor.u32 %v9989_v24, %v8223_v23 }
  0x43   : > { %v8264_v25 = vor.u32 %v9994_v20, %v8261_v22  ;;  %v8799_v28 = vld [vmem:[#allocation7 + $0x5e8] sm:$0xf]  ;;  %1771 = vmatpush.bf16.msra.mxu0 %v8260_v16  ;;  %v10133_v30 = vld [vmem:[#allocation7 + $0x608] sm:$0xf0]  ;;  %v8225_v32 = vld [vmem:[#allocation7 + $0x18c] sm:$0xf0]  ;;  %v8512_v33 = vor.u32 %v10061_v27, %v8511_v26 }
  0x44   : > { %v9985_v31 = vld [vmem:[#allocation7 + $0x16c] sm:$0xf]  ;;  %1820 = vmatpush.bf16.msra.mxu1 %v8548_v17  ;;  %v8800_v34 = vor.u32 %v10133_v30, %v8799_v28  ;;  %v8187_v35 = vld [vmem:[#allocation7 + $0x120] sm:$0xf]  ;;  %v9980_v36 = vld [vmem:[#allocation7 + $0x140] sm:$0xf0] }
  0x45   : > { %1869 = vmatpush.bf16.msra.mxu2 %v8836_v21  ;;  %v8475_v37 = vld [vmem:[#allocation7 + $0x360] sm:$0xf]  ;;  %v8228_v38 = vor.u32 %v9985_v31, %v8225_v32  ;;  %v10052_v39 = vld [vmem:[#allocation7 + $0x380] sm:$0xf0]  ;;  %v8189_v43 = vld [vmem:[#allocation7 + $0x144] sm:$0xf0]  ;;  %v8188_v44 = vor.u32 %v9980_v36, %v8187_v35 }
  0x46   : > { %1918 = vmatpush.bf16.msra.mxu3 %v8264_v25  ;;  %v8763_v40 = vld [vmem:[#allocation7 + $0x5a0] sm:$0xf]  ;;  %v10124_v41 = vld [vmem:[#allocation7 + $0x5c0] sm:$0xf0]  ;;  %v8476_v45 = vor.u32 %v10052_v39, %v8475_v37  ;;  %v8151_v47 = vld [vmem:[#allocation7 + $0xd8] sm:$0xf] }
  0x47   : > { %v9976_v42 = vld [vmem:[#allocation7 + $0x124] sm:$0xf]  ;;  %1772 = vmatpush.bf16.msra.mxu0 %v8224_v29  ;;  %v8764_v46 = vor.u32 %v10124_v41, %v8763_v40  ;;  %v9971_v48 = vld [vmem:[#allocation7 + $0xf8] sm:$0xf0]  ;;  %v8439_v49 = vld [vmem:[#allocation7 + $0x318] sm:$0xf] }
  0x48   : > { %1821 = vmatpush.bf16.msra.mxu1 %v8512_v33  ;;  %v8192_v50 = vor.u32 %v9976_v42, %v8189_v43  ;;  %v10043_v51 = vld [vmem:[#allocation7 + $0x338] sm:$0xf0]  ;;  %v8727_v52 = vld [vmem:[#allocation7 + $0x558] sm:$0xf]  ;;  %v8153_v55 = vld [vmem:[#allocation7 + $0xfc] sm:$0xf0]  ;;  %v8152_v56 = vor.u32 %v9971_v48, %v8151_v47 }
  0x49   : > { %1870 = vmatpush.bf16.msra.mxu2 %v8800_v34  ;;  %v10115_v53 = vld [vmem:[#allocation7 + $0x578] sm:$0xf0]  ;;  %v8440_v57 = vor.u32 %v10043_v51, %v8439_v49  ;;  %v8115_v59 = vld [vmem:[#allocation7 + $0x90] sm:$0xf]  ;;  %v9962_v60 = vld [vmem:[#allocation7 + $0xb0] sm:$0xf0] }
  0x4a   : > { %1919 = vmatpush.bf16.msra.mxu3 %v8228_v38  ;;  %v9967_v54 = vld [vmem:[#allocation7 + $0xdc] sm:$0xf]  ;;  %v8728_v58 = vor.u32 %v10115_v53, %v8727_v52  ;;  %v8403_v61 = vld [vmem:[#allocation7 + $0x2d0] sm:$0xf]  ;;  %v10034_v63 = vld [vmem:[#allocation7 + $0x2f0] sm:$0xf0]  ;;  %v8116_v4 = vor.u32 %v9962_v60, %v8115_v59 }
  0x4b   : > { %1773 = vmatpush.bf16.msra.mxu0 %v8188_v44  ;;  %v8156_v62 = vor.u32 %v9967_v54, %v8153_v55  ;;  %v8691_v0 = vld [vmem:[#allocation7 + $0x510] sm:$0xf]  ;;  %v10106_v1 = vld [vmem:[#allocation7 + $0x530] sm:$0xf0]  ;;  %v8117_v3 = vld [vmem:[#allocation7 + $0xb4] sm:$0xf0]  ;;  %v8404_v5 = vor.u32 %v10034_v63, %v8403_v61 }
  0x4c   : > { %1822 = vmatpush.bf16.msra.mxu1 %v8476_v45  ;;  %v9958_v2 = vld [vmem:[#allocation7 + $0x94] sm:$0xf]  ;;  %v8692_v6 = vor.u32 %v10106_v1, %v8691_v0  ;;  %v8079_v7 = vld [vmem:[#allocation7 + $0x48] sm:$0xf]  ;;  %v9953_v8 = vld [vmem:[#allocation7 + $0x68] sm:$0xf0] }
  0x4d   : > { %1871 = vmatpush.bf16.msra.mxu2 %v8764_v46  ;;  %v8367_v9 = vld [vmem:[#allocation7 + $0x288] sm:$0xf]  ;;  %v8120_v10 = vor.u32 %v9958_v2, %v8117_v3  ;;  %v10025_v11 = vld [vmem:[#allocation7 + $0x2a8] sm:$0xf0]  ;;  %v8081_v15 = vld [vmem:[#allocation7 + $0x6c] sm:$0xf0]  ;;  %v8080_v16 = vor.u32 %v9953_v8, %v8079_v7 }
  0x4e   : > { %1920 = vmatpush.bf16.msra.mxu3 %v8192_v50  ;;  %v8655_v12 = vld [vmem:[#allocation7 + $0x4c8] sm:$0xf]  ;;  %v10097_v13 = vld [vmem:[#allocation7 + $0x4e8] sm:$0xf0]  ;;  %v8043_v17 = vld [vmem:[#allocation7] sm:$0xf]  ;;  %v8368_v20 = vor.u32 %v10025_v11, %v8367_v9 }
  0x4f   : > { %1774 = vmatpush.bf16.msra.mxu0 %v8152_v56  ;;  %v9949_v14 = vld [vmem:[#allocation7 + $0x4c] sm:$0xf]  ;;  %v9944_v18 = vld [vmem:[#allocation7 + $0x20] sm:$0xf0]  ;;  %v8331_v19 = vld [vmem:[#allocation7 + $0x240] sm:$0xf]  ;;  %v8656_v21 = vor.u32 %v10097_v13, %v8655_v12 }
  0x50   : > { %1823 = vmatpush.bf16.msra.mxu1 %v8440_v57  ;;  %v10016_v22 = vld [vmem:[#allocation7 + $0x260] sm:$0xf0]  ;;  %v8619_v23 = vld [vmem:[#allocation7 + $0x480] sm:$0xf]  ;;  %v8084_v25 = vor.u32 %v9949_v14, %v8081_v15  ;;  %v8045_v27 = vld [vmem:[#allocation7 + $0x24] sm:$0xf0]  ;;  %v8044_v32 = vor.u32 %v9944_v18, %v8043_v17 }
  0x51   : > { %1872 = vmatpush.bf16.msra.mxu2 %v8728_v58  ;;  %v10088_v24 = vld [vmem:[#allocation7 + $0x4a0] sm:$0xf0]  ;;  %v7947_v28 = vld [vmem:[%s11222_s20] sm:$0xf]  ;;  %v9917_v29 = vld [vmem:[%s11222_s20 + $0x8] sm:$0xf0]  ;;  %v8332_v36 = vor.u32 %v10016_v22, %v8331_v19 }
  0x52   : > { %1921 = vmatpush.bf16.msra.mxu3 %v8156_v62  ;;  %v9940_v26 = vld [vmem:[#allocation7 + $0x4] sm:$0xf]  ;;  %v8303_v30 = vld [vmem:[#allocation7 + $0x200] sm:$0xf]  ;;  %v8620_v37 = vor.u32 %v10088_v24, %v8619_v23  ;;  %v7949_v38 = vld [vmem:[%s11222_s20 + $0xc] sm:$0xf0]  ;;  %v11242_v46 = vor.u32 %v9917_v29, %v7947_v28 }
  0x53   : > { %1775 = vmatpush.bf16.msra.mxu0 %v8116_v4  ;;  %v10008_v31 = vld [vmem:[#allocation7 + $0x220] sm:$0xf0]  ;;  %v8591_v34 = vld [vmem:[#allocation7 + $0x440] sm:$0xf]  ;;  %v7955_v39 = vld [vmem:[%s11222_s20 + $0x8] sm:$0xf]  ;;  %v8048_v41 = vor.u32 %v9940_v26, %v8045_v27 }
  0x54   : > { %1824 = vmatpush.bf16.msra.mxu1 %v8404_v5  ;;  %v9916_v33 = vld [vmem:[%s11222_s20 + $0x4] sm:$0xf]  ;;  %v9918_v40 = vld [vmem:[%s11222_s20 + $0x10] sm:$0xf0]  ;;  %v8304_v42 = vor.u32 %v10008_v31, %v8303_v30  ;;  %v10147_v43 = vld [vmem:[#allocation7 + $0x67c] sm:$0xf] }
  0x55   : > { %1873 = vmatpush.bf16.msra.mxu2 %v8692_v6  ;;  %v10080_v35 = vld [vmem:[#allocation7 + $0x460] sm:$0xf0]  ;;  %v8873_v44 = vld [vmem:[#allocation7 + $0x69c] sm:$0xf0]  ;;  %v10075_v45 = vld [vmem:[#allocation7 + $0x43c] sm:$0xf]  ;;  %v11244_v51 = vor.u32 %v9916_v33, %v7949_v38  ;;  %v11246_v52 = vor.u32 %v9918_v40, %v7955_v39 }
  0x56   : > { %1922 = vmatpush.bf16.msra.mxu3 %v8120_v10  ;;  %14029 = vst [vmem:[#allocation17_spill] sm:$0xff] %v11242_v46  ;;  %v8592_v47 = vor.u32 %v10080_v35, %v8591_v34  ;;  %v8585_v48 = vld [vmem:[#allocation7 + $0x45c] sm:$0xf0]  ;;  %v8267_v49 = vld [vmem:[#allocation7 + $0x1b8] sm:$0xf]  ;;  %v8876_v55 = vor.u32 %v10147_v43, %v8873_v44  ;;  %s11074_s21 = smov 64  }
  0x57   : > { %1776 = vmatpush.bf16.msra.mxu0 %v8080_v16  ;;  %v9999_v50 = vld [vmem:[#allocation7 + $0x1d8] sm:$0xf0]  ;;  %14030 = vst [vmem:[#allocation18_spill] sm:$0xff] %v11244_v51  ;;  %v8555_v53 = vld [vmem:[#allocation7 + $0x3f8] sm:$0xf]  ;;  %v8588_v56 = vor.u32 %v10075_v45, %v8585_v48  ;;  %vm3432_vm0 = vcmask 523264  }
  0x58   : > { %1825 = vmatpush.bf16.msra.mxu1 %v8368_v20  ;;  %14031 = vst [vmem:[#allocation19_spill] sm:$0xff] %v11246_v52  ;;  %v10071_v54 = vld [vmem:[#allocation7 + $0x418] sm:$0xf0]  ;;  %v8268_v57 = vor.u32 %v9999_v50, %v8267_v49  ;;  %v10138_v58 = vld [vmem:[#allocation7 + $0x634] sm:$0xf]  ;;  %s10399_s26 = smul.u32 384, %s11218_s10 }
  0x59   : > { %1874 = vmatpush.bf16.msra.mxu2 %v8656_v21  ;;  %v8837_v59 = vld [vmem:[#allocation7 + $0x654] sm:$0xf0]  ;;  %v8556_v60 = vor.u32 %v10071_v54, %v8555_v53  ;;  %v10066_v61 = vld [vmem:[#allocation7 + $0x3f4] sm:$0xf]  ;;  %v8231_v0 = vld [vmem:[#allocation7 + $0x170] sm:$0xf] }
  0x5a   : > { %1923 = vmatpush.bf16.msra.mxu3 %v8084_v25  ;;  %v8549_v62 = vld [vmem:[#allocation7 + $0x414] sm:$0xf0]  ;;  %v8840_v63 = vor.u32 %v10138_v58, %v8837_v59  ;;  %v9990_v1 = vld [vmem:[#allocation7 + $0x190] sm:$0xf0]  ;;  %v8519_v2 = vld [vmem:[#allocation7 + $0x3b0] sm:$0xf] }
  0x5b   : > { %1777 = vmatpush.bf16.msra.mxu0 %v8044_v32  ;;  %v8552_v3 = vor.u32 %v10066_v61, %v8549_v62  ;;  %v8232_v4 = vor.u32 %v9990_v1, %v8231_v0  ;;  %v10062_v5 = vld [vmem:[#allocation7 + $0x3d0] sm:$0xf0]  ;;  %v10129_v6 = vld [vmem:[#allocation7 + $0x5ec] sm:$0xf]  ;;  %v8801_v7 = vld [vmem:[#allocation7 + $0x60c] sm:$0xf0] }
  0x5c   : > { %1826 = vmatpush.bf16.msra.mxu1 %v8332_v36  ;;  %v8520_v8 = vor.u32 %v10062_v5, %v8519_v2  ;;  %v10057_v9 = vld [vmem:[#allocation7 + $0x3ac] sm:$0xf]  ;;  %v8513_v10 = vld [vmem:[#allocation7 + $0x3cc] sm:$0xf0]  ;;  %v8804_v11 = vor.u32 %v10129_v6, %v8801_v7  ;;  %v7959_v13 = vld [vmem:[%s11222_s20 + $0x18] sm:$0xf] }
  0x5d   : > { %1875 = vmatpush.bf16.msra.mxu2 %v8620_v37  ;;  %v8516_v12 = vor.u32 %v10057_v9, %v8513_v10  ;;  %v9920_v14 = vld [vmem:[%s11222_s20 + $0x20] sm:$0xf0]  ;;  %v9919_v15 = vld [vmem:[%s11222_s20 + $0x1c] sm:$0xf]  ;;  %v7961_v16 = vld [vmem:[%s11222_s20 + $0x24] sm:$0xf0] }
  0x5e   : > { %1924 = vmatpush.bf16.msra.mxu3 %v8048_v41  ;;  %1778 = vmatmul.bf16.vlgmr.msra.gmra.mxu0 %v11242_v46  ;;  %v7967_v17 = vld [vmem:[%s11222_s20 + $0x20] sm:$0xf]  ;;  %v9921_v18 = vld [vmem:[%s11222_s20 + $0x28] sm:$0xf0]  ;;  %v11258_v19 = vor.u32 %v9920_v14, %v7959_v13  ;;  %v11260_v20 = vor.u32 %v9919_v15, %v7961_v16  ;;  %v8195_v22 = vld [vmem:[#allocation7 + $0x128] sm:$0xf] }
  0x5f   : > { %1827 = vmatmul.bf16.vlgmr.msra.gmra.mxu1 %v11244_v51  ;;  %1966 = vmatpush.bf16.msrb.mxu0 %v8588_v56  ;;  %v11262_v21 = vor.u32 %v9921_v18, %v7967_v17  ;;  %v9981_v23 = vld [vmem:[#allocation7 + $0x148] sm:$0xf0]  ;;  %v8483_v24 = vld [vmem:[#allocation7 + $0x368] sm:$0xf]  ;;  %v10120_v27 = vld [vmem:[#allocation7 + $0x5a4] sm:$0xf] }
  0x60   : > { %1876 = vmatmul.bf16.vlgmr.msra.gmra.mxu2 %v11246_v52  ;;  %2015 = vmatpush.bf16.msrb.mxu1 %v8876_v55  ;;  %v8196_v25 = vor.u32 %v9981_v23, %v8195_v22  ;;  %v10053_v26 = vld [vmem:[#allocation7 + $0x388] sm:$0xf0]  ;;  %v8765_v28 = vld [vmem:[#allocation7 + $0x5c4] sm:$0xf0]  ;;  %v10048_v31 = vld [vmem:[#allocation7 + $0x364] sm:$0xf] }
  0x61   : > { %2064 = vmatpush.bf16.msrb.mxu2 %v8304_v42  ;;  %1925 = vmatmul.bf16.vlgmr.msra.gmra.mxu3 %v11242_v46  ;;  %v8484_v29 = vor.u32 %v10053_v26, %v8483_v24  ;;  %v8768_v30 = vor.u32 %v10120_v27, %v8765_v28  ;;  %v8477_v32 = vld [vmem:[#allocation7 + $0x384] sm:$0xf0]  ;;  %v7971_v34 = vld [vmem:[%s11222_s20 + $0x30] sm:$0xf]  ;;  %v9923_v35 = vld [vmem:[%s11222_s20 + $0x38] sm:$0xf0] }
  0x62   : > { %2113 = vmatpush.bf16.msrb.mxu3 %v8592_v47  ;;  %v8480_v33 = vor.u32 %v10048_v31, %v8477_v32  ;;  %v9922_v36 = vld [vmem:[%s11222_s20 + $0x34] sm:$0xf]  ;;  %v7973_v37 = vld [vmem:[%s11222_s20 + $0x3c] sm:$0xf0]  ;;  %v7979_v38 = vld [vmem:[%s11222_s20 + $0x38] sm:$0xf]  ;;  %v11274_v40 = vor.u32 %v9923_v35, %v7971_v34 }
  0x63   : > { %1967 = vmatpush.bf16.msrb.mxu0 %v8552_v3  ;;  %v9924_v39 = vld [vmem:[%s11222_s20 + $0x40] sm:$0xf0]  ;;  %v11276_v41 = vor.u32 %v9922_v36, %v7973_v37  ;;  %v8159_v43 = vld [vmem:[#allocation7 + $0xe0] sm:$0xf]  ;;  %v10111_v49 = vld [vmem:[#allocation7 + $0x55c] sm:$0xf] }
  0x64   : > { %2016 = vmatpush.bf16.msrb.mxu1 %v8840_v63  ;;  %v11278_v42 = vor.u32 %v9924_v39, %v7979_v38  ;;  %v9972_v44 = vld [vmem:[#allocation7 + $0x100] sm:$0xf0]  ;;  %v8447_v45 = vld [vmem:[#allocation7 + $0x320] sm:$0xf]  ;;  %v10039_v55 = vld [vmem:[#allocation7 + $0x31c] sm:$0xf] }
  0x65   : > { %2065 = vmatpush.bf16.msrb.mxu2 %v8268_v57  ;;  %v8160_v47 = vor.u32 %v9972_v44, %v8159_v43  ;;  %v10044_v48 = vld [vmem:[#allocation7 + $0x340] sm:$0xf0]  ;;  %v8729_v50 = vld [vmem:[#allocation7 + $0x57c] sm:$0xf0]  ;;  %v7983_v58 = vld [vmem:[%s11222_s20 + $0x48] sm:$0xf] }
  0x66   : > { %2114 = vmatpush.bf16.msrb.mxu3 %v8556_v60  ;;  %v8448_v53 = vor.u32 %v10044_v48, %v8447_v45  ;;  %v8732_v54 = vor.u32 %v10111_v49, %v8729_v50  ;;  %v8441_v56 = vld [vmem:[#allocation7 + $0x33c] sm:$0xf0]  ;;  %v9926_v59 = vld [vmem:[%s11222_s20 + $0x50] sm:$0xf0]  ;;  %v9925_v60 = vld [vmem:[%s11222_s20 + $0x4c] sm:$0xf] }
  0x67   : > { %1968 = vmatpush.bf16.msrb.mxu0 %v8516_v12  ;;  %v8444_v57 = vor.u32 %v10039_v55, %v8441_v56  ;;  %v7985_v61 = vld [vmem:[%s11222_s20 + $0x54] sm:$0xf0]  ;;  %v7991_v62 = vld [vmem:[%s11222_s20 + $0x50] sm:$0xf]  ;;  %v9927_v63 = vld [vmem:[%s11222_s20 + $0x58] sm:$0xf0]  ;;  %v11290_v0 = vor.u32 %v9926_v59, %v7983_v58 }
  0x68   : > { %2017 = vmatpush.bf16.msrb.mxu1 %v8804_v11  ;;  %v11292_v1 = vor.u32 %v9925_v60, %v7985_v61  ;;  %v11294_v2 = vor.u32 %v9927_v63, %v7991_v62  ;;  %v8123_v3 = vld [vmem:[#allocation7 + $0x98] sm:$0xf]  ;;  %v10035_v7 = vld [vmem:[#allocation7 + $0x2f8] sm:$0xf0]  ;;  %v10030_v12 = vld [vmem:[#allocation7 + $0x2d4] sm:$0xf] }
  0x69   : > { %2066 = vmatpush.bf16.msrb.mxu2 %v8232_v4  ;;  %v9963_v4 = vld [vmem:[#allocation7 + $0xb8] sm:$0xf0]  ;;  %v8411_v5 = vld [vmem:[#allocation7 + $0x2d8] sm:$0xf]  ;;  %v7995_v15 = vld [vmem:[%s11222_s20 + $0x60] sm:$0xf] }
  0x6a   : > { %2115 = vmatpush.bf16.msrb.mxu3 %v8520_v8  ;;  %v8124_v6 = vor.u32 %v9963_v4, %v8123_v3  ;;  %v10102_v8 = vld [vmem:[#allocation7 + $0x514] sm:$0xf]  ;;  %v8693_v9 = vld [vmem:[#allocation7 + $0x534] sm:$0xf0]  ;;  %v8412_v10 = vor.u32 %v10035_v7, %v8411_v5  ;;  %v9929_v16 = vld [vmem:[%s11222_s20 + $0x68] sm:$0xf0] }
  0x6b   : > { %1969 = vmatpush.bf16.msrb.mxu0 %v8480_v33  ;;  %v8696_v11 = vor.u32 %v10102_v8, %v8693_v9  ;;  %v8405_v13 = vld [vmem:[#allocation7 + $0x2f4] sm:$0xf0]  ;;  %v9928_v17 = vld [vmem:[%s11222_s20 + $0x64] sm:$0xf]  ;;  %v7997_v18 = vld [vmem:[%s11222_s20 + $0x6c] sm:$0xf0]  ;;  %v11306_v24 = vor.u32 %v9929_v16, %v7995_v15 }
  0x6c   : > { %2018 = vmatpush.bf16.msrb.mxu1 %v8768_v30  ;;  %v8408_v14 = vor.u32 %v10030_v12, %v8405_v13  ;;  %v8003_v22 = vld [vmem:[%s11222_s20 + $0x68] sm:$0xf]  ;;  %v9930_v23 = vld [vmem:[%s11222_s20 + $0x70] sm:$0xf0]  ;;  %v8087_v27 = vld [vmem:[#allocation7 + $0x50] sm:$0xf] }
  0x6d   : > { %2067 = vmatpush.bf16.msrb.mxu2 %v8196_v25  ;;  %v11308_v25 = vor.u32 %v9928_v17, %v7997_v18  ;;  %v11310_v26 = vor.u32 %v9930_v23, %v8003_v22  ;;  %v9954_v28 = vld [vmem:[#allocation7 + $0x70] sm:$0xf0]  ;;  %v10093_v32 = vld [vmem:[#allocation7 + $0x4cc] sm:$0xf]  ;;  %v8657_v33 = vld [vmem:[#allocation7 + $0x4ec] sm:$0xf0] }
  0x6e   : > { %1783 = vmatmul.bf16.gmra.mxu0 %v11258_v19  ;;  %2116 = vmatpush.bf16.msrb.mxu3 %v8484_v29  ;;  %v8375_v29 = vld [vmem:[#allocation7 + $0x290] sm:$0xf]  ;;  %v8088_v30 = vor.u32 %v9954_v28, %v8087_v27  ;;  %v10026_v31 = vld [vmem:[#allocation7 + $0x2b0] sm:$0xf0]  ;;  %v8660_v35 = vor.u32 %v10093_v32, %v8657_v33  ;;  %v10021_v36 = vld [vmem:[#allocation7 + $0x28c] sm:$0xf] }
  0x6f   : > { %1832 = vmatmul.bf16.gmra.mxu1 %v11260_v20  ;;  %1970 = vmatpush.bf16.msrb.mxu0 %v8444_v57  ;;  %v8376_v34 = vor.u32 %v10026_v31, %v8375_v29  ;;  %v8369_v37 = vld [vmem:[#allocation7 + $0x2ac] sm:$0xf0]  ;;  %v8007_v39 = vld [vmem:[%s11222_s20 + $0x78] sm:$0xf]  ;;  %v9932_v43 = vld [vmem:[%s11222_s20 + $0x80] sm:$0xf0] }
  0x70   : > { %1881 = vmatmul.bf16.gmra.mxu2 %v11262_v21  ;;  %2019 = vmatpush.bf16.msrb.mxu1 %v8732_v54  ;;  %v8372_v38 = vor.u32 %v10021_v36, %v8369_v37  ;;  %v9931_v44 = vld [vmem:[%s11222_s20 + $0x7c] sm:$0xf]  ;;  %v8009_v45 = vld [vmem:[%s11222_s20 + $0x84] sm:$0xf0]  ;;  %v9933_v48 = vld [vmem:[%s11222_s20 + $0x88] sm:$0xf0]  ;;  %v11322_v49 = vor.u32 %v9932_v43, %v8007_v39 }
  0x71   : > { %1930 = vmatmul.bf16.gmra.mxu3 %v11258_v19  ;;  %2068 = vmatpush.bf16.msrb.mxu2 %v8160_v47  ;;  %v8015_v47 = vld [vmem:[%s11222_s20 + $0x80] sm:$0xf]  ;;  %v11324_v50 = vor.u32 %v9931_v44, %v8009_v45  ;;  %v8051_v54 = vld [vmem:[#allocation7 + $0x8] sm:$0xf]  ;;  %v9945_v55 = vld [vmem:[#allocation7 + $0x28] sm:$0xf0] }
  0x72   : > { %2117 = vmatpush.bf16.msrb.mxu3 %v8448_v53  ;;  %v11326_v53 = vor.u32 %v9933_v48, %v8015_v47  ;;  %v8339_v56 = vld [vmem:[#allocation7 + $0x248] sm:$0xf]  ;;  %v8052_v57 = vor.u32 %v9945_v55, %v8051_v54  ;;  %v10017_v58 = vld [vmem:[#allocation7 + $0x268] sm:$0xf0]  ;;  %v10084_v59 = vld [vmem:[#allocation7 + $0x484] sm:$0xf] }
  0x73   : > { %1971 = vmatpush.bf16.msrb.mxu0 %v8408_v14  ;;  %v8621_v60 = vld [vmem:[#allocation7 + $0x4a4] sm:$0xf0]  ;;  %v8340_v61 = vor.u32 %v10017_v58, %v8339_v56  ;;  %v10012_v63 = vld [vmem:[#allocation7 + $0x244] sm:$0xf]  ;;  %v8019_v5 = vld [vmem:[%s11222_s20 + $0x90] sm:$0xf] }
  0x74   : > { %2020 = vmatpush.bf16.msrb.mxu1 %v8696_v11  ;;  %v8624_v62 = vor.u32 %v10084_v59, %v8621_v60  ;;  %v8333_v3 = vld [vmem:[#allocation7 + $0x264] sm:$0xf0]  ;;  %v9934_v7 = vld [vmem:[%s11222_s20 + $0x94] sm:$0xf]  ;;  %v8021_v8 = vld [vmem:[%s11222_s20 + $0x9c] sm:$0xf0] }
  0x75   : > { %2069 = vmatpush.bf16.msrb.mxu2 %v8124_v6  ;;  %v8336_v4 = vor.u32 %v10012_v63, %v8333_v3  ;;  %v9935_v6 = vld [vmem:[%s11222_s20 + $0x98] sm:$0xf0]  ;;  %v8027_v9 = vld [vmem:[%s11222_s20 + $0x98] sm:$0xf]  ;;  %v11340_v12 = vor.u32 %v9934_v7, %v8021_v8  ;;  %v10076_v14 = vld [vmem:[#allocation7 + $0x444] sm:$0xf] }
  0x76   : > { %2118 = vmatpush.bf16.msrb.mxu3 %v8412_v10  ;;  %v9936_v10 = vld [vmem:[%s11222_s20 + $0xa0] sm:$0xf0]  ;;  %v11338_v11 = vor.u32 %v9935_v6, %v8019_v5  ;;  %v8593_v15 = vld [vmem:[#allocation7 + $0x464] sm:$0xf0]  ;;  %v8879_v28 = vld [vmem:[#allocation7 + $0x680] sm:$0xf] }
  0x77   : > { %1972 = vmatpush.bf16.msrb.mxu0 %v8372_v38  ;;  %14033 = vst [vmem:[#allocation21_spill] sm:$0xff] %v11340_v12  ;;  %v11342_v13 = vor.u32 %v9936_v10, %v8027_v9  ;;  %v10148_v16 = vld [vmem:[#allocation7 + $0x684] sm:$0xf]  ;;  %v8596_v17 = vor.u32 %v10076_v14, %v8593_v15  ;;  %v8881_v18 = vld [vmem:[#allocation7 + $0x6a4] sm:$0xf0]  ;;  %s13634_s13 = scalar_lea.vmem [#allocation12], %s10399_s26 }
  0x78   : > { %2021 = vmatpush.bf16.msrb.mxu1 %v8660_v35  ;;  %14032 = vst [vmem:[#allocation20_spill] sm:$0xff] %v11338_v11  ;;  %v8884_v22 = vor.u32 %v10148_v16, %v8881_v18  ;;  %v10004_v23 = vld [vmem:[#allocation7 + $0x204] sm:$0xf]  ;;  %v8305_v27 = vld [vmem:[#allocation7 + $0x224] sm:$0xf0]  ;;  %s10400_s14 = smul.u32 384, %s11124_s19 }
  0x79   : > { %2070 = vmatpush.bf16.msrb.mxu2 %v8088_v30  ;;  %14034 = vst [vmem:[#allocation22_spill] sm:$0xff] %v11342_v13  ;;  %v8308_v29 = vor.u32 %v10004_v23, %v8305_v27  ;;  %v10152_v30 = vld [vmem:[#allocation7 + $0x6a0] sm:$0xf0]  ;;  %v8031_v31 = vld [vmem:[%s11222_s20 + $0xa8] sm:$0xf]  ;;  %s7829_s28 = sshll.u32 %s13634_s13, 4  ;;  %s7830_s28 = int_to_ptr.vmem [resolvable:$true] %s7829_s28 }
  0x7a   : > { %2119 = vmatpush.bf16.msrb.mxu3 %v8376_v34  ;;  %v9938_v32 = vld [vmem:[%s11222_s20 + $0xb0] sm:$0xf0]  ;;  %v9937_v33 = vld [vmem:[%s11222_s20 + $0xac] sm:$0xf]  ;;  %v8880_v34 = vor.u32 %v10152_v30, %v8879_v28  ;;  %v8033_v35 = vld [vmem:[%s11222_s20 + $0xb4] sm:$0xf0]  ;;  %s7828_s27 = scalar_lea.hbm %s13950_s4, %s10400_s14 }
  0x7b   : > { %1973 = vmatpush.bf16.msrb.mxu0 %v8336_v4  ;;  %v8039_v36 = vld [vmem:[%s11222_s20 + $0xb0] sm:$0xf]  ;;  %v9939_v37 = vld [vmem:[%s11222_s20 + $0xb8] sm:$0xf0]  ;;  %v11354_v38 = vor.u32 %v9938_v32, %v8031_v31  ;;  %v11356_v39 = vor.u32 %v9937_v33, %v8033_v35  ;;  %v8557_v45 = vld [vmem:[#allocation7 + $0x41c] sm:$0xf0] }
  0x7c   : > { %2022 = vmatpush.bf16.msrb.mxu1 %v8624_v62  ;;  %v11358_v43 = vor.u32 %v9939_v37, %v8039_v36  ;;  %v10067_v44 = vld [vmem:[#allocation7 + $0x3fc] sm:$0xf]  ;;  %v8845_v54 = vld [vmem:[#allocation7 + $0x65c] sm:$0xf0]  ;;  %v8843_v58 = vld [vmem:[#allocation7 + $0x638] sm:$0xf] }
  0x7d   : > { %2071 = vmatpush.bf16.msrb.mxu2 %v8052_v57  ;;  %14035 = vst [vmem:[#allocation23_spill] sm:$0xff] %v11354_v38  ;;  %v10139_v47 = vld [vmem:[#allocation7 + $0x63c] sm:$0xf]  ;;  %v8560_v48 = vor.u32 %v10067_v44, %v8557_v45  ;;  %v8269_v57 = vld [vmem:[#allocation7 + $0x1dc] sm:$0xf0]  ;;  %s7831_s29 = sshll.u32 %s7828_s27, 4  ;;  %s7832_s29 = int_to_ptr.hbm [resolvable:$true] %s7831_s29 }
  0x7e   : > { %1788 = vmatmul.bf16.gmra.mxu0 %v11274_v40  ;;  %2120 = vmatpush.bf16.msrb.mxu3 %v8340_v61  ;;  %14036 = vst [vmem:[#allocation24_spill] sm:$0xff] %v11356_v39  ;;  %v8848_v55 = vor.u32 %v10139_v47, %v8845_v54  ;;  %v9995_v56 = vld [vmem:[#allocation7 + $0x1bc] sm:$0xf]  ;;  %v10058_v4 = vld [vmem:[#allocation7 + $0x3b4] sm:$0xf]  ;;  %s7817_s19 = scalar_lea.sflag [#allocation6], %s11218_s10 }
  0x7f   : > { %1837 = vmatmul.bf16.gmra.mxu1 %v11276_v41  ;;  %2162 = vmatpush.bf16.msra.mxu0 %v8880_v34  ;;  %14037 = vst [vmem:[#allocation25_spill] sm:$0xff] %v11358_v43  ;;  %v8272_v59 = vor.u32 %v9995_v56, %v8269_v57  ;;  %v10143_v60 = vld [vmem:[#allocation7 + $0x658] sm:$0xf0]  ;;  %v8521_v5 = vld [vmem:[#allocation7 + $0x3d4] sm:$0xf0]  ;;  %s11005_s8 = sshra.s32 %s7832_s29, 4  ;;  %s11006_s8 = int_to_ptr.hbm [resolvable:$true] %s11005_s8 }
  0x80   : > { %1886 = vmatmul.bf16.gmra.mxu2 %v11278_v42  ;;  %2211 = vmatpush.bf16.msra.mxu1 %v8308_v29  ;;  %v8844_v61 = vor.u32 %v10143_v60, %v8843_v58  ;;  %v10130_v6 = vld [vmem:[#allocation7 + $0x5f4] sm:$0xf]  ;;  %v8524_v7 = vor.u32 %v10058_v4, %v8521_v5  ;;  %v8809_v8 = vld [vmem:[#allocation7 + $0x614] sm:$0xf0]  ;;  %v8807_v27 = vld [vmem:[#allocation7 + $0x5f0] sm:$0xf]  ;;  %p11012_p11 = scmp.lt.s32.totalorder %s11006_s8, %s13950_s4 }
  0x81   : > { %1935 = vmatmul.bf16.gmra.mxu3 %v11274_v40  ;;  %2260 = vmatpush.bf16.msra.mxu2 %v8596_v17  ;;  %v8812_v10 = vor.u32 %v10130_v6, %v8809_v8  ;;  %v8233_v23 = vld [vmem:[#allocation7 + $0x194] sm:$0xf0]  ;;  %v10134_v29 = vld [vmem:[#allocation7 + $0x610] sm:$0xf0]  ;;  %v10049_v37 = vld [vmem:[#allocation7 + $0x36c] sm:$0xf] }
  0x82   : > { %2309 = vmatpush.bf16.msra.mxu3 %v8884_v22  ;;  %v9986_v22 = vld [vmem:[#allocation7 + $0x174] sm:$0xf]  ;;  %v8808_v30 = vor.u32 %v10134_v29, %v8807_v27  ;;  %v8485_v44 = vld [vmem:[#allocation7 + $0x38c] sm:$0xf0]  ;;  %v10121_v45 = vld [vmem:[#allocation7 + $0x5ac] sm:$0xf] }
  0x83   : > { %2163 = vmatpush.bf16.msra.mxu0 %v8844_v61  ;;  %v8236_v28 = vor.u32 %v9986_v22, %v8233_v23  ;;  %v8488_v47 = vor.u32 %v10049_v37, %v8485_v44  ;;  %v9977_v61 = vld [vmem:[#allocation7 + $0x12c] sm:$0xf]  ;;  %v10112_v22 = vld [vmem:[#allocation7 + $0x564] sm:$0xf]  ;;  %v8737_v27 = vld [vmem:[#allocation7 + $0x584] sm:$0xf0] }
  0x84   : > { %2212 = vmatpush.bf16.msra.mxu1 %v8272_v59  ;;  %v10125_v4 = vld [vmem:[#allocation7 + $0x5c8] sm:$0xf0]  ;;  %v8740_v29 = vor.u32 %v10112_v22, %v8737_v27  ;;  %v9968_v37 = vld [vmem:[#allocation7 + $0xe4] sm:$0xf]  ;;  %v8161_v44 = vld [vmem:[#allocation7 + $0x104] sm:$0xf0] }
  0x85   : > { %2261 = vmatpush.bf16.msra.mxu2 %v8560_v48  ;;  %v8773_v48 = vld [vmem:[#allocation7 + $0x5cc] sm:$0xf0]  ;;  %v9959_v27 = vld [vmem:[#allocation7 + $0x9c] sm:$0xf]  ;;  %s11007_s9 = scalar_lea.hbm %s11006_s8, 384  ;;  %s11011_s11 = scalar_lea.hbm %s13950_s4, 768 }
  0x86   : > { %2310 = vmatpush.bf16.msra.mxu3 %v8848_v55  ;;  %v8776_v55 = vor.u32 %v10121_v45, %v8773_v48  ;;  %v8735_v45 = vld [vmem:[#allocation7 + $0x560] sm:$0xf]  ;;  %v10116_v48 = vld [vmem:[#allocation7 + $0x580] sm:$0xf0]  ;;  %p11008_p1 = scmp.ne.s32.totalorder %s11006_s8, %s11007_s9  ;;  %p11013_p9 = scmp.lt.s32.totalorder %s11011_s11, %s11007_s9 }
  0x87   : > { %2164 = vmatpush.bf16.msra.mxu0 %v8808_v30 }
  0x88   : > { %2213 = vmatpush.bf16.msra.mxu1 %v8236_v28  ;;  %p11009_p4 = pnand %p11008_p1, %p11189_p7  ;;  %p11014_p2 = por %p11013_p9, %p11012_p11 }
  0x89   : > { %2262 = vmatpush.bf16.msra.mxu2 %v8524_v7 }
  0x8a   : > { %2311 = vmatpush.bf16.msra.mxu3 %v8812_v10  ;;  %p11010_p8 = pneg %p11009_p4 }
  0x8c   : > { %p11015_p10 = pnand %p11014_p2, %p11010_p8 }
  0x8d   : > { %2263 = vmatpush.bf16.msra.mxu2 %v8488_v47  ;;  %v8164_v47 = vor.u32 %v9968_v37, %v8161_v44 }
  0x8e   : > { %1793 = vmatmul.bf16.gmra.mxu0 %v11290_v0  ;;  %2312 = vmatpush.bf16.msra.mxu3 %v8776_v55 }
  0x8f   : > { %1842 = vmatmul.bf16.gmra.mxu1 %v11292_v1 }
  0x90   : > { %1891 = vmatmul.bf16.gmra.mxu2 %v11294_v2 }
  0x91   : > { %1940 = vmatmul.bf16.gmra.mxu3 %v11290_v0 }
  0x92   : > { %2313 = vmatpush.bf16.msra.mxu3 %v8740_v29  ;;  %v8699_v29 = vld [vmem:[#allocation7 + $0x518] sm:$0xf] }
  0x9e   : > { %1798 = vmatmul.bf16.gmra.mxu0 %v11306_v24 }
  0x9f   : > { %1847 = vmatmul.bf16.gmra.mxu1 %v11308_v25 }
  0xa0   : > { %1896 = vmatmul.bf16.gmra.mxu2 %v11310_v26 }
  0xa1   : > { %1945 = vmatmul.bf16.gmra.mxu3 %v11306_v24 }
  0xae   : > { %1803 = vmatmul.bf16.gmra.mxu0 %v11322_v49 }
  0xaf   : > { %1852 = vmatmul.bf16.gmra.mxu1 %v11324_v50 }
  0xb0   : > { %1901 = vmatmul.bf16.gmra.mxu2 %v11326_v53 }
  0xb1   : > { %1950 = vmatmul.bf16.gmra.mxu3 %v11322_v49 }
  0xbe   : > { %1808 = vmatmul.bf16.gmra.mxu0 %v11338_v11 }
  0xbf   : > { %1857 = vmatmul.bf16.gmra.mxu1 %v11340_v12 }
  0xc0   : > { %1906 = vmatmul.bf16.gmra.mxu2 %v11342_v13 }
  0xc1   : > { %1955 = vmatmul.bf16.gmra.mxu3 %v11338_v11 }
  0xce   : > { %1813 = vmatmul.bf16.gmra.mxu0 %v11354_v38 }
  0xcf   : > { %1862 = vmatmul.bf16.gmra.mxu1 %v11356_v39 }
  0xd0   : > { %1911 = vmatmul.bf16.gmra.mxu2 %v11358_v43 }
  0xd1   : > { %1960 = vmatmul.bf16.gmra.mxu3 %v11354_v38 }
  0xdb   : > { %v1779_v62 = vpop.f32.mrf.mxu0 }
  0xdc   : > { %v1828_v63 = vpop.f32.mrf.mxu1 }
  0xdd   : > { %v1829_v3 = vadd.f32 %v1828_v63, %v1779_v62  ;;  %v8197_v62 = vld [vmem:[#allocation7 + $0x14c] sm:$0xf0]  ;;  %v8771_v63 = vld [vmem:[#allocation7 + $0x5a8] sm:$0xf] }
  0xde   : > { %1974 = vmatmul.bf16.vlgmr.msrb.gmra.mxu0 %v11244_v51  ;;  %v8772_v5 = vor.u32 %v10125_v4, %v8771_v63  ;;  %v10031_v63 = vld [vmem:[#allocation7 + $0x2dc] sm:$0xf] }
  0xdf   : > { %2023 = vmatmul.bf16.vlgmr.msrb.gmra.mxu1 %v11246_v52  ;;  %v10103_v4 = vld [vmem:[#allocation7 + $0x51c] sm:$0xf] }
  0xe0   : > { %2072 = vmatmul.bf16.vlgmr.msrb.gmra.mxu2 %v11242_v46  ;;  %2165 = vmatpush.bf16.msra.mxu0 %v8772_v5 }
  0xe1   : > { %2121 = vmatmul.bf16.vlgmr.msrb.gmra.mxu3 %v11244_v51 }
  0xe3   : > { %v1877_v9 = vpop.f32.mrf.mxu2  ;;  %v1781_v16 = vpop.f32.mrf.mxu0 }
  0xe4   : > { %v11368_v14 = vadd.f32 %v1877_v9, %v1829_v3  ;;  %v11370_v15 = vpop.f32.mrf.mxu3  ;;  %v1830_v17 = vpop.f32.mrf.mxu1  ;;  %v8200_v3 = vor.u32 %v9977_v61, %v8197_v62 }
  0xe5   : > { %v1831_v18 = vadd.f32 %v1830_v17, %v1781_v16  ;;  %v10040_v17 = vld [vmem:[#allocation7 + $0x324] sm:$0xf] }
  0xe6   : > { %2214 = vmatpush.bf16.msra.mxu1 %v8200_v3  ;;  %v8413_v3 = vld [vmem:[#allocation7 + $0x2fc] sm:$0xf0] }
  0xe7   : > { %v8416_v5 = vor.u32 %v10031_v63, %v8413_v3  ;;  %v8665_v63 = vld [vmem:[#allocation7 + $0x4f4] sm:$0xf0] }
  0xea   : > { %2215 = vmatpush.bf16.msra.mxu1 %v8164_v47 }
  0xeb   : > { %v1879_v31 = vpop.f32.mrf.mxu2  ;;  %v1784_v34 = vpop.f32.mrf.mxu0 }
  0xec   : > { %v11372_v32 = vadd.f32 %v1879_v31, %v1831_v18  ;;  %v11374_v33 = vpop.f32.mrf.mxu3  ;;  %v1833_v35 = vpop.f32.mrf.mxu1  ;;  %v8449_v18 = vld [vmem:[#allocation7 + $0x344] sm:$0xf0] }
  0xed   : > { %v1834_v36 = vadd.f32 %v1833_v35, %v1784_v34  ;;  %v8452_v23 = vor.u32 %v10040_v17, %v8449_v18 }
  0xee   : > { %1979 = vmatmul.bf16.gmra.mxu0 %v11260_v20 }
  0xef   : > { %2028 = vmatmul.bf16.gmra.mxu1 %v11262_v21  ;;  %2264 = vmatpush.bf16.msra.mxu2 %v8452_v23 }
  0xf0   : > { %2077 = vmatmul.bf16.gmra.mxu2 %v11258_v19 }
  0xf1   : > { %2126 = vmatmul.bf16.gmra.mxu3 %v11260_v20 }
  0xf3   : > { %v1882_v54 = vpop.f32.mrf.mxu2  ;;  %v1786_v58 = vpop.f32.mrf.mxu0  ;;  %2265 = vmatpush.bf16.msra.mxu2 %v8416_v5 }
  0xf4   : > { %v11380_v56 = vadd.f32 %v1882_v54, %v1834_v36  ;;  %v11382_v57 = vpop.f32.mrf.mxu3  ;;  %v1835_v59 = vpop.f32.mrf.mxu1  ;;  %v8736_v54 = vor.u32 %v10116_v48, %v8735_v45 }
  0xf5   : > { %v1836_v60 = vadd.f32 %v1835_v59, %v1786_v58 }
  0xf6   : > { %2166 = vmatpush.bf16.msra.mxu0 %v8736_v54 }
  0xfb   : > { %v1884_v6 = vpop.f32.mrf.mxu2  ;;  %v1789_v9 = vpop.f32.mrf.mxu0 }
  0xfc   : > { %v11384_v7 = vadd.f32 %v1884_v6, %v1836_v60  ;;  %v11386_v8 = vpop.f32.mrf.mxu3  ;;  %v1838_v10 = vpop.f32.mrf.mxu1  ;;  %v8701_v6 = vld [vmem:[#allocation7 + $0x53c] sm:$0xf0] }
  0xfd   : > { %v1839_v16 = vadd.f32 %v1838_v10, %v1789_v9  ;;  %v8704_v10 = vor.u32 %v10103_v4, %v8701_v6 }
  0xfe   : > { %1984 = vmatmul.bf16.gmra.mxu0 %v11276_v41 }
  0xff   : > { %2033 = vmatmul.bf16.gmra.mxu1 %v11278_v42  ;;  %2314 = vmatpush.bf16.msra.mxu3 %v8704_v10 }
 0x100   : > { %2082 = vmatmul.bf16.gmra.mxu2 %v11274_v40 }
 0x101   : > { %2131 = vmatmul.bf16.gmra.mxu3 %v11276_v41 }
 0x103   : > { %v1887_v28 = vpop.f32.mrf.mxu2  ;;  %v1791_v34 = vpop.f32.mrf.mxu0 }
 0x104   : > { %v11392_v30 = vadd.f32 %v1887_v28, %v1839_v16  ;;  %v11394_v31 = vpop.f32.mrf.mxu3  ;;  %v1840_v35 = vpop.f32.mrf.mxu1  ;;  %v8125_v28 = vld [vmem:[#allocation7 + $0xbc] sm:$0xf0] }
 0x105   : > { %v1841_v36 = vadd.f32 %v1840_v35, %v1791_v34  ;;  %v8128_v34 = vor.u32 %v9959_v27, %v8125_v28  ;;  %v10107_v35 = vld [vmem:[#allocation7 + $0x538] sm:$0xf0]  ;;  %v8663_v27 = vld [vmem:[#allocation7 + $0x4d0] sm:$0xf] }
 0x107   : > { %2216 = vmatpush.bf16.msra.mxu1 %v8128_v34 }
 0x10b   : > { %v1889_v55 = vpop.f32.mrf.mxu2  ;;  %v1794_v60 = vpop.f32.mrf.mxu0 }
 0x10c   : > { %v11396_v58 = vadd.f32 %v1889_v55, %v1841_v36  ;;  %v11398_v59 = vpop.f32.mrf.mxu3  ;;  %v1843_v61 = vpop.f32.mrf.mxu1  ;;  %v8700_v36 = vor.u32 %v10107_v35, %v8699_v29  ;;  %v10022_v55 = vld [vmem:[#allocation7 + $0x294] sm:$0xf] }
 0x10d   : > { %v1844_v62 = vadd.f32 %v1843_v61, %v1794_v60  ;;  %v8377_v60 = vld [vmem:[#allocation7 + $0x2b4] sm:$0xf0]  ;;  %v10094_v61 = vld [vmem:[#allocation7 + $0x4d4] sm:$0xf] }
 0x10e   : > { %1989 = vmatmul.bf16.gmra.mxu0 %v11292_v1  ;;  %v8668_v4 = vor.u32 %v10094_v61, %v8665_v63  ;;  %v10098_v29 = vld [vmem:[#allocation7 + $0x4f0] sm:$0xf0]  ;;  %v10085_v61 = vld [vmem:[#allocation7 + $0x48c] sm:$0xf]  ;;  %v8629_v63 = vld [vmem:[#allocation7 + $0x4ac] sm:$0xf0] }
 0x10f   : > { %2038 = vmatmul.bf16.gmra.mxu1 %v11294_v2  ;;  %2167 = vmatpush.bf16.msra.mxu0 %v8700_v36  ;;  %v8664_v34 = vor.u32 %v10098_v29, %v8663_v27  ;;  %v9941_v27 = vld [vmem:[#allocation7 + $0xc] sm:$0xf]  ;;  %v8627_v29 = vld [vmem:[#allocation7 + $0x488] sm:$0xf] }
 0x110   : > { %2087 = vmatmul.bf16.gmra.mxu2 %v11290_v0  ;;  %2315 = vmatpush.bf16.msra.mxu3 %v8668_v4  ;;  %v8632_v4 = vor.u32 %v10085_v61, %v8629_v63 }
 0x111   : > { %2136 = vmatmul.bf16.gmra.mxu3 %v11292_v1 }
 0x113   : > { %v1892_v9 = vpop.f32.mrf.mxu2  ;;  %v1796_v18 = vpop.f32.mrf.mxu0  ;;  %2168 = vmatpush.bf16.msra.mxu0 %v8664_v34 }
 0x114   : > { %v11404_v16 = vadd.f32 %v1892_v9, %v1844_v62  ;;  %v11406_v17 = vpop.f32.mrf.mxu3  ;;  %v1845_v22 = vpop.f32.mrf.mxu1  ;;  %v8380_v62 = vor.u32 %v10022_v55, %v8377_v60  ;;  %v10013_v55 = vld [vmem:[#allocation7 + $0x24c] sm:$0xf]  ;;  %v8341_v60 = vld [vmem:[#allocation7 + $0x26c] sm:$0xf0]  ;;  %2316 = vmatpush.bf16.msra.mxu3 %v8632_v4 }
 0x115   : > { %v1846_v23 = vadd.f32 %v1845_v22, %v1796_v18  ;;  %v9950_v22 = vld [vmem:[#allocation7 + $0x54] sm:$0xf]  ;;  %v10153_v4 = vld [vmem:[#allocation7 + $0x6a8] sm:$0xf0] }
 0x116   : > { %2266 = vmatpush.bf16.msra.mxu2 %v8380_v62  ;;  %v8344_v62 = vor.u32 %v10013_v55, %v8341_v60 }
 0x11a   : > { %2267 = vmatpush.bf16.msra.mxu2 %v8344_v62 }
 0x11b   : > { %v1894_v37 = vpop.f32.mrf.mxu2  ;;  %v1799_v47 = vpop.f32.mrf.mxu0 }
 0x11c   : > { %v11408_v44 = vadd.f32 %v1894_v37, %v1846_v23  ;;  %v11410_v45 = vpop.f32.mrf.mxu3  ;;  %v1848_v48 = vpop.f32.mrf.mxu1  ;;  %v8089_v23 = vld [vmem:[#allocation7 + $0x74] sm:$0xf0] }
 0x11d   : > { %v1849_v54 = vadd.f32 %v1848_v48, %v1799_v47  ;;  %v8092_v28 = vor.u32 %v9950_v22, %v8089_v23 }
 0x11e   : > { %1994 = vmatmul.bf16.gmra.mxu0 %v11308_v25 }
 0x11f   : > { %2043 = vmatmul.bf16.gmra.mxu1 %v11310_v26 }
 0x120   : > { %2092 = vmatmul.bf16.gmra.mxu2 %v11306_v24  ;;  %2217 = vmatpush.bf16.msra.mxu1 %v8092_v28  ;;  %v8053_v28 = vld [vmem:[#allocation7 + $0x2c] sm:$0xf0] }
 0x121   : > { %2141 = vmatmul.bf16.gmra.mxu3 %v11308_v25  ;;  %v8056_v34 = vor.u32 %v9941_v27, %v8053_v28 }
 0x123   : > { %v1897_v3 = vpop.f32.mrf.mxu2  ;;  %v1801_v9 = vpop.f32.mrf.mxu0 }
 0x124   : > { %v11416_v5 = vadd.f32 %v1897_v3, %v1849_v54  ;;  %v11418_v6 = vpop.f32.mrf.mxu3  ;;  %v1850_v10 = vpop.f32.mrf.mxu1  ;;  %2218 = vmatpush.bf16.msra.mxu1 %v8056_v34 }
 0x125   : > { %v1851_v18 = vadd.f32 %v1850_v10, %v1801_v9 }
 0x12b   : > { %v1899_v35 = vpop.f32.mrf.mxu2  ;;  %v1804_v47 = vpop.f32.mrf.mxu0 }
 0x12c   : > { %v11420_v36 = vadd.f32 %v1899_v35, %v1851_v18  ;;  %v11422_v37 = vpop.f32.mrf.mxu3  ;;  %v1853_v48 = vpop.f32.mrf.mxu1  ;;  %v10089_v35 = vld [vmem:[#allocation7 + $0x4a8] sm:$0xf0] }
 0x12d   : > { %v1854_v54 = vadd.f32 %v1853_v48, %v1804_v47  ;;  %v8628_v47 = vor.u32 %v10089_v35, %v8627_v29  ;;  %v8313_v29 = vld [vmem:[#allocation7 + $0x22c] sm:$0xf0] }
 0x12e   : > { %1999 = vmatmul.bf16.gmra.mxu0 %v11324_v50 }
 0x12f   : > { %2048 = vmatmul.bf16.gmra.mxu1 %v11326_v53  ;;  %2169 = vmatpush.bf16.msra.mxu0 %v8628_v47 }
 0x130   : > { %2097 = vmatmul.bf16.gmra.mxu2 %v11322_v49 }
 0x131   : > { %2146 = vmatmul.bf16.gmra.mxu3 %v11324_v50 }
 0x133   : > { %v1902_v3 = vpop.f32.mrf.mxu2  ;;  %v1806_v18 = vpop.f32.mrf.mxu0 }
 0x134   : > { %v11428_v9 = vadd.f32 %v1902_v3, %v1854_v54  ;;  %v11430_v10 = vpop.f32.mrf.mxu3  ;;  %v1855_v22 = vpop.f32.mrf.mxu1  ;;  %v8887_v3 = vld [vmem:[#allocation7 + $0x688] sm:$0xf] }
 0x135   : > { %v1856_v23 = vadd.f32 %v1855_v22, %v1806_v18  ;;  %v10005_v18 = vld [vmem:[#allocation7 + $0x20c] sm:$0xf]  ;;  %v8888_v28 = vor.u32 %v10153_v4, %v8887_v3 }
 0x136   : > { %v8316_v35 = vor.u32 %v10005_v18, %v8313_v29  ;;  %v8851_v18 = vld [vmem:[#allocation7 + $0x640] sm:$0xf] }
 0x137   : > { %2456 = vmatpush.bf16.msrb.mxu2 %v8888_v28  ;;  %v9996_v28 = vld [vmem:[#allocation7 + $0x1c4] sm:$0xf] }
 0x138   : > { %2505 = vmatpush.bf16.msrb.mxu3 %v8316_v35 }
 0x13b   : > { %v1904_v48 = vpop.f32.mrf.mxu2  ;;  %v1809_v60 = vpop.f32.mrf.mxu0 }
 0x13c   : > { %v11432_v55 = vadd.f32 %v1904_v48, %v1856_v23  ;;  %v11434_v54 = vpop.f32.mrf.mxu3  ;;  %v1858_v61 = vpop.f32.mrf.mxu1 }
 0x13d   : > { %v1859_v63 = vadd.f32 %v1858_v61, %v1809_v60  ;;  %v8599_v60 = vld [vmem:[#allocation7 + $0x448] sm:$0xf]  ;;  %v10081_v61 = vld [vmem:[#allocation7 + $0x468] sm:$0xf0] }
 0x13e   : > { %14038 = vst [vmem:[#allocation26_spill] sm:$0xff] %v11432_v55  ;;  %2004 = vmatmul.bf16.gmra.mxu0 %v11340_v12 }
 0x13f   : > { %2053 = vmatmul.bf16.gmra.mxu1 %v11342_v13 }
 0x140   : > { %2102 = vmatmul.bf16.gmra.mxu2 %v11338_v11 }
 0x141   : > { %2151 = vmatmul.bf16.gmra.mxu3 %v11340_v12  ;;  %v8311_v12 = vld [vmem:[#allocation7 + $0x208] sm:$0xf] }
 0x143   : > { %v1907_v62 = vpop.f32.mrf.mxu2  ;;  %v1811_v27 = vpop.f32.mrf.mxu0 }
 0x144   : > { %v11440_v22 = vadd.f32 %v1907_v62, %v1859_v63  ;;  %v11442_v23 = vpop.f32.mrf.mxu3  ;;  %v1860_v34 = vpop.f32.mrf.mxu1  ;;  %v8600_v62 = vor.u32 %v10081_v61, %v8599_v60  ;;  %v8563_v61 = vld [vmem:[#allocation7 + $0x400] sm:$0xf] }
 0x145   : > { %14040 = vst [vmem:[#allocation28_spill] sm:$0xff] %v11442_v23  ;;  %v1861_v47 = vadd.f32 %v1860_v34, %v1811_v27  ;;  %v10144_v27 = vld [vmem:[#allocation7 + $0x660] sm:$0xf0] }
 0x146   : > { %14039 = vst [vmem:[#allocation27_spill] sm:$0xff] %v11440_v22  ;;  %v10009_v22 = vld [vmem:[#allocation7 + $0x228] sm:$0xf0]  ;;  %2407 = vmatpush.bf16.msrb.mxu1 %v8600_v62 }
 0x147   : > { %v8312_v55 = vor.u32 %v10009_v22, %v8311_v12  ;;  %v8852_v22 = vor.u32 %v10144_v27, %v8851_v18 }
 0x149   : > { %2358 = vmatpush.bf16.msrb.mxu0 %v8312_v55  ;;  %2457 = vmatpush.bf16.msrb.mxu2 %v8852_v22  ;;  %v8275_v55 = vld [vmem:[#allocation7 + $0x1c0] sm:$0xf] }
 0x14b   : > { %v1909_v48 = vpop.f32.mrf.mxu2  ;;  %v1814_v63 = vpop.f32.mrf.mxu0 }
 0x14c   : > { %v11444_v11 = vadd.f32 %v1909_v48, %v1861_v47  ;;  %v11446_v13 = vpop.f32.mrf.mxu3  ;;  %v1863_v23 = vpop.f32.mrf.mxu1 }
 0x14d   : > { %v1864_v3 = vadd.f32 %v1863_v23, %v1814_v63  ;;  %v8277_v23 = vld [vmem:[#allocation7 + $0x1e4] sm:$0xf0]  ;;  %v10072_v63 = vld [vmem:[#allocation7 + $0x420] sm:$0xf0] }
 0x14e   : > { %2009 = vmatmul.bf16.gmra.mxu0 %v11356_v39  ;;  %v8280_v47 = vor.u32 %v9996_v28, %v8277_v23  ;;  %v8815_v23 = vld [vmem:[#allocation7 + $0x5f8] sm:$0xf] }
 0x14f   : > { %2058 = vmatmul.bf16.gmra.mxu1 %v11358_v43 }
 0x150   : > { %2107 = vmatmul.bf16.gmra.mxu2 %v11354_v38  ;;  %2506 = vmatpush.bf16.msrb.mxu3 %v8280_v47 }
 0x151   : > { %2156 = vmatmul.bf16.gmra.mxu3 %v11356_v39 }
 0x153   : > { %v1912_v4 = vpop.f32.mrf.mxu2  ;;  %v1816_v12 = vpop.f32.mrf.mxu0 }
 0x154   : > { %v11452_v29 = vadd.f32 %v1912_v4, %v1864_v3  ;;  %v11454_v34 = vpop.f32.mrf.mxu3  ;;  %v1865_v35 = vpop.f32.mrf.mxu1  ;;  %v8564_v4 = vor.u32 %v10072_v63, %v8563_v61 }
 0x155   : > { %v1866_v48 = vadd.f32 %v1865_v35, %v1816_v12  ;;  %v10135_v35 = vld [vmem:[#allocation7 + $0x618] sm:$0xf0] }
 0x156   : > { %14041 = vst [vmem:[#allocation29_spill] sm:$0xff] %v11452_v29  ;;  %v10000_v29 = vld [vmem:[#allocation7 + $0x1e0] sm:$0xf0]  ;;  %2408 = vmatpush.bf16.msrb.mxu1 %v8564_v4 }
 0x157   : > { %v8276_v27 = vor.u32 %v10000_v29, %v8275_v55  ;;  %v8816_v29 = vor.u32 %v10135_v35, %v8815_v23  ;;  %v8239_v35 = vld [vmem:[#allocation7 + $0x178] sm:$0xf] }
 0x159   : > { %2359 = vmatpush.bf16.msrb.mxu0 %v8276_v27  ;;  %2458 = vmatpush.bf16.msrb.mxu2 %v8816_v29  ;;  %v10063_v27 = vld [vmem:[#allocation7 + $0x3d8] sm:$0xf0] }
 0x15b   : > { %v1914_v60 = vpop.f32.mrf.mxu2  ;;  %v1975_v3 = vpop.f32.mrf.mxu0 }
 0x15c   : > { %v11456_v62 = vadd.f32 %v1914_v60, %v1866_v48  ;;  %v11458_v39 = vpop.f32.mrf.mxu3  ;;  %v1976_v38 = vadd.f32 %v1975_v3, %v11370_v15  ;;  %v2024_v18 = vpop.f32.mrf.mxu1  ;;  %v9987_v48 = vld [vmem:[#allocation7 + $0x17c] sm:$0xf] }
 0x15e   : > { %v2025_v28 = vadd.f32 %v2024_v18, %v1976_v38  ;;  %2170 = vmatmul.bf16.vlgmr.msra.gmra.mxu0 %v11246_v52  ;;  %v8241_v38 = vld [vmem:[#allocation7 + $0x19c] sm:$0xf0]  ;;  %v8527_v18 = vld [vmem:[#allocation7 + $0x3b8] sm:$0xf] }
 0x15f   : > { %2219 = vmatmul.bf16.vlgmr.msra.gmra.mxu1 %v11242_v46  ;;  %v8244_v55 = vor.u32 %v9987_v48, %v8241_v38  ;;  %v8528_v23 = vor.u32 %v10063_v27, %v8527_v18 }
 0x160   : > { %2268 = vmatmul.bf16.vlgmr.msra.gmra.mxu2 %v11244_v51  ;;  %v3093_v12 = vpack.c.bf16 %v2025_v28, %v11368_v14 }
 0x161   : > { %2317 = vmatmul.bf16.vlgmr.msra.gmra.mxu3 %v11246_v52  ;;  %v9991_v52 = vld [vmem:[#allocation7 + $0x198] sm:$0xf0]  ;;  %2409 = vmatpush.bf16.msrb.mxu1 %v8528_v23 }
 0x162   : > { %3173 = vst [vmem:[#allocation2] sm:$0xff] %v3093_v12  ;;  %2507 = vmatpush.bf16.msrb.mxu3 %v8244_v55 }
 0x163   : > { %v2073_v22 = vpop.f32.mrf.mxu2  ;;  %v1977_v47 = vpop.f32.mrf.mxu0 }
 0x164   : > { %v2122_v15 = vpop.f32.mrf.mxu3  ;;  %v1978_v61 = vadd.f32 %v1977_v47, %v11374_v33  ;;  %v2026_v63 = vpop.f32.mrf.mxu1  ;;  %v8240_v47 = vor.u32 %v9991_v52, %v8239_v35 }
 0x165   : > { %v11466_v60 = vadd.f32 %v2122_v15, %v2073_v22 }
 0x166   : > { %v2027_v14 = vadd.f32 %v2026_v63, %v1978_v61  ;;  %2360 = vmatpush.bf16.msrb.mxu0 %v8240_v47 }
 0x168   : > { %v3098_v3 = vpack.c.bf16 %v2027_v14, %v11372_v32  ;;  %v8779_v14 = vld [vmem:[#allocation7 + $0x5b0] sm:$0xf] }
 0x169   : > { %v9219_v48 = vld [vmem:[#allocation2 + $0x4] sm:$0xf]  ;;  %v9011_v61 = vld [vmem:[#allocation2] sm:$0xf] }
 0x16a   : > { %3178 = vst [vmem:[#allocation2 + $0x24] sm:$0xff] %v3098_v3  ;;  %v10126_v3 = vld [vmem:[#allocation7 + $0x5d0] sm:$0xf0] }
 0x16b   : > { %v2075_v4 = vpop.f32.mrf.mxu2  ;;  %v1980_v12 = vpop.f32.mrf.mxu0  ;;  %v8780_v27 = vor.u32 %v10126_v3, %v8779_v14 }
 0x16c   : > { %v2124_v28 = vpop.f32.mrf.mxu3  ;;  %v1981_v33 = vadd.f32 %v1980_v12, %v11382_v57  ;;  %v2029_v15 = vpop.f32.mrf.mxu1  ;;  %v8205_v12 = vld [vmem:[#allocation7 + $0x154] sm:$0xf0] }
 0x16d   : > { %v11470_v22 = vadd.f32 %v2124_v28, %v2075_v4  ;;  %v9978_v28 = vld [vmem:[#allocation7 + $0x134] sm:$0xf]  ;;  %2459 = vmatpush.bf16.msrb.mxu2 %v8780_v27 }
 0x16e   : > { %v2030_v29 = vadd.f32 %v2029_v15, %v1981_v33  ;;  %2175 = vmatmul.bf16.gmra.mxu0 %v11262_v21  ;;  %v8208_v33 = vor.u32 %v9978_v28, %v8205_v12  ;;  %v8743_v12 = vld [vmem:[#allocation7 + $0x568] sm:$0xf] }
 0x16f   : > { %2224 = vmatmul.bf16.gmra.mxu1 %v11258_v19 }
 0x170   : > { %2273 = vmatmul.bf16.gmra.mxu2 %v11260_v20  ;;  %v3103_v32 = vpack.c.bf16 %v2030_v29, %v11380_v56  ;;  %2508 = vmatpush.bf16.msrb.mxu3 %v8208_v33 }
 0x171   : > { %2322 = vmatmul.bf16.gmra.mxu3 %v11262_v21  ;;  %v10228_v38 = vld [vmem:[#allocation2 + $0x24] sm:$0xf0]  ;;  %v10180_v63 = vld [vmem:[#allocation2 + $0x20] sm:$0xf0] }
 0x172   : > { %3183 = vst [vmem:[#allocation2 + $0x48] sm:$0xff] %v3103_v32  ;;  %v9220_v52 = vor.u32 %v10228_v38, %v9219_v48  ;;  %v9012_v55 = vor.u32 %v10180_v63, %v9011_v61  ;;  %v8491_v32 = vld [vmem:[#allocation7 + $0x370] sm:$0xf]  ;;  %v10054_v48 = vld [vmem:[#allocation7 + $0x390] sm:$0xf0] }
 0x173   : > { %v2078_v57 = vpop.f32.mrf.mxu2  ;;  %v1982_v18 = vpop.f32.mrf.mxu0  ;;  %v8492_v63 = vor.u32 %v10054_v48, %v8491_v32 }
 0x174   : > { %v2127_v4 = vpop.f32.mrf.mxu3  ;;  %v1983_v56 = vadd.f32 %v1982_v18, %v11386_v8  ;;  %v2031_v35 = vpop.f32.mrf.mxu1  ;;  %5025 = vrot.lane.b32.xlu0 %v9220_v52, %s11074_s21  ;;  %3900 = vrot.lane.b32.xlu2 %v9012_v55, %s11074_s21  ;;  %v8203_v8 = vld [vmem:[#allocation7 + $0x130] sm:$0xf] }
 0x175   : > { %v11478_v23 = vadd.f32 %v2127_v4, %v2078_v57  ;;  %v9982_v57 = vld [vmem:[#allocation7 + $0x150] sm:$0xf0]  ;;  %2410 = vmatpush.bf16.msrb.mxu1 %v8492_v63 }
 0x176   : > { %v2032_v15 = vadd.f32 %v2031_v35, %v1983_v56  ;;  %v8204_v3 = vor.u32 %v9982_v57, %v8203_v8  ;;  %v10117_v56 = vld [vmem:[#allocation7 + $0x588] sm:$0xf0] }
 0x178   : > { %v3108_v47 = vpack.c.bf16 %v2032_v15, %v11384_v7  ;;  %2361 = vmatpush.bf16.msrb.mxu0 %v8204_v3  ;;  %v8744_v15 = vor.u32 %v10117_v56, %v8743_v12  ;;  %v8455_v3 = vld [vmem:[#allocation7 + $0x328] sm:$0xf] }
 0x179   : > { %v9015_v18 = vld [vmem:[#allocation2 + $0x48] sm:$0xf]  ;;  %v9223_v57 = vld [vmem:[#allocation2 + $0x4c] sm:$0xf] }
 0x17a   : > { %3188 = vst [vmem:[#allocation2 + $0x6c] sm:$0xff] %v3108_v47  ;;  %v9969_v47 = vld [vmem:[#allocation7 + $0xec] sm:$0xf]  ;;  %2460 = vmatpush.bf16.msrb.mxu2 %v8744_v15 }
 0x17b   : > { %v2080_v29 = vpop.f32.mrf.mxu2  ;;  %v1985_v61 = vpop.f32.mrf.mxu0 }
 0x17c   : > { %v2129_v38 = vpop.f32.mrf.mxu3  ;;  %v1986_v52 = vadd.f32 %v1985_v61, %v11394_v31  ;;  %v2034_v55 = vpop.f32.mrf.mxu1 }
 0x17d   : > { %v11484_v14 = vadd.f32 %v2129_v38, %v2080_v29  ;;  %v8169_v29 = vld [vmem:[#allocation7 + $0x10c] sm:$0xf0] }
 0x17e   : > { %v2035_v4 = vadd.f32 %v2034_v55, %v1986_v52  ;;  %2180 = vmatmul.bf16.gmra.mxu0 %v11278_v42  ;;  %v8172_v38 = vor.u32 %v9969_v47, %v8169_v29 }
 0x17f   : > { %2229 = vmatmul.bf16.gmra.mxu1 %v11274_v40 }
 0x180   : > { %2278 = vmatmul.bf16.gmra.mxu2 %v11276_v41  ;;  %v3113_v7 = vpack.c.bf16 %v2035_v4, %v11392_v30  ;;  %2509 = vmatpush.bf16.msrb.mxu3 %v8172_v38  ;;  %v10045_v4 = vld [vmem:[#allocation7 + $0x348] sm:$0xf0] }
 0x181   : > { %2327 = vmatmul.bf16.gmra.mxu3 %v11278_v42  ;;  %v10181_v27 = vld [vmem:[#allocation2 + $0x68] sm:$0xf0]  ;;  %v10229_v63 = vld [vmem:[#allocation2 + $0x6c] sm:$0xf0] }
 0x182   : > { %3193 = vst [vmem:[#allocation2 + $0x90] sm:$0xff] %v3113_v7  ;;  %v9016_v31 = vor.u32 %v10181_v27, %v9015_v18  ;;  %v9224_v55 = vor.u32 %v10229_v63, %v9223_v57  ;;  %v8456_v27 = vor.u32 %v10045_v4, %v8455_v3  ;;  %v10108_v63 = vld [vmem:[#allocation7 + $0x540] sm:$0xf0]  ;;  %v8133_v3 = vld [vmem:[#allocation7 + $0xc4] sm:$0xf0] }
 0x183   : > { %v2083_v28 = vpop.f32.mrf.mxu2  ;;  %v1987_v33 = vpop.f32.mrf.mxu0 }
 0x184   : > { %v2132_v35 = vpop.f32.mrf.mxu3  ;;  %v1988_v48 = vadd.f32 %v1987_v33, %v11398_v59  ;;  %v2036_v30 = vpop.f32.mrf.mxu1  ;;  %3902 = vrot.lane.b32.xlu0 %v9016_v31, %s11074_s21  ;;  %v8167_v59 = vld [vmem:[#allocation7 + $0xe8] sm:$0xf]  ;;  %2411 = vmatpush.bf16.msrb.mxu1 %v8456_v27 }
 0x185   : > { %v11492_v32 = vadd.f32 %v2132_v35, %v2083_v28  ;;  %v9973_v28 = vld [vmem:[#allocation7 + $0x108] sm:$0xf0] }
 0x186   : > { %v2037_v61 = vadd.f32 %v2036_v30, %v1988_v48  ;;  %v8168_v35 = vor.u32 %v9973_v28, %v8167_v59 }
 0x188   : > { %v3118_v8 = vpack.c.bf16 %v2037_v61, %v11396_v58  ;;  %2362 = vmatpush.bf16.msrb.mxu0 %v8168_v35  ;;  %v8707_v61 = vld [vmem:[#allocation7 + $0x520] sm:$0xf] }
 0x189   : > { %v9019_v15 = vld [vmem:[#allocation2 + $0x90] sm:$0xf] }
 0x18a   : > { %3198 = vst [vmem:[#allocation2 + $0xb4] sm:$0xff] %v3118_v8 }
 0x18b   : > { %v2085_v52 = vpop.f32.mrf.mxu2  ;;  %v1990_v18 = vpop.f32.mrf.mxu0 }
 0x18c   : > { %v2134_v7 = vpop.f32.mrf.mxu3  ;;  %v1991_v31 = vadd.f32 %v1990_v18, %v11406_v17  ;;  %v2039_v56 = vpop.f32.mrf.mxu1  ;;  %5027 = vrot.lane.b32.xlu0 %v9224_v55, %s11074_s21  ;;  %v9227_v17 = vld [vmem:[#allocation2 + $0x94] sm:$0xf]  ;;  %v9960_v55 = vld [vmem:[#allocation7 + $0xa4] sm:$0xf] }
 0x18d   : > { %v11497_v12 = vadd.f32 %v2134_v7, %v2085_v52  ;;  %v8708_v52 = vor.u32 %v10108_v63, %v8707_v61  ;;  %v8136_v18 = vor.u32 %v9960_v55, %v8133_v3  ;;  %v8671_v55 = vld [vmem:[#allocation7 + $0x4d8] sm:$0xf]  ;;  %v10099_v3 = vld [vmem:[#allocation7 + $0x4f8] sm:$0xf0] }
 0x18e   : > { %v2040_v58 = vadd.f32 %v2039_v56, %v1991_v31  ;;  %2185 = vmatmul.bf16.gmra.mxu0 %v11294_v2  ;;  %v8419_v31 = vld [vmem:[#allocation7 + $0x2e0] sm:$0xf]  ;;  %v10036_v56 = vld [vmem:[#allocation7 + $0x300] sm:$0xf0] }
 0x18f   : > { %2234 = vmatmul.bf16.gmra.mxu1 %v11290_v0  ;;  %2461 = vmatpush.bf16.msrb.mxu2 %v8708_v52 }
 0x190   : > { %2283 = vmatmul.bf16.gmra.mxu2 %v11292_v1  ;;  %v3123_v33 = vpack.c.bf16 %v2040_v58, %v11404_v16  ;;  %2510 = vmatpush.bf16.msrb.mxu3 %v8136_v18  ;;  %v8672_v18 = vor.u32 %v10099_v3, %v8671_v55  ;;  %v8635_v55 = vld [vmem:[#allocation7 + $0x490] sm:$0xf]  ;;  %v10090_v3 = vld [vmem:[#allocation7 + $0x4b0] sm:$0xf0] }
 0x191   : > { %2332 = vmatmul.bf16.gmra.mxu3 %v11294_v2  ;;  %v10182_v47 = vld [vmem:[#allocation2 + $0xb0] sm:$0xf0]  ;;  %v10230_v29 = vld [vmem:[#allocation2 + $0xb4] sm:$0xf0] }
 0x192   : > { %3203 = vst [vmem:[#allocation2 + $0xd8] sm:$0xff] %v3123_v33  ;;  %v9020_v30 = vor.u32 %v10182_v47, %v9019_v15  ;;  %v9228_v38 = vor.u32 %v10230_v29, %v9227_v17  ;;  %v8420_v33 = vor.u32 %v10036_v56, %v8419_v31  ;;  %v8131_v15 = vld [vmem:[#allocation7 + $0xa0] sm:$0xf] }
 0x193   : > { %v2088_v48 = vpop.f32.mrf.mxu2  ;;  %v1992_v57 = vpop.f32.mrf.mxu0  ;;  %2462 = vmatpush.bf16.msrb.mxu2 %v8672_v18  ;;  %v8636_v18 = vor.u32 %v10090_v3, %v8635_v55  ;;  %v14044_v55 = vld [vmem:[#allocation22_spill] sm:$0xff]  ;;  %v14045_v3 = vld [vmem:[#allocation20_spill] sm:$0xff] }
 0x194   : > { %v2137_v8 = vpop.f32.mrf.mxu3  ;;  %v1993_v16 = vadd.f32 %v1992_v57, %v11410_v45  ;;  %v2041_v7 = vpop.f32.mrf.mxu1  ;;  %3904 = vrot.lane.b32.xlu1 %v9020_v30, %s11074_s21  ;;  %5029 = vrot.lane.b32.xlu2 %v9228_v38, %s11074_s21  ;;  %v9964_v45 = vld [vmem:[#allocation7 + $0xc0] sm:$0xf0] }
 0x195   : > { %v11506_v4 = vadd.f32 %v2137_v8, %v2088_v48  ;;  %v8132_v48 = vor.u32 %v9964_v45, %v8131_v15  ;;  %2412 = vmatpush.bf16.msrb.mxu1 %v8420_v33  ;;  %v8383_v15 = vld [vmem:[#allocation7 + $0x298] sm:$0xf]  ;;  %v10027_v45 = vld [vmem:[#allocation7 + $0x2b8] sm:$0xf0] }
 0x196   : > { %v2042_v27 = vadd.f32 %v2041_v7, %v1993_v16 }
 0x197   : > { %2363 = vmatpush.bf16.msrb.mxu0 %v8132_v48  ;;  %v8384_v48 = vor.u32 %v10027_v45, %v8383_v15  ;;  %2463 = vmatpush.bf16.msrb.mxu2 %v8636_v18 }
 0x198   : > { %v3128_v59 = vpack.c.bf16 %v2042_v27, %v11408_v44  ;;  %v9951_v27 = vld [vmem:[#allocation7 + $0x5c] sm:$0xf] }
 0x199   : > { %v9231_v38 = vld [vmem:[#allocation2 + $0xdc] sm:$0xf]  ;;  %v9023_v63 = vld [vmem:[#allocation2 + $0xd8] sm:$0xf]  ;;  %2413 = vmatpush.bf16.msrb.mxu1 %v8384_v48  ;;  %v8347_v48 = vld [vmem:[#allocation7 + $0x250] sm:$0xf] }
 0x19a   : > { %3208 = vst [vmem:[#allocation2 + $0xfc] sm:$0xff] %v3128_v59  ;;  %v8097_v59 = vld [vmem:[#allocation7 + $0x7c] sm:$0xf0] }
 0x19b   : > { %v2090_v28 = vpop.f32.mrf.mxu2  ;;  %v1995_v58 = vpop.f32.mrf.mxu0  ;;  %v8100_v56 = vor.u32 %v9951_v27, %v8097_v59  ;;  %v9942_v27 = vld [vmem:[#allocation7 + $0x14] sm:$0xf]  ;;  %v8061_v59 = vld [vmem:[#allocation7 + $0x34] sm:$0xf0] }
 0x19c   : > { %v2139_v35 = vpop.f32.mrf.mxu3  ;;  %v1996_v17 = vadd.f32 %v1995_v58, %v11418_v6  ;;  %v2044_v29 = vpop.f32.mrf.mxu1 }
 0x19d   : > { %v11512_v47 = vadd.f32 %v2139_v35, %v2090_v28  ;;  %2511 = vmatpush.bf16.msrb.mxu3 %v8100_v56  ;;  %v8064_v56 = vor.u32 %v9942_v27, %v8061_v59  ;;  %v14047_v27 = vld [vmem:[#allocation27_spill] sm:$0xff] }
 0x19e   : > { %v2045_v30 = vadd.f32 %v2044_v29, %v1996_v17  ;;  %2190 = vmatmul.bf16.gmra.mxu0 %v11310_v26 }
 0x19f   : > { %2239 = vmatmul.bf16.gmra.mxu1 %v11306_v24 }
 0x1a0   : > { %2288 = vmatmul.bf16.gmra.mxu2 %v11308_v25  ;;  %v3133_v44 = vpack.c.bf16 %v2045_v30, %v11416_v5  ;;  %v8095_v30 = vld [vmem:[#allocation7 + $0x58] sm:$0xf] }
 0x1a1   : > { %2337 = vmatmul.bf16.gmra.mxu3 %v11310_v26  ;;  %v10231_v61 = vld [vmem:[#allocation2 + $0xfc] sm:$0xf0]  ;;  %v10183_v8 = vld [vmem:[#allocation2 + $0xf8] sm:$0xf0] }
 0x1a2   : > { %3213 = vst [vmem:[#allocation2 + $0x120] sm:$0xff] %v3133_v44  ;;  %v9232_v57 = vor.u32 %v10231_v61, %v9231_v38  ;;  %v9024_v52 = vor.u32 %v10183_v8, %v9023_v63  ;;  %2512 = vmatpush.bf16.msrb.mxu3 %v8064_v56  ;;  %v8607_v56 = vld [vmem:[#allocation7 + $0x450] sm:$0xf] }
 0x1a3   : > { %v2093_v6 = vpop.f32.mrf.mxu2  ;;  %v1997_v7 = vpop.f32.mrf.mxu0 }
 0x1a4   : > { %v2142_v16 = vpop.f32.mrf.mxu3  ;;  %v1998_v5 = vadd.f32 %v1997_v7, %v11422_v37  ;;  %v2046_v31 = vpop.f32.mrf.mxu1  ;;  %5031 = vrot.lane.b32.xlu0 %v9232_v57, %s11074_s21  ;;  %3906 = vrot.lane.b32.xlu2 %v9024_v52, %s11074_s21  ;;  %v9955_v37 = vld [vmem:[#allocation7 + $0x78] sm:$0xf0] }
 0x1a5   : > { %v11520_v28 = vadd.f32 %v2142_v16, %v2093_v6  ;;  %v8096_v63 = vor.u32 %v9955_v37, %v8095_v30  ;;  %v10018_v30 = vld [vmem:[#allocation7 + $0x270] sm:$0xf0] }
 0x1a6   : > { %v2047_v35 = vadd.f32 %v2046_v31, %v1998_v5 }
 0x1a7   : > { %2364 = vmatpush.bf16.msrb.mxu0 %v8096_v63  ;;  %v9946_v63 = vld [vmem:[#allocation7 + $0x30] sm:$0xf0] }
 0x1a8   : > { %v3138_v58 = vpack.c.bf16 %v2047_v35, %v11420_v36 }
 0x1a9   : > { %v9027_v6 = vld [vmem:[#allocation2 + $0x120] sm:$0xf]  ;;  %v9235_v45 = vld [vmem:[#allocation2 + $0x124] sm:$0xf] }
 0x1aa   : > { %3218 = vst [vmem:[#allocation2 + $0x144] sm:$0xff] %v3138_v58 }
 0x1ab   : > { %v2095_v33 = vpop.f32.mrf.mxu2  ;;  %v2000_v29 = vpop.f32.mrf.mxu0 }
 0x1ac   : > { %v2144_v17 = vpop.f32.mrf.mxu3  ;;  %v2001_v38 = vadd.f32 %v2000_v29, %v11430_v10  ;;  %v2049_v61 = vpop.f32.mrf.mxu1 }
 0x1ad   : > { %v11526_v44 = vadd.f32 %v2144_v17, %v2095_v33  ;;  %v14042_v33 = vld [vmem:[#allocation26_spill] sm:$0xff] }
 0x1ae   : > { %v2050_v8 = vadd.f32 %v2049_v61, %v2001_v38  ;;  %2195 = vmatmul.bf16.gmra.mxu0 %v11326_v53  ;;  %v8348_v61 = vor.u32 %v10018_v30, %v8347_v48 }
 0x1af   : > { %2244 = vmatmul.bf16.gmra.mxu1 %v11322_v49 }
 0x1b0   : > { %2293 = vmatmul.bf16.gmra.mxu2 %v11324_v50  ;;  %v3143_v36 = vpack.c.bf16 %v2050_v8, %v11428_v9  ;;  %2414 = vmatpush.bf16.msrb.mxu1 %v8348_v61 }
 0x1b1   : > { %2342 = vmatmul.bf16.gmra.mxu3 %v11326_v53  ;;  %v10184_v57 = vld [vmem:[#allocation2 + $0x140] sm:$0xf0]  ;;  %v10232_v58 = vld [vmem:[#allocation2 + $0x144] sm:$0xf0] }
 0x1b2   : > { %3223 = vst [vmem:[#allocation2 + $0x168] sm:$0xff] %v3143_v36  ;;  %v9028_v10 = vor.u32 %v10184_v57, %v9027_v6  ;;  %v9236_v29 = vor.u32 %v10232_v58, %v9235_v45  ;;  %v14043_v36 = vld [vmem:[#allocation28_spill] sm:$0xff] }
 0x1b3   : > { %v2098_v52 = vpop.f32.mrf.mxu2  ;;  %v2002_v7 = vpop.f32.mrf.mxu0 }
 0x1b4   : > { %v2147_v16 = vpop.f32.mrf.mxu3  ;;  %v2003_v31 = vadd.f32 %v2002_v7, %v11434_v54  ;;  %v2051_v9 = vpop.f32.mrf.mxu1  ;;  %3908 = vrot.lane.b32.xlu0 %v9028_v10, %s11074_s21  ;;  %v8059_v54 = vld [vmem:[#allocation7 + $0x10] sm:$0xf] }
 0x1b5   : > { %v11534_v5 = vadd.f32 %v2147_v16, %v2098_v52  ;;  %v8060_v52 = vor.u32 %v9946_v63, %v8059_v54  ;;  %v14046_v16 = vld [vmem:[#allocation21_spill] sm:$0xff] }
 0x1b6   : > { %v2052_v35 = vadd.f32 %v2051_v9, %v2003_v31  ;;  %v8319_v31 = vld [vmem:[#allocation7 + $0x210] sm:$0xf]  ;;  %v10010_v9 = vld [vmem:[#allocation7 + $0x230] sm:$0xf0] }
 0x1b7   : > { %2365 = vmatpush.bf16.msrb.mxu0 %v8060_v52  ;;  %v8889_v52 = vld [vmem:[#allocation7 + $0x6ac] sm:$0xf0] }
 0x1b8   : > { %v3148_v15 = vpack.c.bf16 %v2052_v35, %v14042_v33  ;;  %v8320_v33 = vor.u32 %v10010_v9, %v8319_v31 }
 0x1b9   : > { %v9239_v7 = vld [vmem:[#allocation2 + $0x16c] sm:$0xf]  ;;  %v9031_v18 = vld [vmem:[#allocation2 + $0x168] sm:$0xf] }
 0x1ba   : > { %3228 = vst [vmem:[#allocation2 + $0x18c] sm:$0xff] %v3148_v15  ;;  %v10082_v15 = vld [vmem:[#allocation7 + $0x470] sm:$0xf0]  ;;  %2652 = vmatpush.bf16.msra.mxu2 %v8320_v33  ;;  %v14050_v33 = vld [vmem:[#allocation29_spill] sm:$0xff] }
 0x1bb   : > { %v2100_v17 = vpop.f32.mrf.mxu2  ;;  %v2005_v38 = vpop.f32.mrf.mxu0  ;;  %v8608_v48 = vor.u32 %v10082_v15, %v8607_v56 }
 0x1bc   : > { %v2149_v37 = vpop.f32.mrf.mxu3  ;;  %v2006_v6 = vadd.f32 %v2005_v38, %v14043_v36  ;;  %v2054_v57 = vpop.f32.mrf.mxu1  ;;  %5033 = vrot.lane.b32.xlu0 %v9236_v29, %s11074_s21 }
 0x1bd   : > { %v11539_v8 = vadd.f32 %v2149_v37, %v2100_v17  ;;  %2701 = vmatpush.bf16.msra.mxu3 %v8608_v48 }
 0x1be   : > { %v2055_v10 = vadd.f32 %v2054_v57, %v2006_v6  ;;  %2200 = vmatmul.bf16.gmra.mxu0 %v14044_v55  ;;  %v10149_v6 = vld [vmem:[#allocation7 + $0x68c] sm:$0xf] }
 0x1bf   : > { %2249 = vmatmul.bf16.gmra.mxu1 %v14045_v3 }
 0x1c0   : > { %2298 = vmatmul.bf16.gmra.mxu2 %v14046_v16  ;;  %v3153_v59 = vpack.c.bf16 %v2055_v10, %v14047_v27  ;;  %v10077_v10 = vld [vmem:[#allocation7 + $0x44c] sm:$0xf]  ;;  %v8892_v27 = vor.u32 %v10149_v6, %v8889_v52 }
 0x1c1   : > { %2347 = vmatmul.bf16.gmra.mxu3 %v14044_v55  ;;  %v10233_v35 = vld [vmem:[#allocation2 + $0x18c] sm:$0xf0]  ;;  %v10185_v58 = vld [vmem:[#allocation2 + $0x188] sm:$0xf0] }
 0x1c2   : > { %3233 = vst [vmem:[#allocation2 + $0x1b0] sm:$0xff] %v3153_v59  ;;  %v9240_v17 = vor.u32 %v10233_v35, %v9239_v7  ;;  %v9032_v29 = vor.u32 %v10185_v58, %v9031_v18  ;;  %v8601_v59 = vld [vmem:[#allocation7 + $0x46c] sm:$0xf0]  ;;  %2603 = vmatpush.bf16.msra.mxu1 %v8892_v27  ;;  %v14049_v58 = vld [vmem:[#allocation24_spill] sm:$0xff] }
 0x1c3   : > { %v2103_v45 = vpop.f32.mrf.mxu2  ;;  %v2007_v37 = vpop.f32.mrf.mxu0  ;;  %v8604_v56 = vor.u32 %v10077_v10, %v8601_v59 }
 0x1c4   : > { %v2152_v30 = vpop.f32.mrf.mxu3  ;;  %v2008_v61 = vadd.f32 %v2007_v37, %v11446_v13  ;;  %v2056_v54 = vpop.f32.mrf.mxu1  ;;  %5035 = vrot.lane.b32.xlu1 %v9240_v17, %s11074_s21  ;;  %3910 = vrot.lane.b32.xlu0 %v9032_v29, %s11074_s21  ;;  %v8283_v29 = vld [vmem:[#allocation7 + $0x1c8] sm:$0xf] }
 0x1c5   : > { %v11548_v38 = vadd.f32 %v2152_v30, %v2103_v45  ;;  %2554 = vmatpush.bf16.msra.mxu0 %v8604_v56  ;;  %v10001_v30 = vld [vmem:[#allocation7 + $0x1e8] sm:$0xf0]  ;;  %v8571_v37 = vld [vmem:[#allocation7 + $0x408] sm:$0xf] }
 0x1c6   : > { %v2057_v63 = vadd.f32 %v2056_v54, %v2008_v61 }
 0x1c8   : > { %v3158_v36 = vpack.c.bf16 %v2057_v63, %v11444_v11  ;;  %v14048_v11 = vld [vmem:[#allocation23_spill] sm:$0xff]  ;;  %v8284_v63 = vor.u32 %v10001_v30, %v8283_v29 }
 0x1c9   : > { %v9035_v45 = vld [vmem:[#allocation2 + $0x1b0] sm:$0xf]  ;;  %v9243_v59 = vld [vmem:[#allocation2 + $0x1b4] sm:$0xf] }
 0x1ca   : > { %3238 = vst [vmem:[#allocation2 + $0x1d4] sm:$0xff] %v3158_v36  ;;  %v10073_v36 = vld [vmem:[#allocation7 + $0x428] sm:$0xf0]  ;;  %2653 = vmatpush.bf16.msra.mxu2 %v8284_v63 }
 0x1cb   : > { %v2105_v57 = vpop.f32.mrf.mxu2  ;;  %v2010_v18 = vpop.f32.mrf.mxu0  ;;  %v8572_v10 = vor.u32 %v10073_v36, %v8571_v37  ;;  %v9992_v36 = vld [vmem:[#allocation7 + $0x1a0] sm:$0xf0] }
 0x1cc   : > { %v2154_v7 = vpop.f32.mrf.mxu3  ;;  %v2011_v13 = vadd.f32 %v2010_v18, %v11454_v34  ;;  %v2059_v9 = vpop.f32.mrf.mxu1 }
 0x1cd   : > { %v11554_v31 = vadd.f32 %v2154_v7, %v2105_v57  ;;  %2702 = vmatpush.bf16.msra.mxu3 %v8572_v10 }
 0x1ce   : > { %v2060_v35 = vadd.f32 %v2059_v9, %v2011_v13  ;;  %2205 = vmatmul.bf16.gmra.mxu0 %v11358_v43  ;;  %v10140_v13 = vld [vmem:[#allocation7 + $0x644] sm:$0xf] }
 0x1cf   : > { %2254 = vmatmul.bf16.gmra.mxu1 %v14048_v11 }
 0x1d0   : > { %2303 = vmatmul.bf16.gmra.mxu2 %v14049_v58  ;;  %v3163_v15 = vpack.c.bf16 %v2060_v35, %v14050_v33  ;;  %v8853_v35 = vld [vmem:[#allocation7 + $0x664] sm:$0xf0]  ;;  %v10068_v33 = vld [vmem:[#allocation7 + $0x404] sm:$0xf] }
 0x1d1   : > { %2352 = vmatmul.bf16.gmra.mxu3 %v11358_v43  ;;  %v10186_v17 = vld [vmem:[#allocation2 + $0x1d0] sm:$0xf0]  ;;  %v10234_v18 = vld [vmem:[#allocation2 + $0x1d4] sm:$0xf0] }
 0x1d2   : > { %3243 = vst [vmem:[#allocation2 + $0x1f8] sm:$0xff] %v3163_v15  ;;  %v9036_v48 = vor.u32 %v10186_v17, %v9035_v45  ;;  %v9244_v56 = vor.u32 %v10234_v18, %v9243_v59  ;;  %v8565_v17 = vld [vmem:[#allocation7 + $0x424] sm:$0xf0] }
 0x1d3   : > { %v2108_v34 = vpop.f32.mrf.mxu2  ;;  %v2012_v54 = vpop.f32.mrf.mxu0 }
 0x1d4   : > { %v2157_v61 = vpop.f32.mrf.mxu3  ;;  %v2013_v57 = vadd.f32 %v2012_v54, %v11458_v39  ;;  %v2061_v52 = vpop.f32.mrf.mxu1  ;;  %3912 = vrot.lane.b32.xlu0 %v9036_v48, %s11074_s21  ;;  %v8856_v39 = vor.u32 %v10140_v13, %v8853_v35  ;;  %v8568_v48 = vor.u32 %v10068_v33, %v8565_v17  ;;  %v8817_v17 = vld [vmem:[#allocation7 + $0x61c] sm:$0xf0] }
 0x1d5   : > { %v11562_v6 = vadd.f32 %v2157_v61, %v2108_v34  ;;  %v8247_v61 = vld [vmem:[#allocation7 + $0x180] sm:$0xf] }
 0x1d6   : > { %v2062_v7 = vadd.f32 %v2061_v52, %v2013_v57  ;;  %2604 = vmatpush.bf16.msra.mxu1 %v8856_v39  ;;  %2555 = vmatpush.bf16.msra.mxu0 %v8568_v48  ;;  %v8535_v57 = vld [vmem:[#allocation7 + $0x3c0] sm:$0xf]  ;;  %v10064_v52 = vld [vmem:[#allocation7 + $0x3e0] sm:$0xf0]  ;;  %v10131_v39 = vld [vmem:[#allocation7 + $0x5fc] sm:$0xf] }
 0x1d7   : > { %v8536_v59 = vor.u32 %v10064_v52, %v8535_v57 }
 0x1d8   : > { %v3168_v27 = vpack.c.bf16 %v2062_v7, %v11456_v62  ;;  %v14051_v62 = vld [vmem:[#allocation19_spill] sm:$0xff] }
 0x1d9   : > { %v9039_v30 = vld [vmem:[#allocation2 + $0x1f8] sm:$0xf]  ;;  %2703 = vmatpush.bf16.msra.mxu3 %v8536_v59 }
 0x1da   : > { %3248 = vst [vmem:[#allocation2 + $0x21c] sm:$0xff] %v3168_v27  ;;  %v8248_v27 = vor.u32 %v9992_v36, %v8247_v61  ;;  %v8529_v61 = vld [vmem:[#allocation7 + $0x3dc] sm:$0xf0] }
 0x1db   : > { %v2110_v9 = vpop.f32.mrf.mxu2  ;;  %v2171_v45 = vpop.f32.mrf.mxu0 }
 0x1dc   : > { %v2159_v15 = vpop.f32.mrf.mxu3  ;;  %v2220_v34 = vpop.f32.mrf.mxu1  ;;  %5037 = vrot.lane.b32.xlu0 %v9244_v56, %s11074_s21  ;;  %2654 = vmatpush.bf16.msra.mxu2 %v8248_v27  ;;  %v9983_v27 = vld [vmem:[#allocation7 + $0x158] sm:$0xf0] }
 0x1dd   : > { %v11567_v29 = vadd.f32 %v2159_v15, %v2110_v9  ;;  %v2172_v9 = vadd.f32 %v2171_v45, %v11466_v60  ;;  %v9247_v15 = vld [vmem:[#allocation2 + $0x1fc] sm:$0xf] }
 0x1de   : > { %2366 = vmatmul.bf16.vlgmr.msrb.gmra.mxu0 %v11242_v46 }
 0x1df   : > { %2415 = vmatmul.bf16.vlgmr.msrb.gmra.mxu1 %v11244_v51 }
 0x1e0   : > { %2464 = vmatmul.bf16.vlgmr.msrb.gmra.mxu2 %v14051_v62 }
 0x1e1   : > { %2513 = vmatmul.bf16.vlgmr.msrb.gmra.mxu3 %v11242_v46  ;;  %v10187_v37 = vld [vmem:[#allocation2 + $0x218] sm:$0xf0]  ;;  %v10235_v33 = vld [vmem:[#allocation2 + $0x21c] sm:$0xf0] }
 0x1e2   : > { %v9040_v63 = vor.u32 %v10187_v37, %v9039_v30  ;;  %v8820_v30 = vor.u32 %v10131_v39, %v8817_v17  ;;  %v10059_v37 = vld [vmem:[#allocation7 + $0x3bc] sm:$0xf] }
 0x1e3   : > { %v2269_v54 = vpop.f32.mrf.mxu2  ;;  %v2173_v18 = vpop.f32.mrf.mxu0 }
 0x1e4   : > { %v2270_v10 = vadd.f32 %v2269_v54, %v2220_v34  ;;  %v2318_v7 = vpop.f32.mrf.mxu3  ;;  %v2222_v13 = vpop.f32.mrf.mxu1  ;;  %3914 = vrot.lane.b32.xlu1 %v9040_v63, %s11074_s21  ;;  %v9248_v34 = vor.u32 %v10235_v33, %v9247_v15  ;;  %v8532_v63 = vor.u32 %v10059_v37, %v8529_v61  ;;  %2605 = vmatpush.bf16.msra.mxu1 %v8820_v30 }
 0x1e5   : > { %v2174_v60 = vadd.f32 %v2173_v18, %v11470_v22 }
 0x1e6   : > { %v2319_v56 = vadd.f32 %v2318_v7, %v2270_v10  ;;  %2556 = vmatpush.bf16.msra.mxu0 %v8532_v63  ;;  %v8211_v7 = vld [vmem:[#allocation7 + $0x138] sm:$0xf]  ;;  %v10122_v63 = vld [vmem:[#allocation7 + $0x5b4] sm:$0xf] }
 0x1e8   : > { %v3094_v35 = vpack.c.bf16 %v2319_v56, %v2172_v9  ;;  %v8499_v9 = vld [vmem:[#allocation7 + $0x378] sm:$0xf]  ;;  %v10055_v56 = vld [vmem:[#allocation7 + $0x398] sm:$0xf0] }
 0x1e9   : > { %v8500_v33 = vor.u32 %v10055_v56, %v8499_v9 }
 0x1ea   : > { %3174 = vst [vmem:[#allocation2 + $0x8] sm:$0xff] %v3094_v35 }
 0x1eb   : > { %v2271_v48 = vpop.f32.mrf.mxu2  ;;  %v2176_v57 = vpop.f32.mrf.mxu0  ;;  %2704 = vmatpush.bf16.msra.mxu3 %v8500_v33  ;;  %v9974_v33 = vld [vmem:[#allocation7 + $0x110] sm:$0xf0] }
 0x1ec   : > { %v2272_v54 = vadd.f32 %v2271_v48, %v2222_v13  ;;  %v2320_v36 = vpop.f32.mrf.mxu3  ;;  %v2225_v52 = vpop.f32.mrf.mxu1  ;;  %5039 = vrot.lane.b32.xlu1 %v9248_v34, %s11074_s21  ;;  %v8212_v13 = vor.u32 %v9983_v27, %v8211_v7  ;;  %v2177_v39 = vadd.f32 %v2176_v57, %v11478_v23  ;;  %v8493_v7 = vld [vmem:[#allocation7 + $0x394] sm:$0xf0] }
 0x1ee   : > { %v2321_v45 = vadd.f32 %v2320_v36, %v2272_v54  ;;  %2371 = vmatmul.bf16.gmra.mxu0 %v11258_v19  ;;  %2655 = vmatpush.bf16.msra.mxu2 %v8212_v13 }
 0x1ef   : > { %2420 = vmatmul.bf16.gmra.mxu1 %v11260_v20 }
 0x1f0   : > { %v3099_v10 = vpack.c.bf16 %v2321_v45, %v2174_v60  ;;  %2469 = vmatmul.bf16.gmra.mxu2 %v11262_v21  ;;  %v8781_v60 = vld [vmem:[#allocation7 + $0x5d4] sm:$0xf0] }
 0x1f1   : > { %2518 = vmatmul.bf16.gmra.mxu3 %v11258_v19  ;;  %v9043_v34 = vld [vmem:[#allocation2 + $0xc] sm:$0xf]  ;;  %v9427_v37 = vld [vmem:[#allocation2 + $0x8] sm:$0xf]  ;;  %v8784_v45 = vor.u32 %v10122_v63, %v8781_v60 }
 0x1f2   : > { %3179 = vst [vmem:[#allocation2 + $0x2c] sm:$0xff] %v3099_v10  ;;  %v10050_v10 = vld [vmem:[#allocation7 + $0x374] sm:$0xf] }
 0x1f3   : > { %v2274_v59 = vpop.f32.mrf.mxu2  ;;  %v2178_v18 = vpop.f32.mrf.mxu0  ;;  %v8496_v57 = vor.u32 %v10050_v10, %v8493_v7  ;;  %2606 = vmatpush.bf16.msra.mxu1 %v8784_v45 }
 0x1f4   : > { %v2275_v35 = vadd.f32 %v2274_v59, %v2225_v52  ;;  %v2323_v22 = vpop.f32.mrf.mxu3  ;;  %v2227_v15 = vpop.f32.mrf.mxu1  ;;  %v2179_v9 = vadd.f32 %v2178_v18, %v11484_v14 }
 0x1f5   : > { %2557 = vmatpush.bf16.msra.mxu0 %v8496_v57 }
 0x1f6   : > { %v2324_v17 = vadd.f32 %v2323_v22, %v2275_v35  ;;  %v8175_v22 = vld [vmem:[#allocation7 + $0xf0] sm:$0xf] }
 0x1f8   : > { %v3104_v48 = vpack.c.bf16 %v2324_v17, %v2177_v39  ;;  %v8176_v39 = vor.u32 %v9974_v33, %v8175_v22  ;;  %v8463_v17 = vld [vmem:[#allocation7 + $0x330] sm:$0xf] }
 0x1f9   : > { %v10188_v30 = vld [vmem:[#allocation2 + $0x2c] sm:$0xf0]  ;;  %v10276_v61 = vld [vmem:[#allocation2 + $0x28] sm:$0xf0] }
 0x1fa   : > { %3184 = vst [vmem:[#allocation2 + $0x50] sm:$0xff] %v3104_v48  ;;  %v9044_v54 = vor.u32 %v10188_v30, %v9043_v34  ;;  %v9428_v36 = vor.u32 %v10276_v61, %v9427_v37  ;;  %v10046_v48 = vld [vmem:[#allocation7 + $0x350] sm:$0xf0]  ;;  %2656 = vmatpush.bf16.msra.mxu2 %v8176_v39 }
 0x1fb   : > { %v2276_v52 = vpop.f32.mrf.mxu2  ;;  %v2181_v23 = vpop.f32.mrf.mxu0  ;;  %v8464_v30 = vor.u32 %v10046_v48, %v8463_v17  ;;  %v8139_v48 = vld [vmem:[#allocation7 + $0xa8] sm:$0xf] }
 0x1fc   : > { %v2277_v27 = vadd.f32 %v2276_v52, %v2227_v15  ;;  %v2325_v59 = vpop.f32.mrf.mxu3  ;;  %3956 = vrot.lane.b32.xlu1 %v9044_v54, %s11074_s21  ;;  %6149 = vrot.lane.b32.xlu2 %v9428_v36, %s11074_s21  ;;  %v2230_v13 = vpop.f32.mrf.mxu1  ;;  %v2182_v61 = vadd.f32 %v2181_v23, %v11492_v32 }
 0x1fd   : > { %2705 = vmatpush.bf16.msra.mxu3 %v8464_v30 }
 0x1fe   : > { %v2326_v56 = vadd.f32 %v2325_v59, %v2277_v27  ;;  %2376 = vmatmul.bf16.gmra.mxu0 %v11274_v40  ;;  %v10113_v27 = vld [vmem:[#allocation7 + $0x56c] sm:$0xf]  ;;  %v8745_v59 = vld [vmem:[#allocation7 + $0x58c] sm:$0xf0] }
 0x1ff   : > { %2425 = vmatmul.bf16.gmra.mxu1 %v11276_v41 }
 0x200   : > { %v3109_v35 = vpack.c.bf16 %v2326_v56, %v2179_v9  ;;  %2474 = vmatmul.bf16.gmra.mxu2 %v11278_v42  ;;  %v10041_v9 = vld [vmem:[#allocation7 + $0x32c] sm:$0xf]  ;;  %v8457_v56 = vld [vmem:[#allocation7 + $0x34c] sm:$0xf0] }
 0x201   : > { %2523 = vmatmul.bf16.gmra.mxu3 %v11274_v40  ;;  %v9431_v63 = vld [vmem:[#allocation2 + $0x50] sm:$0xf]  ;;  %v9047_v52 = vld [vmem:[#allocation2 + $0x54] sm:$0xf]  ;;  %v8460_v23 = vor.u32 %v10041_v9, %v8457_v56  ;;  %v10032_v56 = vld [vmem:[#allocation7 + $0x2e4] sm:$0xf] }
 0x202   : > { %3189 = vst [vmem:[#allocation2 + $0x74] sm:$0xff] %v3109_v35 }
 0x203   : > { %v2279_v15 = vpop.f32.mrf.mxu2  ;;  %v2183_v18 = vpop.f32.mrf.mxu0  ;;  %2558 = vmatpush.bf16.msra.mxu0 %v8460_v23 }
 0x204   : > { %v2280_v34 = vadd.f32 %v2279_v15, %v2230_v13  ;;  %v2328_v14 = vpop.f32.mrf.mxu3  ;;  %v2232_v37 = vpop.f32.mrf.mxu1  ;;  %v8748_v13 = vor.u32 %v10113_v27, %v8745_v59  ;;  %v2184_v15 = vadd.f32 %v2183_v18, %v11497_v12  ;;  %v10104_v59 = vld [vmem:[#allocation7 + $0x524] sm:$0xf] }
 0x206   : > { %v2329_v54 = vadd.f32 %v2328_v14, %v2280_v34  ;;  %2607 = vmatpush.bf16.msra.mxu1 %v8748_v13  ;;  %v9965_v34 = vld [vmem:[#allocation7 + $0xc8] sm:$0xf0] }
 0x207   : > { %v8140_v30 = vor.u32 %v9965_v34, %v8139_v48 }
 0x208   : > { %v3114_v36 = vpack.c.bf16 %v2329_v54, %v2182_v61  ;;  %v10037_v61 = vld [vmem:[#allocation7 + $0x308] sm:$0xf0] }
 0x209   : > { %v10277_v60 = vld [vmem:[#allocation2 + $0x70] sm:$0xf0]  ;;  %v10189_v45 = vld [vmem:[#allocation2 + $0x74] sm:$0xf0]  ;;  %2657 = vmatpush.bf16.msra.mxu2 %v8140_v30  ;;  %v8103_v30 = vld [vmem:[#allocation7 + $0x60] sm:$0xf] }
 0x20a   : > { %3194 = vst [vmem:[#allocation2 + $0x98] sm:$0xff] %v3114_v36  ;;  %v9432_v10 = vor.u32 %v10277_v60, %v9431_v63  ;;  %v9048_v7 = vor.u32 %v10189_v45, %v9047_v52 }
 0x20b   : > { %v2281_v57 = vpop.f32.mrf.mxu2  ;;  %v2186_v32 = vpop.f32.mrf.mxu0 }
 0x20c   : > { %v2282_v35 = vadd.f32 %v2281_v57, %v2232_v37  ;;  %v2330_v22 = vpop.f32.mrf.mxu3  ;;  %6151 = vrot.lane.b32.xlu1 %v9432_v10, %s11074_s21  ;;  %3958 = vrot.lane.b32.xlu0 %v9048_v7, %s11074_s21  ;;  %v2235_v33 = vpop.f32.mrf.mxu1  ;;  %v8427_v37 = vld [vmem:[#allocation7 + $0x2e8] sm:$0xf]  ;;  %v2187_v60 = vadd.f32 %v2186_v32, %v11506_v4 }
 0x20d   : > { %v8428_v36 = vor.u32 %v10037_v61, %v8427_v37  ;;  %v8709_v57 = vld [vmem:[#allocation7 + $0x544] sm:$0xf0]  ;;  %v9956_v37 = vld [vmem:[#allocation7 + $0x80] sm:$0xf0] }
 0x20e   : > { %v2331_v39 = vadd.f32 %v2330_v22, %v2282_v35  ;;  %2381 = vmatmul.bf16.gmra.mxu0 %v11290_v0  ;;  %v8712_v9 = vor.u32 %v10104_v59, %v8709_v57  ;;  %v8421_v35 = vld [vmem:[#allocation7 + $0x304] sm:$0xf0] }
 0x20f   : > { %2430 = vmatmul.bf16.gmra.mxu1 %v11292_v1  ;;  %2706 = vmatpush.bf16.msra.mxu3 %v8428_v36 }
 0x210   : > { %v3119_v17 = vpack.c.bf16 %v2331_v39, %v2184_v15  ;;  %2479 = vmatmul.bf16.gmra.mxu2 %v11294_v2  ;;  %v8424_v15 = vor.u32 %v10032_v56, %v8421_v35  ;;  %2608 = vmatpush.bf16.msra.mxu1 %v8712_v9  ;;  %v8673_v9 = vld [vmem:[#allocation7 + $0x4fc] sm:$0xf0] }
 0x211   : > { %2528 = vmatmul.bf16.gmra.mxu3 %v11290_v0  ;;  %v9051_v10 = vld [vmem:[#allocation2 + $0x9c] sm:$0xf]  ;;  %v9435_v34 = vld [vmem:[#allocation2 + $0x98] sm:$0xf] }
 0x212   : > { %3199 = vst [vmem:[#allocation2 + $0xbc] sm:$0xff] %v3119_v17  ;;  %2559 = vmatpush.bf16.msra.mxu0 %v8424_v15 }
 0x213   : > { %v2284_v14 = vpop.f32.mrf.mxu2  ;;  %v2188_v18 = vpop.f32.mrf.mxu0 }
 0x214   : > { %v2285_v54 = vadd.f32 %v2284_v14, %v2235_v33  ;;  %v2333_v12 = vpop.f32.mrf.mxu3  ;;  %v2237_v63 = vpop.f32.mrf.mxu1  ;;  %v2189_v32 = vadd.f32 %v2188_v18, %v11512_v47  ;;  %v8391_v47 = vld [vmem:[#allocation7 + $0x2a0] sm:$0xf] }
 0x216   : > { %v2334_v52 = vadd.f32 %v2333_v12, %v2285_v54  ;;  %v8104_v54 = vor.u32 %v9956_v37, %v8103_v30  ;;  %v10028_v12 = vld [vmem:[#allocation7 + $0x2c0] sm:$0xf0]  ;;  %v10150_v30 = vld [vmem:[#allocation7 + $0x694] sm:$0xf]  ;;  %v8897_v37 = vld [vmem:[#allocation7 + $0x6b4] sm:$0xf0] }
 0x218   : > { %v3124_v45 = vpack.c.bf16 %v2334_v52, %v2187_v60  ;;  %v8392_v60 = vor.u32 %v10028_v12, %v8391_v47  ;;  %2658 = vmatpush.bf16.msra.mxu2 %v8104_v54  ;;  %v8900_v54 = vor.u32 %v10150_v30, %v8897_v37  ;;  %v10123_v30 = vld [vmem:[#allocation7 + $0x5bc] sm:$0xf] }
 0x219   : > { %v10190_v7 = vld [vmem:[#allocation2 + $0xbc] sm:$0xf0]  ;;  %v10278_v17 = vld [vmem:[#allocation2 + $0xb8] sm:$0xf0] }
 0x21a   : > { %3204 = vst [vmem:[#allocation2 + $0xe0] sm:$0xff] %v3124_v45  ;;  %v9052_v27 = vor.u32 %v10190_v7, %v9051_v10  ;;  %v9436_v14 = vor.u32 %v10278_v17, %v9435_v34  ;;  %2707 = vmatpush.bf16.msra.mxu3 %v8392_v60  ;;  %v10019_v17 = vld [vmem:[#allocation7 + $0x278] sm:$0xf0] }
 0x21b   : > { %v2286_v13 = vpop.f32.mrf.mxu2  ;;  %v2191_v33 = vpop.f32.mrf.mxu0 }
 0x21c   : > { %v2287_v22 = vadd.f32 %v2286_v13, %v2237_v63  ;;  %v2335_v23 = vpop.f32.mrf.mxu3  ;;  %3960 = vrot.lane.b32.xlu2 %v9052_v27, %s11074_s21  ;;  %v2240_v4 = vpop.f32.mrf.mxu1  ;;  %v2192_v45 = vadd.f32 %v2191_v33, %v11520_v28  ;;  %v10095_v13 = vld [vmem:[#allocation7 + $0x4dc] sm:$0xf]  ;;  %v8355_v33 = vld [vmem:[#allocation7 + $0x258] sm:$0xf] }
 0x21d   : > { %v8676_v35 = vor.u32 %v10095_v13, %v8673_v9 }
 0x21e   : > { %v2336_v39 = vadd.f32 %v2335_v23, %v2287_v22  ;;  %2386 = vmatmul.bf16.gmra.mxu0 %v11306_v24  ;;  %v10023_v22 = vld [vmem:[#allocation7 + $0x29c] sm:$0xf]  ;;  %v8385_v23 = vld [vmem:[#allocation7 + $0x2bc] sm:$0xf0] }
 0x21f   : > { %2435 = vmatmul.bf16.gmra.mxu1 %v11308_v25 }
 0x220   : > { %v3129_v48 = vpack.c.bf16 %v2336_v39, %v2189_v32  ;;  %2484 = vmatmul.bf16.gmra.mxu2 %v11310_v26  ;;  %v8388_v39 = vor.u32 %v10023_v22, %v8385_v23  ;;  %2609 = vmatpush.bf16.msra.mxu1 %v8676_v35  ;;  %v8825_v35 = vld [vmem:[#allocation7 + $0x624] sm:$0xf0] }
 0x221   : > { %2533 = vmatmul.bf16.gmra.mxu3 %v11306_v24  ;;  %v9055_v27 = vld [vmem:[#allocation2 + $0xe4] sm:$0xf]  ;;  %v9439_v12 = vld [vmem:[#allocation2 + $0xe0] sm:$0xf] }
 0x222   : > { %3209 = vst [vmem:[#allocation2 + $0x104] sm:$0xff] %v3129_v48  ;;  %2560 = vmatpush.bf16.msra.mxu0 %v8388_v39 }
 0x223   : > { %v2289_v61 = vpop.f32.mrf.mxu2  ;;  %v2193_v63 = vpop.f32.mrf.mxu0 }
 0x224   : > { %v2290_v18 = vadd.f32 %v2289_v61, %v2240_v4  ;;  %v2338_v36 = vpop.f32.mrf.mxu3  ;;  %6153 = vrot.lane.b32.xlu2 %v9436_v14, %s11074_s21  ;;  %v2242_v52 = vpop.f32.mrf.mxu1  ;;  %v2194_v48 = vadd.f32 %v2193_v63, %v11526_v44  ;;  %v8356_v14 = vor.u32 %v10019_v17, %v8355_v33  ;;  %v8067_v44 = vld [vmem:[#allocation7 + $0x18] sm:$0xf] }
 0x225   : > { %v8637_v33 = vld [vmem:[#allocation7 + $0x4b4] sm:$0xf0] }
 0x226   : > { %v2339_v10 = vadd.f32 %v2338_v36, %v2290_v18  ;;  %2708 = vmatpush.bf16.msra.mxu3 %v8356_v14  ;;  %v9947_v36 = vld [vmem:[#allocation7 + $0x38] sm:$0xf0]  ;;  %v8349_v14 = vld [vmem:[#allocation7 + $0x274] sm:$0xf0] }
 0x227   : > { %v8068_v60 = vor.u32 %v9947_v36, %v8067_v44  ;;  %v10114_v36 = vld [vmem:[#allocation7 + $0x574] sm:$0xf] }
 0x228   : > { %v3134_v7 = vpack.c.bf16 %v2339_v10, %v2192_v45  ;;  %v8861_v45 = vld [vmem:[#allocation7 + $0x66c] sm:$0xf0] }
 0x229   : > { %v10191_v59 = vld [vmem:[#allocation2 + $0x104] sm:$0xf0]  ;;  %v10279_v61 = vld [vmem:[#allocation2 + $0x100] sm:$0xf0]  ;;  %2659 = vmatpush.bf16.msra.mxu2 %v8068_v60 }
 0x22a   : > { %3214 = vst [vmem:[#allocation2 + $0x128] sm:$0xff] %v3134_v7  ;;  %v9056_v57 = vor.u32 %v10191_v59, %v9055_v27  ;;  %v9440_v18 = vor.u32 %v10279_v61, %v9439_v12  ;;  %2897 = vmatpush.bf16.msrb.mxu3 %v8900_v54  ;;  %v8789_v54 = vld [vmem:[#allocation7 + $0x5dc] sm:$0xf0] }
 0x22b   : > { %v2291_v56 = vpop.f32.mrf.mxu2  ;;  %v2196_v32 = vpop.f32.mrf.mxu0  ;;  %v8792_v12 = vor.u32 %v10123_v30, %v8789_v54  ;;  %v8681_v30 = vld [vmem:[#allocation7 + $0x504] sm:$0xf0] }
 0x22c   : > { %v2292_v15 = vadd.f32 %v2291_v56, %v2242_v52  ;;  %v2340_v4 = vpop.f32.mrf.mxu3  ;;  %3962 = vrot.lane.b32.xlu2 %v9056_v57, %s11074_s21  ;;  %v2245_v28 = vpop.f32.mrf.mxu1  ;;  %v10141_v52 = vld [vmem:[#allocation7 + $0x64c] sm:$0xf]  ;;  %v2197_v13 = vadd.f32 %v2196_v32, %v11534_v5  ;;  %v10132_v56 = vld [vmem:[#allocation7 + $0x604] sm:$0xf] }
 0x22d   : > { %v8864_v59 = vor.u32 %v10141_v52, %v8861_v45  ;;  %v8828_v22 = vor.u32 %v10132_v56, %v8825_v35 }
 0x22e   : > { %v2341_v34 = vadd.f32 %v2340_v4, %v2292_v15  ;;  %2391 = vmatmul.bf16.gmra.mxu0 %v11322_v49 }
 0x22f   : > { %2440 = vmatmul.bf16.gmra.mxu1 %v11324_v50  ;;  %2898 = vmatpush.bf16.msrb.mxu3 %v8864_v59 }
 0x230   : > { %v3139_v47 = vpack.c.bf16 %v2341_v34, %v2194_v48  ;;  %2489 = vmatmul.bf16.gmra.mxu2 %v11326_v53  ;;  %v10014_v34 = vld [vmem:[#allocation7 + $0x254] sm:$0xf] }
 0x231   : > { %2538 = vmatmul.bf16.gmra.mxu3 %v11322_v49  ;;  %v9059_v15 = vld [vmem:[#allocation2 + $0x12c] sm:$0xf]  ;;  %v8352_v61 = vor.u32 %v10014_v34, %v8349_v14  ;;  %v10154_v34 = vld [vmem:[#allocation7 + $0x6b0] sm:$0xf0]  ;;  %v10096_v14 = vld [vmem:[#allocation7 + $0x4e4] sm:$0xf] }
 0x232   : > { %3219 = vst [vmem:[#allocation2 + $0x14c] sm:$0xff] %v3139_v47  ;;  %v8684_v54 = vor.u32 %v10096_v14, %v8681_v30 }
 0x233   : > { %v2294_v63 = vpop.f32.mrf.mxu2  ;;  %v2198_v27 = vpop.f32.mrf.mxu0  ;;  %2899 = vmatpush.bf16.msrb.mxu3 %v8828_v22  ;;  %2561 = vmatpush.bf16.msra.mxu0 %v8352_v61 }
 0x234   : > { %v2295_v10 = vadd.f32 %v2294_v63, %v2245_v28  ;;  %v2343_v7 = vpop.f32.mrf.mxu3  ;;  %6155 = vrot.lane.b32.xlu2 %v9440_v18, %s11074_s21  ;;  %v2247_v57 = vpop.f32.mrf.mxu1  ;;  %v10086_v28 = vld [vmem:[#allocation7 + $0x494] sm:$0xf]  ;;  %v2199_v18 = vadd.f32 %v2198_v27, %v11539_v8  ;;  %v8753_v63 = vld [vmem:[#allocation7 + $0x594] sm:$0xf0] }
 0x235   : > { %v8640_v48 = vor.u32 %v10086_v28, %v8637_v33  ;;  %v8756_v52 = vor.u32 %v10114_v36, %v8753_v63  ;;  %v10078_v8 = vld [vmem:[#allocation7 + $0x454] sm:$0xf]  ;;  %v8609_v27 = vld [vmem:[#allocation7 + $0x474] sm:$0xf0]  ;;  %v8645_v36 = vld [vmem:[#allocation7 + $0x4bc] sm:$0xf0] }
 0x236   : > { %v2344_v9 = vadd.f32 %v2343_v7, %v2295_v10  ;;  %v9443_v10 = vld [vmem:[#allocation2 + $0x128] sm:$0xf]  ;;  %v10006_v28 = vld [vmem:[#allocation7 + $0x214] sm:$0xf]  ;;  %v8321_v33 = vld [vmem:[#allocation7 + $0x234] sm:$0xf0] }
 0x237   : > { %2610 = vmatpush.bf16.msra.mxu1 %v8640_v48  ;;  %2900 = vmatpush.bf16.msrb.mxu3 %v8792_v12  ;;  %v8324_v48 = vor.u32 %v10006_v28, %v8321_v33  ;;  %v8285_v28 = vld [vmem:[#allocation7 + $0x1ec] sm:$0xf0]  ;;  %v8859_v33 = vld [vmem:[#allocation7 + $0x648] sm:$0xf] }
 0x238   : > { %v3144_v23 = vpack.c.bf16 %v2344_v9, %v2197_v13  ;;  %v10105_v13 = vld [vmem:[#allocation7 + $0x52c] sm:$0xf]  ;;  %v8717_v9 = vld [vmem:[#allocation7 + $0x54c] sm:$0xf0] }
 0x239   : > { %v10192_v4 = vld [vmem:[#allocation2 + $0x14c] sm:$0xf0]  ;;  %v10280_v60 = vld [vmem:[#allocation2 + $0x148] sm:$0xf0] }
 0x23a   : > { %3224 = vst [vmem:[#allocation2 + $0x170] sm:$0xff] %v3144_v23  ;;  %v9060_v39 = vor.u32 %v10192_v4, %v9059_v15  ;;  %v9444_v7 = vor.u32 %v10280_v60, %v9443_v10  ;;  %v8720_v23 = vor.u32 %v10105_v13, %v8717_v9  ;;  %v8573_v13 = vld [vmem:[#allocation7 + $0x42c] sm:$0xf0] }
 0x23b   : > { %v2296_v17 = vpop.f32.mrf.mxu2  ;;  %v2201_v32 = vpop.f32.mrf.mxu0  ;;  %2901 = vmatpush.bf16.msrb.mxu3 %v8756_v52  ;;  %2799 = vmatpush.bf16.msrb.mxu1 %v8324_v48  ;;  %v10145_v48 = vld [vmem:[#allocation7 + $0x668] sm:$0xf0] }
 0x23c   : > { %v2297_v37 = vadd.f32 %v2296_v17, %v2247_v57  ;;  %v2345_v5 = vpop.f32.mrf.mxu3  ;;  %3964 = vrot.lane.b32.xlu1 %v9060_v39, %s11074_s21  ;;  %v2250_v47 = vpop.f32.mrf.mxu1  ;;  %v8612_v57 = vor.u32 %v10078_v8, %v8609_v27  ;;  %v2202_v4 = vadd.f32 %v2201_v32, %v11548_v38  ;;  %v8895_v17 = vld [vmem:[#allocation7 + $0x690] sm:$0xf]  ;;  %v10087_v32 = vld [vmem:[#allocation7 + $0x49c] sm:$0xf]  ;;  %v8860_v30 = vor.u32 %v10145_v48, %v8859_v33 }
 0x23d   : > { %v8896_v61 = vor.u32 %v10154_v34, %v8895_v17  ;;  %v8648_v60 = vor.u32 %v10087_v32, %v8645_v36 }
 0x23e   : > { %v2346_v44 = vadd.f32 %v2345_v5, %v2297_v37  ;;  %2396 = vmatmul.bf16.gmra.mxu0 %v14045_v3  ;;  %2848 = vmatpush.bf16.msrb.mxu2 %v8612_v57  ;;  %v10069_v57 = vld [vmem:[#allocation7 + $0x40c] sm:$0xf] }
 0x23f   : > { %2445 = vmatmul.bf16.gmra.mxu1 %v14046_v16  ;;  %2902 = vmatpush.bf16.msrb.mxu3 %v8720_v23 }
 0x240   : > { %v3149_v45 = vpack.c.bf16 %v2346_v44, %v2199_v18  ;;  %2494 = vmatmul.bf16.gmra.mxu2 %v14044_v55  ;;  %2750 = vmatpush.bf16.msrb.mxu0 %v8896_v61 }
 0x241   : > { %2543 = vmatmul.bf16.gmra.mxu3 %v14045_v3  ;;  %v9063_v5 = vld [vmem:[#allocation2 + $0x174] sm:$0xf]  ;;  %v9447_v12 = vld [vmem:[#allocation2 + $0x170] sm:$0xf] }
 0x242   : > { %3229 = vst [vmem:[#allocation2 + $0x194] sm:$0xff] %v3149_v45 }
 0x243   : > { %v2299_v59 = vpop.f32.mrf.mxu2  ;;  %v2203_v22 = vpop.f32.mrf.mxu0  ;;  %2903 = vmatpush.bf16.msrb.mxu3 %v8684_v54 }
 0x244   : > { %v2300_v56 = vadd.f32 %v2299_v59, %v2250_v47  ;;  %v2348_v35 = vpop.f32.mrf.mxu3  ;;  %6157 = vrot.lane.b32.xlu1 %v9444_v7, %s11074_s21  ;;  %v2252_v15 = vpop.f32.mrf.mxu1  ;;  %v2204_v8 = vadd.f32 %v2203_v22, %v11554_v31  ;;  %2751 = vmatpush.bf16.msrb.mxu0 %v8860_v30 }
 0x246   : > { %v2349_v39 = vadd.f32 %v2348_v35, %v2300_v56  ;;  %v8576_v56 = vor.u32 %v10069_v57, %v8573_v13  ;;  %v9988_v13 = vld [vmem:[#allocation7 + $0x184] sm:$0xf] }
 0x247   : > { %2904 = vmatpush.bf16.msrb.mxu3 %v8648_v60 }
 0x248   : > { %v3154_v37 = vpack.c.bf16 %v2349_v39, %v2202_v4  ;;  %2849 = vmatpush.bf16.msrb.mxu2 %v8576_v56  ;;  %v9997_v39 = vld [vmem:[#allocation7 + $0x1cc] sm:$0xf] }
 0x249   : > { %v10193_v47 = vld [vmem:[#allocation2 + $0x194] sm:$0xf0]  ;;  %v10281_v18 = vld [vmem:[#allocation2 + $0x190] sm:$0xf0]  ;;  %v8288_v17 = vor.u32 %v9997_v39, %v8285_v28 }
 0x24a   : > { %3234 = vst [vmem:[#allocation2 + $0x1b8] sm:$0xff] %v3154_v37  ;;  %v9064_v44 = vor.u32 %v10193_v47, %v9063_v5  ;;  %v9448_v38 = vor.u32 %v10281_v18, %v9447_v12 }
 0x24b   : > { %v2301_v63 = vpop.f32.mrf.mxu2  ;;  %v2206_v10 = vpop.f32.mrf.mxu0  ;;  %2800 = vmatpush.bf16.msrb.mxu1 %v8288_v17 }
 0x24c   : > { %v2302_v52 = vadd.f32 %v2301_v63, %v2252_v15  ;;  %v2350_v45 = vpop.f32.mrf.mxu3  ;;  %3966 = vrot.lane.b32.xlu1 %v9064_v44, %s11074_s21  ;;  %6159 = vrot.lane.b32.xlu0 %v9448_v38, %s11074_s21  ;;  %v2255_v7 = vpop.f32.mrf.mxu1  ;;  %v2207_v22 = vadd.f32 %v2206_v10, %v11562_v6 }
 0x24e   : > { %v2351_v27 = vadd.f32 %v2350_v45, %v2302_v52  ;;  %2401 = vmatmul.bf16.gmra.mxu0 %v14048_v11  ;;  %v10060_v52 = vld [vmem:[#allocation7 + $0x3c4] sm:$0xf]  ;;  %v8537_v45 = vld [vmem:[#allocation7 + $0x3e4] sm:$0xf0] }
 0x24f   : > { %2450 = vmatmul.bf16.gmra.mxu1 %v14049_v58 }
 0x250   : > { %v3159_v59 = vpack.c.bf16 %v2351_v27, %v2204_v8  ;;  %2499 = vmatmul.bf16.gmra.mxu2 %v11358_v43 }
 0x251   : > { %2548 = vmatmul.bf16.gmra.mxu3 %v14048_v11  ;;  %v9067_v14 = vld [vmem:[#allocation2 + $0x1bc] sm:$0xf]  ;;  %v9451_v5 = vld [vmem:[#allocation2 + $0x1b8] sm:$0xf] }
 0x252   : > { %3239 = vst [vmem:[#allocation2 + $0x1dc] sm:$0xff] %v3159_v59 }
 0x253   : > { %v2304_v9 = vpop.f32.mrf.mxu2  ;;  %v2208_v15 = vpop.f32.mrf.mxu0 }
 0x254   : > { %v2305_v35 = vadd.f32 %v2304_v9, %v2255_v7  ;;  %v2353_v23 = vpop.f32.mrf.mxu3  ;;  %v2257_v31 = vpop.f32.mrf.mxu1  ;;  %v2209_v32 = vadd.f32 %v2208_v15, %v11567_v29  ;;  %v8540_v7 = vor.u32 %v10060_v52, %v8537_v45  ;;  %v8249_v9 = vld [vmem:[#allocation7 + $0x1a4] sm:$0xf0] }
 0x255   : > { %v8252_v56 = vor.u32 %v9988_v13, %v8249_v9  ;;  %v8213_v13 = vld [vmem:[#allocation7 + $0x15c] sm:$0xf0]  ;;  %v8787_v9 = vld [vmem:[#allocation7 + $0x5b8] sm:$0xf] }
 0x256   : > { %v2354_v4 = vadd.f32 %v2353_v23, %v2305_v35  ;;  %2850 = vmatpush.bf16.msrb.mxu2 %v8540_v7  ;;  %v8823_v35 = vld [vmem:[#allocation7 + $0x600] sm:$0xf]  ;;  %v10136_v23 = vld [vmem:[#allocation7 + $0x620] sm:$0xf0] }
 0x257   : > { %2801 = vmatpush.bf16.msrb.mxu1 %v8252_v56  ;;  %v8959_v56 = vld [vmem:[#allocation2 + $0x174] sm:$0xf] }
 0x258   : > { %v3164_v34 = vpack.c.bf16 %v2354_v4, %v2207_v22  ;;  %v8824_v4 = vor.u32 %v10136_v23, %v8823_v35  ;;  %v10127_v23 = vld [vmem:[#allocation7 + $0x5d8] sm:$0xf0] }
 0x259   : > { %v10194_v37 = vld [vmem:[#allocation2 + $0x1dc] sm:$0xf0]  ;;  %v10282_v61 = vld [vmem:[#allocation2 + $0x1d8] sm:$0xf0] }
 0x25a   : > { %3244 = vst [vmem:[#allocation2 + $0x200] sm:$0xff] %v3164_v34  ;;  %v9068_v54 = vor.u32 %v10194_v37, %v9067_v14  ;;  %v9452_v47 = vor.u32 %v10282_v61, %v9451_v5  ;;  %2752 = vmatpush.bf16.msrb.mxu0 %v8824_v4 }
 0x25b   : > { %v2306_v12 = vpop.f32.mrf.mxu2  ;;  %v2367_v44 = vpop.f32.mrf.mxu0 }
 0x25c   : > { %v2307_v18 = vadd.f32 %v2306_v12, %v2257_v31  ;;  %v2355_v6 = vpop.f32.mrf.mxu3  ;;  %3968 = vrot.lane.b32.xlu0 %v9068_v54, %s11074_s21  ;;  %6161 = vrot.lane.b32.xlu2 %v9452_v47, %s11074_s21  ;;  %v2416_v38 = vpop.f32.mrf.mxu1  ;;  %v10170_v47 = vld [vmem:[#allocation2 + $0x1dc] sm:$0xf0] }
 0x25d   : > { %v2417_v63 = vadd.f32 %v2416_v38, %v2367_v44  ;;  %v10051_v44 = vld [vmem:[#allocation7 + $0x37c] sm:$0xf]  ;;  %v8501_v38 = vld [vmem:[#allocation7 + $0x39c] sm:$0xf0] }
 0x25e   : > { %v2356_v36 = vadd.f32 %v2355_v6, %v2307_v18  ;;  %2562 = vmatmul.bf16.vlgmr.msra.gmra.mxu0 %v11244_v51  ;;  %v8963_v18 = vld [vmem:[#allocation2 + $0x1bc] sm:$0xf] }
 0x25f   : > { %2611 = vmatmul.bf16.vlgmr.msra.gmra.mxu1 %v14051_v62  ;;  %v8964_v6 = vor.u32 %v10170_v47, %v8963_v18  ;;  %v8465_v47 = vld [vmem:[#allocation7 + $0x354] sm:$0xf0] }
 0x260   : > { %v3169_v60 = vpack.c.bf16 %v2356_v36, %v2209_v32  ;;  %2660 = vmatmul.bf16.vlgmr.msra.gmra.mxu2 %v11242_v46  ;;  %v8504_v32 = vor.u32 %v10051_v44, %v8501_v38 }
 0x261   : > { %2709 = vmatmul.bf16.vlgmr.msra.gmra.mxu3 %v11244_v51  ;;  %v9455_v15 = vld [vmem:[#allocation2 + $0x200] sm:$0xf]  ;;  %v9071_v31 = vld [vmem:[#allocation2 + $0x204] sm:$0xf]  ;;  %v3476_v45 = vsel %vm3432_vm0, %v8964_v6, 0 }
 0x262   : > { %3249 = vst [vmem:[#allocation2 + $0x224] sm:$0xff] %v3169_v60  ;;  %v8967_v22 = vld [vmem:[#allocation2 + $0x204] sm:$0xf]  ;;  %2851 = vmatpush.bf16.msrb.mxu2 %v8504_v32 }
 0x263   : > { %v2465_v10 = vpop.f32.mrf.mxu2  ;;  %v2369_v29 = vpop.f32.mrf.mxu0 }
 0x264   : > { %v11638_v8 = vadd.f32 %v2465_v10, %v2417_v63  ;;  %v11640_v27 = vpop.f32.mrf.mxu3  ;;  %v2418_v59 = vpop.f32.mrf.mxu1 }
 0x265   : > { %v2419_v57 = vadd.f32 %v2418_v59, %v2369_v29  ;;  %v11658_v10 = vpop.permute.xlu0 %5025  ;;  %v10169_v29 = vld [vmem:[#allocation2 + $0x194] sm:$0xf0] }
 0x266   : > { %14052 = vst [vmem:[#allocation26_spill] sm:$0xff] %v11658_v10  ;;  %v10038_v10 = vld [vmem:[#allocation7 + $0x310] sm:$0xf0] }
 0x269   : > { %v10283_v39 = vld [vmem:[#allocation2 + $0x220] sm:$0xf0]  ;;  %v10195_v28 = vld [vmem:[#allocation2 + $0x224] sm:$0xf0] }
 0x26a   : > { %v10171_v33 = vld [vmem:[#allocation2 + $0x224] sm:$0xf0]  ;;  %v9456_v17 = vor.u32 %v10283_v39, %v9455_v15  ;;  %v9072_v48 = vor.u32 %v10195_v28, %v9071_v31  ;;  %v8960_v15 = vor.u32 %v10169_v29, %v8959_v56  ;;  %v8788_v31 = vor.u32 %v10127_v23, %v8787_v9  ;;  %v8177_v29 = vld [vmem:[#allocation7 + $0x114] sm:$0xf0]  ;;  %v10118_v56 = vld [vmem:[#allocation7 + $0x590] sm:$0xf0] }
 0x26b   : > { %v8968_v34 = vor.u32 %v10171_v33, %v8967_v22  ;;  %v2467_v14 = vpop.f32.mrf.mxu2  ;;  %v2372_v5 = vpop.f32.mrf.mxu0 }
 0x26c   : > { %v11642_v30 = vadd.f32 %v2467_v14, %v2419_v57  ;;  %v11644_v37 = vpop.f32.mrf.mxu3  ;;  %6163 = vrot.lane.b32.xlu1 %v9456_v17, %s11074_s21  ;;  %3970 = vrot.lane.b32.xlu0 %v9072_v48, %s11074_s21  ;;  %v2421_v54 = vpop.f32.mrf.mxu1  ;;  %v9979_v57 = vld [vmem:[#allocation7 + $0x13c] sm:$0xf]  ;;  %v3473_v33 = vsel %vm3432_vm0, %v8960_v15, 0 }
 0x26d   : > { %v3479_v61 = vsel %vm3432_vm0, %v8968_v34, 0  ;;  %v2422_v12 = vadd.f32 %v2421_v54, %v2372_v5  ;;  %v8216_v35 = vor.u32 %v9979_v57, %v8213_v13  ;;  %2753 = vmatpush.bf16.msrb.mxu0 %v8788_v31  ;;  %v11665_v17 = vpop.permute.xlu0 %3902  ;;  %v10168_v34 = vld [vmem:[#allocation2 + $0x14c] sm:$0xf0]  ;;  %v8955_v5 = vld [vmem:[#allocation2 + $0x12c] sm:$0xf] }
 0x26e   : > { %3481 = vmatpush.bf16.xpose.msra.mxu3 %v3479_v61  ;;  %2567 = vmatmul.bf16.gmra.mxu0 %v11260_v20  ;;  %14053 = vst [vmem:[#allocation28_spill] sm:$0xff] %v11665_v17  ;;  %v8956_v61 = vor.u32 %v10168_v34, %v8955_v5  ;;  %v10042_v54 = vld [vmem:[#allocation7 + $0x334] sm:$0xf]  ;;  %v8951_v13 = vld [vmem:[#allocation2 + $0xe4] sm:$0xf] }
 0x26f   : > { %2616 = vmatmul.bf16.gmra.mxu1 %v11262_v21  ;;  %v10166_v34 = vld [vmem:[#allocation2 + $0xbc] sm:$0xf0] }
 0x270   : > { %2665 = vmatmul.bf16.gmra.mxu2 %v11258_v19  ;;  %2802 = vmatpush.bf16.msrb.mxu1 %v8216_v35  ;;  %v3470_v32 = vsel %vm3432_vm0, %v8956_v61, 0  ;;  %v8947_v61 = vld [vmem:[#allocation2 + $0x9c] sm:$0xf] }
 0x271   : > { %2714 = vmatmul.bf16.gmra.mxu3 %v11260_v20 }
 0x273   : > { %v2470_v36 = vpop.f32.mrf.mxu2  ;;  %v2374_v52 = vpop.f32.mrf.mxu0 }
 0x274   : > { %v11653_v63 = vadd.f32 %v2470_v36, %v2422_v12  ;;  %v11655_v60 = vpop.f32.mrf.mxu3  ;;  %v2423_v7 = vpop.f32.mrf.mxu1  ;;  %v8468_v12 = vor.u32 %v10042_v54, %v8465_v47  ;;  %v8948_v54 = vor.u32 %v10166_v34, %v8947_v61  ;;  %v10033_v47 = vld [vmem:[#allocation7 + $0x2ec] sm:$0xf] }
 0x275   : > { %v2424_v59 = vadd.f32 %v2423_v7, %v2374_v52  ;;  %v10167_v52 = vld [vmem:[#allocation2 + $0x104] sm:$0xf0]  ;;  %v9970_v7 = vld [vmem:[#allocation7 + $0xf4] sm:$0xf]  ;;  %v11676_v57 = vpop.permute.xlu0 %5027 }
 0x276   : > { %3482 = vmatpush.bf16.xpose.msra.mxu3 %v3476_v45  ;;  %2852 = vmatpush.bf16.msrb.mxu2 %v8468_v12  ;;  %14054 = vst [vmem:[#allocation22_spill] sm:$0xff] %v11676_v57  ;;  %v8180_v9 = vor.u32 %v9970_v7, %v8177_v29  ;;  %v8952_v35 = vor.u32 %v10167_v52, %v8951_v13  ;;  %v8429_v12 = vld [vmem:[#allocation7 + $0x30c] sm:$0xf0]  ;;  %v10165_v29 = vld [vmem:[#allocation2 + $0x74] sm:$0xf0] }
 0x277   : > { %v9961_v13 = vld [vmem:[#allocation7 + $0xac] sm:$0xf] }
 0x278   : > { %2803 = vmatpush.bf16.msrb.mxu1 %v8180_v9  ;;  %v8141_v9 = vld [vmem:[#allocation7 + $0xcc] sm:$0xf0] }
 0x27b   : > { %v2472_v22 = vpop.f32.mrf.mxu2  ;;  %v2377_v28 = vpop.f32.mrf.mxu0 }
 0x27c   : > { %v11660_v4 = vadd.f32 %v2472_v22, %v2424_v59  ;;  %v11662_v39 = vpop.f32.mrf.mxu3  ;;  %v2426_v48 = vpop.f32.mrf.mxu1  ;;  %v8751_v59 = vld [vmem:[#allocation7 + $0x570] sm:$0xf] }
 0x27d   : > { %v2427_v14 = vadd.f32 %v2426_v48, %v2377_v28  ;;  %v8752_v23 = vor.u32 %v10118_v56, %v8751_v59  ;;  %v11683_v5 = vpop.permute.xlu0 %5031  ;;  %v8715_v56 = vld [vmem:[#allocation7 + $0x528] sm:$0xf] }
 0x27e   : > { %3483 = vmatpush.bf16.xpose.msra.mxu3 %v3473_v33  ;;  %2572 = vmatmul.bf16.gmra.mxu0 %v11276_v41  ;;  %v3467_v33 = vsel %vm3432_vm0, %v8952_v35, 0  ;;  %14055 = vst [vmem:[#allocation20_spill] sm:$0xff] %v11683_v5  ;;  %v11712_v5 = vpop.permute.xlu1 %3904 }
 0x27f   : > { %2621 = vmatmul.bf16.gmra.mxu1 %v11278_v42  ;;  %2754 = vmatpush.bf16.msrb.mxu0 %v8752_v23  ;;  %v8943_v23 = vld [vmem:[#allocation2 + $0x54] sm:$0xf]  ;;  %14058 = vst [vmem:[#allocation29_spill] sm:$0xff] %v11712_v5  ;;  %v10091_v5 = vld [vmem:[#allocation7 + $0x4b8] sm:$0xf0] }
 0x280   : > { %2670 = vmatmul.bf16.gmra.mxu2 %v11274_v40 }
 0x281   : > { %2719 = vmatmul.bf16.gmra.mxu3 %v11276_v41 }
 0x283   : > { %v2475_v18 = vpop.f32.mrf.mxu2  ;;  %v2379_v38 = vpop.f32.mrf.mxu0 }
 0x284   : > { %v11671_v6 = vadd.f32 %v2475_v18, %v2427_v14  ;;  %v11673_v44 = vpop.f32.mrf.mxu3  ;;  %v2428_v36 = vpop.f32.mrf.mxu1  ;;  %v8432_v18 = vor.u32 %v10033_v47, %v8429_v12  ;;  %v9952_v12 = vld [vmem:[#allocation7 + $0x64] sm:$0xf] }
 0x285   : > { %v2429_v45 = vadd.f32 %v2428_v36, %v2379_v38  ;;  %v11694_v35 = vpop.permute.xlu0 %3908 }
 0x286   : > { %3484 = vmatpush.bf16.xpose.msra.mxu3 %v3470_v32  ;;  %2853 = vmatpush.bf16.msrb.mxu2 %v8432_v18  ;;  %14056 = vst [vmem:[#allocation21_spill] sm:$0xff] %v11694_v35  ;;  %v8105_v18 = vld [vmem:[#allocation7 + $0x84] sm:$0xf0]  ;;  %v8643_v35 = vld [vmem:[#allocation7 + $0x498] sm:$0xf] }
 0x28b   : > { %v2477_v15 = vpop.f32.mrf.mxu2  ;;  %v2382_v28 = vpop.f32.mrf.mxu0 }
 0x28c   : > { %v11678_v31 = vadd.f32 %v2477_v15, %v2429_v45  ;;  %v11680_v22 = vpop.f32.mrf.mxu3  ;;  %v2431_v48 = vpop.f32.mrf.mxu1  ;;  %v3464_v45 = vsel %vm3432_vm0, %v8948_v54, 0  ;;  %v8144_v15 = vor.u32 %v9961_v13, %v8141_v9  ;;  %v9943_v13 = vld [vmem:[#allocation7 + $0x1c] sm:$0xf]  ;;  %v8069_v9 = vld [vmem:[#allocation7 + $0x3c] sm:$0xf0] }
 0x28d   : > { %v2432_v14 = vadd.f32 %v2431_v48, %v2382_v28  ;;  %v10109_v28 = vld [vmem:[#allocation7 + $0x548] sm:$0xf0] }
 0x28e   : > { %3485 = vmatpush.bf16.xpose.msra.mxu3 %v3467_v33  ;;  %2577 = vmatmul.bf16.gmra.mxu0 %v11292_v1  ;;  %v8944_v33 = vor.u32 %v10165_v29, %v8943_v23  ;;  %v8716_v48 = vor.u32 %v10109_v28, %v8715_v56  ;;  %v8939_v29 = vld [vmem:[#allocation2 + $0xc] sm:$0xf]  ;;  %v11704_v56 = vpop.permute.xlu0 %5033  ;;  %v10024_v23 = vld [vmem:[#allocation7 + $0x2a4] sm:$0xf]  ;;  %v8072_v28 = vor.u32 %v9943_v13, %v8069_v9 }
 0x28f   : > { %2626 = vmatmul.bf16.gmra.mxu1 %v11294_v2  ;;  %14057 = vst [vmem:[#allocation27_spill] sm:$0xff] %v11704_v56  ;;  %v10074_v56 = vld [vmem:[#allocation7 + $0x430] sm:$0xf0] }
 0x290   : > { %2675 = vmatmul.bf16.gmra.mxu2 %v11290_v0  ;;  %2804 = vmatpush.bf16.msrb.mxu1 %v8144_v15  ;;  %v3461_v47 = vsel %vm3432_vm0, %v8944_v33, 0  ;;  %v8393_v15 = vld [vmem:[#allocation7 + $0x2c4] sm:$0xf0]  ;;  %v8615_v33 = vld [vmem:[#allocation7 + $0x458] sm:$0xf] }
 0x291   : > { %2724 = vmatmul.bf16.gmra.mxu3 %v11292_v1  ;;  %2755 = vmatpush.bf16.msrb.mxu0 %v8716_v48  ;;  %v8396_v48 = vor.u32 %v10024_v23, %v8393_v15  ;;  %v8679_v23 = vld [vmem:[#allocation7 + $0x4e0] sm:$0xf]  ;;  %v10100_v15 = vld [vmem:[#allocation7 + $0x500] sm:$0xf0] }
 0x293   : > { %v2480_v38 = vpop.f32.mrf.mxu2  ;;  %v2384_v52 = vpop.f32.mrf.mxu0  ;;  %2854 = vmatpush.bf16.msrb.mxu2 %v8396_v48 }
 0x294   : > { %v11689_v32 = vadd.f32 %v2480_v38, %v2432_v14  ;;  %v11691_v36 = vpop.f32.mrf.mxu3  ;;  %v2433_v7 = vpop.f32.mrf.mxu1 }
 0x295   : > { %v2434_v59 = vadd.f32 %v2433_v7, %v2384_v52  ;;  %v10164_v52 = vld [vmem:[#allocation2 + $0x2c] sm:$0xf0] }
 0x296   : > { %3486 = vmatpush.bf16.xpose.msra.mxu3 %v3464_v45  ;;  %v8108_v45 = vor.u32 %v9952_v12, %v8105_v18 }
 0x298   : > { %2805 = vmatpush.bf16.msrb.mxu1 %v8108_v45 }
 0x29b   : > { %v2482_v34 = vpop.f32.mrf.mxu2  ;;  %v2387_v54 = vpop.f32.mrf.mxu0 }
 0x29c   : > { %v11696_v14 = vadd.f32 %v2482_v34, %v2434_v59  ;;  %v11698_v61 = vpop.f32.mrf.mxu3  ;;  %v2436_v38 = vpop.f32.mrf.mxu1  ;;  %v8940_v59 = vor.u32 %v10164_v52, %v8939_v29  ;;  %v10083_v34 = vld [vmem:[#allocation7 + $0x478] sm:$0xf0]  ;;  %2806 = vmatpush.bf16.msrb.mxu1 %v8072_v28  ;;  %v8579_v29 = vld [vmem:[#allocation7 + $0x410] sm:$0xf]  ;;  %v8680_v28 = vor.u32 %v10100_v15, %v8679_v23  ;;  %v8471_v15 = vld [vmem:[#allocation7 + $0x338] sm:$0xf] }
 0x29d   : > { %v2437_v7 = vadd.f32 %v2436_v38, %v2387_v54  ;;  %v8580_v9 = vor.u32 %v10074_v56, %v8579_v29  ;;  %v8507_v56 = vld [vmem:[#allocation7 + $0x380] sm:$0xf]  ;;  %v11720_v23 = vpop.permute.xlu1 %5035 }
 0x29e   : > { %3487 = vmatpush.bf16.xpose.msra.mxu3 %v3461_v47  ;;  %2582 = vmatmul.bf16.gmra.mxu0 %v11308_v25  ;;  %v8616_v47 = vor.u32 %v10083_v34, %v8615_v33  ;;  %v3458_v52 = vsel %vm3432_vm0, %v8940_v59, 0  ;;  %v10065_v33 = vld [vmem:[#allocation7 + $0x3e8] sm:$0xf0]  ;;  %14060 = vst [vmem:[#allocation31_spill] sm:$0xff] %v11720_v23  ;;  %v8435_v23 = vld [vmem:[#allocation7 + $0x2f0] sm:$0xf] }
 0x29f   : > { %2631 = vmatmul.bf16.gmra.mxu1 %v11310_v26  ;;  %2756 = vmatpush.bf16.msrb.mxu0 %v8680_v28 }
 0x2a0   : > { %2680 = vmatmul.bf16.gmra.mxu2 %v11306_v24  ;;  %2995 = vmatpush.bf16.msra.mxu1 %v8616_v47 }
 0x2a1   : > { %2729 = vmatmul.bf16.gmra.mxu3 %v11308_v25 }
 0x2a3   : > { %v2485_v54 = vpop.f32.mrf.mxu2  ;;  %v2389_v38 = vpop.f32.mrf.mxu0 }
 0x2a4   : > { %v11707_v12 = vadd.f32 %v2485_v54, %v2437_v7  ;;  %v11709_v18 = vpop.f32.mrf.mxu3  ;;  %v2438_v45 = vpop.f32.mrf.mxu1  ;;  %2996 = vmatpush.bf16.msra.mxu1 %v8580_v9  ;;  %v8543_v7 = vld [vmem:[#allocation7 + $0x3c8] sm:$0xf]  ;;  %v8357_v9 = vld [vmem:[#allocation7 + $0x27c] sm:$0xf0] }
 0x2a5   : > { %v2439_v13 = vadd.f32 %v2438_v45, %v2389_v38  ;;  %v8544_v34 = vor.u32 %v10065_v33, %v8543_v7  ;;  %v11714_v54 = vpop.permute.xlu0 %3910  ;;  %v10056_v45 = vld [vmem:[#allocation7 + $0x3a0] sm:$0xf0]  ;;  %v10047_v7 = vld [vmem:[#allocation7 + $0x358] sm:$0xf0] }
 0x2a6   : > { %3488 = vmatpush.bf16.xpose.msra.mxu3 %v3458_v52  ;;  %14059 = vst [vmem:[#allocation30_spill] sm:$0xff] %v11714_v54  ;;  %v8508_v57 = vor.u32 %v10056_v45, %v8507_v56  ;;  %v8436_v54 = vor.u32 %v10038_v10, %v8435_v23  ;;  %v10020_v10 = vld [vmem:[#allocation7 + $0x280] sm:$0xf0] }
 0x2a8   : > { %2997 = vmatpush.bf16.msra.mxu1 %v8544_v34 }
 0x2ab   : > { %v2487_v59 = vpop.f32.mrf.mxu2  ;;  %v2392_v52 = vpop.f32.mrf.mxu0 }
 0x2ac   : > { %v11716_v48 = vadd.f32 %v2487_v59, %v2439_v13  ;;  %v11718_v47 = vpop.f32.mrf.mxu3  ;;  %v2441_v38 = vpop.f32.mrf.mxu1  ;;  %2998 = vmatpush.bf16.msra.mxu1 %v8508_v57  ;;  %v10015_v13 = vld [vmem:[#allocation7 + $0x25c] sm:$0xf]  ;;  %v8472_v59 = vor.u32 %v10047_v7, %v8471_v15  ;;  %v8399_v15 = vld [vmem:[#allocation7 + $0x2a8] sm:$0xf] }
 0x2ad   : > { %v2442_v29 = vadd.f32 %v2441_v38, %v2392_v52  ;;  %v8360_v28 = vor.u32 %v10015_v13, %v8357_v9  ;;  %v11726_v33 = vpop.permute.xlu0 %3912  ;;  %v11732_v13 = vpop.permute.xlu1 %3914  ;;  %v8644_v9 = vor.u32 %v10091_v5, %v8643_v35 }
 0x2ae   : > { %2587 = vmatmul.bf16.gmra.mxu0 %v11324_v50  ;;  %14061 = vst [vmem:[#allocation32_spill] sm:$0xff] %v11726_v33 }
 0x2af   : > { %2636 = vmatmul.bf16.gmra.mxu1 %v11326_v53  ;;  %2855 = vmatpush.bf16.msrb.mxu2 %v8360_v28  ;;  %14062 = vst [vmem:[#allocation33_spill] sm:$0xff] %v11732_v13 }
 0x2b0   : > { %2685 = vmatmul.bf16.gmra.mxu2 %v11322_v49  ;;  %2999 = vmatpush.bf16.msra.mxu1 %v8472_v59 }
 0x2b1   : > { %2734 = vmatmul.bf16.gmra.mxu3 %v11324_v50  ;;  %2757 = vmatpush.bf16.msrb.mxu0 %v8644_v9 }
 0x2b3   : > { %v2490_v34 = vpop.f32.mrf.mxu2  ;;  %v2394_v56 = vpop.f32.mrf.mxu0 }
 0x2b4   : > { %v11728_v52 = vadd.f32 %v2490_v34, %v2442_v29  ;;  %v11730_v38 = vpop.f32.mrf.mxu3  ;;  %v2443_v45 = vpop.f32.mrf.mxu1  ;;  %3000 = vmatpush.bf16.msra.mxu1 %v8436_v54  ;;  %v10029_v29 = vld [vmem:[#allocation7 + $0x2c8] sm:$0xf0] }
 0x2b5   : > { %v2444_v57 = vadd.f32 %v2443_v45, %v2394_v56  ;;  %v8400_v7 = vor.u32 %v10029_v29, %v8399_v15  ;;  %v8363_v56 = vld [vmem:[#allocation7 + $0x260] sm:$0xf]  ;;  %v11738_v23 = vpop.permute.xlu0 %5037  ;;  %v11743_v5 = vpop.permute.xlu1 %5039 }
 0x2b6   : > { %14063 = vst [vmem:[#allocation34_spill] sm:$0xff] %v11738_v23  ;;  %v8364_v13 = vor.u32 %v10020_v10, %v8363_v56 }
 0x2b7   : > { %14064 = vst [vmem:[#allocation35_spill] sm:$0xff] %v11743_v5 }
 0x2b8   : > { %3001 = vmatpush.bf16.msra.mxu1 %v8400_v7  ;;  %v11752_v7 = vpop.permute.xlu2 %3900 }
 0x2b9   : > { %14065 = vst [vmem:[#allocation36_spill] sm:$0xff] %v11752_v7 }
 0x2bb   : > { %v2492_v34 = vpop.f32.mrf.mxu2  ;;  %v2397_v59 = vpop.f32.mrf.mxu0 }
 0x2bc   : > { %v11734_v33 = vadd.f32 %v2492_v34, %v2444_v57  ;;  %v11736_v28 = vpop.f32.mrf.mxu3  ;;  %v2446_v17 = vpop.f32.mrf.mxu1  ;;  %3002 = vmatpush.bf16.msra.mxu1 %v8364_v13 }
 0x2bd   : > { %v2447_v45 = vadd.f32 %v2446_v17, %v2397_v59  ;;  %v11750_v17 = vpop.permute.xlu0 %3958  ;;  %v11754_v34 = vpop.permute.xlu1 %3956 }
 0x2be   : > { %2592 = vmatmul.bf16.gmra.mxu0 %v14046_v16 }
 0x2bf   : > { %2641 = vmatmul.bf16.gmra.mxu1 %v14044_v55 }
 0x2c0   : > { %2690 = vmatmul.bf16.gmra.mxu2 %v14045_v3 }
 0x2c1   : > { %2739 = vmatmul.bf16.gmra.mxu3 %v14046_v16 }
 0x2c3   : > { %v2495_v35 = vpop.f32.mrf.mxu2  ;;  %v2399_v9 = vpop.f32.mrf.mxu0 }
 0x2c4   : > { %v11746_v54 = vadd.f32 %v2495_v35, %v2447_v45  ;;  %v11748_v57 = vpop.f32.mrf.mxu3  ;;  %v2448_v15 = vpop.f32.mrf.mxu1 }
 0x2c5   : > { %v2449_v29 = vadd.f32 %v2448_v15, %v2399_v9  ;;  %v11760_v45 = vpop.permute.xlu0 %6159  ;;  %v11765_v9 = vpop.permute.xlu2 %5029 }
 0x2c6   : > { %14068 = vst [vmem:[#allocation39_spill] sm:$0xff] %v11760_v45  ;;  %v11767_v15 = vpop.permute.xlu1 %6151 }
 0x2c7   : > { %14069 = vst [vmem:[#allocation40_spill] sm:$0xff] %v11765_v9 }
 0x2c8   : > { %14070 = vst [vmem:[#allocation41_spill] sm:$0xff] %v11767_v15 }
 0x2cb   : > { %v2497_v59 = vpop.f32.mrf.mxu2  ;;  %v2402_v13 = vpop.f32.mrf.mxu0 }
 0x2cc   : > { %v11756_v56 = vadd.f32 %v2497_v59, %v2449_v29  ;;  %v11758_v10 = vpop.f32.mrf.mxu3  ;;  %v2451_v5 = vpop.f32.mrf.mxu1 }
 0x2cd   : > { %14067 = vst [vmem:[#allocation38_spill] sm:$0xff] %v11758_v10  ;;  %v2452_v35 = vadd.f32 %v2451_v5, %v2402_v13 }
 0x2ce   : > { %14066 = vst [vmem:[#allocation37_spill] sm:$0xff] %v11756_v56  ;;  %2597 = vmatmul.bf16.gmra.mxu0 %v14049_v58  ;;  %v3969_v5 = vpop.permute.xlu0 %3968  ;;  %v11774_v56 = vpop.permute.xlu2 %3906 }
 0x2cf   : > { %2646 = vmatmul.bf16.gmra.mxu1 %v11358_v43  ;;  %14073 = vst [vmem:[#allocation44_spill] sm:$0xff] %v11774_v56  ;;  %v11776_v43 = vpop.permute.xlu1 %3964  ;;  %v8903_v56 = vld [vmem:[#allocation7 + $0x698] sm:$0xf] }
 0x2d0   : > { %2695 = vmatmul.bf16.gmra.mxu2 %v14048_v11 }
 0x2d1   : > { %2744 = vmatmul.bf16.gmra.mxu3 %v14049_v58 }
 0x2d3   : > { %v2500_v29 = vpop.f32.mrf.mxu2  ;;  %v2404_v7 = vpop.f32.mrf.mxu0 }
 0x2d4   : > { %v11770_v59 = vadd.f32 %v2500_v29, %v2452_v35  ;;  %v11772_v23 = vpop.f32.mrf.mxu3  ;;  %v2453_v45 = vpop.f32.mrf.mxu1 }
 0x2d5   : > { %14072 = vst [vmem:[#allocation43_spill] sm:$0xff] %v11772_v23  ;;  %v2454_v13 = vadd.f32 %v2453_v45, %v2404_v7 }
 0x2d6   : > { %14071 = vst [vmem:[#allocation42_spill] sm:$0xff] %v11770_v59  ;;  %v11787_v7 = vpop.permute.xlu2 %6149 }
 0x2d7   : > { %14074 = vst [vmem:[#allocation45_spill] sm:$0xff] %v11787_v7  ;;  %v11791_v45 = vpop.permute.xlu1 %6157 }
 0x2d8   : > { %14075 = vst [vmem:[#allocation46_spill] sm:$0xff] %v11791_v45  ;;  %v8327_v45 = vld [vmem:[#allocation7 + $0x218] sm:$0xf] }
 0x2db   : > { %v2502_v11 = vpop.f32.mrf.mxu2  ;;  %v2563_v15 = vpop.f32.mrf.mxu0 }
 0x2dc   : > { %v11778_v10 = vadd.f32 %v2502_v11, %v2454_v13  ;;  %v11780_v9 = vpop.f32.mrf.mxu3  ;;  %v2564_v58 = vadd.f32 %v2563_v15, %v11640_v27  ;;  %v2612_v35 = vpop.f32.mrf.mxu1 }
 0x2de   : > { %v3971_v29 = vpop.permute.xlu0 %3970  ;;  %v2613_v59 = vadd.f32 %v2612_v35, %v2564_v58  ;;  %2758 = vmatmul.bf16.vlgmr.msrb.gmra.mxu0 %v14051_v62 }
 0x2df   : > { %v4018_v23 = vsel %vm3432_vm0, %v3971_v29, 0  ;;  %2807 = vmatmul.bf16.vlgmr.msrb.gmra.mxu1 %v11242_v46 }
 0x2e0   : > { %2856 = vmatmul.bf16.vlgmr.msrb.gmra.mxu2 %v11244_v51  ;;  %v3095_v11 = vpack.c.bf16 %v2613_v59, %v11638_v8  ;;  %4020 = vmatpush.bf16.xpose.msrb.mxu1 %v4018_v23  ;;  %v10155_v51 = vld [vmem:[#allocation7 + $0x6b8] sm:$0xf0]  ;;  %v4015_v8 = vsel %vm3432_vm0, %v3969_v5, 0  ;;  %v11797_v59 = vpop.permute.xlu2 %3960 }
 0x2e1   : > { %2905 = vmatmul.bf16.vlgmr.msrb.gmra.mxu3 %v14051_v62  ;;  %v8904_v46 = vor.u32 %v10155_v51, %v8903_v56 }
 0x2e2   : > { %3175 = vst [vmem:[#allocation2 + $0x10] sm:$0xff] %v3095_v11 }
 0x2e3   : > { %v2661_v27 = vpop.f32.mrf.mxu2  ;;  %v2565_v15 = vpop.f32.mrf.mxu0  ;;  %3044 = vmatpush.bf16.msra.mxu2 %v8904_v46 }
 0x2e4   : > { %v2710_v58 = vpop.f32.mrf.mxu3  ;;  %v2566_v35 = vadd.f32 %v2565_v15, %v11644_v37  ;;  %v2614_v29 = vpop.f32.mrf.mxu1 }
 0x2e5   : > { %v11793_v13 = vadd.f32 %v2710_v58, %v2661_v27  ;;  %v10011_v27 = vld [vmem:[#allocation7 + $0x238] sm:$0xf0]  ;;  %v3967_v15 = vpop.permute.xlu1 %3966 }
 0x2e6   : > { %v2615_v7 = vadd.f32 %v2614_v29, %v2566_v35  ;;  %v8328_v37 = vor.u32 %v10011_v27, %v8327_v45 }
 0x2e7   : > { %14076 = vst [vmem:[#allocation47_spill] sm:$0xff] %v11793_v13 }
 0x2e8   : > { %v3100_v23 = vpack.c.bf16 %v2615_v7, %v11642_v30  ;;  %4021 = vmatpush.bf16.xpose.msrb.mxu1 %v4015_v8  ;;  %2946 = vmatpush.bf16.msra.mxu0 %v8328_v37  ;;  %v4012_v30 = vsel %vm3432_vm0, %v3967_v15, 0  ;;  %v11809_v35 = vpop.permute.xlu2 %6153 }
 0x2e9   : > { %v9251_v7 = vld [vmem:[#allocation2 + $0x10] sm:$0xf] }
 0x2ea   : > { %3180 = vst [vmem:[#allocation2 + $0x34] sm:$0xff] %v3100_v23 }
 0x2eb   : > { %v2663_v11 = vpop.f32.mrf.mxu2  ;;  %v2568_v13 = vpop.f32.mrf.mxu0 }
 0x2ec   : > { %v2712_v58 = vpop.f32.mrf.mxu3  ;;  %v2569_v51 = vadd.f32 %v2568_v13, %v11655_v60  ;;  %v2617_v56 = vpop.f32.mrf.mxu1 }
 0x2ed   : > { %v11800_v62 = vadd.f32 %v2712_v58, %v2663_v11  ;;  %v10146_v58 = vld [vmem:[#allocation7 + $0x670] sm:$0xf0] }
 0x2ee   : > { %v2618_v46 = vadd.f32 %v2617_v56, %v2569_v51  ;;  %2763 = vmatmul.bf16.gmra.mxu0 %v11262_v21  ;;  %v4009_v51 = vsel %vm3432_vm0, %v11776_v43, 0 }
 0x2ef   : > { %2812 = vmatmul.bf16.gmra.mxu1 %v11258_v19 }
 0x2f0   : > { %2861 = vmatmul.bf16.gmra.mxu2 %v11260_v20  ;;  %v3105_v5 = vpack.c.bf16 %v2618_v46, %v11653_v63  ;;  %4022 = vmatpush.bf16.xpose.msrb.mxu1 %v4012_v30  ;;  %v8867_v63 = vld [vmem:[#allocation7 + $0x650] sm:$0xf]  ;;  %v9459_v30 = vld [vmem:[#allocation2 + $0x14] sm:$0xf] }
 0x2f1   : > { %2910 = vmatmul.bf16.gmra.mxu3 %v11262_v21  ;;  %v10236_v45 = vld [vmem:[#allocation2 + $0x30] sm:$0xf0]  ;;  %v8868_v37 = vor.u32 %v10146_v58, %v8867_v63  ;;  %v10284_v56 = vld [vmem:[#allocation2 + $0x34] sm:$0xf0] }
 0x2f2   : > { %3185 = vst [vmem:[#allocation2 + $0x58] sm:$0xff] %v3105_v5  ;;  %v9252_v13 = vor.u32 %v10236_v45, %v9251_v7  ;;  %v9460_v7 = vor.u32 %v10284_v56, %v9459_v30  ;;  %v10002_v45 = vld [vmem:[#allocation7 + $0x1f0] sm:$0xf0] }
 0x2f3   : > { %v2666_v60 = vpop.f32.mrf.mxu2  ;;  %v2570_v8 = vpop.f32.mrf.mxu0  ;;  %3045 = vmatpush.bf16.msra.mxu2 %v8868_v37 }
 0x2f4   : > { %v2715_v29 = vpop.f32.mrf.mxu3  ;;  %v2571_v11 = vadd.f32 %v2570_v8, %v11662_v39  ;;  %v2619_v27 = vpop.f32.mrf.mxu1  ;;  %5081 = vrot.lane.b32.xlu1 %v9252_v13, %s11074_s21  ;;  %v8291_v39 = vld [vmem:[#allocation7 + $0x1d0] sm:$0xf] }
 0x2f5   : > { %v11811_v23 = vadd.f32 %v2715_v29, %v2666_v60  ;;  %v8292_v29 = vor.u32 %v10002_v45, %v8291_v39  ;;  %v3963_v8 = vpop.permute.xlu2 %3962  ;;  %v8831_v39 = vld [vmem:[#allocation7 + $0x608] sm:$0xf]  ;;  %v10137_v45 = vld [vmem:[#allocation7 + $0x628] sm:$0xf0] }
 0x2f6   : > { %v2620_v15 = vadd.f32 %v2619_v27, %v2571_v11  ;;  %v4006_v27 = vsel %vm3432_vm0, %v3963_v8, 0 }
 0x2f7   : > { %2947 = vmatpush.bf16.msra.mxu0 %v8292_v29 }
 0x2f8   : > { %v3110_v46 = vpack.c.bf16 %v2620_v15, %v11660_v4  ;;  %4023 = vmatpush.bf16.xpose.msrb.mxu1 %v4009_v51 }
 0x2f9   : > { %v9255_v37 = vld [vmem:[#allocation2 + $0x58] sm:$0xf] }
 0x2fa   : > { %3190 = vst [vmem:[#allocation2 + $0x7c] sm:$0xff] %v3110_v46 }
 0x2fb   : > { %v2668_v5 = vpop.f32.mrf.mxu2  ;;  %v2573_v13 = vpop.f32.mrf.mxu0 }
 0x2fc   : > { %v2717_v60 = vpop.f32.mrf.mxu3  ;;  %v2574_v11 = vadd.f32 %v2573_v13, %v11673_v44  ;;  %v2622_v43 = vpop.f32.mrf.mxu1  ;;  %6205 = vrot.lane.b32.xlu1 %v9460_v7, %s11074_s21  ;;  %v4003_v13 = vsel %vm3432_vm0, %v11797_v59, 0 }
 0x2fd   : > { %v11818_v63 = vadd.f32 %v2717_v60, %v2668_v5 }
 0x2fe   : > { %v2623_v4 = vadd.f32 %v2622_v43, %v2574_v11  ;;  %2768 = vmatmul.bf16.gmra.mxu0 %v11278_v42  ;;  %v9463_v11 = vld [vmem:[#allocation2 + $0x5c] sm:$0xf] }
 0x2ff   : > { %2817 = vmatmul.bf16.gmra.mxu1 %v11274_v40 }
 0x300   : > { %2866 = vmatmul.bf16.gmra.mxu2 %v11276_v41  ;;  %v3115_v58 = vpack.c.bf16 %v2623_v4, %v11671_v6  ;;  %4024 = vmatpush.bf16.xpose.msrb.mxu1 %v4006_v27  ;;  %v8832_v6 = vor.u32 %v10137_v45, %v8831_v39  ;;  %v9993_v27 = vld [vmem:[#allocation7 + $0x1a8] sm:$0xf0] }
 0x301   : > { %2915 = vmatmul.bf16.gmra.mxu3 %v11278_v42  ;;  %v10237_v44 = vld [vmem:[#allocation2 + $0x78] sm:$0xf0]  ;;  %v10285_v29 = vld [vmem:[#allocation2 + $0x7c] sm:$0xf0] }
 0x302   : > { %3195 = vst [vmem:[#allocation2 + $0xa0] sm:$0xff] %v3115_v58  ;;  %v9256_v51 = vor.u32 %v10237_v44, %v9255_v37  ;;  %3046 = vmatpush.bf16.msra.mxu2 %v8832_v6  ;;  %v9464_v4 = vor.u32 %v10285_v29, %v9463_v11 }
 0x303   : > { %v2671_v15 = vpop.f32.mrf.mxu2  ;;  %v2575_v46 = vpop.f32.mrf.mxu0 }
 0x304   : > { %v2720_v56 = vpop.f32.mrf.mxu3  ;;  %v2576_v5 = vadd.f32 %v2575_v46, %v11680_v22  ;;  %v2624_v7 = vpop.f32.mrf.mxu1  ;;  %5083 = vrot.lane.b32.xlu0 %v9256_v51, %s11074_s21  ;;  %v8255_v22 = vld [vmem:[#allocation7 + $0x188] sm:$0xf] }
 0x305   : > { %v11828_v30 = vadd.f32 %v2720_v56, %v2671_v15  ;;  %v8256_v44 = vor.u32 %v9993_v27, %v8255_v22 }
 0x306   : > { %v2625_v60 = vadd.f32 %v2624_v7, %v2576_v5 }
 0x307   : > { %2948 = vmatpush.bf16.msra.mxu0 %v8256_v44  ;;  %v9984_v44 = vld [vmem:[#allocation7 + $0x160] sm:$0xf0] }
 0x308   : > { %v3120_v8 = vpack.c.bf16 %v2625_v60, %v11678_v31  ;;  %4025 = vmatpush.bf16.xpose.msrb.mxu1 %v4003_v13  ;;  %v4000_v31 = vsel %vm3432_vm0, %v11750_v17, 0  ;;  %v8795_v17 = vld [vmem:[#allocation7 + $0x5c0] sm:$0xf] }
 0x309   : > { %v9467_v27 = vld [vmem:[#allocation2 + $0xa4] sm:$0xf] }
 0x30a   : > { %3200 = vst [vmem:[#allocation2 + $0xc4] sm:$0xff] %v3120_v8  ;;  %v10128_v8 = vld [vmem:[#allocation7 + $0x5e0] sm:$0xf0] }
 0x30b   : > { %v2673_v43 = vpop.f32.mrf.mxu2  ;;  %v2578_v37 = vpop.f32.mrf.mxu0 }
 0x30c   : > { %v2722_v58 = vpop.f32.mrf.mxu3  ;;  %v2579_v51 = vadd.f32 %v2578_v37, %v11691_v36  ;;  %v2627_v56 = vpop.f32.mrf.mxu1  ;;  %6207 = vrot.lane.b32.xlu0 %v9464_v4, %s11074_s21  ;;  %v9259_v36 = vld [vmem:[#allocation2 + $0xa0] sm:$0xf] }
 0x30d   : > { %v11835_v15 = vadd.f32 %v2722_v58, %v2673_v43  ;;  %v3997_v43 = vsel %vm3432_vm0, %v11754_v34, 0 }
 0x30e   : > { %v2628_v59 = vadd.f32 %v2627_v56, %v2579_v51  ;;  %2773 = vmatmul.bf16.gmra.mxu0 %v11294_v2 }
 0x30f   : > { %2822 = vmatmul.bf16.gmra.mxu1 %v11290_v0 }
 0x310   : > { %2871 = vmatmul.bf16.gmra.mxu2 %v11292_v1  ;;  %v3125_v46 = vpack.c.bf16 %v2628_v59, %v11689_v32  ;;  %4026 = vmatpush.bf16.xpose.msrb.mxu1 %v4000_v31  ;;  %v8796_v32 = vor.u32 %v10128_v8, %v8795_v17 }
 0x311   : > { %2920 = vmatmul.bf16.gmra.mxu3 %v11294_v2  ;;  %v10238_v5 = vld [vmem:[#allocation2 + $0xc0] sm:$0xf0]  ;;  %v10286_v4 = vld [vmem:[#allocation2 + $0xc4] sm:$0xf0] }
 0x312   : > { %3205 = vst [vmem:[#allocation2 + $0xe8] sm:$0xff] %v3125_v46  ;;  %v9260_v39 = vor.u32 %v10238_v5, %v9259_v36  ;;  %3047 = vmatpush.bf16.msra.mxu2 %v8796_v32  ;;  %v9468_v37 = vor.u32 %v10286_v4, %v9467_v27 }
 0x313   : > { %v2676_v7 = vpop.f32.mrf.mxu2  ;;  %v2580_v6 = vpop.f32.mrf.mxu0 }
 0x314   : > { %v2725_v45 = vpop.f32.mrf.mxu3  ;;  %v2581_v13 = vadd.f32 %v2580_v6, %v11698_v61  ;;  %v2629_v29 = vpop.f32.mrf.mxu1  ;;  %5085 = vrot.lane.b32.xlu0 %v9260_v39, %s11074_s21  ;;  %v8219_v61 = vld [vmem:[#allocation7 + $0x140] sm:$0xf] }
 0x315   : > { %v11846_v60 = vadd.f32 %v2725_v45, %v2676_v7  ;;  %v8220_v59 = vor.u32 %v9984_v44, %v8219_v61  ;;  %v9975_v61 = vld [vmem:[#allocation7 + $0x118] sm:$0xf0] }
 0x316   : > { %v2630_v11 = vadd.f32 %v2629_v29, %v2581_v13 }
 0x317   : > { %2949 = vmatpush.bf16.msra.mxu0 %v8220_v59 }
 0x318   : > { %v3130_v22 = vpack.c.bf16 %v2630_v11, %v11696_v14  ;;  %4027 = vmatpush.bf16.xpose.msrb.mxu1 %v3997_v43  ;;  %v10119_v43 = vld [vmem:[#allocation7 + $0x598] sm:$0xf0] }
 0x319   : > { %v9263_v5 = vld [vmem:[#allocation2 + $0xe8] sm:$0xf]  ;;  %v9471_v39 = vld [vmem:[#allocation2 + $0xec] sm:$0xf] }
 0x31a   : > { %3210 = vst [vmem:[#allocation2 + $0x10c] sm:$0xff] %v3130_v22 }
 0x31b   : > { %v2678_v58 = vpop.f32.mrf.mxu2  ;;  %v2583_v56 = vpop.f32.mrf.mxu0 }
 0x31c   : > { %v2727_v51 = vpop.f32.mrf.mxu3  ;;  %v2584_v46 = vadd.f32 %v2583_v56, %v11709_v18  ;;  %v2632_v36 = vpop.f32.mrf.mxu1  ;;  %6209 = vrot.lane.b32.xlu0 %v9468_v37, %s11074_s21  ;;  %v8183_v37 = vld [vmem:[#allocation7 + $0xf8] sm:$0xf] }
 0x31d   : > { %v11853_v31 = vadd.f32 %v2727_v51, %v2678_v58  ;;  %v8184_v56 = vor.u32 %v9975_v61, %v8183_v37 }
 0x31e   : > { %v2633_v34 = vadd.f32 %v2632_v36, %v2584_v46  ;;  %2778 = vmatmul.bf16.gmra.mxu0 %v11310_v26 }
 0x31f   : > { %2827 = vmatmul.bf16.gmra.mxu1 %v11306_v24  ;;  %2950 = vmatpush.bf16.msra.mxu0 %v8184_v56 }
 0x320   : > { %2876 = vmatmul.bf16.gmra.mxu2 %v11308_v25  ;;  %v3135_v14 = vpack.c.bf16 %v2633_v34, %v11707_v12  ;;  %v8759_v12 = vld [vmem:[#allocation7 + $0x578] sm:$0xf] }
 0x321   : > { %2925 = vmatmul.bf16.gmra.mxu3 %v11310_v26  ;;  %v10239_v7 = vld [vmem:[#allocation2 + $0x108] sm:$0xf0]  ;;  %v10287_v45 = vld [vmem:[#allocation2 + $0x10c] sm:$0xf0]  ;;  %v8760_v4 = vor.u32 %v10119_v43, %v8759_v12 }
 0x322   : > { %3215 = vst [vmem:[#allocation2 + $0x130] sm:$0xff] %v3135_v14  ;;  %v9264_v6 = vor.u32 %v10239_v7, %v9263_v5  ;;  %v9472_v13 = vor.u32 %v10287_v45, %v9471_v39 }
 0x323   : > { %v2681_v18 = vpop.f32.mrf.mxu2  ;;  %v2585_v17 = vpop.f32.mrf.mxu0  ;;  %3048 = vmatpush.bf16.msra.mxu2 %v8760_v4 }
 0x324   : > { %v2730_v29 = vpop.f32.mrf.mxu3  ;;  %v2586_v32 = vadd.f32 %v2585_v17, %v11718_v47  ;;  %v2634_v11 = vpop.f32.mrf.mxu1  ;;  %5087 = vrot.lane.b32.xlu1 %v9264_v6, %s11074_s21  ;;  %6211 = vrot.lane.b32.xlu2 %v9472_v13, %s11074_s21 }
 0x325   : > { %v11862_v8 = vadd.f32 %v2730_v29, %v2681_v18 }
 0x326   : > { %v2635_v22 = vadd.f32 %v2634_v11, %v2586_v32  ;;  %v10110_v32 = vld [vmem:[#allocation7 + $0x550] sm:$0xf0] }
 0x328   : > { %v3140_v27 = vpack.c.bf16 %v2635_v22, %v11716_v48  ;;  %v8147_v22 = vld [vmem:[#allocation7 + $0xb0] sm:$0xf] }
 0x329   : > { %v9475_v34 = vld [vmem:[#allocation2 + $0x134] sm:$0xf]  ;;  %v9267_v5 = vld [vmem:[#allocation2 + $0x130] sm:$0xf] }
 0x32a   : > { %3220 = vst [vmem:[#allocation2 + $0x154] sm:$0xff] %v3140_v27  ;;  %v9966_v27 = vld [vmem:[#allocation7 + $0xd0] sm:$0xf0] }
 0x32b   : > { %v2683_v58 = vpop.f32.mrf.mxu2  ;;  %v2588_v51 = vpop.f32.mrf.mxu0  ;;  %v8148_v61 = vor.u32 %v9966_v27, %v8147_v22 }
 0x32c   : > { %v2732_v44 = vpop.f32.mrf.mxu3  ;;  %v2589_v59 = vadd.f32 %v2588_v51, %v11730_v38  ;;  %v2637_v46 = vpop.f32.mrf.mxu1 }
 0x32d   : > { %v11868_v47 = vadd.f32 %v2732_v44, %v2683_v58  ;;  %2951 = vmatpush.bf16.msra.mxu0 %v8148_v61 }
 0x32e   : > { %v2638_v36 = vadd.f32 %v2637_v46, %v2589_v59  ;;  %2783 = vmatmul.bf16.gmra.mxu0 %v11326_v53 }
 0x32f   : > { %2832 = vmatmul.bf16.gmra.mxu1 %v11322_v49 }
 0x330   : > { %2881 = vmatmul.bf16.gmra.mxu2 %v11324_v50  ;;  %v3145_v48 = vpack.c.bf16 %v2638_v36, %v11728_v52  ;;  %v8723_v52 = vld [vmem:[#allocation7 + $0x530] sm:$0xf] }
 0x331   : > { %2930 = vmatmul.bf16.gmra.mxu3 %v11326_v53  ;;  %v10288_v14 = vld [vmem:[#allocation2 + $0x154] sm:$0xf0]  ;;  %v10240_v7 = vld [vmem:[#allocation2 + $0x150] sm:$0xf0]  ;;  %v8724_v11 = vor.u32 %v10110_v32, %v8723_v52  ;;  %v8111_v32 = vld [vmem:[#allocation7 + $0x68] sm:$0xf] }
 0x332   : > { %3225 = vst [vmem:[#allocation2 + $0x178] sm:$0xff] %v3145_v48  ;;  %v9476_v38 = vor.u32 %v10288_v14, %v9475_v34  ;;  %v9268_v45 = vor.u32 %v10240_v7, %v9267_v5  ;;  %v14077_v5 = vld [vmem:[#allocation38_spill] sm:$0xff] }
 0x333   : > { %v2686_v39 = vpop.f32.mrf.mxu2  ;;  %v2590_v6 = vpop.f32.mrf.mxu0  ;;  %3049 = vmatpush.bf16.msra.mxu2 %v8724_v11 }
 0x334   : > { %v2735_v18 = vpop.f32.mrf.mxu3  ;;  %v2591_v29 = vadd.f32 %v2590_v6, %v11736_v28  ;;  %v2639_v17 = vpop.f32.mrf.mxu1  ;;  %6213 = vrot.lane.b32.xlu1 %v9476_v38, %s11074_s21  ;;  %5089 = vrot.lane.b32.xlu2 %v9268_v45, %s11074_s21  ;;  %v8687_v45 = vld [vmem:[#allocation7 + $0x4e8] sm:$0xf] }
 0x335   : > { %v11876_v13 = vadd.f32 %v2735_v18, %v2686_v39  ;;  %v10101_v18 = vld [vmem:[#allocation7 + $0x508] sm:$0xf0] }
 0x336   : > { %v2640_v12 = vadd.f32 %v2639_v17, %v2591_v29  ;;  %v8688_v6 = vor.u32 %v10101_v18, %v8687_v45  ;;  %v14078_v29 = vld [vmem:[#allocation37_spill] sm:$0xff] }
 0x338   : > { %v3150_v43 = vpack.c.bf16 %v2640_v12, %v11734_v33  ;;  %3050 = vmatpush.bf16.msra.mxu2 %v8688_v6 }
 0x339   : > { %v9271_v59 = vld [vmem:[#allocation2 + $0x178] sm:$0xf]  ;;  %v9479_v52 = vld [vmem:[#allocation2 + $0x17c] sm:$0xf] }
 0x33a   : > { %3230 = vst [vmem:[#allocation2 + $0x19c] sm:$0xff] %v3150_v43  ;;  %v9957_v43 = vld [vmem:[#allocation7 + $0x88] sm:$0xf0] }
 0x33b   : > { %v2688_v4 = vpop.f32.mrf.mxu2  ;;  %v2593_v37 = vpop.f32.mrf.mxu0 }
 0x33c   : > { %v2737_v58 = vpop.f32.mrf.mxu3  ;;  %v2594_v44 = vadd.f32 %v2593_v37, %v11748_v57  ;;  %v2642_v51 = vpop.f32.mrf.mxu1  ;;  %v10092_v37 = vld [vmem:[#allocation7 + $0x4c0] sm:$0xf0] }
 0x33d   : > { %v11882_v28 = vadd.f32 %v2737_v58, %v2688_v4  ;;  %v8651_v4 = vld [vmem:[#allocation7 + $0x4a0] sm:$0xf]  ;;  %v8112_v58 = vor.u32 %v9957_v43, %v8111_v32 }
 0x33e   : > { %v2643_v56 = vadd.f32 %v2642_v51, %v2594_v44  ;;  %2788 = vmatmul.bf16.gmra.mxu0 %v14044_v55  ;;  %v14079_v44 = vld [vmem:[#allocation43_spill] sm:$0xff] }
 0x33f   : > { %2837 = vmatmul.bf16.gmra.mxu1 %v14045_v3  ;;  %2952 = vmatpush.bf16.msra.mxu0 %v8112_v58 }
 0x340   : > { %2886 = vmatmul.bf16.gmra.mxu2 %v14046_v16  ;;  %v3155_v33 = vpack.c.bf16 %v2643_v56, %v11746_v54 }
 0x341   : > { %2935 = vmatmul.bf16.gmra.mxu3 %v14044_v55  ;;  %v10241_v46 = vld [vmem:[#allocation2 + $0x198] sm:$0xf0]  ;;  %v10289_v54 = vld [vmem:[#allocation2 + $0x19c] sm:$0xf0] }
 0x342   : > { %3235 = vst [vmem:[#allocation2 + $0x1c0] sm:$0xff] %v3155_v33  ;;  %v9272_v48 = vor.u32 %v10241_v46, %v9271_v59  ;;  %v9480_v12 = vor.u32 %v10289_v54, %v9479_v52  ;;  %v8652_v33 = vor.u32 %v10092_v37, %v8651_v4  ;;  %v14080_v46 = vld [vmem:[#allocation25_spill] sm:$0xff] }
 0x343   : > { %v2691_v36 = vpop.f32.mrf.mxu2  ;;  %v2595_v57 = vpop.f32.mrf.mxu0 }
 0x344   : > { %v2740_v34 = vpop.f32.mrf.mxu3  ;;  %v2596_v7 = vadd.f32 %v2595_v57, %v14077_v5  ;;  %v2644_v39 = vpop.f32.mrf.mxu1  ;;  %5091 = vrot.lane.b32.xlu1 %v9272_v48, %s11074_s21  ;;  %3051 = vmatpush.bf16.msra.mxu2 %v8652_v33  ;;  %v9948_v48 = vld [vmem:[#allocation7 + $0x40] sm:$0xf0]  ;;  %v14082_v57 = vld [vmem:[#allocation24_spill] sm:$0xff] }
 0x345   : > { %v11890_v14 = vadd.f32 %v2740_v34, %v2691_v36  ;;  %v8075_v36 = vld [vmem:[#allocation7 + $0x20] sm:$0xf]  ;;  %v14081_v34 = vld [vmem:[#allocation23_spill] sm:$0xff] }
 0x346   : > { %v2645_v38 = vadd.f32 %v2644_v39, %v2596_v7  ;;  %v8076_v5 = vor.u32 %v9948_v48, %v8075_v36  ;;  %v14083_v7 = vld [vmem:[#allocation42_spill] sm:$0xff]  ;;  %v8907_v33 = vld [vmem:[#allocation2] sm:$0xf]  ;;  %v14084_v36 = vld [vmem:[#allocation17_spill] sm:$0xff] }
 0x347   : > { %v14086_v48 = vld [vmem:[#allocation19_spill] sm:$0xff] }
 0x348   : > { %v3160_v17 = vpack.c.bf16 %v2645_v38, %v14078_v29  ;;  %2953 = vmatpush.bf16.msra.mxu0 %v8076_v5 }
 0x349   : > { %v9483_v38 = vld [vmem:[#allocation2 + $0x1c4] sm:$0xf]  ;;  %v9275_v18 = vld [vmem:[#allocation2 + $0x1c0] sm:$0xf] }
 0x34a   : > { %3240 = vst [vmem:[#allocation2 + $0x1e4] sm:$0xff] %v3160_v17 }
 0x34b   : > { %v2693_v11 = vpop.f32.mrf.mxu2  ;;  %v2598_v27 = vpop.f32.mrf.mxu0 }
 0x34c   : > { %v2742_v22 = vpop.f32.mrf.mxu3  ;;  %v2599_v51 = vadd.f32 %v2598_v27, %v14079_v44  ;;  %v2647_v56 = vpop.f32.mrf.mxu1  ;;  %6215 = vrot.lane.b32.xlu1 %v9480_v12, %s11074_s21  ;;  %v10156_v44 = vld [vmem:[#allocation2 + $0x20] sm:$0xf0] }
 0x34d   : > { %v11895_v61 = vadd.f32 %v2742_v22, %v2693_v11 }
 0x34e   : > { %v2648_v59 = vadd.f32 %v2647_v56, %v2599_v51  ;;  %2793 = vmatmul.bf16.gmra.mxu0 %v14080_v46 }
 0x34f   : > { %2842 = vmatmul.bf16.gmra.mxu1 %v14081_v34 }
 0x350   : > { %2891 = vmatmul.bf16.gmra.mxu2 %v14082_v57  ;;  %v3165_v39 = vpack.c.bf16 %v2648_v59, %v14083_v7  ;;  %v8908_v59 = vor.u32 %v10156_v44, %v8907_v33  ;;  %v9171_v33 = vld [vmem:[#allocation2 + $0x1c0] sm:$0xf] }
 0x351   : > { %2940 = vmatmul.bf16.gmra.mxu3 %v14080_v46  ;;  %v10290_v45 = vld [vmem:[#allocation2 + $0x1e4] sm:$0xf0]  ;;  %v10242_v54 = vld [vmem:[#allocation2 + $0x1e0] sm:$0xf0] }
 0x352   : > { %3245 = vst [vmem:[#allocation2 + $0x208] sm:$0xff] %v3165_v39  ;;  %v9484_v29 = vor.u32 %v10290_v45, %v9483_v38  ;;  %v9276_v17 = vor.u32 %v10242_v54, %v9275_v18 }
 0x353   : > { %v2696_v6 = vpop.f32.mrf.mxu2  ;;  %v2600_v32 = vpop.f32.mrf.mxu0 }
 0x354   : > { %v2745_v52 = vpop.f32.mrf.mxu3  ;;  %v2601_v12 = vadd.f32 %v2600_v32, %v11780_v9  ;;  %v2649_v43 = vpop.f32.mrf.mxu1  ;;  %6217 = vrot.lane.b32.xlu1 %v9484_v29, %s11074_s21  ;;  %5093 = vrot.lane.b32.xlu2 %v9276_v17, %s11074_s21  ;;  %v14085_v9 = vld [vmem:[#allocation18_spill] sm:$0xff] }
 0x355   : > { %v11904_v11 = vadd.f32 %v2745_v52, %v2696_v6 }
 0x356   : > { %v2650_v4 = vadd.f32 %v2649_v43, %v2601_v12 }
 0x358   : > { %v3170_v22 = vpack.c.bf16 %v2650_v4, %v11778_v10  ;;  %v14087_v4 = vld [vmem:[#allocation47_spill] sm:$0xff] }
 0x359   : > { %v9279_v5 = vld [vmem:[#allocation2 + $0x208] sm:$0xf]  ;;  %v9487_v10 = vld [vmem:[#allocation2 + $0x20c] sm:$0xf] }
 0x35a   : > { %3250 = vst [vmem:[#allocation2 + $0x22c] sm:$0xff] %v3170_v22  ;;  %v9175_v7 = vld [vmem:[#allocation2 + $0x208] sm:$0xf] }
 0x35b   : > { %v2698_v27 = vpop.f32.mrf.mxu2  ;;  %v2759_v37 = vpop.f32.mrf.mxu0 }
 0x35c   : > { %v2747_v58 = vpop.f32.mrf.mxu3  ;;  %v2808_v56 = vpop.f32.mrf.mxu1  ;;  %v2760_v22 = vadd.f32 %v2759_v37, %v14087_v4  ;;  %v8911_v37 = vld [vmem:[#allocation2 + $0x48] sm:$0xf] }
 0x35d   : > { %v11910_v51 = vadd.f32 %v2747_v58, %v2698_v27  ;;  %v10218_v58 = vld [vmem:[#allocation2 + $0x1e0] sm:$0xf0] }
 0x35e   : > { %2954 = vmatmul.bf16.vlgmr.msra.gmra.mxu0 %v14084_v36 }
 0x35f   : > { %3003 = vmatmul.bf16.vlgmr.msra.gmra.mxu1 %v14085_v9 }
 0x360   : > { %3052 = vmatmul.bf16.vlgmr.msra.gmra.mxu2 %v14086_v48 }
 0x361   : > { %8969 = vmatmul.msk.bf16.vlgmr.msra.gmra.mxu3 %vm3432_vm0, %v8908_v59  ;;  %v10243_v39 = vld [vmem:[#allocation2 + $0x228] sm:$0xf0]  ;;  %v10291_v38 = vld [vmem:[#allocation2 + $0x22c] sm:$0xf0]  ;;  %v9172_v59 = vor.u32 %v10218_v58, %v9171_v33 }
 0x362   : > { %v10219_v45 = vld [vmem:[#allocation2 + $0x228] sm:$0xf0]  ;;  %v9280_v54 = vor.u32 %v10243_v39, %v9279_v5  ;;  %v9488_v6 = vor.u32 %v10291_v38, %v9487_v10  ;;  %v9163_v58 = vld [vmem:[#allocation2 + $0x130] sm:$0xf] }
 0x363   : > { %v2857_v18 = vpop.f32.mrf.mxu2  ;;  %v9176_v29 = vor.u32 %v10219_v45, %v9175_v7  ;;  %v2761_v32 = vpop.f32.mrf.mxu0  ;;  %v10157_v5 = vld [vmem:[#allocation2 + $0x68] sm:$0xf0]  ;;  %v4602_v7 = vsel %vm3432_vm0, %v9172_v59, 0  ;;  %v10217_v45 = vld [vmem:[#allocation2 + $0x198] sm:$0xf0] }
 0x364   : > { %v2858_v17 = vadd.f32 %v2857_v18, %v2808_v56  ;;  %v2906_v52 = vpop.f32.mrf.mxu3  ;;  %v2810_v12 = vpop.f32.mrf.mxu1  ;;  %5095 = vrot.lane.b32.xlu1 %v9280_v54, %s11074_s21  ;;  %6219 = vrot.lane.b32.xlu2 %v9488_v6, %s11074_s21  ;;  %v2762_v39 = vadd.f32 %v2761_v32, %v11800_v62  ;;  %v8912_v18 = vor.u32 %v10157_v5, %v8911_v37  ;;  %v9167_v6 = vld [vmem:[#allocation2 + $0x178] sm:$0xf] }
 0x365   : > { %v4605_v43 = vsel %vm3432_vm0, %v9176_v29, 0  ;;  %v9168_v29 = vor.u32 %v10217_v45, %v9167_v6  ;;  %v8915_v45 = vld [vmem:[#allocation2 + $0x90] sm:$0xf] }
 0x366   : > { %v2907_v27 = vadd.f32 %v2906_v52, %v2858_v17  ;;  %4607 = vmatpush.bf16.xpose.msrb.mxu3 %v4605_v43 }
 0x367   : > { %v4599_v43 = vsel %vm3432_vm0, %v9168_v29, 0  ;;  %v9159_v29 = vld [vmem:[#allocation2 + $0xe8] sm:$0xf] }
 0x368   : > { %v3096_v44 = vpack.c.bf16 %v2907_v27, %v2760_v22  ;;  %v10216_v22 = vld [vmem:[#allocation2 + $0x150] sm:$0xf0] }
 0x369   : > { %v9164_v59 = vor.u32 %v10216_v22, %v9163_v58  ;;  %v9155_v22 = vld [vmem:[#allocation2 + $0xa0] sm:$0xf] }
 0x36a   : > { %3176 = vst [vmem:[#allocation2 + $0x18] sm:$0xff] %v3096_v44 }
 0x36b   : > { %v2859_v36 = vpop.f32.mrf.mxu2  ;;  %v2764_v48 = vpop.f32.mrf.mxu0 }
 0x36c   : > { %v2860_v56 = vadd.f32 %v2859_v36, %v2810_v12  ;;  %v2908_v9 = vpop.f32.mrf.mxu3  ;;  %v2813_v10 = vpop.f32.mrf.mxu1  ;;  %v2765_v4 = vadd.f32 %v2764_v48, %v11811_v23  ;;  %v10158_v48 = vld [vmem:[#allocation2 + $0xb0] sm:$0xf0] }
 0x36e   : > { %v2909_v38 = vadd.f32 %v2908_v9, %v2860_v56  ;;  %4608 = vmatpush.bf16.xpose.msrb.mxu3 %v4602_v7  ;;  %2959 = vmatmul.bf16.gmra.mxu0 %v11258_v19 }
 0x36f   : > { %3008 = vmatmul.bf16.gmra.mxu1 %v11260_v20 }
 0x370   : > { %v3101_v54 = vpack.c.bf16 %v2909_v38, %v2762_v39  ;;  %3057 = vmatmul.bf16.gmra.mxu2 %v11262_v21  ;;  %v4596_v39 = vsel %vm3432_vm0, %v9164_v59, 0 }
 0x371   : > { %8970 = vmatmul.msk.bf16.gmra.mxu3 %vm3432_vm0, %v8912_v18  ;;  %v9083_v27 = vld [vmem:[#allocation2 + $0x18] sm:$0xf]  ;;  %v9291_v44 = vld [vmem:[#allocation2 + $0x1c] sm:$0xf]  ;;  %v10215_v18 = vld [vmem:[#allocation2 + $0x108] sm:$0xf0] }
 0x372   : > { %3181 = vst [vmem:[#allocation2 + $0x3c] sm:$0xff] %v3101_v54  ;;  %v8916_v54 = vor.u32 %v10158_v48, %v8915_v45 }
 0x373   : > { %v2862_v17 = vpop.f32.mrf.mxu2  ;;  %v2766_v32 = vpop.f32.mrf.mxu0 }
 0x374   : > { %v2863_v52 = vadd.f32 %v2862_v17, %v2813_v10  ;;  %v2911_v62 = vpop.f32.mrf.mxu3  ;;  %v2815_v12 = vpop.f32.mrf.mxu1  ;;  %v2767_v38 = vadd.f32 %v2766_v32, %v11818_v63  ;;  %v9160_v17 = vor.u32 %v10215_v18, %v9159_v29 }
 0x376   : > { %v2912_v19 = vadd.f32 %v2911_v62, %v2863_v52  ;;  %4609 = vmatpush.bf16.xpose.msrb.mxu3 %v4599_v43  ;;  %v4593_v43 = vsel %vm3432_vm0, %v9160_v17, 0 }
 0x378   : > { %v3106_v20 = vpack.c.bf16 %v2912_v19, %v2765_v4  ;;  %v10214_v19 = vld [vmem:[#allocation2 + $0xc0] sm:$0xf0] }
 0x379   : > { %v10196_v21 = vld [vmem:[#allocation2 + $0x38] sm:$0xf0]  ;;  %v10244_v33 = vld [vmem:[#allocation2 + $0x3c] sm:$0xf0] }
 0x37a   : > { %3186 = vst [vmem:[#allocation2 + $0x60] sm:$0xff] %v3106_v20  ;;  %v9084_v36 = vor.u32 %v10196_v21, %v9083_v27  ;;  %v9292_v56 = vor.u32 %v10244_v33, %v9291_v44  ;;  %v9156_v27 = vor.u32 %v10214_v19, %v9155_v22 }
 0x37b   : > { %v2864_v9 = vpop.f32.mrf.mxu2  ;;  %v2769_v23 = vpop.f32.mrf.mxu0 }
 0x37c   : > { %v2865_v5 = vadd.f32 %v2864_v9, %v2815_v12  ;;  %v2913_v10 = vpop.f32.mrf.mxu3  ;;  %4245 = vrot.lane.b32.xlu0 %v9084_v36, %s11074_s21  ;;  %5370 = vrot.lane.b32.xlu2 %v9292_v56, %s11074_s21  ;;  %v2818_v7 = vpop.f32.mrf.mxu1  ;;  %v2770_v4 = vadd.f32 %v2769_v23, %v11828_v30  ;;  %v10159_v36 = vld [vmem:[#allocation2 + $0xf8] sm:$0xf0]  ;;  %v4590_v30 = vsel %vm3432_vm0, %v9156_v27, 0 }
 0x37d   : > { %v10213_v23 = vld [vmem:[#allocation2 + $0x78] sm:$0xf0] }
 0x37e   : > { %v2914_v37 = vadd.f32 %v2913_v10, %v2865_v5  ;;  %4610 = vmatpush.bf16.xpose.msrb.mxu3 %v4596_v39  ;;  %2964 = vmatmul.bf16.gmra.mxu0 %v11274_v40  ;;  %v8919_v10 = vld [vmem:[#allocation2 + $0xd8] sm:$0xf] }
 0x37f   : > { %3013 = vmatmul.bf16.gmra.mxu1 %v11276_v41  ;;  %v8920_v48 = vor.u32 %v10159_v36, %v8919_v10  ;;  %v10266_v10 = vld [vmem:[#allocation2 + $0x1e4] sm:$0xf0] }
 0x380   : > { %v3111_v6 = vpack.c.bf16 %v2914_v37, %v2767_v38  ;;  %3062 = vmatmul.bf16.gmra.mxu2 %v11278_v42  ;;  %v9151_v38 = vld [vmem:[#allocation2 + $0x58] sm:$0xf]  ;;  %v11944_v37 = vpop.permute.xlu1 %6163 }
 0x381   : > { %8971 = vmatmul.msk.bf16.gmra.mxu3 %vm3432_vm0, %v8916_v54  ;;  %v9087_v20 = vld [vmem:[#allocation2 + $0x60] sm:$0xf]  ;;  %14088 = vst [vmem:[#allocation38_spill] sm:$0xff] %v11944_v37  ;;  %v9295_v45 = vld [vmem:[#allocation2 + $0x64] sm:$0xf] }
 0x382   : > { %3191 = vst [vmem:[#allocation2 + $0x84] sm:$0xff] %v3111_v6 }
 0x383   : > { %v2867_v52 = vpop.f32.mrf.mxu2  ;;  %v2771_v32 = vpop.f32.mrf.mxu0 }
 0x384   : > { %v2868_v62 = vadd.f32 %v2867_v52, %v2818_v7  ;;  %v2916_v63 = vpop.f32.mrf.mxu3  ;;  %v2820_v12 = vpop.f32.mrf.mxu1  ;;  %v2772_v9 = vadd.f32 %v2771_v32, %v11835_v15  ;;  %v9152_v15 = vor.u32 %v10213_v23, %v9151_v38 }
 0x386   : > { %v2917_v40 = vadd.f32 %v2916_v63, %v2868_v62  ;;  %4611 = vmatpush.bf16.xpose.msrb.mxu3 %v4593_v43  ;;  %v10212_v62 = vld [vmem:[#allocation2 + $0x30] sm:$0xf0]  ;;  %v10267_v63 = vld [vmem:[#allocation2 + $0x22c] sm:$0xf0] }
 0x388   : > { %v3116_v41 = vpack.c.bf16 %v2917_v40, %v2770_v4  ;;  %v11950_v43 = vpop.permute.xlu1 %5081 }
 0x389   : > { %v10197_v42 = vld [vmem:[#allocation2 + $0x80] sm:$0xf0]  ;;  %v10245_v7 = vld [vmem:[#allocation2 + $0x84] sm:$0xf0] }
 0x38a   : > { %3196 = vst [vmem:[#allocation2 + $0xa8] sm:$0xff] %v3116_v41  ;;  %v9088_v58 = vor.u32 %v10197_v42, %v9087_v20  ;;  %v9296_v18 = vor.u32 %v10245_v7, %v9295_v45  ;;  %v9383_v41 = vld [vmem:[#allocation2 + $0x20c] sm:$0xf] }
 0x38b   : > { %v2869_v21 = vpop.f32.mrf.mxu2  ;;  %v2774_v59 = vpop.f32.mrf.mxu0  ;;  %v9384_v20 = vor.u32 %v10267_v63, %v9383_v41 }
 0x38c   : > { %v2870_v44 = vadd.f32 %v2869_v21, %v2820_v12  ;;  %v2918_v33 = vpop.f32.mrf.mxu3  ;;  %4247 = vrot.lane.b32.xlu0 %v9088_v58, %s11074_s21  ;;  %v2823_v56 = vpop.f32.mrf.mxu1  ;;  %v2775_v52 = vadd.f32 %v2774_v59, %v11846_v60  ;;  %v9147_v12 = vld [vmem:[#allocation2 + $0x10] sm:$0xf]  ;;  %v10160_v21 = vld [vmem:[#allocation2 + $0x140] sm:$0xf0] }
 0x38d   : > { %v9148_v19 = vor.u32 %v10212_v62, %v9147_v12 }
 0x38e   : > { %v2919_v5 = vadd.f32 %v2918_v33, %v2870_v44  ;;  %4612 = vmatpush.bf16.xpose.msrb.mxu3 %v4590_v30  ;;  %2969 = vmatmul.bf16.gmra.mxu0 %v11290_v0  ;;  %v5729_v30 = vsel %vm3432_vm0, %v9384_v20, 0 }
 0x38f   : > { %3018 = vmatmul.bf16.gmra.mxu1 %v11292_v1  ;;  %v4587_v1 = vsel %vm3432_vm0, %v9152_v15, 0  ;;  %v4584_v33 = vsel %vm3432_vm0, %v9148_v19, 0 }
 0x390   : > { %v3121_v39 = vpack.c.bf16 %v2919_v5, %v2772_v9  ;;  %3067 = vmatmul.bf16.gmra.mxu2 %v11294_v2  ;;  %v11960_v38 = vpop.permute.xlu1 %6205 }
 0x391   : > { %8972 = vmatmul.msk.bf16.gmra.mxu3 %vm3432_vm0, %v8920_v48  ;;  %v9091_v4 = vld [vmem:[#allocation2 + $0xa8] sm:$0xf]  ;;  %v9299_v48 = vld [vmem:[#allocation2 + $0xac] sm:$0xf] }
 0x392   : > { %3201 = vst [vmem:[#allocation2 + $0xcc] sm:$0xff] %v3121_v39 }
 0x393   : > { %v2872_v54 = vpop.f32.mrf.mxu2  ;;  %v2776_v0 = vpop.f32.mrf.mxu0 }
 0x394   : > { %v2873_v6 = vadd.f32 %v2872_v54, %v2823_v56  ;;  %v2921_v29 = vpop.f32.mrf.mxu3  ;;  %5372 = vrot.lane.b32.xlu0 %v9296_v18, %s11074_s21  ;;  %v2825_v17 = vpop.f32.mrf.mxu1  ;;  %v2777_v59 = vadd.f32 %v2776_v0, %v11853_v31  ;;  %v8923_v56 = vld [vmem:[#allocation2 + $0x120] sm:$0xf]  ;;  %v9379_v31 = vld [vmem:[#allocation2 + $0x1c4] sm:$0xf] }
 0x395   : > { %v8924_v9 = vor.u32 %v10160_v21, %v8923_v56  ;;  %v9380_v39 = vor.u32 %v10266_v10, %v9379_v31 }
 0x396   : > { %v2922_v2 = vadd.f32 %v2921_v29, %v2873_v6  ;;  %4613 = vmatpush.bf16.xpose.msrb.mxu3 %v4587_v1  ;;  %v10265_v29 = vld [vmem:[#allocation2 + $0x19c] sm:$0xf0]  ;;  %v9375_v1 = vld [vmem:[#allocation2 + $0x17c] sm:$0xf] }
 0x397   : > { %v9376_v12 = vor.u32 %v10265_v29, %v9375_v1  ;;  %v8931_v1 = vld [vmem:[#allocation2 + $0x1b0] sm:$0xf] }
 0x398   : > { %v3126_v32 = vpack.c.bf16 %v2922_v2, %v2775_v52 }
 0x399   : > { %v10198_v40 = vld [vmem:[#allocation2 + $0xc8] sm:$0xf0]  ;;  %v10246_v5 = vld [vmem:[#allocation2 + $0xcc] sm:$0xf0] }
 0x39a   : > { %3206 = vst [vmem:[#allocation2 + $0xf0] sm:$0xff] %v3126_v32  ;;  %v9092_v22 = vor.u32 %v10198_v40, %v9091_v4  ;;  %v9300_v7 = vor.u32 %v10246_v5, %v9299_v48  ;;  %v11965_v4 = vpop.permute.xlu1 %5087 }
 0x39b   : > { %v2874_v42 = vpop.f32.mrf.mxu2  ;;  %v2779_v60 = vpop.f32.mrf.mxu0 }
 0x39c   : > { %v2875_v27 = vadd.f32 %v2874_v42, %v2825_v17  ;;  %v2923_v58 = vpop.f32.mrf.mxu3  ;;  %4249 = vrot.lane.b32.xlu0 %v9092_v22, %s11074_s21  ;;  %v2828_v44 = vpop.f32.mrf.mxu1  ;;  %v10161_v22 = vld [vmem:[#allocation2 + $0x188] sm:$0xf0] }
 0x39e   : > { %v2924_v36 = vadd.f32 %v2923_v58, %v2875_v27  ;;  %4614 = vmatpush.bf16.xpose.msrb.mxu3 %v4584_v33  ;;  %2974 = vmatmul.bf16.gmra.mxu0 %v11306_v24  ;;  %v8927_v58 = vld [vmem:[#allocation2 + $0x168] sm:$0xf] }
 0x39f   : > { %3023 = vmatmul.bf16.gmra.mxu1 %v11308_v25  ;;  %v2780_v25 = vadd.f32 %v2779_v60, %v11862_v8  ;;  %v5723_v60 = vsel %vm3432_vm0, %v9376_v12, 0  ;;  %v8928_v21 = vor.u32 %v10161_v22, %v8927_v58 }
 0x3a0   : > { %v3131_v23 = vpack.c.bf16 %v2924_v36, %v2777_v59  ;;  %3072 = vmatmul.bf16.gmra.mxu2 %v11310_v26  ;;  %v5726_v26 = vsel %vm3432_vm0, %v9380_v39, 0  ;;  %v9371_v59 = vld [vmem:[#allocation2 + $0x134] sm:$0xf]  ;;  %v9367_v39 = vld [vmem:[#allocation2 + $0xec] sm:$0xf] }
 0x3a1   : > { %8973 = vmatmul.msk.bf16.gmra.mxu3 %vm3432_vm0, %v8924_v9  ;;  %v9303_v17 = vld [vmem:[#allocation2 + $0xf4] sm:$0xf]  ;;  %v9095_v2 = vld [vmem:[#allocation2 + $0xf0] sm:$0xf] }
 0x3a2   : > { %3211 = vst [vmem:[#allocation2 + $0x114] sm:$0xff] %v3131_v23 }
 0x3a3   : > { %v2877_v45 = vpop.f32.mrf.mxu2  ;;  %v2781_v24 = vpop.f32.mrf.mxu0 }
 0x3a4   : > { %v2878_v15 = vadd.f32 %v2877_v45, %v2828_v44  ;;  %v2926_v18 = vpop.f32.mrf.mxu3  ;;  %5374 = vrot.lane.b32.xlu0 %v9300_v7, %s11074_s21  ;;  %v2830_v54 = vpop.f32.mrf.mxu1  ;;  %v2782_v42 = vadd.f32 %v2781_v24, %v11868_v47  ;;  %v10264_v44 = vld [vmem:[#allocation2 + $0x154] sm:$0xf0] }
 0x3a5   : > { %v9372_v36 = vor.u32 %v10264_v44, %v9371_v59  ;;  %v11979_v45 = vpop.permute.xlu2 %6155 }
 0x3a6   : > { %5731 = vmatpush.bf16.xpose.msra.mxu3 %v5729_v30  ;;  %v2927_v6 = vadd.f32 %v2926_v18, %v2878_v15  ;;  %v11975_v47 = vpop.permute.xlu1 %6213 }
 0x3a7   : > { %v5720_v48 = vsel %vm3432_vm0, %v9372_v36, 0 }
 0x3a8   : > { %v3136_v0 = vpack.c.bf16 %v2927_v6, %v2780_v25 }
 0x3a9   : > { %v10247_v52 = vld [vmem:[#allocation2 + $0x114] sm:$0xf0]  ;;  %v10199_v62 = vld [vmem:[#allocation2 + $0x110] sm:$0xf0] }
 0x3aa   : > { %3216 = vst [vmem:[#allocation2 + $0x138] sm:$0xff] %v3136_v0  ;;  %v9304_v63 = vor.u32 %v10247_v52, %v9303_v17  ;;  %v9096_v32 = vor.u32 %v10199_v62, %v9095_v2 }
 0x3ab   : > { %v2879_v40 = vpop.f32.mrf.mxu2  ;;  %v2784_v41 = vpop.f32.mrf.mxu0 }
 0x3ac   : > { %v2880_v19 = vadd.f32 %v2879_v40, %v2830_v54  ;;  %v2928_v8 = vpop.f32.mrf.mxu3  ;;  %5376 = vrot.lane.b32.xlu1 %v9304_v63, %s11074_s21  ;;  %4251 = vrot.lane.b32.xlu0 %v9096_v32, %s11074_s21  ;;  %v2833_v20 = vpop.f32.mrf.mxu1  ;;  %v2785_v23 = vadd.f32 %v2784_v41, %v11876_v13  ;;  %v10262_v63 = vld [vmem:[#allocation2 + $0xc4] sm:$0xf0]  ;;  %v9363_v40 = vld [vmem:[#allocation2 + $0xa4] sm:$0xf] }
 0x3ae   : > { %5732 = vmatpush.bf16.xpose.msra.mxu3 %v5726_v26  ;;  %v2929_v27 = vadd.f32 %v2928_v8, %v2880_v19  ;;  %2979 = vmatmul.bf16.gmra.mxu0 %v11322_v49  ;;  %v10162_v26 = vld [vmem:[#allocation2 + $0x1d0] sm:$0xf0]  ;;  %v9364_v19 = vor.u32 %v10262_v63, %v9363_v40  ;;  %v11990_v8 = vpop.permute.xlu2 %6161 }
 0x3af   : > { %3028 = vmatmul.bf16.gmra.mxu1 %v11324_v50  ;;  %v10263_v50 = vld [vmem:[#allocation2 + $0x10c] sm:$0xf0]  ;;  %v8932_v2 = vor.u32 %v10162_v26, %v8931_v1 }
 0x3b0   : > { %v3141_v33 = vpack.c.bf16 %v2929_v27, %v2782_v42  ;;  %3077 = vmatmul.bf16.gmra.mxu2 %v11326_v53  ;;  %v9368_v18 = vor.u32 %v10263_v50, %v9367_v39  ;;  %v5714_v58 = vsel %vm3432_vm0, %v9364_v19, 0  ;;  %v10163_v50 = vld [vmem:[#allocation2 + $0x218] sm:$0xf0]  ;;  %v8935_v39 = vld [vmem:[#allocation2 + $0x1f8] sm:$0xf] }
 0x3b1   : > { %8974 = vmatmul.msk.bf16.gmra.mxu3 %vm3432_vm0, %v8928_v21  ;;  %v9099_v31 = vld [vmem:[#allocation2 + $0x138] sm:$0xf]  ;;  %v9307_v12 = vld [vmem:[#allocation2 + $0x13c] sm:$0xf] }
 0x3b2   : > { %3221 = vst [vmem:[#allocation2 + $0x15c] sm:$0xff] %v3141_v33  ;;  %v5717_v52 = vsel %vm3432_vm0, %v9368_v18, 0  ;;  %v9359_v33 = vld [vmem:[#allocation2 + $0x5c] sm:$0xf] }
 0x3b3   : > { %v2882_v56 = vpop.f32.mrf.mxu2  ;;  %v2786_v5 = vpop.f32.mrf.mxu0 }
 0x3b4   : > { %v2883_v30 = vadd.f32 %v2882_v56, %v2833_v20  ;;  %v2931_v9 = vpop.f32.mrf.mxu3  ;;  %v2835_v10 = vpop.f32.mrf.mxu1  ;;  %v2787_v0 = vadd.f32 %v2786_v5, %v11882_v28 }
 0x3b6   : > { %5733 = vmatpush.bf16.xpose.msra.mxu3 %v5723_v60  ;;  %v2932_v49 = vadd.f32 %v2931_v9, %v2883_v30  ;;  %v11981_v24 = vpop.permute.xlu1 %5091  ;;  %v10261_v60 = vld [vmem:[#allocation2 + $0x7c] sm:$0xf0] }
 0x3b7   : > { %v9360_v5 = vor.u32 %v10261_v60, %v9359_v33 }
 0x3b8   : > { %v3146_v53 = vpack.c.bf16 %v2932_v49, %v2785_v23 }
 0x3b9   : > { %v10200_v7 = vld [vmem:[#allocation2 + $0x158] sm:$0xf0]  ;;  %v10248_v62 = vld [vmem:[#allocation2 + $0x15c] sm:$0xf0] }
 0x3ba   : > { %3226 = vst [vmem:[#allocation2 + $0x180] sm:$0xff] %v3146_v53  ;;  %v9100_v15 = vor.u32 %v10200_v7, %v9099_v31  ;;  %v9308_v28 = vor.u32 %v10248_v62, %v9307_v12 }
 0x3bb   : > { %v2884_v54 = vpop.f32.mrf.mxu2  ;;  %v2789_v13 = vpop.f32.mrf.mxu0 }
 0x3bc   : > { %v2885_v25 = vadd.f32 %v2884_v54, %v2835_v10  ;;  %v2933_v6 = vpop.f32.mrf.mxu3  ;;  %4253 = vrot.lane.b32.xlu2 %v9100_v15, %s11074_s21  ;;  %v2838_v29 = vpop.f32.mrf.mxu1  ;;  %v5711_v15 = vsel %vm3432_vm0, %v9360_v5, 0  ;;  %v8936_v54 = vor.u32 %v10163_v50, %v8935_v39 }
 0x3bd   : > { %v11997_v10 = vpop.permute.xlu2 %6211 }
 0x3be   : > { %5734 = vmatpush.bf16.xpose.msra.mxu3 %v5720_v48  ;;  %v2934_v17 = vadd.f32 %v2933_v6, %v2885_v25  ;;  %2984 = vmatmul.bf16.gmra.mxu0 %v14045_v3  ;;  %v11993_v42 = vpop.permute.xlu1 %6215  ;;  %v10260_v25 = vld [vmem:[#allocation2 + $0x34] sm:$0xf0] }
 0x3bf   : > { %3033 = vmatmul.bf16.gmra.mxu1 %v14046_v16 }
 0x3c0   : > { %v3151_v32 = vpack.c.bf16 %v2934_v17, %v2787_v0  ;;  %3082 = vmatmul.bf16.gmra.mxu2 %v14044_v55  ;;  %v2790_v55 = vadd.f32 %v2789_v13, %v11890_v14  ;;  %v9355_v13 = vld [vmem:[#allocation2 + $0x14] sm:$0xf] }
 0x3c1   : > { %8975 = vmatmul.msk.bf16.gmra.mxu3 %vm3432_vm0, %v8932_v2  ;;  %v9311_v44 = vld [vmem:[#allocation2 + $0x184] sm:$0xf]  ;;  %v9103_v36 = vld [vmem:[#allocation2 + $0x180] sm:$0xf] }
 0x3c2   : > { %3231 = vst [vmem:[#allocation2 + $0x1a4] sm:$0xff] %v3151_v32 }
 0x3c3   : > { %v2887_v41 = vpop.f32.mrf.mxu2  ;;  %v2791_v3 = vpop.f32.mrf.mxu0 }
 0x3c4   : > { %v2888_v22 = vadd.f32 %v2887_v41, %v2838_v29  ;;  %v2936_v20 = vpop.f32.mrf.mxu3  ;;  %5378 = vrot.lane.b32.xlu2 %v9308_v28, %s11074_s21  ;;  %v2840_v16 = vpop.f32.mrf.mxu1  ;;  %v2792_v31 = vadd.f32 %v2791_v3, %v11895_v61  ;;  %v9356_v61 = vor.u32 %v10260_v25, %v9355_v13 }
 0x3c5   : > { %v12009_v26 = vpop.permute.xlu2 %5089 }
 0x3c6   : > { %5735 = vmatpush.bf16.xpose.msra.mxu3 %v5717_v52  ;;  %v2937_v27 = vadd.f32 %v2936_v20, %v2888_v22  ;;  %v12003_v18 = vpop.permute.xlu1 %6217  ;;  %v5708_v62 = vsel %vm3432_vm0, %v9356_v61, 0 }
 0x3c8   : > { %v3156_v21 = vpack.c.bf16 %v2937_v27, %v2790_v55 }
 0x3c9   : > { %v10249_v59 = vld [vmem:[#allocation2 + $0x1a4] sm:$0xf0]  ;;  %v10201_v56 = vld [vmem:[#allocation2 + $0x1a0] sm:$0xf0] }
 0x3ca   : > { %3236 = vst [vmem:[#allocation2 + $0x1c8] sm:$0xff] %v3156_v21  ;;  %v9312_v30 = vor.u32 %v10249_v59, %v9311_v44  ;;  %v9104_v9 = vor.u32 %v10201_v56, %v9103_v36  ;;  %v9115_v21 = vld [vmem:[#allocation2 + $0x4] sm:$0xf]  ;;  %v14089_v59 = vld [vmem:[#allocation36_spill] sm:$0xff] }
 0x3cb   : > { %v2889_v23 = vpop.f32.mrf.mxu2  ;;  %v2794_v48 = vpop.f32.mrf.mxu0 }
 0x3cc   : > { %v2890_v49 = vadd.f32 %v2889_v23, %v2840_v16  ;;  %v2938_v14 = vpop.f32.mrf.mxu3  ;;  %5380 = vrot.lane.b32.xlu0 %v9312_v30, %s11074_s21  ;;  %4255 = vrot.lane.b32.xlu2 %v9104_v9, %s11074_s21  ;;  %v2843_v53 = vpop.f32.mrf.mxu1  ;;  %v2795_v2 = vadd.f32 %v2794_v48, %v11904_v11  ;;  %v10204_v11 = vld [vmem:[#allocation2 + $0x24] sm:$0xf0]  ;;  %v3253_v9 = vlaneseq }
 0x3cd   : > { %v5094_v20 = vpop.permute.xlu2 %5093  ;;  %v9116_v44 = vor.u32 %v10204_v11, %v9115_v21 }
 0x3ce   : > { %5736 = vmatpush.bf16.xpose.msra.mxu3 %v5714_v58  ;;  %v2939_v7 = vadd.f32 %v2938_v14, %v2890_v49  ;;  %2989 = vmatmul.bf16.gmra.mxu0 %v14081_v34  ;;  %v5140_v36 = vsel %vm3432_vm0, %v5094_v20, 0  ;;  %v5137_v14 = vsel %vm3432_vm0, %v11981_v24, 0  ;;  %v12023_v48 = vshrl.u32 %v3253_v9, 7  ;;  %v10205_v24 = vld [vmem:[#allocation2 + $0x6c] sm:$0xf0] }
 0x3cf   : > { %3038 = vmatmul.bf16.gmra.mxu1 %v14082_v57  ;;  %v12025_v50 = vand.u32 127, %v3253_v9  ;;  %v10174_v9 = vld [vmem:[#allocation2 + $0xc8] sm:$0xf0] }
 0x3d0   : > { %v3161_v6 = vpack.c.bf16 %v2939_v7, %v2792_v31  ;;  %3087 = vmatmul.bf16.gmra.mxu2 %v14080_v46  ;;  %v12027_v7 = vpop.permute.xlu0 %5083 }
 0x3d1   : > { %8976 = vmatmul.msk.bf16.gmra.mxu3 %vm3432_vm0, %v8936_v54  ;;  %v9107_v32 = vld [vmem:[#allocation2 + $0x1c8] sm:$0xf]  ;;  %v9315_v40 = vld [vmem:[#allocation2 + $0x1cc] sm:$0xf]  ;;  %vm3272_vm1 = vcmp.le.s32.totalorder %v12025_v50, %v12023_v48 }
 0x3d2   : > { %3241 = vst [vmem:[#allocation2 + $0x1ec] sm:$0xff] %v3161_v6 }
 0x3d3   : > { %v2892_v29 = vpop.f32.mrf.mxu2  ;;  %v2796_v1 = vpop.f32.mrf.mxu0 }
 0x3d4   : > { %v2893_v0 = vadd.f32 %v2892_v29, %v2843_v53  ;;  %v2941_v17 = vpop.f32.mrf.mxu3  ;;  %v2845_v52 = vpop.f32.mrf.mxu1  ;;  %v2797_v58 = vadd.f32 %v2796_v1, %v11910_v51 }
 0x3d6   : > { %5737 = vmatpush.bf16.xpose.msra.mxu3 %v5711_v15  ;;  %v2942_v34 = vadd.f32 %v2941_v17, %v2893_v0  ;;  %v5096_v57 = vpop.permute.xlu1 %5095 }
 0x3d7   : > { %v5143_v63 = vsel %vm3432_vm0, %v5096_v57, 0 }
 0x3d8   : > { %v3166_v46 = vpack.c.bf16 %v2942_v34, %v2795_v2  ;;  %5145 = vmatpush.bf16.xpose.msra.mxu1 %v5143_v63  ;;  %v9119_v34 = vld [vmem:[#allocation2 + $0x4c] sm:$0xf]  ;;  %v13972_v63 = vmov -1e+30  }
 0x3d9   : > { %v10202_v12 = vld [vmem:[#allocation2 + $0x1e8] sm:$0xf0]  ;;  %v10250_v28 = vld [vmem:[#allocation2 + $0x1ec] sm:$0xf0]  ;;  %v9120_v57 = vor.u32 %v10205_v24, %v9119_v34  ;;  %v8983_v24 = vld [vmem:[#allocation2 + $0x60] sm:$0xf] }
 0x3da   : > { %3246 = vst [vmem:[#allocation2 + $0x210] sm:$0xff] %v3166_v46  ;;  %v9108_v19 = vor.u32 %v10202_v12, %v9107_v32  ;;  %v9316_v41 = vor.u32 %v10250_v28, %v9315_v40  ;;  %v10178_v61 = vld [vmem:[#allocation2 + $0x1e8] sm:$0xf0]  ;;  %v10177_v46 = vld [vmem:[#allocation2 + $0x1a0] sm:$0xf0]  ;;  %v12033_v32 = vsel %vm3272_vm1, 0.0, %v13972_v63 }
 0x3db   : > { %v2894_v22 = vpop.f32.mrf.mxu2  ;;  %v2955_v16 = vpop.f32.mrf.mxu0  ;;  %14090 = vst [vmem:[#allocation37_spill] sm:$0xff] %v12033_v32  ;;  %v14091_v12 = vld [vmem:[#allocation28_spill] sm:$0xff]  ;;  %v5134_v40 = vsel %vm3432_vm0, %v12009_v26, 0  ;;  %v8995_v26 = vld [vmem:[#allocation2 + $0x138] sm:$0xf] }
 0x3dc   : > { %v2895_v3 = vadd.f32 %v2894_v22, %v2845_v52  ;;  %4257 = vrot.lane.b32.xlu1 %v9108_v19, %s11074_s21  ;;  %5382 = vrot.lane.b32.xlu0 %v9316_v41, %s11074_s21  ;;  %v2943_v55 = vpop.f32.mrf.mxu3  ;;  %v3004_v27 = vpop.f32.mrf.mxu1  ;;  %v9003_v52 = vld [vmem:[#allocation2 + $0x1c8] sm:$0xf]  ;;  %v8999_v19 = vld [vmem:[#allocation2 + $0x180] sm:$0xf] }
 0x3dd   : > { %v3005_v56 = vadd.f32 %v3004_v27, %v2955_v16  ;;  %v9004_v2 = vor.u32 %v10178_v61, %v9003_v52  ;;  %v9000_v41 = vor.u32 %v10177_v46, %v8999_v19  ;;  %v12040_v22 = vpop.permute.xlu0 %6207 }
 0x3de   : > { %5738 = vmatpush.bf16.xpose.msra.mxu3 %v5708_v62  ;;  %v2944_v60 = vadd.f32 %v2943_v55, %v2895_v3  ;;  %v10176_v3 = vld [vmem:[#allocation2 + $0x158] sm:$0xf0] }
 0x3df   : > { %9073 = vmatmul.msk.bf16.vlgmr.msrb.gmra.mxu1 %vm3432_vm0, %v14089_v59 }
 0x3e0   : > { %v3171_v33 = vpack.c.bf16 %v2944_v60, %v2797_v58  ;;  %5146 = vmatpush.bf16.xpose.msra.mxu1 %v5140_v36  ;;  %v8996_v60 = vor.u32 %v10176_v3, %v8995_v26  ;;  %v8991_v36 = vld [vmem:[#allocation2 + $0xf0] sm:$0xf]  ;;  %v5125_v3 = vsel %vm3432_vm0, %v12027_v7, 0  ;;  %v9211_v26 = vld [vmem:[#allocation2 + $0x1cc] sm:$0xf] }
 0x3e1   : > { %9177 = vmatmul.msk.bf16.vlgmr.msrb.gmra.mxu3 %vm3432_vm0, %v9116_v44  ;;  %v9007_v53 = vld [vmem:[#allocation2 + $0x210] sm:$0xf]  ;;  %v9319_v15 = vld [vmem:[#allocation2 + $0x214] sm:$0xf] }
 0x3e2   : > { %3251 = vst [vmem:[#allocation2 + $0x234] sm:$0xff] %v3171_v33  ;;  %v10175_v44 = vld [vmem:[#allocation2 + $0x110] sm:$0xf0]  ;;  %v5131_v33 = vsel %vm3432_vm0, %v11965_v4, 0 }
 0x3e3   : > { %v3053_v30 = vpop.f32.mrf.mxu2  ;;  %v2957_v23 = vpop.f32.mrf.mxu0  ;;  %v9123_v4 = vld [vmem:[#allocation2 + $0x94] sm:$0xf] }
 0x3e4   : > { %v3054_v5 = vadd.f32 %v3053_v30, %v3005_v56  ;;  %v3006_v49 = vpop.f32.mrf.mxu1  ;;  %v3490_v25 = vpop.f32.mrf.mxu3  ;;  %v8992_v56 = vor.u32 %v10175_v44, %v8991_v36  ;;  %v3255_v30 = vadd.s32 8, %v12023_v48  ;;  %v10225_v36 = vld [vmem:[#allocation2 + $0x1a4] sm:$0xf0] }
 0x3e5   : > { %v3007_v31 = vadd.f32 %v3006_v49, %v2957_v23  ;;  %v12043_v20 = vadd.f32 %v3490_v25, %v12033_v32  ;;  %v10206_v23 = vld [vmem:[#allocation2 + $0xb4] sm:$0xf0] }
 0x3e6   : > { %v3097_v51 = vpack.c.bf16 %v3054_v5, %v3054_v5  ;;  %vm3273_vm2 = vcmp.le.s32.totalorder %v12025_v50, %v3255_v30  ;;  %v9124_v25 = vor.u32 %v10206_v23, %v9123_v4 }
 0x3e8   : > { %3177 = vst [vmem:[#allocation2 + $0x20] sm:$0xf] %v3097_v51  ;;  %5147 = vmatpush.bf16.xpose.msra.mxu1 %v5137_v14  ;;  %v5086_v14 = vpop.permute.xlu0 %5085 }
 0x3e9   : > { %v10179_v39 = vld [vmem:[#allocation2 + $0x230] sm:$0xf0]  ;;  %v10251_v54 = vld [vmem:[#allocation2 + $0x234] sm:$0xf0]  ;;  %v5128_v61 = vsel %vm3432_vm0, %v5086_v14, 0 }
 0x3ea   : > { %v9008_v6 = vor.u32 %v10179_v39, %v9007_v53  ;;  %v9320_v13 = vor.u32 %v10251_v54, %v9319_v15  ;;  %v10227_v34 = vld [vmem:[#allocation2 + $0x234] sm:$0xf0] }
 0x3eb   : > { %v3055_v29 = vpop.f32.mrf.mxu2  ;;  %v2960_v17 = vpop.f32.mrf.mxu0 }
 0x3ec   : > { %3714 = vmatpush.bf16.msrb.mxu0 %v9008_v6  ;;  %5384 = vrot.lane.b32.xlu0 %v9320_v13, %s11074_s21  ;;  %v3056_v0 = vadd.f32 %v3055_v29, %v3007_v31  ;;  %v3009_v1 = vpop.f32.mrf.mxu1  ;;  %v3492_v16 = vpop.f32.mrf.mxu3  ;;  %v8987_v31 = vld [vmem:[#allocation2 + $0xa8] sm:$0xf]  ;;  %v10173_v6 = vld [vmem:[#allocation2 + $0x80] sm:$0xf0] }
 0x3ed   : > { %v3010_v28 = vadd.f32 %v3009_v1, %v2960_v17  ;;  %v8988_v15 = vor.u32 %v10174_v9, %v8987_v31  ;;  %v14092_v13 = vld [vmem:[#allocation29_spill] sm:$0xff]  ;;  %v8984_v17 = vor.u32 %v10173_v6, %v8983_v24  ;;  %v10172_v1 = vld [vmem:[#allocation2 + $0x38] sm:$0xf0]  ;;  %v10224_v31 = vld [vmem:[#allocation2 + $0x15c] sm:$0xf0] }
 0x3ee   : > { %v3102_v62 = vpack.c.bf16 %v3056_v0, %v3056_v0  ;;  %v12057_v0 = vsel %vm3273_vm2, 0.0, %v13972_v63  ;;  %v9127_v9 = vld [vmem:[#allocation2 + $0xdc] sm:$0xf]  ;;  %vm3795_vm2 = vcmask 519168  }
 0x3ef   : > { %9074 = vmatmul.msk.bf16.gmra.mxu1 %vm3432_vm0, %v14091_v12  ;;  %14093 = vst [vmem:[#allocation43_spill] sm:$0xff] %v12057_v0  ;;  %v8979_v12 = vld [vmem:[#allocation2 + $0x18] sm:$0xf] }
 0x3f0   : > { %3715 = vmatpush.bf16.msrb.mxu0 %v9004_v2  ;;  %3182 = vst [vmem:[#allocation2 + $0x44] sm:$0xf] %v3102_v62  ;;  %5148 = vmatpush.bf16.xpose.msra.mxu1 %v5134_v40  ;;  %v12060_v2 = vadd.f32 %v3492_v16, %v12057_v0  ;;  %v8980_v40 = vor.u32 %v10172_v1, %v8979_v12  ;;  %v10203_v16 = vld [vmem:[#allocation2 + $0x230] sm:$0xf0] }
 0x3f1   : > { %9178 = vmatmul.msk.bf16.gmra.mxu3 %vm3432_vm0, %v9120_v57 }
 0x3f3   : > { %v3058_v11 = vpop.f32.mrf.mxu2  ;;  %v2962_v27 = vpop.f32.mrf.mxu0 }
 0x3f4   : > { %3716 = vmatpush.bf16.msrb.mxu0 %v9000_v41  ;;  %v3059_v55 = vadd.f32 %v3058_v11, %v3010_v28  ;;  %v3011_v58 = vpop.f32.mrf.mxu1  ;;  %v12049_v39 = vpop.f32.mrf.mxu3  ;;  %v9215_v28 = vld [vmem:[#allocation2 + $0x214] sm:$0xf] }
 0x3f5   : > { %3530 = vmax.xlane.f32.xlu2 %v12043_v20  ;;  %v3012_v59 = vadd.f32 %v3011_v58, %v2962_v27  ;;  %v9216_v41 = vor.u32 %v10227_v34, %v9215_v28  ;;  %v3256_v58 = vadd.s32 16, %v12023_v48 }
 0x3f6   : > { %v3107_v21 = vpack.c.bf16 %v3059_v55, %v3059_v55  ;;  %v10226_v55 = vld [vmem:[#allocation2 + $0x1ec] sm:$0xf0] }
 0x3f7   : > { %vm3274_vm3 = vcmp.le.s32.totalorder %v12025_v50, %v3256_v58  ;;  %v10221_v58 = vld [vmem:[#allocation2 + $0x84] sm:$0xf0] }
 0x3f8   : > { %3717 = vmatpush.bf16.msrb.mxu0 %v8996_v60  ;;  %3187 = vst [vmem:[#allocation2 + $0x68] sm:$0xf] %v3107_v21  ;;  %5149 = vmatpush.bf16.xpose.msra.mxu1 %v5131_v33  ;;  %v9111_v60 = vld [vmem:[#allocation2 + $0x210] sm:$0xf]  ;;  %v9212_v21 = vor.u32 %v10226_v55, %v9211_v26  ;;  %v12073_v4 = vsel %vm3274_vm3, 0.0, %v13972_v63 }
 0x3f9   : > { %v9112_v44 = vor.u32 %v10203_v16, %v9111_v60  ;;  %14095 = vst [vmem:[#allocation25_spill] sm:$0xff] %v12073_v4  ;;  %v12083_v24 = vadd.f32 %v12049_v39, %v12073_v4  ;;  %v6264_v39 = vsel %vm3432_vm0, %v12003_v18, 0 }
 0x3fb   : > { %v3060_v5 = vpop.f32.mrf.mxu2  ;;  %v2965_v51 = vpop.f32.mrf.mxu0 }
 0x3fc   : > { %3718 = vmatpush.bf16.msrb.mxu0 %v8992_v56  ;;  %v3061_v49 = vadd.f32 %v3060_v5, %v3012_v59  ;;  %v3014_v53 = vpop.f32.mrf.mxu1  ;;  %v12065_v11 = vpop.f32.mrf.mxu3  ;;  %v10207_v59 = vld [vmem:[#allocation2 + $0xfc] sm:$0xf0]  ;;  %v9207_v5 = vld [vmem:[#allocation2 + $0x184] sm:$0xf] }
 0x3fd   : > { %v3015_v29 = vadd.f32 %v3014_v53, %v2965_v51  ;;  %v9128_v51 = vor.u32 %v10207_v59, %v9127_v9  ;;  %v9208_v14 = vor.u32 %v10225_v36, %v9207_v5  ;;  %v14094_v53 = vld [vmem:[#allocation44_spill] sm:$0xff]  ;;  %v6261_v9 = vsel %vm3432_vm0, %v11993_v42, 0 }
 0x3fe   : > { %v3112_v54 = vpack.c.bf16 %v3061_v49, %v3061_v49  ;;  %v6220_v49 = vpop.permute.xlu2 %6219  ;;  %v9187_v5 = vld [vmem:[#allocation2 + $0x1c] sm:$0xf]  ;;  %v6258_v42 = vsel %vm3432_vm0, %v11975_v47, 0 }
 0x3ff   : > { %9075 = vmatmul.msk.bf16.gmra.mxu1 %vm3432_vm0, %v14092_v13  ;;  %v9203_v13 = vld [vmem:[#allocation2 + $0x13c] sm:$0xf]  ;;  %v9503_v12 = vld [vmem:[#allocation2 + $0x68] sm:$0xf] }
 0x400   : > { %3719 = vmatpush.bf16.msrb.mxu0 %v8988_v15  ;;  %3192 = vst [vmem:[#allocation2 + $0x8c] sm:$0xf] %v3112_v54  ;;  %5150 = vmatpush.bf16.xpose.msra.mxu1 %v5128_v61  ;;  %v5122_v54 = vsel %vm3432_vm0, %v11950_v43, 0  ;;  %v9204_v61 = vor.u32 %v10224_v31, %v9203_v13  ;;  %v9199_v43 = vld [vmem:[#allocation2 + $0xf4] sm:$0xf] }
 0x401   : > { %9179 = vmatmul.msk.bf16.gmra.mxu3 %vm3432_vm0, %v9124_v25  ;;  %v6267_v25 = vsel %vm3432_vm0, %v6220_v49, 0  ;;  %v9499_v31 = vld [vmem:[#allocation2 + $0x20] sm:$0xf] }
 0x403   : > { %v3063_v52 = vpop.f32.mrf.mxu2  ;;  %v2967_v57 = vpop.f32.mrf.mxu0 }
 0x404   : > { %3720 = vmatpush.bf16.msrb.mxu0 %v8984_v17  ;;  %v3064_v62 = vadd.f32 %v3063_v52, %v3015_v29  ;;  %v3016_v46 = vpop.f32.mrf.mxu1  ;;  %v12079_v6 = vpop.f32.mrf.mxu3  ;;  %v10223_v17 = vld [vmem:[#allocation2 + $0x114] sm:$0xf0] }
 0x405   : > { %v3017_v27 = vadd.f32 %v3016_v46, %v2967_v57  ;;  %v9200_v57 = vor.u32 %v10223_v17, %v9199_v43  ;;  %v10222_v46 = vld [vmem:[#allocation2 + $0xcc] sm:$0xf0] }
 0x406   : > { %3532 = vmax.xlane.f32.xlu1 %v12060_v2  ;;  %v3117_v19 = vpack.c.bf16 %v3064_v62, %v3064_v62 }
 0x408   : > { %3721 = vmatpush.bf16.msrb.mxu0 %v8980_v40  ;;  %3197 = vst [vmem:[#allocation2 + $0xb0] sm:$0xf] %v3117_v19  ;;  %5151 = vmatpush.bf16.xpose.msra.mxu1 %v5125_v3  ;;  %v10293_v40 = vld [vmem:[#allocation2 + $0x88] sm:$0xf0] }
 0x409   : > { %v9195_v19 = vld [vmem:[#allocation2 + $0xac] sm:$0xf]  ;;  %v9504_v3 = vor.u32 %v10293_v40, %v9503_v12 }
 0x40a   : > { %v14097_v40 = vld [vmem:[#allocation30_spill] sm:$0xff] }
 0x40b   : > { %v3065_v33 = vpop.f32.mrf.mxu2  ;;  %v2970_v7 = vpop.f32.mrf.mxu0 }
 0x40c   : > { %4840 = vmatpush.bf16.msra.mxu0 %v9216_v41  ;;  %v3066_v56 = vadd.f32 %v3065_v33, %v3017_v27  ;;  %v3019_v30 = vpop.f32.mrf.mxu1  ;;  %v9196_v41 = vor.u32 %v10222_v46, %v9195_v19  ;;  %v12088_v16 = vpop.f32.mrf.mxu3  ;;  %v10208_v27 = vld [vmem:[#allocation2 + $0x144] sm:$0xf0]  ;;  %v9191_v33 = vld [vmem:[#allocation2 + $0x64] sm:$0xf]  ;;  %v6255_v19 = vsel %vm3432_vm0, %v11997_v10, 0 }
 0x40d   : > { %4259 = vrot.lane.b32.xlu2 %v9112_v44, %s11074_s21  ;;  %v3020_v15 = vadd.f32 %v3019_v30, %v2970_v7  ;;  %v9131_v44 = vld [vmem:[#allocation2 + $0x124] sm:$0xf]  ;;  %v9192_v18 = vor.u32 %v10221_v58, %v9191_v33  ;;  %v10220_v7 = vld [vmem:[#allocation2 + $0x3c] sm:$0xf0] }
 0x40e   : > { %v3122_v23 = vpack.c.bf16 %v3066_v56, %v3066_v56  ;;  %v9132_v36 = vor.u32 %v10208_v27, %v9131_v44  ;;  %v14096_v56 = vld [vmem:[#allocation21_spill] sm:$0xff] }
 0x40f   : > { %9076 = vmatmul.msk.bf16.gmra.mxu1 %vm3432_vm0, %v14094_v53 }
 0x410   : > { %4841 = vmatpush.bf16.msra.mxu0 %v9212_v21  ;;  %3202 = vst [vmem:[#allocation2 + $0xd4] sm:$0xf] %v3122_v23  ;;  %5152 = vmatpush.bf16.xpose.msra.mxu1 %v5122_v54  ;;  %v9188_v23 = vor.u32 %v10220_v7, %v9187_v5 }
 0x411   : > { %9180 = vmatmul.msk.bf16.gmra.mxu3 %vm3432_vm0, %v9128_v51 }
 0x413   : > { %v3068_v29 = vpop.f32.mrf.mxu2  ;;  %v2972_v52 = vpop.f32.mrf.mxu0 }
 0x414   : > { %4842 = vmatpush.bf16.msra.mxu0 %v9208_v14  ;;  %v3069_v1 = vadd.f32 %v3068_v29, %v3020_v15  ;;  %v3021_v34 = vpop.f32.mrf.mxu1  ;;  %v10292_v15 = vld [vmem:[#allocation2 + $0x40] sm:$0xf0]  ;;  %v3505_v54 = vpop.f32.mrf.mxu3  ;;  %v3258_v29 = vadd.s32 32, %v12023_v48 }
 0x415   : > { %v3022_v28 = vadd.f32 %v3021_v34, %v2972_v52  ;;  %v9500_v13 = vor.u32 %v10292_v15, %v9499_v31  ;;  %v12137_v15 = vpop.permute.xlu2 %5370 }
 0x416   : > { %3534 = vmax.xlane.f32.xlu0 %v12083_v24  ;;  %v3127_v62 = vpack.c.bf16 %v3069_v1, %v3069_v1  ;;  %v10209_v1 = vld [vmem:[#allocation2 + $0x18c] sm:$0xf0]  ;;  %vm3276_vm4 = vcmp.le.s32.totalorder %v12025_v50, %v3258_v29  ;;  %v3261_v29 = vadd.s32 56, %v12023_v48 }
 0x417   : > { %v12106_v47 = vsel %vm3276_vm4, 0.0, %v13972_v63 }
 0x418   : > { %6269 = vmatpush.bf16.xpose.msrb.mxu1 %v6267_v25  ;;  %4843 = vmatpush.bf16.msra.mxu0 %v9204_v61  ;;  %3207 = vst [vmem:[#allocation2 + $0xf8] sm:$0xf] %v3127_v62  ;;  %v9135_v62 = vld [vmem:[#allocation2 + $0x16c] sm:$0xf]  ;;  %vm3279_vm7 = vcmp.le.s32.totalorder %v12025_v50, %v3261_v29 }
 0x419   : > { %v9136_v46 = vor.u32 %v10209_v1, %v9135_v62  ;;  %14098 = vst [vmem:[#allocation23_spill] sm:$0xff] %v12106_v47 }
 0x41b   : > { %v3070_v55 = vpop.f32.mrf.mxu2  ;;  %v2975_v60 = vpop.f32.mrf.mxu0 }
 0x41c   : > { %4844 = vmatpush.bf16.msra.mxu0 %v9200_v57  ;;  %v3071_v26 = vadd.f32 %v3070_v55, %v3022_v28  ;;  %v3024_v21 = vpop.f32.mrf.mxu1  ;;  %v12101_v12 = vpop.f32.mrf.mxu3 }
 0x41d   : > { %v3025_v30 = vadd.f32 %v3024_v21, %v2975_v60  ;;  %v6210_v60 = vpop.permute.xlu0 %6209 }
 0x41e   : > { %v3132_v59 = vpack.c.bf16 %v3071_v26, %v3071_v26  ;;  %v6252_v33 = vsel %vm3432_vm0, %v6210_v60, 0  ;;  %v14102_v60 = vld [vmem:[#allocation33_spill] sm:$0xff] }
 0x41f   : > { %6496 = vrot.lane.b32.xlu1 %v9504_v3, %s11074_s21  ;;  %9077 = vmatmul.msk.bf16.gmra.mxu1 %vm3432_vm0, %v14096_v56  ;;  %v12114_v3 = vadd.f32 %v12079_v6, %v12106_v47 }
 0x420   : > { %6270 = vmatpush.bf16.xpose.msrb.mxu1 %v6264_v39  ;;  %4845 = vmatpush.bf16.msra.mxu0 %v9196_v41  ;;  %3212 = vst [vmem:[#allocation2 + $0x11c] sm:$0xf] %v3132_v59  ;;  %v3260_v39 = vadd.s32 48, %v12023_v48 }
 0x421   : > { %9181 = vmatmul.msk.bf16.gmra.mxu3 %vm3432_vm0, %v9132_v36  ;;  %v10210_v36 = vld [vmem:[#allocation2 + $0x1d4] sm:$0xf0] }
 0x422   : > { %vm3278_vm5 = vcmp.le.s32.totalorder %v12025_v50, %v3260_v39  ;;  %v9143_v39 = vld [vmem:[#allocation2 + $0x1fc] sm:$0xf] }
 0x423   : > { %v3073_v49 = vpop.f32.mrf.mxu2  ;;  %v2977_v14 = vpop.f32.mrf.mxu0  ;;  %v12119_v44 = vsel %vm3278_vm5, 0.0, %v13972_v63 }
 0x424   : > { %4846 = vmatpush.bf16.msra.mxu0 %v9192_v18  ;;  %v3074_v51 = vadd.f32 %v3073_v49, %v3025_v30  ;;  %v3026_v53 = vpop.f32.mrf.mxu1  ;;  %v12121_v10 = vpop.f32.mrf.mxu3  ;;  %v12125_v59 = vadd.f32 %v3505_v54, %v12119_v44  ;;  %v3259_v30 = vadd.s32 40, %v12023_v48  ;;  %v14099_v49 = vld [vmem:[#allocation32_spill] sm:$0xff] }
 0x425   : > { %v3027_v61 = vadd.f32 %v3026_v53, %v2977_v14  ;;  %v12133_v14 = vpop.permute.xlu0 %4245  ;;  %v6249_v53 = vsel %vm3432_vm0, %v12040_v22, 0  ;;  %v3257_v22 = vadd.s32 24, %v12023_v48 }
 0x426   : > { %v3137_v25 = vpack.c.bf16 %v3074_v51, %v3074_v51  ;;  %vm3277_vm6 = vcmp.le.s32.totalorder %v12025_v50, %v3259_v30 }
 0x427   : > { %vm3275_vm8 = vcmp.le.s32.totalorder %v12025_v50, %v3257_v22 }
 0x428   : > { %6271 = vmatpush.bf16.xpose.msrb.mxu1 %v6261_v9  ;;  %4847 = vmatpush.bf16.msra.mxu0 %v9188_v23  ;;  %3217 = vst [vmem:[#allocation2 + $0x140] sm:$0xf] %v3137_v25  ;;  %v9139_v9 = vld [vmem:[#allocation2 + $0x1b4] sm:$0xf]  ;;  %v12142_v25 = vsel %vm3277_vm6, 0.0, %v13972_v63 }
 0x429   : > { %v9140_v23 = vor.u32 %v10210_v36, %v9139_v9  ;;  %14100 = vst [vmem:[#allocation24_spill] sm:$0xff] %v12142_v25  ;;  %v12147_v1 = vadd.f32 %v12088_v16, %v12142_v25  ;;  %v12159_v16 = vsel %vm3279_vm7, 0.0, %v13972_v63 }
 0x42a   : > { %6494 = vrot.lane.b32.xlu0 %v9500_v13, %s11074_s21 }
 0x42b   : > { %v3075_v17 = vpop.f32.mrf.mxu2  ;;  %v2980_v34 = vpop.f32.mrf.mxu0 }
 0x42c   : > { %v3076_v52 = vadd.f32 %v3075_v17, %v3027_v61  ;;  %v3029_v43 = vpop.f32.mrf.mxu1  ;;  %v12139_v54 = vpop.f32.mrf.mxu3 }
 0x42d   : > { %v3030_v28 = vadd.f32 %v3029_v43, %v2980_v34  ;;  %v12152_v34 = vpop.permute.xlu0 %4247  ;;  %v6246_v43 = vsel %vm3432_vm0, %v11960_v38, 0  ;;  %v12166_v38 = vadd.f32 %v12101_v12, %v12159_v16 }
 0x42e   : > { %v3142_v57 = vpack.c.bf16 %v3076_v52, %v3076_v52 }
 0x42f   : > { %9078 = vmatmul.msk.bf16.gmra.mxu1 %vm3432_vm0, %v14097_v40 }
 0x430   : > { %6272 = vmatpush.bf16.xpose.msrb.mxu1 %v6258_v42  ;;  %3222 = vst [vmem:[#allocation2 + $0x164] sm:$0xf] %v3142_v57  ;;  %v12156_v57 = vpop.permute.xlu2 %4253 }
 0x431   : > { %9182 = vmatmul.msk.bf16.gmra.mxu3 %vm3432_vm0, %v9136_v46  ;;  %v10211_v46 = vld [vmem:[#allocation2 + $0x21c] sm:$0xf0] }
 0x433   : > { %v3078_v41 = vpop.f32.mrf.mxu2  ;;  %v2982_v27 = vpop.f32.mrf.mxu0 }
 0x434   : > { %v3079_v55 = vadd.f32 %v3078_v41, %v3030_v28  ;;  %v3031_v58 = vpop.f32.mrf.mxu1  ;;  %v12162_v41 = vpop.f32.mrf.mxu3 }
 0x435   : > { %v3032_v21 = vadd.f32 %v3031_v58, %v2982_v27  ;;  %v12169_v27 = vsel %vm3275_vm8, 0.0, %v13972_v63 }
 0x436   : > { %3538 = vmax.xlane.f32.xlu2 %v12114_v3  ;;  %v3147_v26 = vpack.c.bf16 %v3079_v55, %v3079_v55  ;;  %v9144_v55 = vor.u32 %v10211_v46, %v9143_v39  ;;  %14101 = vst [vmem:[#allocation42_spill] sm:$0xff] %v12169_v27  ;;  %v12178_v12 = vadd.f32 %v12065_v11, %v12169_v27 }
 0x438   : > { %6273 = vmatpush.bf16.xpose.msrb.mxu1 %v6255_v19  ;;  %3227 = vst [vmem:[#allocation2 + $0x188] sm:$0xf] %v3147_v26  ;;  %v3262_v26 = vadd.s32 64, %v12023_v48  ;;  %v12184_v30 = vpop.permute.xlu2 %5378 }
 0x43a   : > { %vm3280_vm9 = vcmp.le.s32.totalorder %v12025_v50, %v3262_v26  ;;  %v12207_v26 = vpop.permute.xlu1 %5376 }
 0x43b   : > { %v3080_v6 = vpop.f32.mrf.mxu2  ;;  %v2985_v56 = vpop.f32.mrf.mxu0 }
 0x43c   : > { %v3081_v18 = vadd.f32 %v3080_v6, %v3032_v21  ;;  %v3034_v7 = vpop.f32.mrf.mxu1  ;;  %v10294_v6 = vld [vmem:[#allocation2 + $0xd0] sm:$0xf0] }
 0x43d   : > { %v3035_v51 = vadd.f32 %v3034_v7, %v2985_v56 }
 0x43e   : > { %3542 = vmax.xlane.f32.xlu2 %v12125_v59  ;;  %v3152_v5 = vpack.c.bf16 %v3081_v18, %v3081_v18  ;;  %v12180_v18 = vpop.permute.xlu0 %5372 }
 0x43f   : > { %9079 = vmatmul.msk.bf16.gmra.mxu1 %vm3432_vm0, %v14099_v49 }
 0x440   : > { %6274 = vmatpush.bf16.xpose.msrb.mxu1 %v6252_v33  ;;  %3232 = vst [vmem:[#allocation2 + $0x1ac] sm:$0xf] %v3152_v5  ;;  %v9507_v33 = vld [vmem:[#allocation2 + $0xb0] sm:$0xf]  ;;  %v12188_v5 = vsel %vm3280_vm9, 0.0, %v13972_v63  ;;  %v4256_v46 = vpop.permute.xlu2 %4255 }
 0x441   : > { %9183 = vmatmul.msk.bf16.gmra.mxu3 %vm3432_vm0, %v9140_v23  ;;  %v9508_v56 = vor.u32 %v10294_v6, %v9507_v33  ;;  %v10295_v33 = vld [vmem:[#allocation2 + $0x118] sm:$0xf0]  ;;  %v10253_v6 = vld [vmem:[#allocation2 + $0x70] sm:$0xf0] }
 0x443   : > { %v3083_v31 = vpop.f32.mrf.mxu2  ;;  %v2987_v42 = vpop.f32.mrf.mxu0 }
 0x444   : > { %v3084_v13 = vadd.f32 %v3083_v31, %v3035_v51  ;;  %v3036_v61 = vpop.f32.mrf.mxu1  ;;  %v12190_v51 = vpop.f32.mrf.mxu3  ;;  %v10296_v31 = vld [vmem:[#allocation2 + $0x160] sm:$0xf0] }
 0x445   : > { %v3037_v52 = vadd.f32 %v3036_v61, %v2987_v42  ;;  %v10252_v42 = vld [vmem:[#allocation2 + $0x28] sm:$0xf0] }
 0x446   : > { %v3157_v17 = vpack.c.bf16 %v3084_v13, %v3084_v13  ;;  %v12194_v13 = vadd.f32 %v12121_v10, %v12188_v5  ;;  %v12197_v22 = vpop.permute.xlu0 %4249 }
 0x448   : > { %6275 = vmatpush.bf16.xpose.msrb.mxu1 %v6249_v53  ;;  %3237 = vst [vmem:[#allocation2 + $0x1d0] sm:$0xf] %v3157_v17  ;;  %v9515_v53 = vld [vmem:[#allocation2 + $0x140] sm:$0xf] }
 0x449   : > { %3540 = vmax.xlane.f32.xlu1 %v12147_v1  ;;  %v9516_v29 = vor.u32 %v10296_v31, %v9515_v53 }
 0x44b   : > { %v3085_v62 = vpop.f32.mrf.mxu2  ;;  %v2990_v58 = vpop.f32.mrf.mxu0 }
 0x44c   : > { %v3086_v40 = vadd.f32 %v3085_v62, %v3037_v52  ;;  %v3039_v28 = vpop.f32.mrf.mxu1  ;;  %v9323_v52 = vld [vmem:[#allocation2 + $0x8] sm:$0xf]  ;;  %v12203_v10 = vpop.f32.mrf.mxu3 }
 0x44d   : > { %v3040_v21 = vadd.f32 %v3039_v28, %v2990_v58  ;;  %v9324_v62 = vor.u32 %v10252_v42, %v9323_v52 }
 0x44e   : > { %v3162_v19 = vpack.c.bf16 %v3086_v40, %v3086_v40  ;;  %v14103_v40 = vld [vmem:[#allocation26_spill] sm:$0xff] }
 0x44f   : > { %9080 = vmatmul.msk.bf16.gmra.mxu1 %vm3432_vm0, %v14102_v60  ;;  %v9523_v28 = vld [vmem:[#allocation2 + $0x1d0] sm:$0xf] }
 0x450   : > { %6276 = vmatpush.bf16.xpose.msrb.mxu1 %v6246_v43  ;;  %3242 = vst [vmem:[#allocation2 + $0x1f4] sm:$0xf] %v3162_v19 }
 0x451   : > { %9184 = vmatmul.msk.bf16.gmra.mxu3 %vm3432_vm0, %v9144_v55  ;;  %3544 = vmax.xlane.f32.xlu1 %v12166_v38  ;;  %v12205_v55 = vpop.permute.xlu0 %5374 }
 0x453   : > { %v3088_v36 = vpop.f32.mrf.mxu2  ;;  %v2992_v11 = vpop.f32.mrf.mxu0 }
 0x454   : > { %3536 = vmax.xlane.f32.xlu0 %v12178_v12  ;;  %v3089_v7 = vadd.f32 %v3088_v36, %v3040_v21  ;;  %v3041_v23 = vpop.f32.mrf.mxu1  ;;  %v9511_v21 = vld [vmem:[#allocation2 + $0xf8] sm:$0xf]  ;;  %v12212_v36 = vpop.f32.mrf.mxu3 }
 0x455   : > { %v3042_v49 = vadd.f32 %v3041_v23, %v2992_v11  ;;  %v14104_v23 = vld [vmem:[#allocation22_spill] sm:$0xff] }
 0x456   : > { %6498 = vrot.lane.b32.xlu2 %v9508_v56, %s11074_s21  ;;  %v3167_v9 = vpack.c.bf16 %v3089_v7, %v3089_v7  ;;  %v9327_v56 = vld [vmem:[#allocation2 + $0x50] sm:$0xf]  ;;  %v9512_v7 = vor.u32 %v10295_v33, %v9511_v21 }
 0x457   : > { %v10298_v39 = vld [vmem:[#allocation2 + $0x1f0] sm:$0xf0] }
 0x458   : > { %3247 = vst [vmem:[#allocation2 + $0x218] sm:$0xf] %v3167_v9  ;;  %v9524_v19 = vor.u32 %v10298_v39, %v9523_v28  ;;  %v9328_v9 = vor.u32 %v10253_v6, %v9327_v56  ;;  %v10254_v28 = vld [vmem:[#allocation2 + $0xb8] sm:$0xf0]  ;;  %v3267_v56 = vadd.s32 104, %v12023_v48 }
 0x459   : > { %v4252_v53 = vpop.permute.xlu0 %4251 }
 0x45a   : > { %vm3285_vm11 = vcmp.le.s32.totalorder %v12025_v50, %v3267_v56  ;;  %v10272_v56 = vld [vmem:[#allocation2 + $0x160] sm:$0xf0] }
 0x45b   : > { %v3090_v61 = vpop.f32.mrf.mxu2 }
 0x45c   : > { %3546 = vmax.xlane.f32.xlu0 %v12194_v13  ;;  %v3091_v17 = vadd.f32 %v3090_v61, %v3042_v49  ;;  %v12209_v60 = vpop.f32.mrf.mxu1  ;;  %v4258_v49 = vpop.permute.xlu1 %4257 }
 0x45e   : > { %6502 = vrot.lane.b32.xlu2 %v9516_v29, %s11074_s21  ;;  %v3172_v43 = vpack.c.bf16 %v3091_v17, %v3091_v17  ;;  %v12221_v29 = vpop.f32.mrf.mxu3 }
 0x45f   : > { %9281 = vmatmul.msk.bf16.vlgmr.msra.gmra.mxu1 %vm3432_vm0, %v14103_v40 }
 0x460   : > { %3252 = vst [vmem:[#allocation2 + $0x23c] sm:$0xf] %v3172_v43 }
 0x461   : > { %9385 = vmatmul.msk.bf16.vlgmr.msra.gmra.mxu3 %vm3432_vm0, %v9324_v62  ;;  %v12223_v52 = vpop.permute.xlu0 %5380  ;;  %v3265_v62 = vadd.s32 88, %v12023_v48 }
 0x463   : > { %vm3283_vm10 = vcmp.le.s32.totalorder %v12025_v50, %v3265_v62  ;;  %v9415_v62 = vld [vmem:[#allocation2 + $0x188] sm:$0xf] }
 0x464   : > { %v12218_v31 = vpop.f32.mrf.mxu1 }
 0x467   : > { %v10275_v21 = vld [vmem:[#allocation2 + $0x238] sm:$0xf0] }
 0x468   : > { %v3531_v58 = vpop.xlane.xlu2 %3530 }
 0x469   : > { %v3562_v61 = vsub.f32 %v12043_v20, %v3531_v58  ;;  %v9331_v20 = vld [vmem:[#allocation2 + $0x98] sm:$0xf]  ;;  %v14105_v58 = vld [vmem:[#allocation40_spill] sm:$0xff]  ;;  %v5383_v33 = vpop.permute.xlu0 %5382 }
 0x46a   : > { %6506 = vrot.lane.b32.xlu1 %v9524_v19, %s11074_s21  ;;  %v9332_v19 = vor.u32 %v10254_v28, %v9331_v20  ;;  %v10255_v28 = vld [vmem:[#allocation2 + $0x100] sm:$0xf0] }
 0x46b   : > { %v3578_v42 = vmul.f32 1.442695, %v3562_v61 }
 0x46c   : > { %v12228_v39 = vpop.f32.mrf.mxu1 }
 0x46d   : > { %10486 = vpow2.f32 %v3578_v42 }
 0x46f   : > { %9282 = vmatmul.msk.bf16.gmra.mxu1 %vm3432_vm0, %v14104_v23 }
 0x470   : > { %6500 = vrot.lane.b32.xlu0 %v9512_v7, %s11074_s21  ;;  %v4260_v11 = vpop.permute.xlu2 %4259 }
 0x471   : > { %9386 = vmatmul.msk.bf16.gmra.mxu3 %vm3432_vm0, %v9328_v9  ;;  %4269 = vmatpush.bf16.msrb.mxu2 %v4260_v11 }
 0x473   : > { %v12239_v6 = vpop.eup %10486 }
 0x474   : > { %v12253_v61 = vpop.f32.mrf.mxu1 }
 0x475   : > { %4270 = vmatpush.bf16.msrb.mxu2 %v4258_v49  ;;  %v9419_v49 = vld [vmem:[#allocation2 + $0x1d0] sm:$0xf] }
 0x479   : > { %v3533_v17 = vpop.xlane.xlu1 %3532  ;;  %4271 = vmatpush.bf16.msrb.mxu2 %v4256_v46  ;;  %v12233_v46 = vpop.f32.mrf.mxu3 }
 0x47a   : > { %v3563_v43 = vsub.f32 %v12060_v2, %v3533_v17  ;;  %v9423_v2 = vld [vmem:[#allocation2 + $0x218] sm:$0xf]  ;;  %v5385_v17 = vpop.permute.xlu0 %5384 }
 0x47b   : > { %v9424_v9 = vor.u32 %v10275_v21, %v9423_v2  ;;  %v9411_v21 = vld [vmem:[#allocation2 + $0x140] sm:$0xf] }
 0x47c   : > { %v3580_v40 = vmul.f32 1.442695, %v3563_v43 }
 0x47d   : > { %4272 = vmatpush.bf16.msrb.mxu2 %v12156_v57  ;;  %v12237_v57 = vsel %vm3283_vm10, 0.0, %v13972_v63 }
 0x47e   : > { %10488 = vpow2.f32 %v3580_v40  ;;  %14106 = vst [vmem:[#allocation17_spill] sm:$0xff] %v12237_v57  ;;  %v12249_v11 = vadd.f32 %v12190_v51, %v12237_v57  ;;  %v3268_v51 = vadd.s32 112, %v12023_v48  ;;  %v10273_v40 = vld [vmem:[#allocation2 + $0x1a8] sm:$0xf0] }
 0x47f   : > { %9283 = vmatmul.msk.bf16.gmra.mxu1 %vm3432_vm0, %v14105_v58  ;;  %v3263_v58 = vadd.s32 72, %v12023_v48 }
 0x480   : > { %vm3286_vm12 = vcmp.le.s32.totalorder %v12025_v50, %v3268_v51 }
 0x481   : > { %9387 = vmatmul.msk.bf16.gmra.mxu3 %vm3432_vm0, %v9332_v19  ;;  %4273 = vmatpush.bf16.msrb.mxu2 %v4252_v53  ;;  %v10274_v53 = vld [vmem:[#allocation2 + $0x1f0] sm:$0xf0]  ;;  %v12260_v43 = vpop.f32.mrf.mxu3  ;;  %v9335_v19 = vld [vmem:[#allocation2 + $0xe0] sm:$0xf]  ;;  %vm3281_vm13 = vcmp.le.s32.totalorder %v12025_v50, %v3263_v58 }
 0x482   : > { %v9420_v42 = vor.u32 %v10274_v53, %v9419_v49  ;;  %v9336_v2 = vor.u32 %v10255_v28, %v9335_v19  ;;  %v9412_v49 = vor.u32 %v10272_v56, %v9411_v21  ;;  %v12280_v53 = vadd.f32 %v12218_v31, %v12057_v0  ;;  %v10270_v19 = vld [vmem:[#allocation2 + $0xd0] sm:$0xf0]  ;;  %v10256_v56 = vld [vmem:[#allocation2 + $0x148] sm:$0xf0] }
 0x483   : > { %v3264_v31 = vadd.s32 80, %v12023_v48 }
 0x484   : > { %v12242_v7 = vpop.eup %10488 }
 0x485   : > { %v3658_v23 = vpack.c.bf16 %v12242_v7, %v12239_v6  ;;  %4274 = vmatpush.bf16.msrb.mxu2 %v12197_v22  ;;  %v12257_v22 = vsel %vm3285_vm11, 0.0, %v13972_v63  ;;  %vm3282_vm14 = vcmp.le.s32.totalorder %v12025_v50, %v3264_v31 }
 0x486   : > { %14107 = vst [vmem:[#allocation18_spill] sm:$0xff] %v12257_v22  ;;  %v12265_v20 = vadd.f32 %v12212_v36, %v12257_v22  ;;  %v12276_v36 = vpop.f32.mrf.mxu1 }
 0x487   : > { %3552 = vmax.xlane.f32.xlu2 %v12249_v11  ;;  %3722 = vmatmul.bf16.vlgmr.msrb.gmra.mxu0 %v3658_v23 }
 0x488   : > { %5964 = vmatpush.bf16.msrb.mxu0 %v9424_v9  ;;  %v14108_v9 = vld [vmem:[#allocation20_spill] sm:$0xff] }
 0x489   : > { %4275 = vmatpush.bf16.msrb.mxu2 %v12152_v34  ;;  %v9416_v34 = vor.u32 %v10273_v40, %v9415_v62  ;;  %v3535_v23 = vpop.xlane.xlu0 %3534  ;;  %v12288_v62 = vpop.f32.mrf.mxu3  ;;  %v12292_v40 = vsel %vm3281_vm13, 0.0, %v13972_v63 }
 0x48c   : > { %5965 = vmatpush.bf16.msrb.mxu0 %v9420_v42  ;;  %v9407_v42 = vld [vmem:[#allocation2 + $0xf8] sm:$0xf] }
 0x48d   : > { %4276 = vmatpush.bf16.msrb.mxu2 %v12133_v14  ;;  %v12274_v14 = vsel %vm3286_vm12, 0.0, %v13972_v63 }
 0x48e   : > { %v12286_v51 = vadd.f32 %v12221_v29, %v12274_v14  ;;  %v12299_v29 = vadd.f32 %v12139_v54, %v12292_v40  ;;  %v12304_v21 = vpop.f32.mrf.mxu1  ;;  %v12312_v54 = vadd.f32 %v12209_v60, %v12033_v32  ;;  %v14109_v60 = vld [vmem:[#allocation27_spill] sm:$0xff] }
 0x48f   : > { %3556 = vmax.xlane.f32.xlu2 %v12265_v20  ;;  %9284 = vmatmul.msk.bf16.gmra.mxu1 %vm3432_vm0, %v14108_v9  ;;  %v12308_v9 = vsel %vm3282_vm14, 0.0, %v13972_v63 }
 0x490   : > { %5966 = vmatpush.bf16.msrb.mxu0 %v9416_v34  ;;  %v9403_v34 = vld [vmem:[#allocation2 + $0xb0] sm:$0xf]  ;;  %v12319_v31 = vadd.f32 %v12162_v41, %v12308_v9 }
 0x491   : > { %5394 = vmatpush.bf16.msra.mxu2 %v5385_v17  ;;  %9388 = vmatmul.msk.bf16.gmra.mxu3 %vm3432_vm0, %v9336_v2  ;;  %v10271_v17 = vld [vmem:[#allocation2 + $0x118] sm:$0xf0]  ;;  %v9399_v2 = vld [vmem:[#allocation2 + $0x68] sm:$0xf] }
 0x492   : > { %v9408_v28 = vor.u32 %v10271_v17, %v9407_v42  ;;  %v4621_v42 = vpop.f32.mrf.mxu3 }
 0x494   : > { %5967 = vmatpush.bf16.msrb.mxu0 %v9412_v49  ;;  %4071 = vmax.xlane.f32.xlu1 %v12280_v53  ;;  %v9339_v49 = vld [vmem:[#allocation2 + $0x128] sm:$0xf] }
 0x495   : > { %5395 = vmatpush.bf16.msra.mxu2 %v5383_v33  ;;  %v3564_v33 = vsub.f32 %v12083_v24, %v3535_v23  ;;  %v9404_v24 = vor.u32 %v10270_v19, %v9403_v34  ;;  %v3266_v23 = vadd.s32 96, %v12023_v48  ;;  %v9340_v17 = vor.u32 %v10256_v56, %v9339_v49 }
 0x496   : > { %v12330_v41 = vpop.f32.mrf.mxu1 }
 0x497   : > { %3558 = vmax.xlane.f32.xlu2 %v12286_v51  ;;  %v3582_v58 = vmul.f32 1.442695, %v3564_v33  ;;  %v10268_v33 = vld [vmem:[#allocation2 + $0x40] sm:$0xf0]  ;;  %vm3284_vm15 = vcmp.le.s32.totalorder %v12025_v50, %v3266_v23  ;;  %v10297_v23 = vld [vmem:[#allocation2 + $0x1a8] sm:$0xf0] }
 0x498   : > { %5968 = vmatpush.bf16.msrb.mxu0 %v9408_v28  ;;  %v12328_v34 = vsel %vm3284_vm15, 0.0, %v13972_v63 }
 0x499   : > { %5396 = vmatpush.bf16.msra.mxu2 %v12223_v52  ;;  %v10269_v52 = vld [vmem:[#allocation2 + $0x88] sm:$0xf0]  ;;  %10490 = vpow2.f32 %v3582_v58  ;;  %v12336_v19 = vadd.f32 %v12203_v10, %v12328_v34 }
 0x49a   : > { %3548 = vmax.xlane.f32.xlu0 %v12299_v29  ;;  %v4623_v58 = vpop.f32.mrf.mxu3 }
 0x49c   : > { %5969 = vmatpush.bf16.msrb.mxu0 %v9404_v24  ;;  %3612 = vadd.xlane.f32.xlu1 %v12242_v7  ;;  %v9395_v7 = vld [vmem:[#allocation2 + $0x20] sm:$0xf]  ;;  %v10257_v24 = vld [vmem:[#allocation2 + $0x190] sm:$0xf0] }
 0x49d   : > { %5397 = vmatpush.bf16.msra.mxu2 %v12184_v30  ;;  %v9400_v30 = vor.u32 %v10269_v52, %v9399_v2  ;;  %v14112_v52 = vld [vmem:[#allocation31_spill] sm:$0xff] }
 0x49e   : > { %v4046_v2 = vpop.f32.mrf.mxu1 }
 0x49f   : > { %4069 = vmax.xlane.f32.xlu2 %v12312_v54  ;;  %9285 = vmatmul.msk.bf16.gmra.mxu1 %vm3432_vm0, %v14109_v60  ;;  %v10491_v28 = vpop.eup %10490 }
 0x4a0   : > { %5970 = vmatpush.bf16.msrb.mxu0 %v9400_v30 }
 0x4a1   : > { %5398 = vmatpush.bf16.msra.mxu2 %v12207_v26  ;;  %9389 = vmatmul.msk.bf16.gmra.mxu3 %vm3432_vm0, %v9340_v17  ;;  %v9396_v26 = vor.u32 %v10268_v33, %v9395_v7  ;;  %v9347_v7 = vld [vmem:[#allocation2 + $0x1b8] sm:$0xf]  ;;  %v12364_v33 = vpop.permute.xlu0 %6494 }
 0x4a2   : > { %3550 = vmax.xlane.f32.xlu0 %v12319_v31  ;;  %v12356_v56 = vpop.f32.mrf.mxu3 }
 0x4a4   : > { %5971 = vmatpush.bf16.msrb.mxu0 %v9396_v26  ;;  %3614 = vadd.xlane.f32.xlu1 %v10491_v28  ;;  %v9527_v26 = vld [vmem:[#allocation2 + $0x218] sm:$0xf] }
 0x4a5   : > { %5399 = vmatpush.bf16.msra.mxu2 %v12205_v55  ;;  %v12339_v55 = vadd.f32 %v4621_v42, %v12073_v4  ;;  %v10258_v42 = vld [vmem:[#allocation2 + $0x1d8] sm:$0xf0] }
 0x4a6   : > { %v12359_v30 = vpop.f32.mrf.mxu1  ;;  %v9348_v60 = vor.u32 %v10258_v42, %v9347_v7  ;;  %v10259_v7 = vld [vmem:[#allocation2 + $0x220] sm:$0xf0] }
 0x4a7   : > { %3610 = vadd.xlane.f32.xlu2 %v12239_v6  ;;  %14110 = vst [vmem:[#allocation19_spill] sm:$0xff] %v12339_v55  ;;  %v9343_v6 = vld [vmem:[#allocation2 + $0x170] sm:$0xf] }
 0x4a8   : > { %v9344_v10 = vor.u32 %v10257_v24, %v9343_v6  ;;  %v10299_v24 = vld [vmem:[#allocation2 + $0x238] sm:$0xf0] }
 0x4a9   : > { %5400 = vmatpush.bf16.msra.mxu2 %v12180_v18  ;;  %v12346_v18 = vadd.f32 %v12260_v43, %v12033_v32  ;;  %v9519_v43 = vld [vmem:[#allocation2 + $0x188] sm:$0xf] }
 0x4aa   : > { %3554 = vmax.xlane.f32.xlu0 %v12336_v19  ;;  %v9520_v49 = vor.u32 %v10297_v23, %v9519_v43  ;;  %v12361_v17 = vpop.f32.mrf.mxu3 }
 0x4ab   : > { %14111 = vst [vmem:[#allocation47_spill] sm:$0xff] %v12346_v18 }
 0x4ac   : > { %4660 = vmax.xlane.f32.xlu1 %v12339_v55 }
 0x4ad   : > { %5401 = vmatpush.bf16.msra.mxu2 %v12137_v15  ;;  %v12354_v15 = vadd.f32 %v12253_v61, %v12169_v27  ;;  %v14114_v61 = vld [vmem:[#allocation34_spill] sm:$0xff] }
 0x4ae   : > { %v12369_v6 = vpop.f32.mrf.mxu1 }
 0x4af   : > { %4656 = vmax.xlane.f32.xlu2 %v12346_v18  ;;  %9286 = vmatmul.msk.bf16.gmra.mxu1 %vm3432_vm0, %v14112_v52  ;;  %14113 = vst [vmem:[#allocation36_spill] sm:$0xff] %v12354_v15  ;;  %v12371_v52 = vpop.permute.xlu1 %6496 }
 0x4b1   : > { %9390 = vmatmul.msk.bf16.gmra.mxu3 %vm3432_vm0, %v9344_v10  ;;  %v9528_v10 = vor.u32 %v10299_v24, %v9527_v26  ;;  %v3539_v24 = vpop.xlane.xlu2 %3538 }
 0x4b2   : > { %v12373_v43 = vpop.f32.mrf.mxu3 }
 0x4b4   : > { %4075 = vmax.xlane.f32.xlu1 %v12354_v15  ;;  %v14115_v15 = vld [vmem:[#allocation35_spill] sm:$0xff] }
 0x4ba   : > { %v12381_v26 = vpop.f32.mrf.mxu3 }
 0x4bc   : > { %v3541_v63 = vpop.xlane.xlu1 %3540 }
 0x4be   : > { %6504 = vrot.lane.b32.xlu0 %v9520_v49, %s11074_s21 }
 0x4bf   : > { %9287 = vmatmul.msk.bf16.gmra.mxu1 %vm3432_vm0, %v14114_v61  ;;  %v12377_v61 = vpop.f32.mrf.mxu1 }
 0x4c1   : > { %9391 = vmatmul.msk.bf16.gmra.mxu3 %vm3432_vm0, %v9348_v60  ;;  %v9351_v60 = vld [vmem:[#allocation2 + $0x200] sm:$0xf] }
 0x4c2   : > { %v9352_v55 = vor.u32 %v10259_v7, %v9351_v60  ;;  %v14116_v60 = vld [vmem:[#allocation45_spill] sm:$0xff] }
 0x4c7   : > { %v3537_v23 = vpop.xlane.xlu0 %3536  ;;  %6508 = vrot.lane.b32.xlu2 %v9528_v10, %s11074_s21  ;;  %v3567_v10 = vsub.f32 %v12147_v1, %v3541_v63  ;;  %v12386_v37 = vpop.f32.mrf.mxu1  ;;  %v3269_v63 = vadd.s32 120, %v12023_v48 }
 0x4c8   : > { %v3565_v49 = vsub.f32 %v12178_v12, %v3537_v23  ;;  %v3566_v23 = vsub.f32 %v12114_v3, %v3539_v24  ;;  %v3543_v1 = vpop.xlane.xlu2 %3542 }
 0x4c9   : > { %vm3287_vm1 = vcmp.le.s32.totalorder %v12025_v50, %v3269_v63 }
 0x4ca   : > { %v3584_v42 = vmul.f32 1.442695, %v3565_v49  ;;  %v3588_v49 = vmul.f32 1.442695, %v3567_v10 }
 0x4cc   : > { %10492 = vpow2.f32 %v3584_v42  ;;  %v3586_v42 = vmul.f32 1.442695, %v3566_v23 }
 0x4cd   : > { %10494 = vpow2.f32 %v3588_v49  ;;  %v3568_v49 = vsub.f32 %v12125_v59, %v3543_v1  ;;  %v12425_v59 = vadd.f32 %v12276_v36, %v12106_v47  ;;  %v14120_v1 = vld [vmem:[#allocation41_spill] sm:$0xff] }
 0x4ce   : > { %10496 = vpow2.f32 %v3586_v42 }
 0x4cf   : > { %9288 = vmatmul.msk.bf16.gmra.mxu1 %vm3432_vm0, %v14115_v15  ;;  %v3547_v7 = vpop.xlane.xlu0 %3546  ;;  %v12389_v15 = vadd.f32 %v4623_v58, %v12169_v27  ;;  %v12400_v58 = vadd.f32 %v4046_v2, %v12159_v16  ;;  %v12402_v10 = vpop.f32.mrf.mxu1  ;;  %v3590_v42 = vmul.f32 1.442695, %v3568_v49  ;;  %v12461_v49 = vadd.f32 %v12361_v17, %v12142_v25 }
 0x4d0   : > { %v12478_v17 = vadd.f32 %v12304_v21, %v12142_v25 }
 0x4d1   : > { %9392 = vmatmul.msk.bf16.gmra.mxu3 %vm3432_vm0, %v9352_v55  ;;  %v3570_v55 = vsub.f32 %v12194_v13, %v3547_v7  ;;  %14117 = vst [vmem:[#allocation28_spill] sm:$0xff] %v12400_v58  ;;  %v12415_v7 = vpop.permute.xlu2 %6498 }
 0x4d2   : > { %v10493_v18 = vpop.eup %10492  ;;  %14123 = vst [vmem:[#allocation30_spill] sm:$0xff] %v12461_v49 }
 0x4d3   : > { %3616 = vadd.xlane.f32.xlu1 %v10493_v18  ;;  %v3659_v12 = vpack.c.bf16 %v10493_v18, %v10491_v28  ;;  %v3545_v28 = vpop.xlane.xlu1 %3544  ;;  %v12394_v3 = vpop.eup %10494  ;;  %v3594_v18 = vmul.f32 1.442695, %v3570_v55  ;;  %14125 = vst [vmem:[#allocation33_spill] sm:$0xff] %v12478_v17 }
 0x4d4   : > { %v10497_v24 = vpop.eup %10496  ;;  %v3569_v13 = vsub.f32 %v12166_v38, %v3545_v28  ;;  %v12439_v28 = vadd.f32 %v12369_v6, %v12292_v40 }
 0x4d5   : > { %3727 = vmatmul.bf16.gmra.mxu0 %v3659_v12  ;;  %v3660_v48 = vpack.c.bf16 %v12394_v3, %v10497_v24  ;;  %v14118_v12 = vmov -1e+30   ;;  %10498 = vpow2.f32 %v3594_v18 }
 0x4d6   : > { %v12408_v23 = vsel %vm3287_vm1, 0.0, %v14118_v12  ;;  %v3592_v50 = vmul.f32 1.442695, %v3569_v13  ;;  %14121 = vst [vmem:[#allocation44_spill] sm:$0xff] %v12439_v28 }
 0x4d7   : > { %14119 = vst [vmem:[#allocation29_spill] sm:$0xff] %v12408_v23  ;;  %v12413_v2 = vadd.f32 %v12233_v46, %v12408_v23  ;;  %v12421_v55 = vpop.f32.mrf.mxu1  ;;  %v12429_v46 = vadd.f32 %v12288_v62, %v12057_v0 }
 0x4d8   : > { %10500 = vpow2.f32 %v3592_v50  ;;  %v4636_v50 = vpop.f32.mrf.mxu3 }
 0x4d9   : > { %10502 = vpow2.f32 %v3590_v42  ;;  %v12441_v36 = vpop.permute.xlu2 %6502 }
 0x4db   : > { %4662 = vmax.xlane.f32.xlu1 %v12389_v15  ;;  %v12418_v38 = vpop.eup %10498 }
 0x4dc   : > { %v12457_v12 = vpop.permute.xlu1 %6506 }
 0x4de   : > { %v12431_v63 = vpop.eup %10500 }
 0x4df   : > { %9489 = vmatmul.msk.bf16.vlgmr.msrb.gmra.mxu1 %vm3432_vm0, %v14116_v60  ;;  %v10503_v18 = vpop.eup %10502  ;;  %v12447_v60 = vadd.f32 %v12356_v56, %v12106_v47  ;;  %v12449_v13 = vpop.f32.mrf.mxu1 }
 0x4e0   : > { %v3661_v62 = vpack.c.bf16 %v12431_v63, %v10503_v18 }
 0x4e1   : > { %14122 = vst [vmem:[#allocation21_spill] sm:$0xff] %v12447_v60 }
 0x4e2   : > { %v12470_v42 = vpop.permute.xlu0 %6500 }
 0x4e3   : > { %4083 = vmax.xlane.f32.xlu1 %v12400_v58 }
 0x4e5   : > { %3732 = vmatmul.bf16.gmra.mxu0 %v3660_v48  ;;  %v12453_v48 = vadd.f32 %v12228_v39, %v12073_v4 }
 0x4e7   : > { %v12463_v56 = vpop.f32.mrf.mxu1 }
 0x4e8   : > { %3560 = vmax.xlane.f32.xlu0 %v12413_v2 }
 0x4eb   : > { %3626 = vadd.xlane.f32.xlu1 %v12418_v38 }
 0x4ef   : > { %9490 = vmatmul.msk.bf16.gmra.mxu1 %vm3432_vm0, %v14120_v1  ;;  %v12474_v1 = vadd.f32 %v12330_v41, %v12119_v44 }
 0x4f0   : > { %4077 = vmax.xlane.f32.xlu0 %v12425_v59  ;;  %4658 = vmax.xlane.f32.xlu2 %v12429_v46 }
 0x4f1   : > { %14124 = vst [vmem:[#allocation32_spill] sm:$0xff] %v12474_v1 }
 0x4f3   : > { %4087 = vmax.xlane.f32.xlu1 %v12439_v28  ;;  %v12481_v28 = vpop.f32.mrf.mxu3 }
 0x4f5   : > { %3737 = vmatmul.bf16.gmra.mxu0 %v3661_v62 }
 0x4f8   : > { %4664 = vmax.xlane.f32.xlu0 %v12447_v60  ;;  %4073 = vmax.xlane.f32.xlu2 %v12453_v48 }
 0x4fa   : > { %v3553_v6 = vpop.xlane.xlu2 %3552 }
 0x4ff   : > { %9491 = vmatmul.msk.bf16.gmra.mxu1 %vm3432_vm0, %v11809_v35  ;;  %v12484_v35 = vpop.f32.mrf.mxu1 }
 0x500   : > { %4666 = vmax.xlane.f32.xlu0 %v12461_v49  ;;  %3618 = vadd.xlane.f32.xlu2 %v10497_v24 }
 0x502   : > { %v12468_v39 = vpop.xlane.xlu2 %3556 }
 0x504   : > { %v3723_v47 = vpop.f32.mrf.mxu0 }
 0x507   : > { %v4072_v62 = vpop.xlane.xlu1 %4071 }
 0x508   : > { %4081 = vmax.xlane.f32.xlu0 %v12474_v1  ;;  %4079 = vmax.xlane.f32.xlu2 %v12478_v17  ;;  %v4102_v41 = vsub.f32 %v12280_v53, %v4072_v62  ;;  %v12493_v1 = vpop.f32.mrf.mxu3  ;;  %v12496_v17 = vpop.f32.mrf.mxu1 }
 0x50a   : > { %v12486_v24 = vpop.xlane.xlu2 %3558  ;;  %v4119_v21 = vmul.f32 1.442695, %v4102_v41 }
 0x50d   : > { %v3549_v58 = vpop.xlane.xlu0 %3548 }
 0x50e   : > { %v3571_v60 = vsub.f32 %v12299_v29, %v3549_v58 }
 0x50f   : > { %v3613_v27 = vpop.xlane.xlu1 %3612  ;;  %9492 = vmatmul.msk.bf16.gmra.mxu1 %vm3432_vm0, %v11979_v45  ;;  %v3725_v45 = vpop.f32.mrf.mxu0 }
 0x510   : > { %v3596_v49 = vmul.f32 1.442695, %v3571_v60  ;;  %10504 = vrcp.f32 %v3613_v27  ;;  %3622 = vadd.xlane.f32.xlu0 %v10503_v18  ;;  %3620 = vadd.xlane.f32.xlu2 %v12394_v3  ;;  %v12500_v27 = vadd.f32 %v12373_v43, %v12119_v44  ;;  %v12505_v18 = vadd.f32 %v12359_v30, %v12188_v5  ;;  %v4643_v41 = vpop.f32.mrf.mxu3 }
 0x512   : > { %10506 = vpow2.f32 %v3596_v49  ;;  %v4070_v25 = vpop.xlane.xlu2 %4069  ;;  %v3573_v49 = vsub.f32 %v12249_v11, %v3553_v6  ;;  %v14126_v6 = vld [vmem:[#allocation46_spill] sm:$0xff] }
 0x513   : > { %v4101_v4 = vsub.f32 %v12312_v54, %v4070_v25  ;;  %10508 = vpow2.f32 %v4119_v21  ;;  %v12516_v21 = vpop.f32.mrf.mxu1 }
 0x515   : > { %v4117_v53 = vmul.f32 1.442695, %v4101_v4  ;;  %v3551_v29 = vpop.xlane.xlu0 %3550 }
 0x516   : > { %v10505_v58 = vpop.eup %10504  ;;  %v3572_v3 = vsub.f32 %v12319_v31, %v3551_v29 }
 0x517   : > { %v3764_v60 = vmul.f32 %v10505_v58, %v3725_v45  ;;  %10510 = vpow2.f32 %v4117_v53  ;;  %v3600_v53 = vmul.f32 1.442695, %v3573_v49 }
 0x518   : > { %v10507_v25 = vpop.eup %10506  ;;  %v3598_v54 = vmul.f32 1.442695, %v3572_v3  ;;  %4668 = vmax.xlane.f32.xlu0 %v12500_v27  ;;  %4085 = vmax.xlane.f32.xlu2 %v12505_v18 }
 0x519   : > { %v3780_v4 = vpack.c.bf16 %v3764_v60, %v3764_v60  ;;  %v3662_v43 = vpack.c.bf16 %v10507_v25, %v12418_v38  ;;  %v12512_v30 = vpop.eup %10508  ;;  %v12521_v38 = vadd.f32 %v4636_v50, %v12188_v5  ;;  %v12531_v50 = vadd.f32 %v12381_v26, %v12159_v16 }
 0x51a   : > { %10512 = vpow2.f32 %v3598_v54  ;;  %v3611_v31 = vpop.xlane.xlu2 %3610 }
 0x51b   : > { %10514 = vrcp.f32 %v3611_v31  ;;  %3742 = vmatmul.bf16.gmra.mxu0 %v3662_v43  ;;  %3797 = vst.msk [vmem:[#allocation3 + $0xc] sm:$0xf] %vm3795_vm2, %v3780_v4  ;;  %v4646_v4 = vpop.f32.mrf.mxu3  ;;  %v12538_v49 = vpop.f32.mrf.mxu1  ;;  %v12543_v31 = vadd.f32 %v4643_v41, %v12237_v57  ;;  %v12556_v41 = vadd.f32 %v12402_v10, %v12328_v34  ;;  %v12566_v10 = vadd.f32 %v12481_v28, %v12292_v40 }
 0x51c   : > { %10516 = vpow2.f32 %v3600_v53  ;;  %v3575_v53 = vsub.f32 %v12265_v20, %v12468_v39  ;;  %v12579_v28 = vadd.f32 %v12386_v37, %v12237_v57  ;;  %v3576_v37 = vsub.f32 %v12286_v51, %v12486_v24  ;;  %v14128_v24 = vld [vmem:[#allocation38_spill] sm:$0xff] }
 0x51d   : > { %v12514_v62 = vpop.eup %10510  ;;  %v3555_v54 = vpop.xlane.xlu0 %3554  ;;  %v12613_v51 = vadd.f32 %v12421_v55, %v12257_v22 }
 0x51e   : > { %v4197_v29 = vpack.c.bf16 %v12512_v30, %v12514_v62 }
 0x51f   : > { %9493 = vmatmul.msk.bf16.gmra.mxu1 %vm3432_vm0, %v14126_v6  ;;  %v3604_v6 = vmul.f32 1.442695, %v3575_v53 }
 0x520   : > { %v10513_v11 = vpop.eup %10512  ;;  %3624 = vadd.xlane.f32.xlu0 %v12431_v63  ;;  %4672 = vmax.xlane.f32.xlu2 %v12521_v38  ;;  %v12536_v63 = vadd.f32 %v12377_v61, %v12308_v9 }
 0x521   : > { %v10515_v58 = vpop.eup %10514  ;;  %4277 = vmatmul.bf16.vlgmr.msrb.gmra.mxu2 %v4197_v29  ;;  %3630 = vadd.xlane.f32.xlu1 %v10513_v11 }
 0x522   : > { %v3763_v45 = vmul.f32 %v10515_v58, %v3723_v47  ;;  %v12527_v3 = vpop.xlane.xlu2 %4656  ;;  %v10517_v43 = vpop.eup %10516  ;;  %v3574_v47 = vsub.f32 %v12336_v19, %v3555_v54  ;;  %v12551_v19 = vadd.f32 %v12493_v1, %v12308_v9 }
 0x523   : > { %v3663_v26 = vpack.c.bf16 %v10517_v43, %v10513_v11  ;;  %v14127_v11 = vld [vmem:[#allocation39_spill] sm:$0xff]  ;;  %v4648_v20 = vpop.f32.mrf.mxu3  ;;  %v12561_v39 = vpop.f32.mrf.mxu1 }
 0x524   : > { %v3779_v60 = vpack.c.bf16 %v3763_v45, %v3763_v45  ;;  %v3602_v29 = vmul.f32 1.442695, %v3574_v47 }
 0x526   : > { %3796 = vst.msk [vmem:[#allocation3] sm:$0xf] %vm3795_vm2, %v3779_v60  ;;  %10518 = vpow2.f32 %v3602_v29 }
 0x527   : > { %10520 = vpow2.f32 %v3604_v6  ;;  %v14129_v6 = vld [vmem:[#allocation47_spill] sm:$0xff] }
 0x528   : > { %4670 = vmax.xlane.f32.xlu0 %v12531_v50  ;;  %4089 = vmax.xlane.f32.xlu2 %v12536_v63 }
 0x529   : > { %4678 = vmax.xlane.f32.xlu1 %v12543_v31 }
 0x52a   : > { %v6509_v61 = vpop.permute.xlu2 %6508 }
 0x52b   : > { %3747 = vmatmul.bf16.gmra.mxu0 %v3663_v26  ;;  %6518 = vmatpush.bf16.msrb.mxu2 %v6509_v61  ;;  %v4651_v54 = vpop.f32.mrf.mxu3  ;;  %v12575_v47 = vpop.f32.mrf.mxu1 }
 0x52c   : > { %v10519_v1 = vpop.eup %10518 }
 0x52d   : > { %v10521_v45 = vpop.eup %10520 }
 0x52e   : > { %v3664_v60 = vpack.c.bf16 %v10521_v45, %v10519_v1 }
 0x52f   : > { %6519 = vmatpush.bf16.msrb.mxu2 %v12457_v12  ;;  %9494 = vmatmul.msk.bf16.gmra.mxu1 %vm3432_vm0, %v14127_v11  ;;  %v3615_v12 = vpop.xlane.xlu1 %3614  ;;  %v4688_v11 = vsub.f32 %v14129_v6, %v12527_v3 }
 0x530   : > { %3628 = vadd.xlane.f32.xlu0 %v10507_v25  ;;  %4676 = vmax.xlane.f32.xlu2 %v12551_v19  ;;  %v6505_v58 = vpop.permute.xlu0 %6504  ;;  %v12571_v25 = vadd.f32 %v4648_v20, %v12257_v22 }
 0x531   : > { %4093 = vmax.xlane.f32.xlu1 %v12556_v41 }
 0x533   : > { %6520 = vmatpush.bf16.msrb.mxu2 %v6505_v58 }
 0x537   : > { %6521 = vmatpush.bf16.msrb.mxu2 %v12441_v36  ;;  %v12582_v36 = vadd.f32 %v4646_v4, %v12328_v34  ;;  %v12584_v26 = vpop.xlane.xlu1 %4660  ;;  %v4653_v4 = vpop.f32.mrf.mxu3 }
 0x538   : > { %4674 = vmax.xlane.f32.xlu0 %v12566_v10  ;;  %3632 = vadd.xlane.f32.xlu2 %v10517_v43  ;;  %v12599_v43 = vpop.f32.mrf.mxu1 }
 0x539   : > { %4682 = vmax.xlane.f32.xlu1 %v12571_v25 }
 0x53b   : > { %3752 = vmatmul.bf16.gmra.mxu0 %v3664_v60  ;;  %6522 = vmatpush.bf16.msrb.mxu2 %v12470_v42  ;;  %v12592_v42 = vadd.f32 %v12463_v56, %v12408_v23  ;;  %v12607_v56 = vadd.f32 %v4653_v4, %v12408_v23 }
 0x53f   : > { %6523 = vmatpush.bf16.msrb.mxu2 %v12415_v7  ;;  %9495 = vmatmul.msk.bf16.gmra.mxu1 %vm3432_vm0, %v11990_v8  ;;  %v3606_v7 = vmul.f32 1.442695, %v3576_v37  ;;  %v12603_v8 = vadd.f32 %v12449_v13, %v12274_v14  ;;  %v4076_v53 = vpop.xlane.xlu1 %4075  ;;  %v12617_v13 = vadd.f32 %v12484_v35, %v12033_v32  ;;  %v5740_v58 = vpop.f32.mrf.mxu3 }
 0x540   : > { %4091 = vmax.xlane.f32.xlu0 %v12579_v28  ;;  %4680 = vmax.xlane.f32.xlu2 %v12582_v36 }
 0x541   : > { %4099 = vmax.xlane.f32.xlu1 %v12592_v42  ;;  %10522 = vpow2.f32 %v3606_v7 }
 0x542   : > { %10524 = vrcp.f32 %v3615_v12  ;;  %v4704_v12 = vmul.f32 1.442695, %v4688_v11 }
 0x543   : > { %6524 = vmatpush.bf16.msrb.mxu2 %v12371_v52 }
 0x547   : > { %6525 = vmatpush.bf16.msrb.mxu2 %v12364_v33  ;;  %v10523_v52 = vpop.eup %10522  ;;  %v12619_v33 = vpop.f32.mrf.mxu1 }
 0x548   : > { %3634 = vadd.xlane.f32.xlu0 %v10519_v1  ;;  %4097 = vmax.xlane.f32.xlu2 %v12603_v8  ;;  %v3617_v61 = vpop.xlane.xlu1 %3616  ;;  %v10525_v29 = vpop.eup %10524  ;;  %v12628_v1 = vadd.f32 %v4651_v54, %v12274_v14 }
 0x549   : > { %4686 = vmax.xlane.f32.xlu1 %v12607_v56  ;;  %10526 = vrcp.f32 %v3617_v61  ;;  %v5742_v6 = vpop.f32.mrf.mxu3 }
 0x54a   : > { %10528 = vpow2.f32 %v4704_v12 }
 0x54f   : > { %9496 = vmatmul.msk.bf16.gmra.mxu1 %vm3432_vm0, %v14128_v24  ;;  %v10527_v60 = vpop.eup %10526  ;;  %vm4414_vm0 = vcmask 1043968  }
 0x550   : > { %4095 = vmax.xlane.f32.xlu0 %v12613_v51  ;;  %3638 = vadd.xlane.f32.xlu2 %v10523_v52 }
 0x551   : > { %5194 = vmax.xlane.f32.xlu1 %v12617_v13 }
 0x552   : > { %v3728_v55 = vpop.f32.mrf.mxu0 }
 0x553   : > { %v3765_v20 = vmul.f32 %v10525_v29, %v3728_v55  ;;  %v10529_v29 = vpop.eup %10528 }
 0x555   : > { %v3781_v35 = vpack.c.bf16 %v3765_v20, %v3765_v20  ;;  %v12636_v20 = vadd.f32 %v5740_v58, %v12033_v32 }
 0x557   : > { %3798 = vst.msk [vmem:[#allocation3 + $0x18] sm:$0xf] %vm3795_vm2, %v3781_v35 }
 0x558   : > { %3636 = vadd.xlane.f32.xlu0 %v10521_v45  ;;  %4684 = vmax.xlane.f32.xlu2 %v12628_v1 }
 0x55a   : > { %v3730_v37 = vpop.f32.mrf.mxu0 }
 0x55b   : > { %v3766_v3 = vmul.f32 %v10527_v60, %v3730_v37  ;;  %v3561_v4 = vpop.xlane.xlu0 %3560  ;;  %v5745_v37 = vpop.f32.mrf.mxu3 }
 0x55c   : > { %v3577_v7 = vsub.f32 %v12413_v2, %v3561_v4  ;;  %v14130_v2 = vld [vmem:[#allocation36_spill] sm:$0xff] }
 0x55d   : > { %v3782_v24 = vpack.c.bf16 %v3766_v3, %v3766_v3  ;;  %v4104_v60 = vsub.f32 %v14130_v2, %v4076_v53  ;;  %v14131_v3 = vld [vmem:[#allocation19_spill] sm:$0xff] }
 0x55e   : > { %v3608_v61 = vmul.f32 1.442695, %v3577_v7  ;;  %v4690_v4 = vsub.f32 %v14131_v3, %v12584_v26 }
 0x55f   : > { %3799 = vst.msk [vmem:[#allocation3 + $0x24] sm:$0xf] %vm3795_vm2, %v3782_v24 }
 0x560   : > { %10530 = vpow2.f32 %v3608_v61  ;;  %4736 = vadd.xlane.f32.xlu2 %v10529_v29  ;;  %v4708_v61 = vmul.f32 1.442695, %v4690_v4 }
 0x562   : > { %v3733_v53 = vpop.f32.mrf.mxu0 }
 0x563   : > { %v4078_v54 = vpop.xlane.xlu0 %4077  ;;  %v4659_v11 = vpop.xlane.xlu2 %4658 }
 0x564   : > { %v4689_v45 = vsub.f32 %v12429_v46, %v4659_v11  ;;  %v4123_v46 = vmul.f32 1.442695, %v4104_v60  ;;  %v4105_v4 = vsub.f32 %v12425_v59, %v4078_v54 }
 0x566   : > { %v10531_v55 = vpop.eup %10530  ;;  %v4706_v35 = vmul.f32 1.442695, %v4689_v45 }
 0x567   : > { %3640 = vadd.xlane.f32.xlu0 %v10531_v55  ;;  %v3665_v12 = vpack.c.bf16 %v10531_v55, %v10523_v52  ;;  %v4663_v52 = vpop.xlane.xlu1 %4662  ;;  %v5747_v55 = vpop.f32.mrf.mxu3 }
 0x568   : > { %10532 = vpow2.f32 %v4706_v35  ;;  %5780 = vmax.xlane.f32.xlu2 %v12636_v20  ;;  %v4691_v2 = vsub.f32 %v12389_v15, %v4663_v52  ;;  %v4125_v15 = vmul.f32 1.442695, %v4105_v4  ;;  %v14132_v52 = vld [vmem:[#allocation33_spill] sm:$0xff] }
 0x569   : > { %3757 = vmatmul.bf16.gmra.mxu0 %v3665_v12  ;;  %10534 = vpow2.f32 %v4123_v46  ;;  %v12649_v12 = vadd.f32 %v12496_v17, %v12057_v0 }
 0x56a   : > { %v4710_v17 = vmul.f32 1.442695, %v4691_v2 }
 0x56b   : > { %v12642_v7 = vpop.xlane.xlu0 %4664  ;;  %v4074_v24 = vpop.xlane.xlu2 %4073 }
 0x56c   : > { %v4103_v58 = vsub.f32 %v12453_v48, %v4074_v24 }
 0x56e   : > { %v10533_v11 = vpop.eup %10532  ;;  %v4121_v45 = vmul.f32 1.442695, %v4103_v58 }
 0x56f   : > { %4149 = vadd.xlane.f32.xlu0 %v12514_v62  ;;  %4738 = vadd.xlane.f32.xlu1 %v10533_v11  ;;  %v10535_v48 = vpop.eup %10534  ;;  %v12653_v62 = vadd.f32 %v5742_v6, %v12057_v0  ;;  %v4784_v3 = vpack.c.bf16 %v10533_v11, %v10529_v29  ;;  %v14133_v11 = vld [vmem:[#allocation25_spill] sm:$0xff]  ;;  %v12663_v59 = vpop.f32.mrf.mxu3 }
 0x570   : > { %10536 = vpow2.f32 %v4121_v45  ;;  %4151 = vadd.xlane.f32.xlu2 %v12512_v30 }
 0x571   : > { %10538 = vpow2.f32 %v4708_v61  ;;  %v3735_v61 = vpop.f32.mrf.mxu0 }
 0x573   : > { %v4667_v26 = vpop.xlane.xlu0 %4666  ;;  %v3619_v35 = vpop.xlane.xlu2 %3618 }
 0x574   : > { %10540 = vrcp.f32 %v3619_v35  ;;  %v12661_v35 = vadd.f32 %v12516_v21, %v14133_v11  ;;  %v12668_v21 = vadd.f32 %v5745_v37, %v14133_v11 }
 0x575   : > { %10542 = vpow2.f32 %v4710_v17 }
 0x576   : > { %v10537_v60 = vpop.eup %10536  ;;  %14134 = vst [vmem:[#allocation26_spill] sm:$0xff] %v12661_v35  ;;  %10544 = vpow2.f32 %v4125_v15  ;;  %v14137_v15 = vld [vmem:[#allocation42_spill] sm:$0xff] }
 0x577   : > { %5196 = vmax.xlane.f32.xlu0 %v12649_v12  ;;  %v10539_v30 = vpop.eup %10538  ;;  %5782 = vmax.xlane.f32.xlu1 %v12653_v62  ;;  %v4198_v46 = vpack.c.bf16 %v10535_v48, %v10537_v60  ;;  %14135 = vst [vmem:[#allocation22_spill] sm:$0xff] %v12668_v21  ;;  %v12680_v37 = vpop.f32.mrf.mxu3 }
 0x578   : > { %4740 = vadd.xlane.f32.xlu2 %v10539_v30 }
 0x579   : > { %4848 = vmatmul.bf16.vlgmr.msra.gmra.mxu0 %v4784_v3  ;;  %4282 = vmatmul.bf16.gmra.mxu2 %v4198_v46  ;;  %v3738_v17 = vpop.f32.mrf.mxu0 }
 0x57a   : > { %v10541_v24 = vpop.eup %10540 }
 0x57b   : > { %v4082_v58 = vpop.xlane.xlu0 %4081  ;;  %v3767_v6 = vmul.f32 %v10541_v24, %v3733_v53  ;;  %v4080_v45 = vpop.xlane.xlu2 %4079  ;;  %v14136_v24 = vld [vmem:[#allocation30_spill] sm:$0xff] }
 0x57c   : > { %v4106_v29 = vsub.f32 %v14132_v52, %v4080_v45  ;;  %v4084_v53 = vpop.xlane.xlu1 %4083  ;;  %v10543_v3 = vpop.eup %10542 }
 0x57d   : > { %v3783_v54 = vpack.c.bf16 %v3767_v6, %v3767_v6  ;;  %v10545_v46 = vpop.eup %10544  ;;  %v12673_v6 = vadd.f32 %v12538_v49, %v14137_v15 }
 0x57e   : > { %v4127_v0 = vmul.f32 1.442695, %v4106_v29  ;;  %v4785_v29 = vpack.c.bf16 %v10543_v3, %v10539_v30 }
 0x57f   : > { %4153 = vadd.xlane.f32.xlu0 %v10537_v60  ;;  %3800 = vst.msk [vmem:[#allocation3 + $0x30] sm:$0xf] %vm3795_vm2, %v3783_v54  ;;  %5198 = vmax.xlane.f32.xlu1 %v12661_v35  ;;  %v4693_v60 = vsub.f32 %v14136_v24, %v4667_v26  ;;  %v14140_v54 = vld [vmem:[#allocation21_spill] sm:$0xff] }
 0x580   : > { %10546 = vpow2.f32 %v4127_v0  ;;  %4155 = vadd.xlane.f32.xlu2 %v10535_v48  ;;  %14138 = vst [vmem:[#allocation40_spill] sm:$0xff] %v12673_v6  ;;  %v12676_v0 = vadd.f32 %v5747_v55, %v14137_v15  ;;  %v14139_v48 = vld [vmem:[#allocation32_spill] sm:$0xff] }
 0x581   : > { %v4107_v52 = vsub.f32 %v14139_v48, %v4082_v58  ;;  %v4714_v24 = vmul.f32 1.442695, %v4693_v60  ;;  %v3740_v60 = vpop.f32.mrf.mxu0 }
 0x583   : > { %v3623_v2 = vpop.xlane.xlu0 %3622  ;;  %v3621_v4 = vpop.xlane.xlu2 %3620  ;;  %v4129_v48 = vmul.f32 1.442695, %v4107_v52 }
 0x584   : > { %10548 = vrcp.f32 %v3623_v2  ;;  %v4692_v2 = vsub.f32 %v14140_v54, %v12642_v7  ;;  %v3627_v11 = vpop.xlane.xlu1 %3626 }
 0x585   : > { %10550 = vrcp.f32 %v3621_v4  ;;  %v14141_v4 = vld [vmem:[#allocation28_spill] sm:$0xff] }
 0x586   : > { %v10547_v45 = vpop.eup %10546  ;;  %v4108_v49 = vsub.f32 %v14141_v4, %v4084_v53  ;;  %v4712_v32 = vmul.f32 1.442695, %v4692_v2  ;;  %10552 = vpow2.f32 %v4714_v24 }
 0x587   : > { %5784 = vmax.xlane.f32.xlu0 %v12668_v21  ;;  %5200 = vmax.xlane.f32.xlu1 %v12673_v6  ;;  %v4199_v26 = vpack.c.bf16 %v10547_v45, %v10545_v46  ;;  %v14142_v6 = vld [vmem:[#allocation23_spill] sm:$0xff]  ;;  %10554 = vpow2.f32 %v4129_v48 }
 0x588   : > { %5786 = vmax.xlane.f32.xlu2 %v12676_v0  ;;  %v4131_v7 = vmul.f32 1.442695, %v4108_v49  ;;  %v12689_v23 = vadd.f32 %v12561_v39, %v14142_v6  ;;  %10556 = vpow2.f32 %v4712_v32 }
 0x589   : > { %4853 = vmatmul.bf16.gmra.mxu0 %v4785_v29  ;;  %4287 = vmatmul.bf16.gmra.mxu2 %v4199_v26  ;;  %v14143_v26 = vld [vmem:[#allocation24_spill] sm:$0xff] }
 0x58a   : > { %v10549_v55 = vpop.eup %10548  ;;  %10558 = vpow2.f32 %v4131_v7 }
 0x58b   : > { %v10551_v58 = vpop.eup %10550  ;;  %v3769_v15 = vmul.f32 %v10549_v55, %v3738_v17  ;;  %v4669_v30 = vpop.xlane.xlu0 %4668  ;;  %10560 = vrcp.f32 %v3627_v11 }
 0x58c   : > { %v3768_v21 = vmul.f32 %v10551_v58, %v3735_v61  ;;  %v4086_v35 = vpop.xlane.xlu2 %4085  ;;  %v12694_v61 = vpop.f32.mrf.mxu3  ;;  %v4694_v29 = vsub.f32 %v12500_v27, %v4669_v30  ;;  %v14144_v58 = vld [vmem:[#allocation44_spill] sm:$0xff] }
 0x58d   : > { %v3785_v54 = vpack.c.bf16 %v3769_v15, %v3769_v15  ;;  %v12696_v17 = vpop.f32.mrf.mxu1  ;;  %v10553_v15 = vpop.eup %10552  ;;  %v4109_v11 = vsub.f32 %v12505_v18, %v4086_v35 }
 0x58e   : > { %v3784_v53 = vpack.c.bf16 %v3768_v21, %v3768_v21  ;;  %v10555_v52 = vpop.eup %10554  ;;  %v4088_v32 = vpop.xlane.xlu1 %4087  ;;  %v4716_v30 = vmul.f32 1.442695, %v4694_v29 }
 0x58f   : > { %3802 = vst.msk [vmem:[#allocation3 + $0x48] sm:$0xf] %vm3795_vm2, %v3785_v54  ;;  %4742 = vadd.xlane.f32.xlu0 %v10543_v3  ;;  %5202 = vmax.xlane.f32.xlu1 %v12689_v23  ;;  %v10557_v3 = vpop.eup %10556  ;;  %v4110_v48 = vsub.f32 %v14144_v58, %v4088_v32  ;;  %v12734_v58 = vadd.f32 %v12599_v43, %v12119_v44 }
 0x590   : > { %3801 = vst.msk [vmem:[#allocation3 + $0x3c] sm:$0xf] %vm3795_vm2, %v3784_v53  ;;  %4159 = vadd.xlane.f32.xlu2 %v10547_v45  ;;  %v12701_v2 = vpop.eup %10558  ;;  %v12705_v45 = vadd.f32 %v12575_v47, %v14143_v26  ;;  %v4786_v4 = vpack.c.bf16 %v10553_v15, %v10557_v3  ;;  %v4133_v47 = vmul.f32 1.442695, %v4109_v11 }
 0x591   : > { %v10561_v49 = vpop.eup %10560  ;;  %v4200_v24 = vpack.c.bf16 %v12701_v2, %v10555_v52 }
 0x593   : > { %v3625_v39 = vpop.xlane.xlu0 %3624 }
 0x594   : > { %10562 = vrcp.f32 %v3625_v39  ;;  %v12698_v21 = vpop.xlane.xlu2 %4672  ;;  %v5757_v35 = vpop.f32.mrf.mxu3 }
 0x595   : > { %v12718_v32 = vpop.f32.mrf.mxu1  ;;  %10564 = vpow2.f32 %v4716_v30 }
 0x596   : > { %v3631_v29 = vpop.xlane.xlu1 %3630  ;;  %10566 = vpow2.f32 %v4133_v47  ;;  %v4696_v47 = vsub.f32 %v12521_v38, %v12698_v21 }
 0x597   : > { %4157 = vadd.xlane.f32.xlu0 %v10545_v46  ;;  %4744 = vadd.xlane.f32.xlu1 %v10557_v3  ;;  %v12716_v3 = vadd.f32 %v12680_v37, %v14143_v26 }
 0x598   : > { %v3743_v55 = vpop.f32.mrf.mxu0  ;;  %5204 = vmax.xlane.f32.xlu2 %v12705_v45 }
 0x599   : > { %v3771_v7 = vmul.f32 %v10561_v49, %v3743_v55  ;;  %4858 = vmatmul.bf16.gmra.mxu0 %v4786_v4  ;;  %4292 = vmatmul.bf16.gmra.mxu2 %v4200_v24  ;;  %v4135_v49 = vmul.f32 1.442695, %v4110_v48 }
 0x59a   : > { %v10563_v27 = vpop.eup %10562 }
 0x59b   : > { %v3770_v54 = vmul.f32 %v10563_v27, %v3740_v60  ;;  %v3787_v53 = vpack.c.bf16 %v3771_v7, %v3771_v7  ;;  %v4671_v18 = vpop.xlane.xlu0 %4670  ;;  %v12723_v60 = vadd.f32 %v12663_v59, %v14142_v6  ;;  %v12728_v55 = vpop.eup %10564 }
 0x59c   : > { %v4695_v46 = vsub.f32 %v12531_v50, %v4671_v18  ;;  %v12712_v39 = vpop.xlane.xlu2 %4089  ;;  %14145 = vst [vmem:[#allocation20_spill] sm:$0xff] %v12728_v55  ;;  %v10567_v24 = vpop.eup %10566 }
 0x59d   : > { %v3786_v4 = vpack.c.bf16 %v3770_v54, %v3770_v54  ;;  %3804 = vst.msk [vmem:[#allocation3 + $0x60] sm:$0xf] %vm3795_vm2, %v3787_v53  ;;  %v12738_v7 = vpop.f32.mrf.mxu3  ;;  %v12746_v30 = vpop.f32.mrf.mxu1 }
 0x59e   : > { %v4718_v11 = vmul.f32 1.442695, %v4695_v46  ;;  %v4679_v53 = vpop.xlane.xlu1 %4678 }
 0x59f   : > { %3803 = vst.msk [vmem:[#allocation3 + $0x54] sm:$0xf] %vm3795_vm2, %v3786_v4  ;;  %5790 = vmax.xlane.f32.xlu0 %v12716_v3  ;;  %5788 = vmax.xlane.f32.xlu1 %v12723_v60  ;;  %v4720_v4 = vmul.f32 1.442695, %v4696_v47 }
 0x5a0   : > { %10568 = vpow2.f32 %v4718_v11  ;;  %v3745_v50 = vpop.f32.mrf.mxu0  ;;  %4746 = vadd.xlane.f32.xlu2 %v10553_v15  ;;  %v12744_v15 = vadd.f32 %v12619_v33, %v12159_v16 }
 0x5a1   : > { %10570 = vpow2.f32 %v4135_v49 }
 0x5a2   : > { %10572 = vrcp.f32 %v3631_v29 }
 0x5a3   : > { %v3629_v37 = vpop.xlane.xlu0 %3628 }
 0x5a4   : > { %10574 = vrcp.f32 %v3629_v37  ;;  %v12730_v59 = vpop.xlane.xlu2 %4676 }
 0x5a5   : > { %v12769_v47 = vpop.f32.mrf.mxu1 }
 0x5a6   : > { %v12736_v48 = vpop.eup %10568 }
 0x5a7   : > { %14146 = vst [vmem:[#allocation27_spill] sm:$0xff] %v12736_v48  ;;  %v12740_v27 = vpop.eup %10570  ;;  %5206 = vmax.xlane.f32.xlu0 %v12734_v58  ;;  %v4787_v43 = vpack.c.bf16 %v12736_v48, %v12728_v55  ;;  %4161 = vadd.xlane.f32.xlu1 %v10555_v52  ;;  %v12759_v52 = vadd.f32 %v12694_v61, %v12119_v44  ;;  %v4094_v61 = vpop.xlane.xlu1 %4093 }
 0x5a8   : > { %v10573_v54 = vpop.eup %10572  ;;  %v3748_v18 = vpop.f32.mrf.mxu0  ;;  %v4201_v46 = vpack.c.bf16 %v12740_v27, %v10567_v24  ;;  %5208 = vmax.xlane.f32.xlu2 %v12744_v15 }
 0x5a9   : > { %v3773_v49 = vmul.f32 %v10573_v54, %v3748_v18  ;;  %4863 = vmatmul.bf16.gmra.mxu0 %v4787_v43  ;;  %v12762_v43 = vadd.f32 %v5757_v35, %v12159_v16 }
 0x5aa   : > { %v10575_v33 = vpop.eup %10574  ;;  %4297 = vmatmul.bf16.gmra.mxu2 %v4201_v46 }
 0x5ab   : > { %v3772_v29 = vmul.f32 %v10575_v33, %v3745_v50  ;;  %v3789_v38 = vpack.c.bf16 %v3773_v49, %v3773_v49  ;;  %v4675_v21 = vpop.xlane.xlu0 %4674  ;;  %v4111_v50 = vsub.f32 %v12536_v63, %v12712_v39 }
 0x5ac   : > { %v4697_v11 = vsub.f32 %v12566_v10, %v4675_v21  ;;  %v3633_v37 = vpop.xlane.xlu2 %3632  ;;  %v5762_v10 = vpop.f32.mrf.mxu3 }
 0x5ad   : > { %v3788_v55 = vpack.c.bf16 %v3772_v29, %v3772_v29  ;;  %3806 = vst.msk [vmem:[#allocation3 + $0x78] sm:$0xf] %vm3795_vm2, %v3789_v38  ;;  %10576 = vrcp.f32 %v3633_v37  ;;  %v4137_v35 = vmul.f32 1.442695, %v4111_v50  ;;  %v12784_v29 = vadd.f32 %v12696_v17, %v12188_v5 }
 0x5ae   : > { %v4722_v54 = vmul.f32 1.442695, %v4697_v11  ;;  %10578 = vpow2.f32 %v4720_v4  ;;  %v4698_v38 = vsub.f32 %v12551_v19, %v12730_v59  ;;  %v4699_v37 = vsub.f32 %v12543_v31, %v4679_v53  ;;  %v12794_v19 = vpop.f32.mrf.mxu1 }
 0x5af   : > { %3805 = vst.msk [vmem:[#allocation3 + $0x6c] sm:$0xf] %vm3795_vm2, %v3788_v55  ;;  %4163 = vadd.xlane.f32.xlu0 %v12701_v2  ;;  %5792 = vmax.xlane.f32.xlu1 %v12759_v52  ;;  %v12778_v2 = vadd.f32 %v5762_v10, %v12292_v40  ;;  %v12798_v31 = vadd.f32 %v12738_v7, %v12188_v5 }
 0x5b0   : > { %10580 = vpow2.f32 %v4722_v54  ;;  %5794 = vmax.xlane.f32.xlu2 %v12762_v43  ;;  %v3750_v46 = vpop.f32.mrf.mxu0  ;;  %v4724_v54 = vmul.f32 1.442695, %v4698_v38  ;;  %v4726_v50 = vmul.f32 1.442695, %v4699_v37  ;;  %v4113_v53 = vsub.f32 %v12556_v41, %v4094_v61 }
 0x5b1   : > { %10582 = vpow2.f32 %v4137_v35  ;;  %v4683_v35 = vpop.xlane.xlu1 %4682  ;;  %v12810_v41 = vadd.f32 %v12746_v30, %v12308_v9 }
 0x5b3   : > { %v10577_v18 = vpop.eup %10576  ;;  %v4092_v49 = vpop.xlane.xlu0 %4091 }
 0x5b4   : > { %v3774_v33 = vmul.f32 %v10577_v18, %v3750_v46  ;;  %v4112_v63 = vsub.f32 %v12579_v28, %v4092_v49  ;;  %v12773_v39 = vpop.xlane.xlu2 %4680  ;;  %v12775_v55 = vpop.eup %10578 }
 0x5b5   : > { %14147 = vst [vmem:[#allocation31_spill] sm:$0xff] %v12775_v55  ;;  %v5765_v17 = vpop.f32.mrf.mxu3 }
 0x5b6   : > { %v12780_v4 = vpop.eup %10580  ;;  %v3790_v21 = vpack.c.bf16 %v3774_v33, %v3774_v33  ;;  %v4139_v11 = vmul.f32 1.442695, %v4112_v63  ;;  %v4141_v63 = vmul.f32 1.442695, %v4113_v53 }
 0x5b7   : > { %14148 = vst [vmem:[#allocation34_spill] sm:$0xff] %v12780_v4  ;;  %5798 = vmax.xlane.f32.xlu0 %v12778_v2  ;;  %v4788_v28 = vpack.c.bf16 %v12780_v4, %v12775_v55  ;;  %5210 = vmax.xlane.f32.xlu1 %v12784_v29  ;;  %v10583_v18 = vpop.eup %10582 }
 0x5b8   : > { %3807 = vst.msk [vmem:[#allocation3 + $0x84] sm:$0xf] %vm3795_vm2, %v3790_v21  ;;  %10584 = vpow2.f32 %v4139_v11  ;;  %4165 = vadd.xlane.f32.xlu2 %v10567_v24  ;;  %v3753_v33 = vpop.f32.mrf.mxu0 }
 0x5b9   : > { %4868 = vmatmul.bf16.gmra.mxu0 %v4788_v28  ;;  %v4100_v53 = vpop.xlane.xlu1 %4099 }
 0x5bb   : > { %v3635_v59 = vpop.xlane.xlu0 %3634 }
 0x5bc   : > { %10586 = vrcp.f32 %v3635_v59  ;;  %v4098_v10 = vpop.xlane.xlu2 %4097  ;;  %v12815_v59 = vadd.f32 %v5765_v17, %v12308_v9  ;;  %v4701_v17 = vsub.f32 %v12571_v25, %v4683_v35 }
 0x5bd   : > { %10588 = vpow2.f32 %v4724_v54  ;;  %v5767_v28 = vpop.f32.mrf.mxu3  ;;  %v4115_v25 = vsub.f32 %v12603_v8, %v4098_v10 }
 0x5be   : > { %v10585_v46 = vpop.eup %10584  ;;  %10590 = vpow2.f32 %v4726_v50  ;;  %v4700_v50 = vsub.f32 %v12582_v36, %v12773_v39  ;;  %v4730_v39 = vmul.f32 1.442695, %v4701_v17 }
 0x5bf   : > { %4169 = vadd.xlane.f32.xlu0 %v10583_v18  ;;  %v4202_v24 = vpack.c.bf16 %v10585_v46, %v10583_v18  ;;  %4167 = vadd.xlane.f32.xlu1 %v12740_v27  ;;  %v5186_v27 = vpop.f32.mrf.mxu1  ;;  %10592 = vpow2.f32 %v4141_v63  ;;  %v12832_v63 = vadd.f32 %v12769_v47, %v12237_v57 }
 0x5c0   : > { %5796 = vmax.xlane.f32.xlu2 %v12798_v31  ;;  %v4728_v36 = vmul.f32 1.442695, %v4700_v50  ;;  %v12842_v8 = vadd.f32 %v5186_v27, %v12257_v22 }
 0x5c1   : > { %4302 = vmatmul.bf16.gmra.mxu2 %v4202_v24 }
 0x5c2   : > { %v10587_v49 = vpop.eup %10586 }
 0x5c3   : > { %v3775_v38 = vmul.f32 %v10587_v49, %v3753_v33  ;;  %v4096_v21 = vpop.xlane.xlu0 %4095  ;;  %v12803_v11 = vpop.eup %10588 }
 0x5c4   : > { %14149 = vst [vmem:[#allocation35_spill] sm:$0xff] %v12803_v11  ;;  %v4114_v7 = vsub.f32 %v12613_v51, %v4096_v21  ;;  %v12806_v37 = vpop.xlane.xlu2 %3638  ;;  %v12812_v54 = vpop.eup %10590  ;;  %v12821_v51 = vadd.f32 %v12718_v32, %v12292_v40 }
 0x5c5   : > { %v3791_v61 = vpack.c.bf16 %v3775_v38, %v3775_v38  ;;  %14150 = vst [vmem:[#allocation45_spill] sm:$0xff] %v12812_v54  ;;  %v4789_v30 = vpack.c.bf16 %v12812_v54, %v12803_v11  ;;  %v10593_v49 = vpop.eup %10592  ;;  %v5770_v38 = vpop.f32.mrf.mxu3 }
 0x5c6   : > { %v4143_v18 = vmul.f32 1.442695, %v4114_v7  ;;  %v4116_v7 = vsub.f32 %v12592_v42, %v4100_v53  ;;  %v12847_v42 = vadd.f32 %v5767_v28, %v12237_v57  ;;  %v12852_v53 = vadd.f32 %v12794_v19, %v12328_v34  ;;  %v12892_v54 = vpop.f32.mrf.mxu2 }
 0x5c7   : > { %3808 = vst.msk [vmem:[#allocation3 + $0x90] sm:$0xf] %vm3795_vm2, %v3791_v61  ;;  %5214 = vmax.xlane.f32.xlu0 %v12810_v41  ;;  %5800 = vmax.xlane.f32.xlu1 %v12815_v59  ;;  %v5189_v35 = vpop.f32.mrf.mxu1  ;;  %v4687_v61 = vpop.xlane.xlu1 %4686 }
 0x5c8   : > { %10594 = vpow2.f32 %v4143_v18  ;;  %5212 = vmax.xlane.f32.xlu2 %v12821_v51  ;;  %v4145_v18 = vmul.f32 1.442695, %v4115_v25 }
 0x5c9   : > { %4873 = vmatmul.bf16.gmra.mxu0 %v4789_v30  ;;  %v3755_v30 = vpop.f32.mrf.mxu0 }
 0x5cb   : > { %v3637_v32 = vpop.xlane.xlu0 %3636 }
 0x5cc   : > { %10596 = vrcp.f32 %v3637_v32  ;;  %v4685_v24 = vpop.xlane.xlu2 %4684 }
 0x5cd   : > { %10598 = vpow2.f32 %v4728_v36  ;;  %v4147_v36 = vmul.f32 1.442695, %v4116_v7  ;;  %v5772_v25 = vpop.f32.mrf.mxu3 }
 0x5ce   : > { %v10595_v33 = vpop.eup %10594  ;;  %10600 = vpow2.f32 %v4730_v39 }
 0x5cf   : > { %4175 = vadd.xlane.f32.xlu0 %v10595_v33  ;;  %v4203_v21 = vpack.c.bf16 %v10595_v33, %v10593_v49  ;;  %5216 = vmax.xlane.f32.xlu1 %v12832_v63  ;;  %10602 = vpow2.f32 %v4145_v18  ;;  %v4703_v33 = vsub.f32 %v12607_v56, %v4687_v61  ;;  %v5191_v28 = vpop.f32.mrf.mxu1  ;;  %v12862_v61 = vadd.f32 %v5772_v25, %v12257_v22  ;;  %v14159_v22 = vld [vmem:[#allocation37_spill] sm:$0xff] }
 0x5d0   : > { %4171 = vadd.xlane.f32.xlu2 %v10585_v46  ;;  %v4702_v46 = vsub.f32 %v12628_v1, %v4685_v24  ;;  %10604 = vpow2.f32 %v4147_v36  ;;  %v12865_v18 = vadd.f32 %v5770_v38, %v12328_v34 }
 0x5d1   : > { %4307 = vmatmul.bf16.gmra.mxu2 %v4203_v21  ;;  %v4734_v24 = vmul.f32 1.442695, %v4703_v33  ;;  %v5195_v21 = vpop.xlane.xlu1 %5194 }
 0x5d2   : > { %v10597_v50 = vpop.eup %10596  ;;  %v4732_v1 = vmul.f32 1.442695, %v4702_v46  ;;  %v5226_v36 = vsub.f32 %v12617_v13, %v5195_v21 }
 0x5d3   : > { %v3776_v47 = vmul.f32 %v10597_v50, %v3755_v30  ;;  %v12837_v17 = vpop.eup %10598 }
 0x5d4   : > { %14151 = vst [vmem:[#allocation41_spill] sm:$0xff] %v12837_v17  ;;  %v12839_v32 = vpop.xlane.xlu2 %4736  ;;  %v12844_v39 = vpop.eup %10600  ;;  %10606 = vpow2.f32 %v4732_v1 }
 0x5d5   : > { %v3792_v10 = vpack.c.bf16 %v3776_v47, %v3776_v47  ;;  %14152 = vst [vmem:[#allocation46_spill] sm:$0xff] %v12844_v39  ;;  %v4790_v27 = vpack.c.bf16 %v12844_v39, %v12837_v17  ;;  %v10603_v56 = vpop.eup %10602  ;;  %10608 = vpow2.f32 %v4734_v24  ;;  %v5775_v47 = vpop.f32.mrf.mxu3  ;;  %v5242_v24 = vmul.f32 1.442695, %v5226_v36 }
 0x5d6   : > { %v10605_v50 = vpop.eup %10604  ;;  %10610 = vrcp.f32 %v12806_v37  ;;  %v12882_v37 = vadd.f32 %v5189_v35, %v12274_v14  ;;  %v12885_v1 = vadd.f32 %v5775_v47, %v12274_v14 }
 0x5d7   : > { %3809 = vst.msk [vmem:[#allocation3 + $0x9c] sm:$0xf] %vm3795_vm2, %v3792_v10  ;;  %5220 = vmax.xlane.f32.xlu0 %v12842_v8  ;;  %5802 = vmax.xlane.f32.xlu1 %v12847_v42  ;;  %v4204_v30 = vpack.c.bf16 %v10605_v50, %v10603_v56  ;;  %v12873_v46 = vpop.f32.mrf.mxu1 }
 0x5d8   : > { %5218 = vmax.xlane.f32.xlu2 %v12852_v53 }
 0x5d9   : > { %4878 = vmatmul.bf16.gmra.mxu0 %v4790_v27 }
 0x5da   : > { %v3641_v19 = vpop.xlane.xlu0 %3640  ;;  %v12875_v38 = vpop.eup %10606 }
 0x5db   : > { %14153 = vst [vmem:[#allocation39_spill] sm:$0xff] %v12875_v38  ;;  %v12879_v25 = vpop.eup %10608  ;;  %10612 = vrcp.f32 %v3641_v19 }
 0x5dc   : > { %v5781_v7 = vpop.xlane.xlu2 %5780  ;;  %14154 = vst [vmem:[#allocation38_spill] sm:$0xff] %v12879_v25  ;;  %v4791_v17 = vpack.c.bf16 %v12879_v25, %v12875_v38  ;;  %10614 = vpow2.f32 %v5242_v24 }
 0x5dd   : > { %v5812_v13 = vsub.f32 %v12636_v20, %v5781_v7  ;;  %10616 = vrcp.f32 %v12839_v32 }
 0x5df   : > { %5806 = vmax.xlane.f32.xlu0 %v12862_v61  ;;  %4173 = vadd.xlane.f32.xlu1 %v10593_v49  ;;  %v10611_v49 = vpop.eup %10610  ;;  %v5828_v35 = vmul.f32 1.442695, %v5812_v13  ;;  %v6280_v38 = vpop.f32.mrf.mxu1 }
 0x5e0   : > { %5804 = vmax.xlane.f32.xlu2 %v12865_v18 }
 0x5e1   : > { %4312 = vmatmul.bf16.gmra.mxu2 %v4204_v30  ;;  %10618 = vpow2.f32 %v5828_v35 }
 0x5e2   : > { %v12871_v10 = vpop.xlane.xlu0 %4149  ;;  %v4739_v33 = vpop.xlane.xlu1 %4738 }
 0x5e4   : > { %v12877_v27 = vpop.xlane.xlu2 %4151 }
 0x5e6   : > { %v3758_v21 = vpop.f32.mrf.mxu0 }
 0x5e7   : > { %v3777_v30 = vmul.f32 %v10611_v49, %v3758_v21  ;;  %5222 = vmax.xlane.f32.xlu0 %v12882_v37  ;;  %5808 = vmax.xlane.f32.xlu1 %v12885_v1  ;;  %v14155_v21 = vld [vmem:[#allocation29_spill] sm:$0xff]  ;;  %v6283_v25 = vpop.f32.mrf.mxu1 }
 0x5e8   : > { %4177 = vadd.xlane.f32.xlu2 %v10603_v56  ;;  %v12898_v19 = vadd.f32 %v5191_v28, %v14155_v21  ;;  %v10613_v56 = vpop.eup %10612 }
 0x5e9   : > { %v3793_v11 = vpack.c.bf16 %v3777_v30, %v3777_v30  ;;  %4883 = vmatmul.bf16.gmra.mxu0 %v4791_v17 }
 0x5ea   : > { %v5197_v47 = vpop.xlane.xlu0 %5196  ;;  %v5783_v7 = vpop.xlane.xlu1 %5782 }
 0x5eb   : > { %3810 = vst.msk [vmem:[#allocation3 + $0xa8] sm:$0xf] %vm3795_vm2, %v3793_v11  ;;  %v5227_v20 = vsub.f32 %v12649_v12, %v5197_v47  ;;  %v5813_v36 = vsub.f32 %v12653_v62, %v5783_v7  ;;  %v10615_v12 = vpop.eup %10614  ;;  %v5777_v11 = vpop.f32.mrf.mxu3 }
 0x5ec   : > { %v4741_v49 = vpop.xlane.xlu2 %4740  ;;  %v10617_v47 = vpop.eup %10616 }
 0x5ed   : > { %v5244_v17 = vmul.f32 1.442695, %v5227_v20  ;;  %v5830_v24 = vmul.f32 1.442695, %v5813_v36  ;;  %v10619_v20 = vpop.eup %10618  ;;  %v12908_v36 = vadd.f32 %v5777_v11, %v14155_v21 }
 0x5ee   : > { %v3760_v13 = vpop.f32.mrf.mxu0 }
 0x5ef   : > { %10620 = vpow2.f32 %v5244_v17  ;;  %v3778_v30 = vmul.f32 %v10613_v56, %v3760_v13  ;;  %5224 = vmax.xlane.f32.xlu0 %v12898_v19  ;;  %4179 = vadd.xlane.f32.xlu1 %v10605_v50  ;;  %v12910_v17 = vpop.f32.mrf.mxu2 }
 0x5f0   : > { %10622 = vpow2.f32 %v5830_v24  ;;  %5274 = vadd.xlane.f32.xlu2 %v10615_v12  ;;  %v14156_v24 = vld [vmem:[#allocation26_spill] sm:$0xff] }
 0x5f1   : > { %v3794_v62 = vpack.c.bf16 %v3778_v30, %v3778_v30  ;;  %10624 = vrcp.f32 %v4739_v33 }
 0x5f2   : > { %v12902_v28 = vpop.xlane.xlu0 %4153  ;;  %v5199_v32 = vpop.xlane.xlu1 %5198  ;;  %10626 = vrcp.f32 %v4741_v49 }
 0x5f3   : > { %3811 = vst.msk [vmem:[#allocation3 + $0xb4] sm:$0xf] %vm3795_vm2, %v3794_v62  ;;  %v5228_v13 = vsub.f32 %v14156_v24, %v5199_v32  ;;  %v14158_v32 = vld [vmem:[#allocation40_spill] sm:$0xff] }
 0x5f4   : > { %v12905_v35 = vpop.xlane.xlu2 %4155 }
 0x5f5   : > { %v10621_v7 = vpop.eup %10620  ;;  %v5246_v11 = vmul.f32 1.442695, %v5228_v13 }
 0x5f6   : > { %v10623_v56 = vpop.eup %10622  ;;  %v5322_v50 = vpack.c.bf16 %v10621_v7, %v10615_v12  ;;  %v4849_v30 = vpop.f32.mrf.mxu0  ;;  %v14157_v12 = vld [vmem:[#allocation22_spill] sm:$0xff] }
 0x5f7   : > { %v5908_v39 = vpack.c.bf16 %v10623_v56, %v10619_v20  ;;  %v4889_v55 = vmul.f32 %v10617_v47, %v4849_v30  ;;  %5810 = vmax.xlane.f32.xlu0 %v12908_v36  ;;  %5862 = vadd.xlane.f32.xlu1 %v10623_v56  ;;  %v12919_v47 = vadd.f32 %v12873_v46, %v14159_v22  ;;  %v14160_v56 = vld [vmem:[#allocation25_spill] sm:$0xff]  ;;  %10628 = vpow2.f32 %v5246_v11  ;;  %v14161_v30 = vld [vmem:[#allocation43_spill] sm:$0xff] }
 0x5f8   : > { %5402 = vmatmul.bf16.vlgmr.msra.gmra.mxu2 %v5322_v50  ;;  %5276 = vadd.xlane.f32.xlu2 %v10621_v7  ;;  %v12925_v50 = vadd.f32 %v6283_v25, %v14160_v56 }
 0x5f9   : > { %v4905_v62 = vpack.c.bf16 %v4889_v55, %v4889_v55  ;;  %5972 = vmatmul.bf16.vlgmr.msrb.gmra.mxu0 %v5908_v39  ;;  %v10625_v39 = vpop.eup %10624 }
 0x5fa   : > { %v5785_v4 = vpop.xlane.xlu0 %5784  ;;  %v5201_v48 = vpop.xlane.xlu1 %5200 }
 0x5fb   : > { %4921 = vst.msk [vmem:[#allocation3 + $0x4] sm:$0xf] %vm3795_vm2, %v4905_v62  ;;  %v5814_v21 = vsub.f32 %v14157_v12, %v5785_v4  ;;  %v5229_v24 = vsub.f32 %v14158_v32, %v5201_v48  ;;  %v12928_v48 = vadd.f32 %v6280_v38, %v14161_v30  ;;  %v10627_v25 = vpop.eup %10626 }
 0x5fc   : > { %v5787_v57 = vpop.xlane.xlu2 %5786  ;;  %v12922_v7 = vpop.f32.mrf.mxu2 }
 0x5fd   : > { %v5832_v33 = vmul.f32 1.442695, %v5814_v21  ;;  %v5815_v55 = vsub.f32 %v12676_v0, %v5787_v57  ;;  %v5248_v13 = vmul.f32 1.442695, %v5229_v24  ;;  %v12932_v57 = vpop.f32.mrf.mxu1  ;;  %v10629_v49 = vpop.eup %10628 }
 0x5fe   : > { %v4851_v4 = vpop.f32.mrf.mxu0 }
 0x5ff   : > { %10630 = vpow2.f32 %v5832_v33  ;;  %v5834_v62 = vmul.f32 1.442695, %v5815_v55  ;;  %v4890_v22 = vmul.f32 %v10625_v39, %v4851_v4  ;;  %6318 = vmax.xlane.f32.xlu0 %v12919_v47  ;;  %6322 = vmax.xlane.f32.xlu1 %v12925_v50 }
 0x600   : > { %10632 = vpow2.f32 %v5248_v13  ;;  %6320 = vmax.xlane.f32.xlu2 %v12928_v48 }
 0x601   : > { %10634 = vpow2.f32 %v5834_v62  ;;  %v4906_v0 = vpack.c.bf16 %v4890_v22, %v4890_v22 }
 0x602   : > { %v4743_v46 = vpop.xlane.xlu0 %4742  ;;  %v5203_v38 = vpop.xlane.xlu1 %5202 }
 0x603   : > { %4922 = vst.msk [vmem:[#allocation3 + $0x10] sm:$0xf] %vm3795_vm2, %v4906_v0  ;;  %v5230_v55 = vsub.f32 %v12689_v23, %v5203_v38  ;;  %10636 = vrcp.f32 %v4743_v46 }
 0x604   : > { %v12936_v21 = vpop.xlane.xlu2 %4159  ;;  %v12938_v12 = vpop.f32.mrf.mxu2  ;;  %10638 = vrcp.f32 %v12871_v10 }
 0x605   : > { %v10631_v11 = vpop.eup %10630  ;;  %v6288_v62 = vpop.f32.mrf.mxu1  ;;  %v5250_v22 = vmul.f32 1.442695, %v5230_v55  ;;  %10640 = vrcp.f32 %v12877_v27 }
 0x606   : > { %v12940_v32 = vpop.eup %10632  ;;  %v4854_v24 = vpop.f32.mrf.mxu0  ;;  %v12955_v38 = vadd.f32 %v6288_v62, %v14142_v6 }
 0x607   : > { %v12942_v33 = vpop.eup %10634  ;;  %v4891_v39 = vmul.f32 %v10627_v25, %v4854_v24  ;;  %5860 = vadd.xlane.f32.xlu0 %v10619_v20  ;;  %v5323_v56 = vpack.c.bf16 %v12940_v32, %v10629_v49  ;;  %5864 = vadd.xlane.f32.xlu1 %v10631_v11  ;;  %10642 = vpow2.f32 %v5250_v22 }
 0x608   : > { %v5909_v13 = vpack.c.bf16 %v12942_v33, %v10631_v11  ;;  %5278 = vadd.xlane.f32.xlu2 %v10629_v49 }
 0x609   : > { %v4907_v4 = vpack.c.bf16 %v4891_v39, %v4891_v39  ;;  %5407 = vmatmul.bf16.gmra.mxu2 %v5323_v56  ;;  %v10637_v25 = vpop.eup %10636 }
 0x60a   : > { %5977 = vmatmul.bf16.gmra.mxu0 %v5909_v13  ;;  %v12947_v30 = vpop.xlane.xlu0 %4157  ;;  %v4745_v0 = vpop.xlane.xlu1 %4744 }
 0x60b   : > { %4923 = vst.msk [vmem:[#allocation3 + $0x1c] sm:$0xf] %vm3795_vm2, %v4907_v4  ;;  %10644 = vrcp.f32 %v4745_v0  ;;  %v10639_v55 = vpop.eup %10638 }
 0x60c   : > { %v5205_v23 = vpop.xlane.xlu2 %5204  ;;  %v12952_v46 = vpop.f32.mrf.mxu2  ;;  %v4318_v0 = vmul.f32 %v10639_v55, %v12892_v54 }
 0x60d   : > { %v5231_v20 = vsub.f32 %v12705_v45, %v5205_v23  ;;  %v10641_v6 = vpop.eup %10640 }
 0x60e   : > { %v4856_v49 = vpop.f32.mrf.mxu0  ;;  %v12962_v4 = vpop.eup %10642 }
 0x60f   : > { %v5252_v11 = vmul.f32 1.442695, %v5231_v20  ;;  %v4892_v24 = vmul.f32 %v10637_v25, %v4856_v49  ;;  %6326 = vmax.xlane.f32.xlu1 %v12955_v38 }
 0x611   : > { %10646 = vpow2.f32 %v5252_v11  ;;  %v4908_v10 = vpack.c.bf16 %v4892_v24, %v4892_v24  ;;  %v10645_v23 = vpop.eup %10644  ;;  %v4334_v24 = vpack.c.bf16 %v4318_v0, %v4318_v0 }
 0x612   : > { %v5791_v39 = vpop.xlane.xlu0 %5790  ;;  %v5789_v45 = vpop.xlane.xlu1 %5788 }
 0x613   : > { %4924 = vst.msk [vmem:[#allocation3 + $0x28] sm:$0xf] %vm3795_vm2, %v4908_v10  ;;  %v5817_v56 = vsub.f32 %v12716_v3, %v5791_v39  ;;  %v5816_v13 = vsub.f32 %v12723_v60, %v5789_v45  ;;  %v4319_v39 = vmul.f32 %v10641_v6, %v12910_v17 }
 0x614   : > { %v4747_v27 = vpop.xlane.xlu2 %4746  ;;  %v12964_v22 = vpop.f32.mrf.mxu2 }
 0x615   : > { %v5838_v62 = vmul.f32 1.442695, %v5817_v56  ;;  %v5836_v20 = vmul.f32 1.442695, %v5816_v13  ;;  %10648 = vrcp.f32 %v4747_v27  ;;  %v4335_v6 = vpack.c.bf16 %v4319_v39, %v4319_v39 }
 0x616   : > { %v4859_v25 = vpop.f32.mrf.mxu0 }
 0x617   : > { %v12967_v49 = vpop.eup %10646  ;;  %10650 = vpow2.f32 %v5838_v62  ;;  %v4893_v11 = vmul.f32 %v10645_v23, %v4859_v25 }
 0x618   : > { %10652 = vpow2.f32 %v5836_v20  ;;  %v5324_v3 = vpack.c.bf16 %v12967_v49, %v12962_v4 }
 0x619   : > { %v4909_v60 = vpack.c.bf16 %v4893_v11, %v4893_v11  ;;  %10654 = vrcp.f32 %v12902_v28 }
 0x61a   : > { %5412 = vmatmul.bf16.gmra.mxu2 %v5324_v3  ;;  %v5207_v10 = vpop.xlane.xlu0 %5206  ;;  %v4162_v54 = vpop.xlane.xlu1 %4161 }
 0x61b   : > { %4925 = vst.msk [vmem:[#allocation3 + $0x34] sm:$0xf] %vm3795_vm2, %v4909_v60  ;;  %v5232_v55 = vsub.f32 %v12734_v58, %v5207_v10  ;;  %4366 = vrot.lane.b32.xlu0 %v4334_v24, %s11074_s21  ;;  %v10649_v45 = vpop.eup %10648  ;;  %10656 = vrcp.f32 %v4162_v54 }
 0x61c   : > { %v5209_v56 = vpop.xlane.xlu2 %5208  ;;  %v4293_v23 = vpop.f32.mrf.mxu2 }
 0x61d   : > { %v12976_v13 = vpop.eup %10650  ;;  %v5254_v27 = vmul.f32 1.442695, %v5232_v55  ;;  %v5233_v62 = vsub.f32 %v12744_v15, %v5209_v56 }
 0x61e   : > { %v12979_v0 = vpop.eup %10652  ;;  %v4861_v17 = vpop.f32.mrf.mxu0 }
 0x61f   : > { %10658 = vpow2.f32 %v5254_v27  ;;  %v5256_v28 = vmul.f32 1.442695, %v5233_v62  ;;  %v4894_v20 = vmul.f32 %v10649_v45, %v4861_v17  ;;  %v5910_v58 = vpack.c.bf16 %v12976_v13, %v12979_v0  ;;  %v10655_v25 = vpop.eup %10654 }
 0x620   : > { %4368 = vrot.lane.b32.xlu2 %v4335_v6, %s11074_s21  ;;  %v4320_v15 = vmul.f32 %v10655_v25, %v12922_v7 }
 0x621   : > { %10660 = vpow2.f32 %v5256_v28  ;;  %v4910_v11 = vpack.c.bf16 %v4894_v20, %v4894_v20  ;;  %5982 = vmatmul.bf16.gmra.mxu0 %v5910_v58  ;;  %v10657_v3 = vpop.eup %10656 }
 0x622   : > { %v12984_v60 = vpop.xlane.xlu0 %4163  ;;  %v12987_v24 = vmul.f32 %v10657_v3, %v4293_v23  ;;  %v5793_v10 = vpop.xlane.xlu1 %5792  ;;  %v4336_v17 = vpack.c.bf16 %v4320_v15, %v4320_v15 }
 0x623   : > { %4926 = vst.msk [vmem:[#allocation3 + $0x40] sm:$0xf] %vm3795_vm2, %v4910_v11  ;;  %v5818_v39 = vsub.f32 %v12759_v52, %v5793_v10 }
 0x624   : > { %v5795_v54 = vpop.xlane.xlu2 %5794  ;;  %v13000_v28 = vpop.f32.mrf.mxu2 }
 0x625   : > { %v12991_v55 = vpop.eup %10658  ;;  %v5819_v45 = vsub.f32 %v12762_v43, %v5795_v54  ;;  %v5840_v56 = vmul.f32 1.442695, %v5818_v39 }
 0x626   : > { %v12994_v27 = vpop.f32.mrf.mxu0 }
 0x627   : > { %14162 = vst [vmem:[#allocation47_spill] sm:$0xff] %v12994_v27  ;;  %v12996_v62 = vpop.eup %10660  ;;  %v5842_v6 = vmul.f32 1.442695, %v5819_v45  ;;  %10662 = vpow2.f32 %v5840_v56 }
 0x628   : > { %v5325_v7 = vpack.c.bf16 %v12996_v62, %v12991_v55  ;;  %4370 = vrot.lane.b32.xlu1 %v4336_v17, %s11074_s21 }
 0x629   : > { %10664 = vpow2.f32 %v5842_v6 }
 0x62a   : > { %5417 = vmatmul.bf16.gmra.mxu2 %v5325_v7  ;;  %v5799_v52 = vpop.xlane.xlu0 %5798  ;;  %v5211_v23 = vpop.xlane.xlu1 %5210 }
 0x62b   : > { %v5821_v11 = vsub.f32 %v12778_v2, %v5799_v52  ;;  %v5234_v2 = vsub.f32 %v12784_v29, %v5211_v23 }
 0x62c   : > { %v4166_v43 = vpop.xlane.xlu2 %4165 }
 0x62d   : > { %10666 = vrcp.f32 %v4166_v43  ;;  %v13003_v20 = vpop.eup %10662  ;;  %v4298_v39 = vpop.f32.mrf.mxu2  ;;  %v5846_v45 = vmul.f32 1.442695, %v5821_v11  ;;  %v5258_v27 = vmul.f32 1.442695, %v5234_v2 }
 0x62e   : > { %14163 = vst [vmem:[#allocation36_spill] sm:$0xff] %v13003_v20  ;;  %v13005_v58 = vpop.f32.mrf.mxu0 }
 0x62f   : > { %14164 = vst [vmem:[#allocation19_spill] sm:$0xff] %v13005_v58  ;;  %v13007_v25 = vpop.eup %10664  ;;  %10668 = vpow2.f32 %v5846_v45 }
 0x630   : > { %14165 = vst [vmem:[#allocation33_spill] sm:$0xff] %v13007_v25  ;;  %v5911_v3 = vpack.c.bf16 %v13007_v25, %v13003_v20 }
 0x632   : > { %5987 = vmatmul.bf16.gmra.mxu0 %v5911_v3  ;;  %v13012_v15 = vpop.xlane.xlu0 %4169  ;;  %v13014_v54 = vpop.xlane.xlu1 %4167 }
 0x633   : > { %v10667_v10 = vpop.eup %10666 }
 0x634   : > { %v13016_v56 = vmul.f32 %v10667_v10, %v4298_v39  ;;  %v5797_v17 = vpop.xlane.xlu2 %5796 }
 0x635   : > { %v5820_v6 = vsub.f32 %v12798_v31, %v5797_v17  ;;  %v13023_v20 = vpop.eup %10668 }
 0x636   : > { %v13019_v7 = vpop.f32.mrf.mxu0 }
 0x637   : > { %14166 = vst [vmem:[#allocation30_spill] sm:$0xff] %v13019_v7  ;;  %v5844_v43 = vmul.f32 1.442695, %v5820_v6 }
 0x639   : > { %10670 = vpow2.f32 %v5844_v43 }
 0x63a   : > { %v5215_v52 = vpop.xlane.xlu0 %5214  ;;  %v5801_v3 = vpop.xlane.xlu1 %5800  ;;  %10672 = vpow2.f32 %v5258_v27 }
 0x63b   : > { %v5236_v43 = vsub.f32 %v12810_v41, %v5215_v52 }
 0x63c   : > { %v5213_v25 = vpop.xlane.xlu2 %5212 }
 0x63d   : > { %v5235_v58 = vsub.f32 %v12821_v51, %v5213_v25  ;;  %v5822_v25 = vsub.f32 %v12815_v59, %v5801_v3 }
 0x63e   : > { %v13025_v11 = vpop.f32.mrf.mxu0 }
 0x63f   : > { %v13027_v10 = vpop.eup %10670  ;;  %v5260_v31 = vmul.f32 1.442695, %v5235_v58  ;;  %v5848_v2 = vmul.f32 1.442695, %v5822_v25 }
 0x640   : > { %v5912_v39 = vpack.c.bf16 %v13023_v20, %v13027_v10  ;;  %v13036_v51 = vpop.eup %10672 }
 0x641   : > { %10674 = vpow2.f32 %v5260_v31  ;;  %v14168_v31 = vld [vmem:[#allocation42_spill] sm:$0xff] }
 0x642   : > { %5992 = vmatmul.bf16.gmra.mxu0 %v5912_v39  ;;  %v13031_v29 = vpop.xlane.xlu0 %4175  ;;  %v5217_v23 = vpop.xlane.xlu1 %5216  ;;  %v13050_v39 = vadd.f32 %v12932_v57, %v14168_v31  ;;  %10676 = vpow2.f32 %v5848_v2 }
 0x643   : > { %v5237_v27 = vsub.f32 %v12832_v63, %v5217_v23  ;;  %v5262_v23 = vmul.f32 1.442695, %v5236_v43 }
 0x644   : > { %v13033_v45 = vpop.xlane.xlu2 %4171 }
 0x645   : > { %5280 = vadd.xlane.f32.xlu0 %v12940_v32  ;;  %v5264_v59 = vmul.f32 1.442695, %v5237_v27 }
 0x646   : > { %v13039_v17 = vpop.f32.mrf.mxu0 }
 0x647   : > { %14167 = vst [vmem:[#allocation32_spill] sm:$0xff] %v13039_v17  ;;  %v13041_v58 = vpop.eup %10674  ;;  %v6290_v17 = vpop.f32.mrf.mxu1  ;;  %10678 = vpow2.f32 %v5264_v59 }
 0x648   : > { %v5326_v6 = vpack.c.bf16 %v13041_v58, %v13036_v51 }
 0x649   : > { %5866 = vadd.xlane.f32.xlu2 %v12942_v33  ;;  %v13056_v33 = vpop.f32.mrf.mxu2 }
 0x64a   : > { %5422 = vmatmul.bf16.gmra.mxu2 %v5326_v6  ;;  %v5221_v32 = vpop.xlane.xlu0 %5220  ;;  %v5803_v3 = vpop.xlane.xlu1 %5802 }
 0x64b   : > { %v5823_v7 = vsub.f32 %v12847_v42, %v5803_v3  ;;  %v13062_v42 = vpop.eup %10676  ;;  %v5239_v27 = vsub.f32 %v12842_v8, %v5221_v32 }
 0x64c   : > { %v5219_v63 = vpop.xlane.xlu2 %5218 }
 0x64d   : > { %6324 = vmax.xlane.f32.xlu0 %v13050_v39  ;;  %v5850_v41 = vmul.f32 1.442695, %v5823_v7  ;;  %v13065_v7 = vpop.eup %10678  ;;  %v5238_v8 = vsub.f32 %v12852_v53, %v5219_v63  ;;  %v13088_v63 = vadd.f32 %v6290_v17, %v14143_v26  ;;  %v9687_v17 = vld [vmem:[#allocation9 + $0x78] sm:$0xf] }
 0x64e   : > { %v13054_v52 = vpop.f32.mrf.mxu0 }
 0x64f   : > { %14169 = vst [vmem:[#allocation21_spill] sm:$0xff] %v13054_v52  ;;  %10680 = vpow2.f32 %v5850_v41  ;;  %v6293_v31 = vpop.f32.mrf.mxu1 }
 0x650   : > { %10682 = vpow2.f32 %v5262_v23  ;;  %v5268_v23 = vmul.f32 1.442695, %v5239_v27  ;;  %v5266_v27 = vmul.f32 1.442695, %v5238_v8  ;;  %v10340_v8 = vld [vmem:[#allocation9 + $0x80] sm:$0xf0] }
 0x651   : > { %5282 = vadd.xlane.f32.xlu2 %v12962_v4 }
 0x652   : > { %v5807_v57 = vpop.xlane.xlu0 %5806  ;;  %v13059_v25 = vpop.xlane.xlu1 %4173  ;;  %5286 = vadd.xlane.f32.xlu1 %v12991_v55  ;;  %10684 = vpow2.f32 %v5268_v23 }
 0x653   : > { %v5825_v43 = vsub.f32 %v12862_v61, %v5807_v57  ;;  %v13076_v55 = vpop.f32.mrf.mxu2  ;;  %v10346_v57 = vld [vmem:[#allocation9 + $0xb0] sm:$0xf0] }
 0x654   : > { %v5805_v6 = vpop.xlane.xlu2 %5804 }
 0x655   : > { %5868 = vadd.xlane.f32.xlu0 %v12979_v0  ;;  %v13069_v2 = vpop.eup %10680  ;;  %v5824_v4 = vsub.f32 %v12865_v18, %v5805_v6  ;;  %v13084_v0 = vadd.f32 %v6293_v31, %v12119_v44  ;;  %v5854_v41 = vmul.f32 1.442695, %v5825_v43  ;;  %v9711_v18 = vld [vmem:[#allocation9 + $0xa8] sm:$0xf]  ;;  %v9699_v43 = vld [vmem:[#allocation9 + $0x90] sm:$0xf] }
 0x656   : > { %14170 = vst [vmem:[#allocation28_spill] sm:$0xff] %v13069_v2  ;;  %v13072_v59 = vpop.f32.mrf.mxu0  ;;  %v13074_v3 = vpop.eup %10682  ;;  %v5913_v32 = vpack.c.bf16 %v13069_v2, %v13062_v42  ;;  %v9712_v53 = vor.u32 %v10346_v57, %v9711_v18  ;;  %v10343_v31 = vld [vmem:[#allocation9 + $0x98] sm:$0xf0] }
 0x657   : > { %14171 = vst [vmem:[#allocation23_spill] sm:$0xff] %v13072_v59  ;;  %v5327_v61 = vpack.c.bf16 %v13065_v7, %v13074_v3  ;;  %v5852_v6 = vmul.f32 1.442695, %v5824_v4  ;;  %10686 = vpow2.f32 %v5854_v41  ;;  %v9700_v4 = vor.u32 %v10343_v31, %v9699_v43  ;;  %v10337_v43 = vld [vmem:[#allocation9 + $0x68] sm:$0xf0] }
 0x658   : > { %5997 = vmatmul.bf16.gmra.mxu0 %v5913_v32  ;;  %7327 = vmatpush.bf16.msrb.mxu3 %v9712_v53  ;;  %v13098_v32 = vpop.eup %10684 }
 0x659   : > { %5284 = vadd.xlane.f32.xlu2 %v12967_v49  ;;  %10688 = vpow2.f32 %v5852_v6 }
 0x65a   : > { %5427 = vmatmul.bf16.gmra.mxu2 %v5327_v61  ;;  %v5223_v59 = vpop.xlane.xlu0 %5222  ;;  %v5809_v52 = vpop.xlane.xlu1 %5808  ;;  %6330 = vmax.xlane.f32.xlu1 %v13084_v0  ;;  %10690 = vpow2.f32 %v5266_v27  ;;  %v9688_v61 = vor.u32 %v10340_v8, %v9687_v17 }
 0x65b   : > { %v13096_v26 = vpop.f32.mrf.mxu2  ;;  %10692 = vrcp.f32 %v12905_v35  ;;  %v5826_v27 = vsub.f32 %v12885_v1, %v5809_v52  ;;  %v5240_v8 = vsub.f32 %v12882_v37, %v5223_v59  ;;  %v10334_v1 = vld [vmem:[#allocation9 + $0x50] sm:$0xf0] }
 0x65c   : > { %v13091_v44 = vpop.xlane.xlu2 %4177  ;;  %7328 = vmatpush.bf16.msrb.mxu3 %v9700_v4  ;;  %10694 = vrcp.f32 %v12947_v30 }
 0x65d   : > { %6328 = vmax.xlane.f32.xlu0 %v13088_v63  ;;  %v13101_v41 = vpop.eup %10686  ;;  %10696 = vrcp.f32 %v12936_v21 }
 0x65e   : > { %v13094_v49 = vpop.f32.mrf.mxu0  ;;  %14173 = vst [vmem:[#allocation44_spill] sm:$0xff] %v13101_v41 }
 0x65f   : > { %14172 = vst [vmem:[#allocation24_spill] sm:$0xff] %v13094_v49  ;;  %v13106_v57 = vpop.eup %10688  ;;  %v9663_v49 = vld [vmem:[#allocation9 + $0x48] sm:$0xf] }
 0x660   : > { %7329 = vmatpush.bf16.msrb.mxu3 %v9688_v61  ;;  %v13111_v53 = vpop.eup %10690  ;;  %v5856_v61 = vmul.f32 1.442695, %v5826_v27  ;;  %v5270_v27 = vmul.f32 1.442695, %v5240_v8 }
 0x661   : > { %5870 = vadd.xlane.f32.xlu2 %v12976_v13  ;;  %v9675_v13 = vld [vmem:[#allocation9 + $0x60] sm:$0xf]  ;;  %v5328_v35 = vpack.c.bf16 %v13098_v32, %v13111_v53  ;;  %v10693_v52 = vpop.eup %10692 }
 0x662   : > { %v5225_v23 = vpop.xlane.xlu0 %5224  ;;  %v13103_v18 = vpop.xlane.xlu1 %4179  ;;  %5288 = vadd.xlane.f32.xlu1 %v12996_v62  ;;  %v9676_v17 = vor.u32 %v10337_v43, %v9675_v13  ;;  %v5914_v62 = vpack.c.bf16 %v13101_v41, %v13106_v57  ;;  %v4321_v13 = vmul.f32 %v10693_v52, %v12938_v12  ;;  %10698 = vpow2.f32 %v5856_v61  ;;  %v10328_v52 = vld [vmem:[#allocation9 + $0x20] sm:$0xf0] }
 0x663   : > { %v5241_v31 = vsub.f32 %v12898_v19, %v5225_v23  ;;  %v9664_v23 = vor.u32 %v10334_v1, %v9663_v49  ;;  %v13124_v43 = vpop.f32.mrf.mxu2  ;;  %v9639_v1 = vld [vmem:[#allocation9 + $0x18] sm:$0xf] }
 0x664   : > { %v13109_v6 = vpop.xlane.xlu2 %5274  ;;  %7330 = vmatpush.bf16.msrb.mxu3 %v9676_v17  ;;  %v4337_v30 = vpack.c.bf16 %v4321_v13, %v4321_v13 }
 0x665   : > { %v5272_v2 = vmul.f32 1.442695, %v5241_v31 }
 0x666   : > { %v13115_v4 = vpop.f32.mrf.mxu0 }
 0x667   : > { %14174 = vst [vmem:[#allocation26_spill] sm:$0xff] %v13115_v4  ;;  %10700 = vpow2.f32 %v5272_v2 }
 0x668   : > { %6002 = vmatmul.bf16.gmra.mxu0 %v5914_v62  ;;  %7331 = vmatpush.bf16.msrb.mxu3 %v9664_v23  ;;  %v9651_v62 = vld [vmem:[#allocation9 + $0x30] sm:$0xf] }
 0x66a   : > { %5432 = vmatmul.bf16.gmra.mxu2 %v5328_v35  ;;  %v5811_v19 = vpop.xlane.xlu0 %5810  ;;  %v5863_v37 = vpop.xlane.xlu1 %5862  ;;  %v10331_v35 = vld [vmem:[#allocation9 + $0x38] sm:$0xf0] }
 0x66b   : > { %v5827_v59 = vsub.f32 %v12908_v36, %v5811_v19  ;;  %v9652_v12 = vor.u32 %v10331_v35, %v9651_v62  ;;  %v9640_v36 = vor.u32 %v10328_v52, %v9639_v1  ;;  %v10695_v19 = vpop.eup %10694  ;;  %v10325_v62 = vld [vmem:[#allocation9 + $0x8] sm:$0xf0] }
 0x66c   : > { %v13128_v17 = vpop.xlane.xlu2 %5276  ;;  %v10697_v21 = vpop.eup %10696  ;;  %v4322_v2 = vmul.f32 %v10695_v19, %v12952_v46 }
 0x66d   : > { %v5858_v31 = vmul.f32 1.442695, %v5827_v59  ;;  %7332 = vmatpush.bf16.msrb.mxu3 %v9652_v12  ;;  %v13133_v61 = vpop.eup %10698  ;;  %v13142_v12 = vpop.f32.mrf.mxu2 }
 0x66e   : > { %v13130_v49 = vpop.f32.mrf.mxu0  ;;  %14176 = vst [vmem:[#allocation40_spill] sm:$0xff] %v13133_v61  ;;  %v13135_v23 = vpop.eup %10700 }
 0x66f   : > { %14175 = vst [vmem:[#allocation22_spill] sm:$0xff] %v13130_v49  ;;  %10702 = vpow2.f32 %v5858_v31  ;;  %v9627_v31 = vld [vmem:[#allocation9] sm:$0xf] }
 0x670   : > { %10704 = vpow2.f32 %v5270_v27  ;;  %v9628_v27 = vor.u32 %v10325_v62, %v9627_v31 }
 0x671   : > { %4372 = vrot.lane.b32.xlu0 %v4337_v30, %s11074_s21  ;;  %7333 = vmatpush.bf16.msrb.mxu3 %v9640_v36  ;;  %v4323_v30 = vmul.f32 %v10697_v21, %v12964_v22  ;;  %v4338_v36 = vpack.c.bf16 %v4322_v2, %v4322_v2  ;;  %10706 = vrcp.f32 %v5863_v37 }
 0x672   : > { %v6319_v8 = vpop.xlane.xlu0 %6318  ;;  %v13138_v59 = vpop.xlane.xlu1 %6322 }
 0x673   : > { %v6350_v1 = vsub.f32 %v12919_v47, %v6319_v8  ;;  %v4339_v31 = vpack.c.bf16 %v4323_v30, %v4323_v30 }
 0x674   : > { %v6321_v13 = vpop.xlane.xlu2 %6320 }
 0x675   : > { %v13140_v35 = vpop.eup %10702  ;;  %v6351_v19 = vsub.f32 %v12928_v48, %v6321_v13  ;;  %7334 = vmatpush.bf16.msrb.mxu3 %v9628_v27  ;;  %v6366_v62 = vmul.f32 1.442695, %v6350_v1  ;;  %v13157_v2 = vpop.f32.mrf.mxu2 }
 0x676   : > { %14177 = vst [vmem:[#allocation37_spill] sm:$0xff] %v13140_v35  ;;  %v5973_v52 = vpop.f32.mrf.mxu0  ;;  %v5915_v4 = vpack.c.bf16 %v13140_v35, %v13133_v61  ;;  %v13148_v46 = vpop.eup %10704 }
 0x677   : > { %v5329_v49 = vpack.c.bf16 %v13135_v23, %v13148_v46  ;;  %v6368_v22 = vmul.f32 1.442695, %v6351_v19  ;;  %v10707_v48 = vpop.eup %10706 }
 0x678   : > { %6007 = vmatmul.bf16.gmra.mxu0 %v5915_v4 }
 0x679   : > { %4374 = vrot.lane.b32.xlu2 %v4338_v36, %s11074_s21 }
 0x67a   : > { %5437 = vmatmul.bf16.gmra.mxu2 %v5329_v49  ;;  %v5861_v47 = vpop.xlane.xlu0 %5860  ;;  %v5865_v37 = vpop.xlane.xlu1 %5864 }
 0x67b   : > { %10708 = vrcp.f32 %v5861_v47  ;;  %4376 = vrot.lane.b32.xlu1 %v4339_v31, %s11074_s21 }
 0x67c   : > { %v13155_v21 = vpop.xlane.xlu2 %5278  ;;  %10710 = vpow2.f32 %v6366_v62 }
 0x67d   : > { %10712 = vpow2.f32 %v6368_v22 }
 0x67e   : > { %v5975_v8 = vpop.f32.mrf.mxu0  ;;  %10714 = vrcp.f32 %v5865_v37 }
 0x67f   : > { %v6014_v4 = vmul.f32 %v10707_v48, %v5975_v8  ;;  %10716 = vrcp.f32 %v12984_v60 }
 0x680   : > { %10718 = vrcp.f32 %v13014_v54 }
 0x681   : > { %v10709_v13 = vpop.eup %10708  ;;  %v6030_v27 = vpack.c.bf16 %v6014_v4, %v6014_v4 }
 0x682   : > { %v6013_v30 = vmul.f32 %v10709_v13, %v5973_v52  ;;  %v13160_v49 = vpop.eup %10710  ;;  %v13168_v52 = vpop.f32.mrf.mxu2 }
 0x683   : > { %6046 = vst.msk [vmem:[#allocation3 + $0x14] sm:$0xf] %vm3795_vm2, %v6030_v27  ;;  %v13162_v36 = vpop.eup %10712  ;;  %v13174_v4 = vpop.xlane.xlu1 %6326 }
 0x684   : > { %v6029_v1 = vpack.c.bf16 %v6013_v30, %v6013_v30  ;;  %v4369_v19 = vpop.permute.xlu2 %4368  ;;  %v10715_v31 = vpop.eup %10714  ;;  %v6446_v47 = vpack.c.bf16 %v13162_v36, %v13160_v49 }
 0x685   : > { %4416 = vst.msk [vmem:[#allocation3 + $0xc] sm:$0xf] %vm4414_vm0, %v4369_v19  ;;  %v6295_v13 = vpop.f32.mrf.mxu1 }
 0x686   : > { %6045 = vst.msk [vmem:[#allocation3 + $0x8] sm:$0xf] %vm3795_vm2, %v6029_v1  ;;  %v13180_v19 = vadd.f32 %v6295_v13, %v12159_v16 }
 0x687   : > { %v5978_v62 = vpop.f32.mrf.mxu0 }
 0x688   : > { %v6015_v22 = vmul.f32 %v10715_v31, %v5978_v62 }
 0x68a   : > { %v6031_v48 = vpack.c.bf16 %v6015_v22, %v6015_v22  ;;  %6526 = vmatmul.bf16.vlgmr.msrb.gmra.mxu2 %v6446_v47  ;;  %v13172_v8 = vpop.f32.mrf.mxu2 }
 0x68c   : > { %6047 = vst.msk [vmem:[#allocation3 + $0x20] sm:$0xf] %vm3795_vm2, %v6031_v48  ;;  %v10301_v30 = vld [vmem:[#allocation3 + $0x8] sm:$0xf0] }
 0x68d   : > { %v4367_v37 = vpop.permute.xlu0 %4366  ;;  %v6298_v47 = vpop.f32.mrf.mxu1 }
 0x68e   : > { %4415 = vst.msk [vmem:[#allocation3] sm:$0xf] %vm4414_vm0, %v4367_v37  ;;  %v13187_v22 = vadd.f32 %v6298_v47, %v12188_v5  ;;  %v10717_v5 = vpop.eup %10716 }
 0x692   : > { %v13182_v31 = vpop.f32.mrf.mxu2 }
 0x695   : > { %v9531_v27 = vld [vmem:[#allocation3] sm:$0xf]  ;;  %v6300_v16 = vpop.f32.mrf.mxu1 }
 0x696   : > { %v13176_v1 = vor.u32 %v10301_v30, %v9531_v27  ;;  %v13195_v37 = vadd.f32 %v6300_v16, %v12292_v40  ;;  %v4325_v27 = vmul.f32 %v10717_v5, %v13000_v28  ;;  %v10719_v30 = vpop.eup %10718 }
 0x698   : > { %7335 = vmatmul.bf16.vlgmr.msrb.gmra.mxu3 %v13176_v1 }
 0x69a   : > { %v4371_v62 = vpop.permute.xlu1 %4370  ;;  %v13191_v48 = vpop.f32.mrf.mxu2 }
 0x69b   : > { %6332 = vmax.xlane.f32.xlu0 %v13180_v19  ;;  %4417 = vst.msk [vmem:[#allocation3 + $0x18] sm:$0xf] %vm4414_vm0, %v4371_v62  ;;  %v4327_v62 = vmul.f32 %v10719_v30, %v13056_v33 }
 0x69d   : > { %v6303_v60 = vpop.f32.mrf.mxu1  ;;  %v4343_v28 = vpack.c.bf16 %v4327_v62, %v4327_v62 }
 0x69e   : > { %v13212_v54 = vadd.f32 %v6303_v60, %v12308_v9  ;;  %v5980_v9 = vpop.f32.mrf.mxu0 }
 0x6a2   : > { %6334 = vmax.xlane.f32.xlu2 %v13187_v22  ;;  %v13199_v13 = vpop.f32.mrf.mxu2 }
 0x6a3   : > { %5290 = vadd.xlane.f32.xlu0 %v13036_v51  ;;  %v4340_v51 = vpack.c.bf16 %v12987_v24, %v12987_v24  ;;  %v6352_v24 = vsub.f32 %v12925_v50, %v13138_v59 }
 0x6a5   : > { %5292 = vadd.xlane.f32.xlu1 %v13041_v58  ;;  %v4341_v58 = vpack.c.bf16 %v4325_v27, %v4325_v27  ;;  %v13221_v59 = vpop.f32.mrf.mxu1 }
 0x6aa   : > { %v5413_v47 = vpop.f32.mrf.mxu2 }
 0x6ad   : > { %6336 = vmax.xlane.f32.xlu1 %v13195_v37 }
 0x6b5   : > { %5294 = vadd.xlane.f32.xlu1 %v13074_v3  ;;  %v6370_v3 = vmul.f32 1.442695, %v6352_v24 }
 0x6b7   : > { %4378 = vrot.lane.b32.xlu0 %v4340_v51, %s11074_s21  ;;  %v13219_v51 = vpop.f32.mrf.mxu2 }
 0x6b8   : > { %v13207_v40 = vpop.xlane.xlu0 %5280 }
 0x6ba   : > { %4380 = vrot.lane.b32.xlu2 %v4341_v58, %s11074_s21 }
 0x6bc   : > { %v5867_v16 = vpop.xlane.xlu2 %5866 }
 0x6bd   : > { %10720 = vrcp.f32 %v5867_v16  ;;  %6338 = vmax.xlane.f32.xlu1 %v13212_v54 }
 0x6be   : > { %10722 = vpow2.f32 %v6370_v3  ;;  %v6354_v3 = vsub.f32 %v12955_v38, %v13174_v4 }
 0x6bf   : > { %4384 = vrot.lane.b32.xlu0 %v4343_v28, %s11074_s21 }
 0x6c0   : > { %v6325_v5 = vpop.xlane.xlu0 %6324 }
 0x6c1   : > { %v6353_v33 = vsub.f32 %v13050_v39, %v6325_v5 }
 0x6c3   : > { %v6372_v27 = vmul.f32 1.442695, %v6353_v33  ;;  %v10721_v30 = vpop.eup %10720 }
 0x6c4   : > { %v6016_v60 = vmul.f32 %v10721_v30, %v5980_v9  ;;  %v5283_v50 = vpop.xlane.xlu2 %5282  ;;  %v13224_v39 = vpop.eup %10722 }
 0x6c5   : > { %10724 = vpow2.f32 %v6372_v27  ;;  %v5287_v58 = vpop.xlane.xlu1 %5286  ;;  %v5418_v27 = vpop.f32.mrf.mxu2 }
 0x6c6   : > { %10726 = vrcp.f32 %v5283_v50  ;;  %v6032_v62 = vpack.c.bf16 %v6016_v60, %v6016_v60 }
 0x6c7   : > { %10728 = vrcp.f32 %v5287_v58  ;;  %v5983_v58 = vpop.f32.mrf.mxu0 }
 0x6c8   : > { %v5869_v28 = vpop.xlane.xlu0 %5868  ;;  %6048 = vst.msk [vmem:[#allocation3 + $0x2c] sm:$0xf] %vm3795_vm2, %v6032_v62  ;;  %v6308_v62 = vpop.f32.mrf.mxu1 }
 0x6c9   : > { %10730 = vrcp.f32 %v5869_v28  ;;  %v6374_v28 = vmul.f32 1.442695, %v6354_v3 }
 0x6cb   : > { %v13226_v24 = vpop.eup %10724  ;;  %10732 = vpow2.f32 %v6374_v28 }
 0x6cc   : > { %v10727_v16 = vpop.eup %10726  ;;  %v6447_v5 = vpack.c.bf16 %v13226_v24, %v13224_v39  ;;  %v13234_v9 = vpop.xlane.xlu2 %5284 }
 0x6cd   : > { %v10729_v33 = vpop.eup %10728  ;;  %v13232_v30 = vmul.f32 %v10727_v16, %v5413_v47  ;;  %v4342_v47 = vpack.c.bf16 %v13016_v56, %v13016_v56 }
 0x6ce   : > { %v13236_v60 = vmul.f32 %v10729_v33, %v5418_v27  ;;  %6531 = vmatmul.bf16.gmra.mxu2 %v6447_v5 }
 0x6cf   : > { %v10731_v50 = vpop.eup %10730 }
 0x6d0   : > { %v6017_v35 = vmul.f32 %v10731_v50, %v5983_v58  ;;  %v6329_v61 = vpop.xlane.xlu0 %6328  ;;  %v6310_v3 = vpop.f32.mrf.mxu1 }
 0x6d1   : > { %v6355_v38 = vsub.f32 %v13088_v63, %v6329_v61  ;;  %v13243_v5 = vpop.eup %10732  ;;  %v5985_v63 = vpop.f32.mrf.mxu0 }
 0x6d2   : > { %v6033_v4 = vpack.c.bf16 %v6017_v35, %v6017_v35  ;;  %v6331_v61 = vpop.xlane.xlu1 %6330 }
 0x6d3   : > { %v6376_v41 = vmul.f32 1.442695, %v6355_v38 }
 0x6d4   : > { %6049 = vst.msk [vmem:[#allocation3 + $0x38] sm:$0xf] %vm3795_vm2, %v6033_v4  ;;  %v5871_v16 = vpop.xlane.xlu2 %5870 }
 0x6d5   : > { %10734 = vpow2.f32 %v6376_v41 }
 0x6d6   : > { %10736 = vrcp.f32 %v5871_v16  ;;  %4382 = vrot.lane.b32.xlu1 %v4342_v47, %s11074_s21  ;;  %v13260_v47 = vadd.f32 %v6308_v62, %v12328_v34  ;;  %v9543_v16 = vld [vmem:[#allocation3 + $0x18] sm:$0xf] }
 0x6d7   : > { %10738 = vrcp.f32 %v13059_v25  ;;  %v14179_v25 = vld [vmem:[#allocation17_spill] sm:$0xff] }
 0x6d8   : > { %v6313_v28 = vpop.f32.mrf.mxu1  ;;  %10740 = vrcp.f32 %v13033_v45 }
 0x6d9   : > { %v13256_v4 = vadd.f32 %v6313_v28, %v12274_v14  ;;  %v14178_v14 = vld [vmem:[#allocation18_spill] sm:$0xff]  ;;  %v13279_v28 = vadd.f32 %v13221_v59, %v14179_v25  ;;  %10742 = vrcp.f32 %v13012_v15 }
 0x6da   : > { %v13253_v38 = vpop.xlane.xlu1 %5288 }
 0x6db   : > { %v13245_v33 = vpop.eup %10734 }
 0x6dc   : > { %v10737_v27 = vpop.eup %10736  ;;  %v6448_v35 = vpack.c.bf16 %v13245_v33, %v13243_v5  ;;  %v4375_v58 = vpop.permute.xlu2 %4374 }
 0x6dd   : > { %v6018_v50 = vmul.f32 %v10737_v27, %v5985_v63  ;;  %4419 = vst.msk [vmem:[#allocation3 + $0x30] sm:$0xf] %vm4414_vm0, %v4375_v58 }
 0x6de   : > { %6536 = vmatmul.bf16.gmra.mxu2 %v6448_v35 }
 0x6df   : > { %v6034_v56 = vpack.c.bf16 %v6018_v50, %v6018_v50  ;;  %v10739_v50 = vpop.eup %10738 }
 0x6e0   : > { %v4330_v34 = vmul.f32 %v10739_v50, %v13124_v43 }
 0x6e1   : > { %6050 = vst.msk [vmem:[#allocation3 + $0x44] sm:$0xf] %vm3795_vm2, %v6034_v56 }
 0x6e2   : > { %v4346_v58 = vpack.c.bf16 %v4330_v34, %v4330_v34 }
 0x6e3   : > { %v4373_v41 = vpop.permute.xlu0 %4372  ;;  %5296 = vadd.xlane.f32.xlu2 %v13065_v7  ;;  %v13269_v7 = vadd.f32 %v6310_v3, %v14178_v14  ;;  %v10741_v3 = vpop.eup %10740 }
 0x6e4   : > { %4418 = vst.msk [vmem:[#allocation3 + $0x24] sm:$0xf] %vm4414_vm0, %v4373_v41  ;;  %v9555_v56 = vld [vmem:[#allocation3 + $0x30] sm:$0xf]  ;;  %v4329_v43 = vmul.f32 %v10741_v3, %v13096_v26  ;;  %v10743_v34 = vpop.eup %10742 }
 0x6e5   : > { %v4328_v45 = vmul.f32 %v10743_v34, %v13076_v55 }
 0x6e9   : > { %6346 = vmax.xlane.f32.xlu0 %v13256_v4 }
 0x6eb   : > { %v10304_v27 = vld [vmem:[#allocation3 + $0x20] sm:$0xf0]  ;;  %6342 = vmax.xlane.f32.xlu2 %v13260_v47 }
 0x6ec   : > { %v13263_v63 = vor.u32 %v10304_v27, %v9543_v16  ;;  %v4345_v16 = vpack.c.bf16 %v4329_v43, %v4329_v43  ;;  %v6356_v27 = vsub.f32 %v13084_v0, %v6331_v61  ;;  %v4344_v0 = vpack.c.bf16 %v4328_v45, %v4328_v45 }
 0x6ed   : > { %v4377_v35 = vpop.permute.xlu1 %4376 }
 0x6ee   : > { %7340 = vmatmul.bf16.gmra.mxu3 %v13263_v63  ;;  %4420 = vst.msk [vmem:[#allocation3 + $0x3c] sm:$0xf] %vm4414_vm0, %v4377_v35  ;;  %v6378_v35 = vmul.f32 1.442695, %v6356_v27  ;;  %v6315_v27 = vpop.f32.mrf.mxu1 }
 0x6f0   : > { %10744 = vpow2.f32 %v6378_v35 }
 0x6f3   : > { %6344 = vmax.xlane.f32.xlu2 %v13269_v7 }
 0x6f5   : > { %v10307_v62 = vld [vmem:[#allocation3 + $0x38] sm:$0xf0] }
 0x6f6   : > { %v13273_v41 = vor.u32 %v10307_v62, %v9555_v56  ;;  %v13290_v62 = vpop.eup %10744 }
 0x6fd   : > { %4390 = vrot.lane.b32.xlu0 %v4346_v58, %s11074_s21 }
 0x6fe   : > { %7345 = vmatmul.bf16.gmra.mxu3 %v13273_v41 }
 0x700   : > { %6340 = vmax.xlane.f32.xlu1 %v13279_v28 }
 0x70b   : > { %4388 = vrot.lane.b32.xlu2 %v4345_v16, %s11074_s21 }
 0x70e   : > { %v6333_v14 = vpop.xlane.xlu0 %6332 }
 0x70f   : > { %v6357_v50 = vsub.f32 %v13180_v19, %v6333_v14 }
 0x711   : > { %v6380_v59 = vmul.f32 1.442695, %v6357_v50 }
 0x713   : > { %10746 = vpow2.f32 %v6380_v59 }
 0x714   : > { %10748 = vrcp.f32 %v13031_v29 }
 0x715   : > { %v6335_v26 = vpop.xlane.xlu2 %6334  ;;  %10750 = vrcp.f32 %v13109_v6  ;;  %v14180_v6 = vld [vmem:[#allocation29_spill] sm:$0xff] }
 0x716   : > { %v6358_v29 = vsub.f32 %v13187_v22, %v6335_v26  ;;  %v13303_v43 = vpop.xlane.xlu0 %5290  ;;  %v13309_v59 = vadd.f32 %v6315_v27, %v14180_v6 }
 0x718   : > { %v13294_v58 = vpop.xlane.xlu1 %5292  ;;  %v6382_v3 = vmul.f32 1.442695, %v6358_v29 }
 0x719   : > { %v13292_v61 = vpop.eup %10746  ;;  %4386 = vrot.lane.b32.xlu1 %v4344_v0, %s11074_s21 }
 0x71a   : > { %v6449_v15 = vpack.c.bf16 %v13292_v61, %v13290_v62  ;;  %v10749_v19 = vpop.eup %10748  ;;  %10752 = vpow2.f32 %v6382_v3 }
 0x71b   : > { %v4331_v56 = vmul.f32 %v10749_v19, %v13142_v12  ;;  %v10751_v14 = vpop.eup %10750 }
 0x71c   : > { %6541 = vmatmul.bf16.gmra.mxu2 %v6449_v15  ;;  %v5443_v12 = vmul.f32 %v10751_v14, %v13172_v8 }
 0x71d   : > { %v4381_v55 = vpop.permute.xlu2 %4380  ;;  %v4347_v25 = vpack.c.bf16 %v4331_v56, %v4331_v56 }
 0x71e   : > { %4422 = vst.msk [vmem:[#allocation3 + $0x54] sm:$0xf] %vm4414_vm0, %v4381_v55  ;;  %v5459_v22 = vpack.c.bf16 %v5443_v12, %v5443_v12 }
 0x720   : > { %v6337_v16 = vpop.xlane.xlu1 %6336 }
 0x721   : > { %v6359_v35 = vsub.f32 %v13195_v37, %v6337_v16  ;;  %4392 = vrot.lane.b32.xlu1 %v4347_v25, %s11074_s21  ;;  %v13314_v37 = vpop.eup %10752 }
 0x723   : > { %v6384_v50 = vmul.f32 1.442695, %v6359_v35 }
 0x725   : > { %10754 = vpow2.f32 %v6384_v50  ;;  %v10310_v15 = vld [vmem:[#allocation3 + $0x50] sm:$0xf0] }
 0x726   : > { %10756 = vrcp.f32 %v13103_v18 }
 0x727   : > { %6348 = vmax.xlane.f32.xlu0 %v13309_v59  ;;  %10758 = vrcp.f32 %v13091_v44 }
 0x728   : > { %v13327_v55 = vpop.xlane.xlu1 %5294  ;;  %10760 = vrcp.f32 %v13155_v21 }
 0x729   : > { %v4379_v34 = vpop.permute.xlu0 %4378  ;;  %5491 = vrot.lane.b32.xlu1 %v5459_v22, %s11074_s21  ;;  %10762 = vrcp.f32 %v13234_v9  ;;  %v9701_v9 = vld [vmem:[#allocation9 + $0x9c] sm:$0xf0] }
 0x72a   : > { %4421 = vst.msk [vmem:[#allocation3 + $0x48] sm:$0xf] %vm4414_vm0, %v4379_v34 }
 0x72b   : > { %v13316_v45 = vpop.eup %10754 }
 0x72c   : > { %v6450_v8 = vpack.c.bf16 %v13316_v45, %v13314_v37  ;;  %v10757_v56 = vpop.eup %10756 }
 0x72d   : > { %v4333_v29 = vmul.f32 %v10757_v56, %v13168_v52  ;;  %v10759_v3 = vpop.eup %10758 }
 0x72e   : > { %6546 = vmatmul.bf16.gmra.mxu2 %v6450_v8  ;;  %v4332_v16 = vmul.f32 %v10759_v3, %v13157_v2  ;;  %v13341_v2 = vpop.f32.mrf.mxu2  ;;  %v10761_v50 = vpop.eup %10760  ;;  %v9713_v3 = vld [vmem:[#allocation9 + $0xb4] sm:$0xf0] }
 0x72f   : > { %v4349_v25 = vpack.c.bf16 %v4333_v29, %v4333_v29  ;;  %v5445_v6 = vmul.f32 %v10761_v50, %v13191_v48  ;;  %v10339_v50 = vld [vmem:[#allocation9 + $0x7c] sm:$0xf] }
 0x730   : > { %v6339_v18 = vpop.xlane.xlu1 %6338  ;;  %v4348_v35 = vpack.c.bf16 %v4332_v16, %v4332_v16  ;;  %v10342_v16 = vld [vmem:[#allocation9 + $0x94] sm:$0xf] }
 0x731   : > { %v4385_v26 = vpop.permute.xlu0 %4384  ;;  %v9567_v0 = vld [vmem:[#allocation3 + $0x48] sm:$0xf]  ;;  %v5461_v8 = vpack.c.bf16 %v5445_v6, %v5445_v6  ;;  %v6360_v21 = vsub.f32 %v13212_v54, %v6339_v18 }
 0x732   : > { %4424 = vst.msk [vmem:[#allocation3 + $0x6c] sm:$0xf] %vm4414_vm0, %v4385_v26  ;;  %v13322_v19 = vor.u32 %v10310_v15, %v9567_v0  ;;  %v9689_v6 = vld [vmem:[#allocation9 + $0x84] sm:$0xf0] }
 0x733   : > { %v6386_v48 = vmul.f32 1.442695, %v6360_v21  ;;  %v9677_v21 = vld [vmem:[#allocation9 + $0x6c] sm:$0xf0] }
 0x734   : > { %7350 = vmatmul.bf16.gmra.mxu3 %v13322_v19  ;;  %6398 = vadd.xlane.f32.xlu2 %v13160_v49 }
 0x735   : > { %10764 = vpow2.f32 %v6386_v48 }
 0x736   : > { %v13347_v26 = vpop.f32.mrf.mxu2 }
 0x739   : > { %v10313_v14 = vld [vmem:[#allocation3 + $0x68] sm:$0xf0] }
 0x73b   : > { %4396 = vrot.lane.b32.xlu0 %v4349_v25, %s11074_s21  ;;  %v10763_v25 = vpop.eup %10762 }
 0x73c   : > { %v5448_v18 = vmul.f32 %v10763_v25, %v13219_v51  ;;  %v9692_v51 = vor.u32 %v10339_v50, %v9689_v6  ;;  %v10324_v6 = vld [vmem:[#allocation9 + $0x4] sm:$0xf] }
 0x73e   : > { %v13355_v15 = vpop.f32.mrf.mxu2 }
 0x748   : > { %v4383_v27 = vpop.permute.xlu1 %4382 }
 0x749   : > { %4423 = vst.msk [vmem:[#allocation3 + $0x60] sm:$0xf] %vm4414_vm0, %v4383_v27  ;;  %v13360_v27 = vpop.eup %10764 }
 0x74c   : > { %4394 = vrot.lane.b32.xlu2 %v4348_v35, %s11074_s21  ;;  %v9704_v35 = vor.u32 %v10342_v16, %v9701_v9 }
 0x750   : > { %v9579_v52 = vld [vmem:[#allocation3 + $0x60] sm:$0xf] }
 0x751   : > { %v13334_v49 = vor.u32 %v10313_v14, %v9579_v52  ;;  %v5464_v14 = vpack.c.bf16 %v5448_v18, %v5448_v18  ;;  %v9653_v18 = vld [vmem:[#allocation9 + $0x3c] sm:$0xf0] }
 0x753   : > { %6406 = vadd.xlane.f32.xlu1 %v13243_v5  ;;  %7355 = vmatmul.bf16.gmra.mxu3 %v13334_v49 }
 0x756   : > { %v13338_v12 = vpop.xlane.xlu2 %5296 }
 0x75c   : > { %v13345_v22 = vpop.xlane.xlu0 %6346 }
 0x75e   : > { %v6343_v44 = vpop.xlane.xlu2 %6342 }
 0x765   : > { %6402 = vadd.xlane.f32.xlu0 %v13224_v39 }
 0x766   : > { %v6345_v34 = vpop.xlane.xlu2 %6344 }
 0x76c   : > { %5495 = vrot.lane.b32.xlu1 %v5461_v8, %s11074_s21 }
 0x76d   : > { %6404 = vadd.xlane.f32.xlu0 %v13226_v24  ;;  %v10345_v24 = vld [vmem:[#allocation9 + $0xac] sm:$0xf] }
 0x76e   : > { %v4389_v5 = vpop.permute.xlu2 %4388  ;;  %v9716_v54 = vor.u32 %v10345_v24, %v9713_v3  ;;  %v9665_v24 = vld [vmem:[#allocation9 + $0x54] sm:$0xf0] }
 0x76f   : > { %v4391_v0 = vpop.permute.xlu0 %4390  ;;  %4426 = vst.msk [vmem:[#allocation3 + $0x84] sm:$0xf] %vm4414_vm0, %v4389_v5  ;;  %v6362_v5 = vsub.f32 %v13260_v47, %v6343_v44 }
 0x770   : > { %4427 = vst.msk [vmem:[#allocation3 + $0x90] sm:$0xf] %vm4414_vm0, %v4391_v0  ;;  %7474 = vmatpush.bf16.msra.mxu2 %v9716_v54  ;;  %v10336_v0 = vld [vmem:[#allocation9 + $0x64] sm:$0xf]  ;;  %v10330_v54 = vld [vmem:[#allocation9 + $0x34] sm:$0xf] }
 0x771   : > { %v9656_v16 = vor.u32 %v10330_v54, %v9653_v18 }
 0x773   : > { %v6341_v39 = vpop.xlane.xlu1 %6340 }
 0x774   : > { %v6361_v56 = vsub.f32 %v13279_v28, %v6341_v39  ;;  %v13364_v28 = vpop.f32.mrf.mxu2  ;;  %7475 = vmatpush.bf16.msra.mxu2 %v9704_v35  ;;  %v10327_v35 = vld [vmem:[#allocation9 + $0x1c] sm:$0xf] }
 0x775   : > { %6400 = vadd.xlane.f32.xlu2 %v13162_v36  ;;  %v6363_v36 = vsub.f32 %v13269_v7, %v6345_v34  ;;  %v9680_v7 = vor.u32 %v10336_v0, %v9677_v21  ;;  %v6390_v34 = vmul.f32 1.442695, %v6362_v5 }
 0x776   : > { %v6388_v29 = vmul.f32 1.442695, %v6361_v56  ;;  %v10316_v0 = vld [vmem:[#allocation3 + $0x80] sm:$0xf0] }
 0x777   : > { %v6392_v48 = vmul.f32 1.442695, %v6363_v36  ;;  %v9641_v36 = vld [vmem:[#allocation9 + $0x24] sm:$0xf0] }
 0x778   : > { %10766 = vpow2.f32 %v6388_v29  ;;  %7476 = vmatpush.bf16.msra.mxu2 %v9692_v51 }
 0x779   : > { %10768 = vrcp.f32 %v13128_v17  ;;  %v10333_v17 = vld [vmem:[#allocation9 + $0x4c] sm:$0xf] }
 0x77a   : > { %10770 = vpow2.f32 %v6392_v48  ;;  %v9668_v47 = vor.u32 %v10333_v17, %v9665_v24 }
 0x77b   : > { %10772 = vpow2.f32 %v6390_v34 }
 0x77c   : > { %7477 = vmatpush.bf16.msra.mxu2 %v9680_v7  ;;  %v13373_v29 = vpop.f32.mrf.mxu2  ;;  %v6364_v7 = vsub.f32 %v13256_v4, %v13345_v22 }
 0x77e   : > { %v13362_v52 = vpop.eup %10766  ;;  %v6394_v34 = vmul.f32 1.442695, %v6364_v7 }
 0x77f   : > { %v6451_v8 = vpack.c.bf16 %v13362_v52, %v13360_v27  ;;  %v10769_v39 = vpop.eup %10768 }
 0x780   : > { %v5444_v56 = vmul.f32 %v10769_v39, %v13182_v31  ;;  %7478 = vmatpush.bf16.msra.mxu2 %v9668_v47  ;;  %v10771_v3 = vpop.eup %10770  ;;  %10774 = vpow2.f32 %v6394_v34  ;;  %v10366_v34 = vld [vmem:[#allocation9 + $0x154] sm:$0xf] }
 0x781   : > { %5501 = vrot.lane.b32.xlu0 %v5464_v14, %s11074_s21  ;;  %6551 = vmatmul.bf16.gmra.mxu2 %v6451_v8  ;;  %v13377_v9 = vpop.eup %10772  ;;  %v9644_v14 = vor.u32 %v10327_v35, %v9641_v36  ;;  %v9629_v8 = vld [vmem:[#allocation9 + $0xc] sm:$0xf0] }
 0x782   : > { %v5460_v44 = vpack.c.bf16 %v5444_v56, %v5444_v56  ;;  %v6452_v31 = vpack.c.bf16 %v10771_v3, %v13377_v9  ;;  %v9632_v21 = vor.u32 %v10324_v6, %v9629_v8 }
 0x784   : > { %7479 = vmatpush.bf16.msra.mxu2 %v9656_v16  ;;  %v13380_v50 = vpop.f32.mrf.mxu2 }
 0x786   : > { %v13394_v22 = vpop.eup %10774 }
 0x788   : > { %7480 = vmatpush.bf16.msra.mxu2 %v9644_v14 }
 0x78b   : > { %v4387_v25 = vpop.permute.xlu1 %4386 }
 0x78c   : > { %4425 = vst.msk [vmem:[#allocation3 + $0x78] sm:$0xf] %vm4414_vm0, %v4387_v25  ;;  %7481 = vmatpush.bf16.msra.mxu2 %v9632_v21  ;;  %v13390_v24 = vpop.f32.mrf.mxu2 }
 0x78d   : > { %5493 = vrot.lane.b32.xlu2 %v5460_v44, %s11074_s21  ;;  %v14182_v44 = vld [vmem:[#allocation27_spill] sm:$0xff] }
 0x791   : > { %6556 = vmatmul.bf16.gmra.mxu2 %v6452_v31  ;;  %v14184_v31 = vld [vmem:[#allocation36_spill] sm:$0xff] }
 0x793   : > { %v4393_v51 = vpop.permute.xlu1 %4392  ;;  %v9591_v5 = vld [vmem:[#allocation3 + $0x78] sm:$0xf] }
 0x794   : > { %4428 = vst.msk [vmem:[#allocation3 + $0x9c] sm:$0xf] %vm4414_vm0, %v4393_v51  ;;  %v13383_v48 = vor.u32 %v10316_v0, %v9591_v5  ;;  %v13402_v18 = vpop.f32.mrf.mxu2  ;;  %v10370_v5 = vld [vmem:[#allocation9 + $0x170] sm:$0xf0]  ;;  %v10369_v0 = vld [vmem:[#allocation9 + $0x16c] sm:$0xf] }
 0x796   : > { %14181 = vst [vmem:[#allocation25_spill] sm:$0xff] %v13383_v48  ;;  %6410 = vadd.xlane.f32.xlu1 %v13290_v62  ;;  %7360 = vmatmul.bf16.gmra.mxu3 %v13383_v48  ;;  %v9603_v62 = vld [vmem:[#allocation3 + $0x90] sm:$0xf] }
 0x79a   : > { %v6349_v39 = vpop.xlane.xlu0 %6348 }
 0x79b   : > { %v6365_v56 = vsub.f32 %v13309_v59, %v6349_v39  ;;  %v5492_v17 = vpop.permute.xlu1 %5491  ;;  %v10319_v4 = vld [vmem:[#allocation3 + $0x98] sm:$0xf0] }
 0x79c   : > { %5539 = vst.msk [vmem:[#allocation3 + $0x4] sm:$0xf] %vm4414_vm0, %v5492_v17  ;;  %v13398_v54 = vor.u32 %v10319_v4, %v9603_v62  ;;  %v13411_v14 = vpop.f32.mrf.mxu2 }
 0x79d   : > { %v6396_v47 = vmul.f32 1.442695, %v6365_v56  ;;  %v9797_v56 = vld [vmem:[#allocation9 + $0x15c] sm:$0xf0] }
 0x79e   : > { %4750 = vadd.xlane.f32.xlu1 %v14182_v44  ;;  %14183 = vst [vmem:[#allocation43_spill] sm:$0xff] %v13398_v54  ;;  %v9800_v17 = vor.u32 %v10366_v34, %v9797_v56  ;;  %v10363_v44 = vld [vmem:[#allocation9 + $0x13c] sm:$0xf]  ;;  %v9761_v34 = vld [vmem:[#allocation9 + $0x114] sm:$0xf0] }
 0x79f   : > { %10776 = vpow2.f32 %v6396_v47  ;;  %v10364_v47 = vld [vmem:[#allocation9 + $0x140] sm:$0xf0]  ;;  %v10355_v56 = vld [vmem:[#allocation9 + $0xf8] sm:$0xf0] }
 0x7a0   : > { %10778 = vrcp.f32 %v13207_v40 }
 0x7a4   : > { %v13419_v51 = vpop.f32.mrf.mxu2 }
 0x7a5   : > { %v13396_v25 = vpop.eup %10776 }
 0x7a6   : > { %v6453_v59 = vpack.c.bf16 %v13396_v25, %v13394_v22  ;;  %6420 = vadd.xlane.f32.xlu1 %v13362_v52  ;;  %7365 = vmatmul.bf16.gmra.mxu3 %v13398_v54 }
 0x7a7   : > { %v13406_v16 = vpop.xlane.xlu2 %6398 }
 0x7a8   : > { %6561 = vmatmul.bf16.gmra.mxu2 %v6453_v59  ;;  %v9785_v59 = vld [vmem:[#allocation9 + $0x144] sm:$0xf0]  ;;  %10780 = vrcp.f32 %v13406_v16 }
 0x7a9   : > { %v9788_v40 = vor.u32 %v10363_v44, %v9785_v59  ;;  %v10352_v59 = vld [vmem:[#allocation9 + $0xe0] sm:$0xf0] }
 0x7ab   : > { %5872 = vadd.xlane.f32.xlu0 %v14184_v31  ;;  %v10779_v31 = vpop.eup %10778 }
 0x7ac   : > { %v13425_v4 = vpop.f32.mrf.mxu2 }
 0x7ad   : > { %v4397_v35 = vpop.permute.xlu0 %4396 }
 0x7ae   : > { %4430 = vst.msk [vmem:[#allocation3 + $0xb4] sm:$0xf] %vm4414_vm0, %v4397_v35  ;;  %5298 = vadd.xlane.f32.xlu1 %v13111_v53  ;;  %v9807_v53 = vld [vmem:[#allocation9 + $0x168] sm:$0xf]  ;;  %v9771_v35 = vld [vmem:[#allocation9 + $0x120] sm:$0xf] }
 0x7af   : > { %v4395_v36 = vpop.permute.xlu2 %4394  ;;  %v9808_v21 = vor.u32 %v10370_v5, %v9807_v53  ;;  %v9773_v53 = vld [vmem:[#allocation9 + $0x12c] sm:$0xf0] }
 0x7b0   : > { %4429 = vst.msk [vmem:[#allocation3 + $0xa8] sm:$0xf] %vm4414_vm0, %v4395_v36  ;;  %v10361_v36 = vld [vmem:[#allocation9 + $0x128] sm:$0xf0] }
 0x7b1   : > { %7376 = vmatpush.bf16.msra.mxu0 %v9808_v21  ;;  %v10358_v21 = vld [vmem:[#allocation9 + $0x110] sm:$0xf0] }
 0x7b3   : > { %6416 = vadd.xlane.f32.xlu0 %v13316_v45  ;;  %v9809_v45 = vld [vmem:[#allocation9 + $0x174] sm:$0xf0] }
 0x7b4   : > { %v9812_v7 = vor.u32 %v10369_v0, %v9809_v45  ;;  %v9759_v0 = vld [vmem:[#allocation9 + $0x108] sm:$0xf]  ;;  %v10357_v45 = vld [vmem:[#allocation9 + $0x10c] sm:$0xf] }
 0x7b5   : > { %v10322_v6 = vld [vmem:[#allocation3 + $0xb0] sm:$0xf0] }
 0x7b6   : > { %6408 = vadd.xlane.f32.xlu2 %v13245_v33  ;;  %6424 = vadd.xlane.f32.xlu1 %v10771_v3  ;;  %v9795_v33 = vld [vmem:[#allocation9 + $0x150] sm:$0xf]  ;;  %v10367_v3 = vld [vmem:[#allocation9 + $0x158] sm:$0xf0] }
 0x7b7   : > { %v9615_v52 = vld [vmem:[#allocation3 + $0xa8] sm:$0xf]  ;;  %7523 = vmatpush.bf16.msra.mxu3 %v9812_v7  ;;  %v9796_v39 = vor.u32 %v10367_v3, %v9795_v33  ;;  %v6532_v7 = vpop.f32.mrf.mxu2  ;;  %v9760_v3 = vor.u32 %v10358_v21, %v9759_v0  ;;  %v10349_v0 = vld [vmem:[#allocation9 + $0xc8] sm:$0xf0]  ;;  %v10348_v21 = vld [vmem:[#allocation9 + $0xc4] sm:$0xf] }
 0x7b8   : > { %7482 = vmatmul.bf16.vlgmr.msra.gmra.mxu2 %v13176_v1  ;;  %v13417_v8 = vor.u32 %v10322_v6, %v9615_v52  ;;  %v10360_v52 = vld [vmem:[#allocation9 + $0x124] sm:$0xf]  ;;  %v9772_v6 = vor.u32 %v10361_v36, %v9771_v35  ;;  %v9737_v36 = vld [vmem:[#allocation9 + $0xe4] sm:$0xf0] }
 0x7b9   : > { %7377 = vmatpush.bf16.msra.mxu0 %v9796_v39  ;;  %v9776_v5 = vor.u32 %v10360_v52, %v9773_v53  ;;  %v9764_v39 = vor.u32 %v10357_v45, %v9761_v34  ;;  %v10781_v52 = vpop.eup %10780 }
 0x7ba   : > { %14185 = vst [vmem:[#allocation42_spill] sm:$0xff] %v13417_v8  ;;  %7370 = vmatmul.bf16.gmra.mxu3 %v13417_v8  ;;  %v6567_v45 = vmul.f32 %v10781_v52, %v13419_v51 }
 0x7bb   : > { %6418 = vadd.xlane.f32.xlu0 %v13360_v27  ;;  %7524 = vmatpush.bf16.msra.mxu3 %v9800_v17  ;;  %v9783_v27 = vld [vmem:[#allocation9 + $0x138] sm:$0xf]  ;;  %v10354_v17 = vld [vmem:[#allocation9 + $0xf4] sm:$0xf] }
 0x7bc   : > { %v9784_v62 = vor.u32 %v10364_v47, %v9783_v27  ;;  %v9749_v47 = vld [vmem:[#allocation9 + $0xfc] sm:$0xf0]  ;;  %v6583_v34 = vpack.c.bf16 %v6567_v45, %v6567_v45  ;;  %v10371_v45 = vld [vmem:[#allocation9 + $0x178] sm:$0xf0] }
 0x7bd   : > { %v9752_v44 = vor.u32 %v10354_v17, %v9749_v47 }
 0x7be   : > { %7378 = vmatpush.bf16.msra.mxu0 %v9784_v62  ;;  %v9735_v62 = vld [vmem:[#allocation9 + $0xd8] sm:$0xf] }
 0x7bf   : > { %7525 = vmatpush.bf16.msra.mxu3 %v9788_v40  ;;  %v5465_v40 = vpack.c.bf16 %v13236_v60, %v13236_v60  ;;  %v9736_v35 = vor.u32 %v10352_v59, %v9735_v62  ;;  %v6534_v16 = vpop.f32.mrf.mxu2  ;;  %v13440_v59 = vpop.f32.mrf.mxu3 }
 0x7c2   : > { %7379 = vmatpush.bf16.msra.mxu0 %v9772_v6 }
 0x7c3   : > { %5300 = vadd.xlane.f32.xlu0 %v13098_v32  ;;  %v5446_v32 = vmul.f32 %v10779_v31, %v13199_v13  ;;  %7526 = vmatpush.bf16.msra.mxu3 %v9776_v5  ;;  %v9747_v13 = vld [vmem:[#allocation9 + $0xf0] sm:$0xf]  ;;  %v10351_v31 = vld [vmem:[#allocation9 + $0xdc] sm:$0xf]  ;;  %v9723_v5 = vld [vmem:[#allocation9 + $0xc0] sm:$0xf] }
 0x7c4   : > { %v9748_v27 = vor.u32 %v10355_v56, %v9747_v13  ;;  %v9724_v60 = vor.u32 %v10349_v0, %v9723_v5 }
 0x7c5   : > { %v5462_v33 = vpack.c.bf16 %v5446_v32, %v5446_v32  ;;  %v9740_v32 = vor.u32 %v10351_v31, %v9737_v36 }
 0x7c6   : > { %7380 = vmatpush.bf16.msra.mxu0 %v9760_v3  ;;  %v6407_v6 = vpop.xlane.xlu1 %6406 }
 0x7c7   : > { %7527 = vmatpush.bf16.msra.mxu3 %v9764_v39  ;;  %v6537_v17 = vpop.f32.mrf.mxu2  ;;  %v13448_v5 = vpop.f32.mrf.mxu3 }
 0x7c8   : > { %7487 = vmatmul.bf16.gmra.mxu2 %v13263_v63 }
 0x7ca   : > { %7381 = vmatpush.bf16.msra.mxu0 %v9748_v27 }
 0x7cb   : > { %7528 = vmatpush.bf16.msra.mxu3 %v9752_v44 }
 0x7ce   : > { %5497 = vrot.lane.b32.xlu2 %v5462_v33, %s11074_s21  ;;  %7382 = vmatpush.bf16.msra.mxu0 %v9736_v35  ;;  %v9725_v33 = vld [vmem:[#allocation9 + $0xcc] sm:$0xf0] }
 0x7cf   : > { %7529 = vmatpush.bf16.msra.mxu3 %v9740_v32  ;;  %v9728_v3 = vor.u32 %v10348_v21, %v9725_v33  ;;  %v13442_v31 = vpop.f32.mrf.mxu2  ;;  %v9815_v21 = vld [vmem:[#allocation9 + $0x170] sm:$0xf] }
 0x7d0   : > { %v9816_v33 = vor.u32 %v10371_v45, %v9815_v21  ;;  %v9743_v45 = vld [vmem:[#allocation9 + $0xe0] sm:$0xf] }
 0x7d2   : > { %7383 = vmatpush.bf16.msra.mxu0 %v9724_v60  ;;  %7670 = vmatpush.bf16.msrb.mxu2 %v9816_v33  ;;  %v10353_v33 = vld [vmem:[#allocation9 + $0xe8] sm:$0xf0] }
 0x7d3   : > { %7530 = vmatpush.bf16.msra.mxu3 %v9728_v3 }
 0x7d7   : > { %5503 = vrot.lane.b32.xlu0 %v5465_v40, %s11074_s21  ;;  %v6542_v52 = vpop.f32.mrf.mxu2 }
 0x7d8   : > { %v6403_v53 = vpop.xlane.xlu0 %6402  ;;  %7492 = vmatmul.bf16.gmra.mxu2 %v13273_v41 }
 0x7d9   : > { %10782 = vrcp.f32 %v6403_v53 }
 0x7de   : > { %v5496_v13 = vpop.permute.xlu1 %5495 }
 0x7df   : > { %v10783_v39 = vpop.eup %10782  ;;  %6615 = vrot.lane.b32.xlu0 %v6583_v34, %s11074_s21  ;;  %5541 = vst.msk [vmem:[#allocation3 + $0x1c] sm:$0xf] %vm4414_vm0, %v5496_v13  ;;  %v13457_v34 = vpop.f32.mrf.mxu3  ;;  %v10368_v13 = vld [vmem:[#allocation9 + $0x160] sm:$0xf0] }
 0x7e0   : > { %v6405_v56 = vpop.xlane.xlu0 %6404  ;;  %v6569_v27 = vmul.f32 %v10783_v39, %v6532_v7  ;;  %v13459_v39 = vpop.f32.mrf.mxu2 }
 0x7e1   : > { %10784 = vrcp.f32 %v6405_v56 }
 0x7e2   : > { %v6585_v47 = vpack.c.bf16 %v6569_v27, %v6569_v27  ;;  %v10365_v27 = vld [vmem:[#allocation9 + $0x148] sm:$0xf0] }
 0x7e7   : > { %v10785_v44 = vpop.eup %10784  ;;  %6619 = vrot.lane.b32.xlu0 %v6585_v47, %s11074_s21 }
 0x7e8   : > { %7497 = vmatmul.bf16.gmra.mxu2 %v13322_v19  ;;  %v6570_v51 = vmul.f32 %v10785_v44, %v6534_v16  ;;  %v6401_v62 = vpop.xlane.xlu2 %6400  ;;  %v13463_v44 = vpop.f32.mrf.mxu2 }
 0x7e9   : > { %10786 = vrcp.f32 %v6401_v62  ;;  %v10362_v62 = vld [vmem:[#allocation9 + $0x130] sm:$0xf0] }
 0x7ea   : > { %v6586_v40 = vpack.c.bf16 %v6570_v51, %v6570_v51  ;;  %10788 = vrcp.f32 %v6407_v6  ;;  %v10300_v6 = vld [vmem:[#allocation3 + $0x4] sm:$0xf]  ;;  %v9779_v51 = vld [vmem:[#allocation9 + $0x128] sm:$0xf] }
 0x7ef   : > { %6621 = vrot.lane.b32.xlu0 %v6586_v40, %s11074_s21  ;;  %v10787_v35 = vpop.eup %10786  ;;  %v9780_v40 = vor.u32 %v10362_v62, %v9779_v51 }
 0x7f0   : > { %v6568_v7 = vmul.f32 %v10787_v35, %v13425_v4  ;;  %v5494_v36 = vpop.permute.xlu2 %5493  ;;  %v10789_v16 = vpop.eup %10788 }
 0x7f1   : > { %5540 = vst.msk [vmem:[#allocation3 + $0x10] sm:$0xf] %vm4414_vm0, %v5494_v36  ;;  %v6571_v0 = vmul.f32 %v10789_v16, %v6537_v17  ;;  %v9791_v17 = vld [vmem:[#allocation9 + $0x140] sm:$0xf]  ;;  %v13465_v35 = vpop.f32.mrf.mxu3  ;;  %v10359_v36 = vld [vmem:[#allocation9 + $0x118] sm:$0xf0] }
 0x7f2   : > { %v6584_v53 = vpack.c.bf16 %v6568_v7, %v6568_v7  ;;  %v9792_v47 = vor.u32 %v10365_v27, %v9791_v17  ;;  %v9767_v7 = vld [vmem:[#allocation9 + $0x110] sm:$0xf]  ;;  %v10356_v16 = vld [vmem:[#allocation9 + $0x100] sm:$0xf0]  ;;  %v9731_v17 = vld [vmem:[#allocation9 + $0xc8] sm:$0xf] }
 0x7f3   : > { %v5502_v32 = vpop.permute.xlu0 %5501  ;;  %v6587_v3 = vpack.c.bf16 %v6571_v0, %v6571_v0  ;;  %v10350_v27 = vld [vmem:[#allocation9 + $0xd0] sm:$0xf0] }
 0x7f4   : > { %5544 = vst.msk [vmem:[#allocation3 + $0x40] sm:$0xf] %vm4414_vm0, %v5502_v32  ;;  %6617 = vrot.lane.b32.xlu1 %v6584_v53, %s11074_s21  ;;  %v9768_v53 = vor.u32 %v10359_v36, %v9767_v7  ;;  %v9732_v51 = vor.u32 %v10350_v27, %v9731_v17 }
 0x7f7   : > { %6412 = vadd.xlane.f32.xlu2 %v13292_v61  ;;  %v9803_v61 = vld [vmem:[#allocation9 + $0x158] sm:$0xf] }
 0x7f8   : > { %7502 = vmatmul.bf16.gmra.mxu2 %v13334_v49  ;;  %v9533_v4 = vld [vmem:[#allocation3 + $0xc] sm:$0xf0]  ;;  %v9804_v56 = vor.u32 %v10368_v13, %v9803_v61  ;;  %v9744_v13 = vor.u32 %v10353_v33, %v9743_v45  ;;  %v5988_v33 = vpop.f32.mrf.mxu0 }
 0x7f9   : > { %v13453_v60 = vor.u32 %v10300_v6, %v9533_v4  ;;  %v13468_v6 = vpop.f32.mrf.mxu2  ;;  %v13470_v21 = vpop.f32.mrf.mxu3 }
 0x7fa   : > { %7671 = vmatpush.bf16.msrb.mxu2 %v9804_v56 }
 0x7fb   : > { %7384 = vmatmul.bf16.vlgmr.msra.gmra.mxu0 %v13453_v60  ;;  %7531 = vmatmul.bf16.vlgmr.msra.gmra.mxu3 %v13453_v60 }
 0x7fc   : > { %6623 = vrot.lane.b32.xlu1 %v6587_v3, %s11074_s21 }
 0x7fe   : > { %7672 = vmatpush.bf16.msrb.mxu2 %v9792_v47  ;;  %v5463_v47 = vpack.c.bf16 %v13232_v30, %v13232_v30 }
 0x7ff   : > { %6414 = vadd.xlane.f32.xlu2 %v13314_v37  ;;  %v9755_v37 = vld [vmem:[#allocation9 + $0xf8] sm:$0xf] }
 0x800   : > { %v9756_v0 = vor.u32 %v10356_v16, %v9755_v37 }
 0x802   : > { %7673 = vmatpush.bf16.msrb.mxu2 %v9780_v40 }
 0x804   : > { %v6552_v62 = vpop.f32.mrf.mxu2 }
 0x806   : > { %7674 = vmatpush.bf16.msrb.mxu2 %v9768_v53 }
 0x808   : > { %7507 = vmatmul.bf16.gmra.mxu2 %v13383_v48  ;;  %v14192_v48 = vld [vmem:[#allocation31_spill] sm:$0xff] }
 0x809   : > { %v6411_v32 = vpop.xlane.xlu1 %6410 }
 0x80a   : > { %10790 = vrcp.f32 %v6411_v32  ;;  %7675 = vmatpush.bf16.msrb.mxu2 %v9756_v0  ;;  %v13478_v32 = vpop.f32.mrf.mxu3 }
 0x80c   : > { %v6554_v16 = vpop.f32.mrf.mxu2 }
 0x80e   : > { %7676 = vmatpush.bf16.msrb.mxu2 %v9744_v13 }
 0x810   : > { %v10791_v4 = vpop.eup %10790 }
 0x811   : > { %v6573_v3 = vmul.f32 %v10791_v4, %v6542_v52  ;;  %v4751_v61 = vpop.xlane.xlu1 %4750  ;;  %v14186_v52 = vld [vmem:[#allocation19_spill] sm:$0xff] }
 0x812   : > { %10792 = vrcp.f32 %v4751_v61  ;;  %7677 = vmatpush.bf16.msrb.mxu2 %v9732_v51  ;;  %v13483_v4 = vpop.f32.mrf.mxu3  ;;  %v9903_v51 = vld [vmem:[#allocation9 + $0x228] sm:$0xf] }
 0x813   : > { %v6589_v56 = vpack.c.bf16 %v6573_v3, %v6573_v3 }
 0x815   : > { %6627 = vrot.lane.b32.xlu1 %v6589_v56, %s11074_s21 }
 0x817   : > { %5499 = vrot.lane.b32.xlu2 %v5463_v47, %s11074_s21 }
 0x818   : > { %7512 = vmatmul.bf16.gmra.mxu2 %v13398_v54  ;;  %v10793_v40 = vpop.eup %10792 }
 0x819   : > { %v4896_v7 = vmul.f32 %v10793_v40, %v14186_v52  ;;  %v6421_v36 = vpop.xlane.xlu1 %6420  ;;  %v10394_v40 = vld [vmem:[#allocation9 + $0x230] sm:$0xf0] }
 0x81a   : > { %10794 = vrcp.f32 %v6421_v36  ;;  %v13489_v17 = vpop.f32.mrf.mxu3  ;;  %v9904_v36 = vor.u32 %v10394_v40, %v9903_v51  ;;  %v9867_v40 = vld [vmem:[#allocation9 + $0x1e0] sm:$0xf] }
 0x81b   : > { %v4912_v53 = vpack.c.bf16 %v4896_v7, %v4896_v7 }
 0x81c   : > { %7425 = vmatpush.bf16.msra.mxu1 %v9904_v36  ;;  %v9855_v36 = vld [vmem:[#allocation9 + $0x1c8] sm:$0xf] }
 0x81d   : > { %4928 = vst.msk [vmem:[#allocation3 + $0x58] sm:$0xf] %vm3795_vm2, %v4912_v53  ;;  %v9891_v53 = vld [vmem:[#allocation9 + $0x210] sm:$0xf] }
 0x81e   : > { %v5873_v37 = vpop.xlane.xlu0 %5872 }
 0x81f   : > { %10796 = vrcp.f32 %v5873_v37  ;;  %v10391_v37 = vld [vmem:[#allocation9 + $0x218] sm:$0xf0] }
 0x820   : > { %v10795_v30 = vpop.eup %10794 }
 0x821   : > { %v13481_v0 = vmul.f32 %v10795_v30, %v6554_v16 }
 0x822   : > { %v13493_v16 = vpop.f32.mrf.mxu3 }
 0x825   : > { %v10797_v45 = vpop.eup %10796 }
 0x826   : > { %v6019_v3 = vmul.f32 %v10797_v45, %v5988_v33  ;;  %v13485_v61 = vpop.xlane.xlu0 %6416  ;;  %v9892_v33 = vor.u32 %v10391_v37, %v9891_v53  ;;  %v10382_v53 = vld [vmem:[#allocation9 + $0x1d0] sm:$0xf0] }
 0x827   : > { %v9856_v37 = vor.u32 %v10382_v53, %v9855_v36 }
 0x828   : > { %v6035_v13 = vpack.c.bf16 %v6019_v3, %v6019_v3  ;;  %7517 = vmatmul.bf16.gmra.mxu2 %v13417_v8  ;;  %7426 = vmatpush.bf16.msra.mxu1 %v9892_v33 }
 0x829   : > { %v6409_v56 = vpop.xlane.xlu2 %6408 }
 0x82a   : > { %6051 = vst.msk [vmem:[#allocation3 + $0x50] sm:$0xf] %vm3795_vm2, %v6035_v13  ;;  %10798 = vrcp.f32 %v6409_v56  ;;  %v10388_v13 = vld [vmem:[#allocation9 + $0x200] sm:$0xf0]  ;;  %v10303_v56 = vld [vmem:[#allocation3 + $0x1c] sm:$0xf] }
 0x82e   : > { %v6419_v27 = vpop.xlane.xlu0 %6418 }
 0x82f   : > { %10800 = vrcp.f32 %v6419_v27 }
 0x830   : > { %v10799_v47 = vpop.eup %10798  ;;  %10802 = vrcp.f32 %v13303_v43 }
 0x831   : > { %v6572_v52 = vmul.f32 %v10799_v47, %v13442_v31  ;;  %v5498_v7 = vpop.permute.xlu2 %5497  ;;  %v9879_v31 = vld [vmem:[#allocation9 + $0x1f8] sm:$0xf]  ;;  %10804 = vrcp.f32 %v13253_v38 }
 0x832   : > { %5542 = vst.msk [vmem:[#allocation3 + $0x28] sm:$0xf] %vm4414_vm0, %v5498_v7  ;;  %v9880_v47 = vor.u32 %v10388_v13, %v9879_v31  ;;  %v10385_v7 = vld [vmem:[#allocation9 + $0x1e8] sm:$0xf0]  ;;  %v14188_v13 = vld [vmem:[#allocation33_spill] sm:$0xff]  ;;  %10806 = vrcp.f32 %v13485_v61 }
 0x833   : > { %v6588_v45 = vpack.c.bf16 %v6572_v52, %v6572_v52  ;;  %v9868_v8 = vor.u32 %v10385_v7, %v9867_v40  ;;  %v13499_v52 = vpop.f32.mrf.mxu3  ;;  %v10373_v40 = vld [vmem:[#allocation9 + $0x188] sm:$0xf0] }
 0x834   : > { %7427 = vmatpush.bf16.msra.mxu1 %v9880_v47  ;;  %v9819_v47 = vld [vmem:[#allocation9 + $0x180] sm:$0xf] }
 0x835   : > { %v10801_v30 = vpop.eup %10800  ;;  %6625 = vrot.lane.b32.xlu0 %v6588_v45, %s11074_s21  ;;  %v10379_v45 = vld [vmem:[#allocation9 + $0x1b8] sm:$0xf0]  ;;  %v9820_v7 = vor.u32 %v10373_v40, %v9819_v47 }
 0x836   : > { %v13495_v3 = vmul.f32 %v10801_v30, %v6552_v62  ;;  %v13502_v62 = vpop.xlane.xlu0 %5300  ;;  %v9843_v30 = vld [vmem:[#allocation9 + $0x1b0] sm:$0xf]  ;;  %v10803_v53 = vpop.eup %10802 }
 0x837   : > { %v9844_v33 = vor.u32 %v10379_v45, %v9843_v30  ;;  %v10805_v45 = vpop.eup %10804 }
 0x838   : > { %7678 = vmatmul.bf16.vlgmr.msrb.gmra.mxu2 %v13453_v60  ;;  %v14187_v60 = vld [vmem:[#allocation20_spill] sm:$0xff]  ;;  %7428 = vmatpush.bf16.msra.mxu1 %v9868_v8  ;;  %v5450_v61 = vmul.f32 %v10805_v45, %v13341_v2 }
 0x839   : > { %v9545_v27 = vld [vmem:[#allocation3 + $0x24] sm:$0xf0] }
 0x83a   : > { %v9548_v51 = vor.u32 %v10303_v56, %v9545_v27  ;;  %v9831_v56 = vld [vmem:[#allocation9 + $0x198] sm:$0xf]  ;;  %v10376_v27 = vld [vmem:[#allocation9 + $0x1a0] sm:$0xf0] }
 0x83b   : > { %v13505_v31 = vpop.f32.mrf.mxu3  ;;  %v9832_v8 = vor.u32 %v10376_v27, %v9831_v56  ;;  %v10807_v56 = vpop.eup %10806  ;;  %v14189_v27 = vld [vmem:[#allocation34_spill] sm:$0xff] }
 0x83c   : > { %7389 = vmatmul.bf16.gmra.mxu0 %v9548_v51  ;;  %7536 = vmatmul.bf16.gmra.mxu3 %v9548_v51 }
 0x83d   : > { %7429 = vmatpush.bf16.msra.mxu1 %v9856_v37 }
 0x83f   : > { %5876 = vadd.xlane.f32.xlu1 %v13027_v10 }
 0x840   : > { %4748 = vadd.xlane.f32.xlu2 %v14187_v60 }
 0x841   : > { %7430 = vmatpush.bf16.msra.mxu1 %v9844_v33 }
 0x843   : > { %v13511_v60 = vpop.f32.mrf.mxu3 }
 0x845   : > { %7431 = vmatpush.bf16.msra.mxu1 %v9832_v8 }
 0x847   : > { %5304 = vadd.xlane.f32.xlu1 %v13135_v23  ;;  %v13516_v23 = vpop.f32.mrf.mxu2 }
 0x848   : > { %7683 = vmatmul.bf16.gmra.mxu2 %v9548_v51  ;;  %5874 = vadd.xlane.f32.xlu2 %v14188_v13  ;;  %v13518_v51 = vpop.xlane.xlu1 %5298 }
 0x849   : > { %v13509_v10 = vpop.permute.xlu0 %5503  ;;  %7432 = vmatpush.bf16.msra.mxu1 %v9820_v7  ;;  %v5466_v7 = vpack.c.bf16 %v5450_v61, %v5450_v61 }
 0x84b   : > { %v13524_v30 = vpop.f32.mrf.mxu3 }
 0x84f   : > { %v13526_v43 = vpop.f32.mrf.mxu2 }
 0x850   : > { %6422 = vadd.xlane.f32.xlu2 %v13377_v9  ;;  %v5451_v9 = vmul.f32 %v10803_v53, %v13347_v26  ;;  %v13528_v33 = vpop.xlane.xlu1 %6424  ;;  %v6576_v26 = vmul.f32 %v10807_v56, %v13468_v6 }
 0x851   : > { %v6616_v36 = vpop.permute.xlu0 %6615 }
 0x852   : > { %6663 = vst.msk [vmem:[#allocation3 + $0x8] sm:$0xf] %vm4414_vm0, %v6616_v36  ;;  %v5467_v13 = vpack.c.bf16 %v5451_v9, %v5451_v9  ;;  %v6592_v36 = vpack.c.bf16 %v6576_v26, %v6576_v26 }
 0x853   : > { %v13535_v8 = vpop.f32.mrf.mxu3 }
 0x857   : > { %v13537_v47 = vpop.f32.mrf.mxu2 }
 0x859   : > { %v6620_v37 = vpop.permute.xlu0 %6619  ;;  %v9539_v9 = vld [vmem:[#allocation3 + $0x8] sm:$0xf] }
 0x85a   : > { %6665 = vst.msk [vmem:[#allocation3 + $0x20] sm:$0xf] %vm4414_vm0, %v6620_v37 }
 0x85b   : > { %v13542_v37 = vpop.f32.mrf.mxu3 }
 0x85c   : > { %14190 = vst [vmem:[#allocation18_spill] sm:$0xff] %v13542_v37 }
 0x85f   : > { %4754 = vadd.xlane.f32.xlu0 %v14189_v27 }
 0x860   : > { %5507 = vrot.lane.b32.xlu1 %v5467_v13, %s11074_s21  ;;  %v13547_v13 = vpop.f32.mrf.mxu2 }
 0x861   : > { %v6622_v38 = vpop.permute.xlu0 %6621 }
 0x862   : > { %6666 = vst.msk [vmem:[#allocation3 + $0x2c] sm:$0xf] %vm4414_vm0, %v6622_v38 }
 0x863   : > { %v13551_v26 = vpop.f32.mrf.mxu3 }
 0x864   : > { %14191 = vst [vmem:[#allocation17_spill] sm:$0xff] %v13551_v26  ;;  %v9557_v26 = vld [vmem:[#allocation3 + $0x3c] sm:$0xf0] }
 0x866   : > { %v6618_v40 = vpop.permute.xlu1 %6617 }
 0x867   : > { %6664 = vst.msk [vmem:[#allocation3 + $0x14] sm:$0xf] %vm4414_vm0, %v6618_v40  ;;  %v13554_v40 = vld [vmem:[#allocation10] sm:$0x7] }
 0x868   : > { %5505 = vrot.lane.b32.xlu2 %v5466_v7, %s11074_s21  ;;  %6633 = vrot.lane.b32.xlu1 %v6592_v36, %s11074_s21  ;;  %v13557_v7 = vperm.slane %v13554_v40, 1  ;;  %v7483_v36 = vpop.f32.mrf.mxu2 }
 0x86a   : > { %v6413_v53 = vpop.xlane.xlu2 %6412 }
 0x86b   : > { %10808 = vrcp.f32 %v6413_v53 }
 0x86c   : > { %10810 = vrcp.f32 %v13338_v12 }
 0x86d   : > { %10812 = vrcp.f32 %v13294_v58 }
 0x86e   : > { %v6624_v2 = vpop.permute.xlu1 %6623  ;;  %v10302_v6 = vld [vmem:[#allocation3 + $0x10] sm:$0xf0] }
 0x86f   : > { %6667 = vst.msk [vmem:[#allocation3 + $0x38] sm:$0xf] %vm4414_vm0, %v6624_v2  ;;  %v13545_v45 = vor.u32 %v10302_v6, %v9539_v9  ;;  %v10305_v2 = vld [vmem:[#allocation3 + $0x28] sm:$0xf0]  ;;  %v7484_v9 = vadd.f32 %v7483_v36, %v13557_v7 }
 0x871   : > { %v10809_v56 = vpop.eup %10808  ;;  %7433 = vmatmul.bf16.vlgmr.msra.gmra.mxu1 %v13545_v45 }
 0x872   : > { %v6574_v27 = vmul.f32 %v10809_v56, %v13459_v39  ;;  %v6415_v38 = vpop.xlane.xlu2 %6414  ;;  %v9551_v39 = vld [vmem:[#allocation3 + $0x20] sm:$0xf] }
 0x873   : > { %10814 = vrcp.f32 %v6415_v38 }
 0x874   : > { %v6590_v61 = vpack.c.bf16 %v6574_v27, %v6574_v27  ;;  %v13563_v27 = vor.u32 %v10305_v2, %v9551_v39 }
 0x876   : > { %6629 = vrot.lane.b32.xlu0 %v6590_v61, %s11074_s21  ;;  %v9563_v12 = vld [vmem:[#allocation3 + $0x38] sm:$0xf] }
 0x87a   : > { %v5500_v53 = vpop.permute.xlu2 %5499 }
 0x87b   : > { %5543 = vst.msk [vmem:[#allocation3 + $0x34] sm:$0xf] %vm4414_vm0, %v5500_v53  ;;  %v5990_v53 = vpop.f32.mrf.mxu0 }
 0x87e   : > { %v7532_v6 = vpop.f32.mrf.mxu3 }
 0x87f   : > { %v13561_v56 = vadd.f32 %v7532_v6, %v7484_v9  ;;  %v13584_v9 = vpop.f32.mrf.mxu2 }
 0x880   : > { %14193 = vst [vmem:[#allocation29_spill] sm:$0xff] %v13584_v9 }
 0x881   : > { %7438 = vmatmul.bf16.gmra.mxu1 %v13563_v27 }
 0x882   : > { %v10306_v61 = vld [vmem:[#allocation3 + $0x34] sm:$0xf] }
 0x883   : > { %v9560_v37 = vor.u32 %v10306_v61, %v9557_v26  ;;  %v5993_v36 = vpop.f32.mrf.mxu0  ;;  %v10811_v26 = vpop.eup %10810 }
 0x885   : > { %7394 = vmatmul.bf16.gmra.mxu0 %v9560_v37  ;;  %7541 = vmatmul.bf16.gmra.mxu3 %v9560_v37 }
 0x886   : > { %7688 = vmatmul.bf16.gmra.mxu2 %v9560_v37  ;;  %v5454_v37 = vmul.f32 %v10811_v26, %v13373_v29  ;;  %v13591_v26 = vpop.f32.mrf.mxu3 }
 0x887   : > { %v6628_v54 = vpop.permute.xlu1 %6627 }
 0x888   : > { %6669 = vst.msk [vmem:[#allocation3 + $0x50] sm:$0xf] %vm4414_vm0, %v6628_v54 }
 0x88b   : > { %v13573_v2 = vpop.f32.mrf.mxu0 }
 0x891   : > { %4752 = vadd.xlane.f32.xlu2 %v14192_v48 }
 0x892   : > { %5880 = vadd.xlane.f32.xlu1 %v13062_v42  ;;  %v5470_v42 = vpack.c.bf16 %v5454_v37, %v5454_v37 }
 0x899   : > { %5878 = vadd.xlane.f32.xlu2 %v13023_v20  ;;  %v13580_v20 = vpop.f32.mrf.mxu0 }
 0x8a0   : > { %5302 = vadd.xlane.f32.xlu0 %v13148_v46  ;;  %v10813_v46 = vpop.eup %10812 }
 0x8a1   : > { %6426 = vadd.xlane.f32.xlu2 %v13394_v22  ;;  %v10815_v6 = vpop.eup %10814  ;;  %v13588_v39 = vpop.f32.mrf.mxu0 }
 0x8a2   : > { %v6575_v38 = vmul.f32 %v10815_v6, %v13463_v44 }
 0x8a7   : > { %v6626_v54 = vpop.permute.xlu0 %6625 }
 0x8a8   : > { %6428 = vadd.xlane.f32.xlu0 %v13396_v25  ;;  %6668 = vst.msk [vmem:[#allocation3 + $0x44] sm:$0xf] %vm4414_vm0, %v6626_v54  ;;  %v5452_v25 = vmul.f32 %v10813_v46, %v13355_v15 }
 0x8a9   : > { %v13599_v6 = vpop.f32.mrf.mxu0 }
 0x8aa   : > { %v5468_v61 = vpack.c.bf16 %v5452_v25, %v5452_v25 }
 0x8ab   : > { %5513 = vrot.lane.b32.xlu1 %v5470_v42, %s11074_s21 }
 0x8af   : > { %v10308_v48 = vld [vmem:[#allocation3 + $0x40] sm:$0xf0] }
 0x8b0   : > { %v13582_v22 = vor.u32 %v10308_v48, %v9563_v12  ;;  %v6591_v12 = vpack.c.bf16 %v6575_v38, %v6575_v38  ;;  %v14194_v48 = vld [vmem:[#allocation47_spill] sm:$0xff] }
 0x8b2   : > { %v5877_v29 = vpop.xlane.xlu1 %5876  ;;  %7443 = vmatmul.bf16.gmra.mxu1 %v13582_v22 }
 0x8b3   : > { %10816 = vrcp.f32 %v5877_v29  ;;  %v4749_v58 = vpop.xlane.xlu2 %4748  ;;  %v7488_v29 = vpop.f32.mrf.mxu2 }
 0x8b4   : > { %10818 = vrcp.f32 %v4749_v58  ;;  %v7489_v44 = vadd.f32 %v7488_v29, %v13557_v7  ;;  %v14196_v29 = vld [vmem:[#allocation46_spill] sm:$0xff] }
 0x8b9   : > { %v10817_v37 = vpop.eup %10816  ;;  %5509 = vrot.lane.b32.xlu2 %v5468_v61, %s11074_s21 }
 0x8ba   : > { %v10819_v54 = vpop.eup %10818  ;;  %v6021_v42 = vmul.f32 %v10817_v37, %v5993_v36 }
 0x8bb   : > { %v4895_v15 = vmul.f32 %v10819_v54, %v14194_v48  ;;  %v5875_v46 = vpop.xlane.xlu2 %5874 }
 0x8bc   : > { %v6037_v9 = vpack.c.bf16 %v6021_v42, %v6021_v42  ;;  %10820 = vrcp.f32 %v5875_v46  ;;  %6631 = vrot.lane.b32.xlu0 %v6591_v12, %s11074_s21 }
 0x8bd   : > { %v4911_v58 = vpack.c.bf16 %v4895_v15, %v4895_v15 }
 0x8be   : > { %6053 = vst.msk [vmem:[#allocation3 + $0x68] sm:$0xf] %vm3795_vm2, %v6037_v9  ;;  %v13608_v9 = vpop.f32.mrf.mxu0 }
 0x8bf   : > { %4927 = vst.msk [vmem:[#allocation3 + $0x4c] sm:$0xf] %vm3795_vm2, %v4911_v58  ;;  %v7537_v36 = vpop.f32.mrf.mxu3 }
 0x8c0   : > { %5545 = vst.msk [vmem:[#allocation3 + $0x4c] sm:$0xf] %vm4414_vm0, %v13509_v10  ;;  %v13603_v25 = vadd.f32 %v7537_v36, %v7489_v44 }
 0x8c2   : > { %14195 = vst [vmem:[#allocation27_spill] sm:$0xff] %v13603_v25  ;;  %v10821_v38 = vpop.eup %10820 }
 0x8c3   : > { %v6020_v61 = vmul.f32 %v10821_v38, %v5990_v53  ;;  %v13605_v37 = vpop.xlane.xlu2 %6422  ;;  %v14197_v38 = vld [vmem:[#allocation45_spill] sm:$0xff] }
 0x8c5   : > { %v6036_v54 = vpack.c.bf16 %v6020_v61, %v6020_v61 }
 0x8c6   : > { %v13611_v46 = vpop.f32.mrf.mxu0 }
 0x8c7   : > { %6052 = vst.msk [vmem:[#allocation3 + $0x5c] sm:$0xf] %vm3795_vm2, %v6036_v54  ;;  %v10309_v48 = vld [vmem:[#allocation3 + $0x4c] sm:$0xf]  ;;  %v13649_v25 = vpop.f32.mrf.mxu3 }
 0x8cb   : > { %v5506_v42 = vpop.permute.xlu2 %5505 }
 0x8cc   : > { %5546 = vst.msk [vmem:[#allocation3 + $0x58] sm:$0xf] %vm4414_vm0, %v5506_v42  ;;  %v14198_v42 = vld [vmem:[#allocation35_spill] sm:$0xff] }
 0x8ce   : > { %v13615_v36 = vpop.f32.mrf.mxu0 }
 0x8d2   : > { %v4755_v12 = vpop.xlane.xlu0 %4754 }
 0x8d3   : > { %v9569_v15 = vld [vmem:[#allocation3 + $0x54] sm:$0xf0]  ;;  %10822 = vrcp.f32 %v4755_v12  ;;  %v13622_v12 = vperm.slane %v13554_v40, 0  ;;  %v14199_v40 = vld [vmem:[#allocation28_spill] sm:$0xff] }
 0x8d4   : > { %v9572_v10 = vor.u32 %v10309_v48, %v9569_v15  ;;  %10824 = vrcp.f32 %v13502_v62  ;;  %v13630_v62 = vpop.xlane.xlu1 %5304 }
 0x8d5   : > { %4762 = vadd.xlane.f32.xlu1 %v14196_v29  ;;  %10826 = vrcp.f32 %v13327_v55 }
 0x8d6   : > { %7399 = vmatmul.bf16.gmra.mxu0 %v9572_v10  ;;  %7546 = vmatmul.bf16.gmra.mxu3 %v9572_v10  ;;  %v7385_v54 = vpop.f32.mrf.mxu0 }
 0x8d7   : > { %7693 = vmatmul.bf16.gmra.mxu2 %v9572_v10 }
 0x8d9   : > { %v10823_v53 = vpop.eup %10822 }
 0x8da   : > { %v4898_v58 = vmul.f32 %v10823_v53, %v13025_v11  ;;  %v10825_v61 = vpop.eup %10824  ;;  %v7337_v11 = vadd.f32 %v13440_v59, %v13622_v12  ;;  %v7339_v59 = vadd.f32 %v13448_v5, %v13622_v12 }
 0x8db   : > { %v5456_v48 = vmul.f32 %v10825_v61, %v13390_v24  ;;  %v10827_v61 = vpop.eup %10826 }
 0x8dc   : > { %v4914_v44 = vpack.c.bf16 %v4898_v58, %v4898_v58  ;;  %v7386_v29 = vadd.f32 %v7385_v54, %v7337_v11  ;;  %v5508_v54 = vpop.permute.xlu1 %5507 }
 0x8dd   : > { %v5472_v10 = vpack.c.bf16 %v5456_v48, %v5456_v48 }
 0x8de   : > { %4930 = vst.msk [vmem:[#allocation3 + $0x70] sm:$0xf] %vm3795_vm2, %v4914_v44  ;;  %v7387_v24 = vpop.f32.mrf.mxu0  ;;  %v9575_v44 = vld [vmem:[#allocation3 + $0x50] sm:$0xf] }
 0x8df   : > { %v7388_v48 = vadd.f32 %v7387_v24, %v7339_v59  ;;  %v6593_v24 = vpack.c.bf16 %v13495_v3, %v13495_v3 }
 0x8e2   : > { %4758 = vadd.xlane.f32.xlu2 %v14197_v38 }
 0x8e6   : > { %4756 = vadd.xlane.f32.xlu0 %v14198_v42  ;;  %v5453_v42 = vmul.f32 %v10827_v61, %v13364_v28  ;;  %v6594_v28 = vpack.c.bf16 %v13481_v0, %v13481_v0 }
 0x8e8   : > { %v6630_v15 = vpop.permute.xlu0 %6629 }
 0x8e9   : > { %6670 = vst.msk [vmem:[#allocation3 + $0x5c] sm:$0xf] %vm4414_vm0, %v6630_v15 }
 0x8ee   : > { %5517 = vrot.lane.b32.xlu1 %v5472_v10, %s11074_s21  ;;  %v7434_v53 = vpop.f32.mrf.mxu1  ;;  %5882 = vadd.xlane.f32.xlu0 %v14199_v40  ;;  %v7390_v10 = vpop.f32.mrf.mxu0  ;;  %v7342_v40 = vadd.f32 %v13457_v34, %v13622_v12  ;;  %v7344_v34 = vadd.f32 %v13465_v35, %v13622_v12 }
 0x8ef   : > { %v7435_v58 = vadd.f32 %v7434_v53, %v7386_v29  ;;  %v5469_v29 = vpack.c.bf16 %v5453_v42, %v5453_v42  ;;  %v13644_v53 = vpop.f32.mrf.mxu2 }
 0x8f0   : > { %v10311_v38 = vld [vmem:[#allocation3 + $0x58] sm:$0xf0]  ;;  %v7391_v5 = vadd.f32 %v7390_v10, %v7342_v40 }
 0x8f1   : > { %7768 = vst [vmem:[%s13634_s13] sm:$0xff] %v7435_v58  ;;  %v13637_v55 = vor.u32 %v10311_v38, %v9575_v44  ;;  %v6634_v58 = vpop.permute.xlu1 %6633 }
 0x8f3   : > { %7448 = vmatmul.bf16.gmra.mxu1 %v13637_v55 }
 0x8f6   : > { %v7436_v15 = vpop.f32.mrf.mxu1  ;;  %v7392_v61 = vpop.f32.mrf.mxu0 }
 0x8f7   : > { %v7437_v11 = vadd.f32 %v7436_v15, %v7388_v48  ;;  %v7493_v59 = vpop.f32.mrf.mxu2  ;;  %v7393_v48 = vadd.f32 %v7392_v61, %v7344_v34 }
 0x8f9   : > { %7771 = vst [vmem:[%s13634_s13 + $0x18] sm:$0xff] %v7437_v11  ;;  %v7494_v11 = vadd.f32 %v7493_v59, %v13557_v7 }
 0x8fa   : > { %5511 = vrot.lane.b32.xlu2 %v5469_v29, %s11074_s21 }
 0x8fe   : > { %v7439_v44 = vpop.f32.mrf.mxu1 }
 0x8ff   : > { %v7440_v38 = vadd.f32 %v7439_v44, %v7391_v5  ;;  %v14200_v44 = vld [vmem:[#allocation30_spill] sm:$0xff] }
 0x901   : > { %7774 = vst [vmem:[%s13634_s13 + $0x30] sm:$0xff] %v7440_v38 }
 0x902   : > { %6637 = vrot.lane.b32.xlu2 %v6594_v28, %s11074_s21  ;;  %6635 = vrot.lane.b32.xlu0 %v6593_v24, %s11074_s21 }
 0x904   : > { %v4753_v42 = vpop.xlane.xlu2 %4752 }
 0x905   : > { %10828 = vrcp.f32 %v4753_v42  ;;  %v5881_v15 = vpop.xlane.xlu1 %5880 }
 0x906   : > { %10830 = vrcp.f32 %v5881_v15  ;;  %v7441_v0 = vpop.f32.mrf.mxu1  ;;  %v14201_v15 = vld [vmem:[#allocation38_spill] sm:$0xff] }
 0x907   : > { %v7442_v3 = vadd.f32 %v7441_v0, %v7393_v48 }
 0x908   : > { %v7542_v10 = vpop.f32.mrf.mxu3 }
 0x909   : > { %7777 = vst [vmem:[%s13634_s13 + $0x48] sm:$0xff] %v7442_v3  ;;  %v13662_v29 = vadd.f32 %v7542_v10, %v7494_v11 }
 0x90b   : > { %v10829_v40 = vpop.eup %10828 }
 0x90c   : > { %v10831_v5 = vpop.eup %10830  ;;  %v4897_v38 = vmul.f32 %v10829_v40, %v14200_v44  ;;  %v5879_v28 = vpop.xlane.xlu2 %5878  ;;  %v7347_v44 = vadd.f32 %v13470_v21, %v13622_v12  ;;  %v7349_v21 = vadd.f32 %v13478_v32, %v13622_v12 }
 0x90d   : > { %v6023_v35 = vmul.f32 %v10831_v5, %v13580_v20  ;;  %10832 = vrcp.f32 %v5879_v28  ;;  %v7395_v40 = vpop.f32.mrf.mxu0 }
 0x90e   : > { %v4913_v24 = vpack.c.bf16 %v4897_v38, %v4897_v38  ;;  %v7396_v28 = vadd.f32 %v7395_v40, %v7347_v44 }
 0x90f   : > { %v6039_v61 = vpack.c.bf16 %v6023_v35, %v6023_v35 }
 0x910   : > { %4929 = vst.msk [vmem:[#allocation3 + $0x64] sm:$0xf] %vm3795_vm2, %v4913_v24 }
 0x911   : > { %5547 = vst.msk [vmem:[#allocation3 + $0x64] sm:$0xf] %vm4414_vm0, %v5508_v54 }
 0x912   : > { %6055 = vst.msk [vmem:[#allocation3 + $0x80] sm:$0xf] %vm3795_vm2, %v6039_v61 }
 0x913   : > { %v10833_v34 = vpop.eup %10832  ;;  %v5303_v20 = vpop.xlane.xlu0 %5302 }
 0x914   : > { %v6022_v59 = vmul.f32 %v10833_v34, %v13573_v2  ;;  %v13670_v42 = vpop.xlane.xlu2 %6426  ;;  %10834 = vrcp.f32 %v5303_v20 }
 0x916   : > { %v6038_v48 = vpack.c.bf16 %v6022_v59, %v6022_v59 }
 0x918   : > { %6054 = vst.msk [vmem:[#allocation3 + $0x74] sm:$0xf] %vm3795_vm2, %v6038_v48  ;;  %4766 = vadd.xlane.f32.xlu1 %v14201_v15  ;;  %v10312_v54 = vld [vmem:[#allocation3 + $0x64] sm:$0xf] }
 0x919   : > { %6672 = vst.msk [vmem:[#allocation3 + $0x74] sm:$0xf] %vm4414_vm0, %v6634_v58  ;;  %v14202_v58 = vld [vmem:[#allocation41_spill] sm:$0xff] }
 0x91a   : > { %v10835_v2 = vpop.eup %10834 }
 0x91b   : > { %v6429_v10 = vpop.xlane.xlu0 %6428  ;;  %v5457_v5 = vmul.f32 %v10835_v2, %v13402_v18  ;;  %v14203_v18 = vld [vmem:[#allocation44_spill] sm:$0xff] }
 0x91c   : > { %v5510_v0 = vpop.permute.xlu2 %5509  ;;  %10836 = vrcp.f32 %v6429_v10 }
 0x91d   : > { %5548 = vst.msk [vmem:[#allocation3 + $0x70] sm:$0xf] %vm4414_vm0, %v5510_v0  ;;  %v5473_v35 = vpack.c.bf16 %v5457_v5, %v5457_v5  ;;  %10838 = vrcp.f32 %v13518_v51  ;;  %v5514_v10 = vpop.permute.xlu1 %5513 }
 0x91e   : > { %10840 = vrcp.f32 %v13605_v37 }
 0x91f   : > { %10842 = vrcp.f32 %v13528_v33  ;;  %v14204_v33 = vld [vmem:[#allocation24_spill] sm:$0xff] }
 0x920   : > { %v10314_v15 = vld [vmem:[#allocation3 + $0x70] sm:$0xf0] }
 0x922   : > { %v10837_v24 = vpop.eup %10836 }
 0x923   : > { %v6582_v59 = vmul.f32 %v10837_v24, %v13547_v13  ;;  %v10839_v51 = vpop.eup %10838  ;;  %v13705_v24 = vpop.f32.mrf.mxu3 }
 0x924   : > { %v9581_v11 = vld [vmem:[#allocation3 + $0x6c] sm:$0xf0]  ;;  %v5455_v32 = vmul.f32 %v10839_v51, %v13380_v50 }
 0x925   : > { %v9584_v3 = vor.u32 %v10312_v54, %v9581_v11  ;;  %v6598_v0 = vpack.c.bf16 %v6582_v59, %v6582_v59 }
 0x926   : > { %v5471_v2 = vpack.c.bf16 %v5455_v32, %v5455_v32 }
 0x927   : > { %7404 = vmatmul.bf16.gmra.mxu0 %v9584_v3  ;;  %7551 = vmatmul.bf16.gmra.mxu3 %v9584_v3 }
 0x928   : > { %7698 = vmatmul.bf16.gmra.mxu2 %v9584_v3  ;;  %v10841_v3 = vpop.eup %10840 }
 0x929   : > { %v10843_v40 = vpop.eup %10842  ;;  %v6579_v5 = vmul.f32 %v10841_v3, %v13516_v23 }
 0x92a   : > { %v6580_v37 = vmul.f32 %v10843_v40, %v13526_v43 }
 0x92b   : > { %5884 = vadd.xlane.f32.xlu2 %v13106_v57  ;;  %v7397_v57 = vpop.f32.mrf.mxu0 }
 0x92c   : > { %4760 = vadd.xlane.f32.xlu0 %v14202_v58  ;;  %v7398_v20 = vadd.f32 %v7397_v57, %v7349_v21  ;;  %v6595_v58 = vpack.c.bf16 %v6579_v5, %v6579_v5 }
 0x92e   : > { %v6632_v38 = vpop.permute.xlu0 %6631 }
 0x92f   : > { %6671 = vst.msk [vmem:[#allocation3 + $0x68] sm:$0xf] %vm4414_vm0, %v6632_v38  ;;  %v7444_v61 = vpop.f32.mrf.mxu1  ;;  %v6596_v38 = vpack.c.bf16 %v6580_v37, %v6580_v37 }
 0x930   : > { %v7445_v34 = vadd.f32 %v7444_v61, %v7396_v28  ;;  %v13701_v28 = vpop.f32.mrf.mxu2 }
 0x931   : > { %5519 = vrot.lane.b32.xlu1 %v5473_v35, %s11074_s21 }
 0x932   : > { %7780 = vst [vmem:[%s13634_s13 + $0x60] sm:$0xff] %v7445_v34 }
 0x934   : > { %5886 = vadd.xlane.f32.xlu0 %v14203_v18 }
 0x936   : > { %v9587_v48 = vld [vmem:[#allocation3 + $0x68] sm:$0xf] }
 0x937   : > { %v13689_v54 = vor.u32 %v10314_v15, %v9587_v48  ;;  %v7446_v11 = vpop.f32.mrf.mxu1  ;;  %v14205_v48 = vld [vmem:[#allocation21_spill] sm:$0xff] }
 0x938   : > { %v7447_v13 = vadd.f32 %v7446_v11, %v7398_v20  ;;  %v7498_v61 = vpop.f32.mrf.mxu2 }
 0x939   : > { %6645 = vrot.lane.b32.xlu1 %v6598_v0, %s11074_s21  ;;  %7453 = vmatmul.bf16.gmra.mxu1 %v13689_v54  ;;  %v7499_v34 = vadd.f32 %v7498_v61, %v13557_v7 }
 0x93a   : > { %7783 = vst [vmem:[%s13634_s13 + $0x78] sm:$0xff] %v7447_v13  ;;  %v14206_v13 = vld [vmem:[#allocation32_spill] sm:$0xff] }
 0x943   : > { %5515 = vrot.lane.b32.xlu2 %v5471_v2, %s11074_s21 }
 0x948   : > { %v4763_v44 = vpop.xlane.xlu1 %4762  ;;  %6639 = vrot.lane.b32.xlu0 %v6595_v58, %s11074_s21 }
 0x949   : > { %10844 = vrcp.f32 %v4763_v44  ;;  %v7352_v44 = vadd.f32 %v13483_v4, %v13622_v12 }
 0x94b   : > { %6641 = vrot.lane.b32.xlu2 %v6596_v38, %s11074_s21 }
 0x94f   : > { %v10845_v50 = vpop.eup %10844 }
 0x950   : > { %v4902_v35 = vmul.f32 %v10845_v50, %v14204_v33 }
 0x952   : > { %v4918_v23 = vpack.c.bf16 %v4902_v35, %v4902_v35 }
 0x953   : > { %v7400_v37 = vpop.f32.mrf.mxu0 }
 0x954   : > { %4934 = vst.msk [vmem:[#allocation3 + $0xa0] sm:$0xf] %vm3795_vm2, %v4918_v23  ;;  %v7401_v35 = vadd.f32 %v7400_v37, %v7352_v44 }
 0x955   : > { %v4759_v43 = vpop.xlane.xlu2 %4758 }
 0x956   : > { %10846 = vrcp.f32 %v4759_v43 }
 0x959   : > { %v4757_v59 = vpop.xlane.xlu0 %4756  ;;  %v7547_v57 = vpop.f32.mrf.mxu3 }
 0x95a   : > { %10848 = vrcp.f32 %v4757_v59  ;;  %v13709_v18 = vadd.f32 %v7547_v57, %v7499_v34  ;;  %v14208_v34 = vld [vmem:[#allocation40_spill] sm:$0xff]  ;;  %v7354_v59 = vadd.f32 %v13489_v17, %v13622_v12 }
 0x95b   : > { %v7402_v43 = vpop.f32.mrf.mxu0 }
 0x95c   : > { %v10847_v21 = vpop.eup %10846  ;;  %v7403_v57 = vadd.f32 %v7402_v43, %v7354_v59 }
 0x95d   : > { %v4900_v15 = vmul.f32 %v10847_v21, %v14205_v48  ;;  %v5512_v2 = vpop.permute.xlu2 %5511  ;;  %v9911_v21 = vld [vmem:[#allocation9 + $0x230] sm:$0xf]  ;;  %v10395_v48 = vld [vmem:[#allocation9 + $0x238] sm:$0xf0] }
 0x95f   : > { %v4916_v20 = vpack.c.bf16 %v4900_v15, %v4900_v15  ;;  %v9719_v15 = vld [vmem:[#allocation9 + $0xb0] sm:$0xf] }
 0x960   : > { %v10849_v0 = vpop.eup %10848  ;;  %v5518_v11 = vpop.permute.xlu1 %5517 }
 0x961   : > { %4932 = vst.msk [vmem:[#allocation3 + $0x88] sm:$0xf] %vm3795_vm2, %v4916_v20  ;;  %v4899_v51 = vmul.f32 %v10849_v0, %v14206_v13  ;;  %v5883_v32 = vpop.xlane.xlu0 %5882  ;;  %v9912_v0 = vor.u32 %v10395_v48, %v9911_v21  ;;  %v9887_v48 = vld [vmem:[#allocation9 + $0x200] sm:$0xf] }
 0x962   : > { %5550 = vst.msk [vmem:[#allocation3 + $0x88] sm:$0xf] %vm4414_vm0, %v5514_v10  ;;  %10850 = vrcp.f32 %v5883_v32  ;;  %v14209_v32 = vld [vmem:[#allocation37_spill] sm:$0xff] }
 0x963   : > { %v4915_v3 = vpack.c.bf16 %v4899_v51, %v4899_v51  ;;  %5552 = vst.msk [vmem:[#allocation3 + $0xa0] sm:$0xf] %vm4414_vm0, %v5518_v11  ;;  %v10347_v11 = vld [vmem:[#allocation9 + $0xb8] sm:$0xf0]  ;;  %7719 = vmatpush.bf16.msrb.mxu3 %v9912_v0  ;;  %10852 = vrcp.f32 %v13630_v62 }
 0x964   : > { %v9720_v51 = vor.u32 %v10347_v11, %v9719_v15  ;;  %10854 = vrcp.f32 %v13670_v42  ;;  %v10389_v15 = vld [vmem:[#allocation9 + $0x208] sm:$0xf0]  ;;  %v9695_v11 = vld [vmem:[#allocation9 + $0x80] sm:$0xf] }
 0x965   : > { %4931 = vst.msk [vmem:[#allocation3 + $0x7c] sm:$0xf] %vm3795_vm2, %v4915_v3  ;;  %v6638_v10 = vpop.permute.xlu2 %6637  ;;  %v9888_v0 = vor.u32 %v10389_v15, %v9887_v48 }
 0x966   : > { %5549 = vst.msk [vmem:[#allocation3 + $0x7c] sm:$0xf] %vm4414_vm0, %v5512_v2  ;;  %7621 = vmatpush.bf16.msrb.mxu1 %v9720_v51 }
 0x968   : > { %v10851_v40 = vpop.eup %10850 }
 0x969   : > { %v6024_v5 = vmul.f32 %v10851_v40, %v13588_v39  ;;  %v9593_v50 = vld [vmem:[#allocation3 + $0x84] sm:$0xf0]  ;;  %v14207_v39 = vld [vmem:[#allocation39_spill] sm:$0xff]  ;;  %v10853_v40 = vpop.eup %10852 }
 0x96a   : > { %v5458_v37 = vmul.f32 %v10853_v40, %v13411_v14  ;;  %v9707_v14 = vld [vmem:[#allocation9 + $0x98] sm:$0xf]  ;;  %v9881_v40 = vld [vmem:[#allocation9 + $0x204] sm:$0xf0] }
 0x96b   : > { %v6040_v58 = vpack.c.bf16 %v6024_v5, %v6024_v5  ;;  %v10855_v5 = vpop.eup %10854 }
 0x96c   : > { %v5474_v44 = vpack.c.bf16 %v5458_v37, %v5458_v37 }
 0x96d   : > { %6056 = vst.msk [vmem:[#allocation3 + $0x8c] sm:$0xf] %vm3795_vm2, %v6040_v58  ;;  %v10315_v38 = vld [vmem:[#allocation3 + $0x7c] sm:$0xf]  ;;  %v6581_v58 = vmul.f32 %v10855_v5, %v13537_v47  ;;  %v10344_v47 = vld [vmem:[#allocation9 + $0xa0] sm:$0xf0]  ;;  %v13744_v5 = vpop.f32.mrf.mxu3 }
 0x96e   : > { %6674 = vst.msk [vmem:[#allocation3 + $0x8c] sm:$0xf] %vm4414_vm0, %v6638_v10  ;;  %v9596_v33 = vor.u32 %v10315_v38, %v9593_v50  ;;  %v10393_v10 = vld [vmem:[#allocation9 + $0x22c] sm:$0xf]  ;;  %v9905_v38 = vld [vmem:[#allocation9 + $0x234] sm:$0xf0] }
 0x96f   : > { %v6597_v62 = vpack.c.bf16 %v6581_v58, %v6581_v58 }
 0x970   : > { %7409 = vmatmul.bf16.gmra.mxu0 %v9596_v33  ;;  %v7449_v23 = vpop.f32.mrf.mxu1  ;;  %7556 = vmatmul.bf16.gmra.mxu3 %v9596_v33 }
 0x971   : > { %v7450_v61 = vadd.f32 %v7449_v23, %v7401_v35  ;;  %7703 = vmatmul.bf16.gmra.mxu2 %v9596_v33  ;;  %v9908_v33 = vor.u32 %v10393_v10, %v9905_v38  ;;  %v14210_v35 = vld [vmem:[#allocation22_spill] sm:$0xff]  ;;  %v9875_v10 = vld [vmem:[#allocation9 + $0x1e8] sm:$0xf]  ;;  %v10386_v38 = vld [vmem:[#allocation9 + $0x1f0] sm:$0xf0] }
 0x972   : > { %4764 = vadd.xlane.f32.xlu0 %v14207_v39  ;;  %v10392_v39 = vld [vmem:[#allocation9 + $0x220] sm:$0xf0] }
 0x973   : > { %7786 = vst [vmem:[%s13634_s13 + $0x90] sm:$0xff] %v7450_v61  ;;  %7572 = vmatpush.bf16.msrb.mxu0 %v9908_v33  ;;  %v9899_v61 = vld [vmem:[#allocation9 + $0x218] sm:$0xf] }
 0x974   : > { %5888 = vadd.xlane.f32.xlu2 %v14208_v34  ;;  %v6636_v4 = vpop.permute.xlu0 %6635  ;;  %v9900_v43 = vor.u32 %v10392_v39, %v9899_v61  ;;  %v10390_v34 = vld [vmem:[#allocation9 + $0x214] sm:$0xf]  ;;  %v9869_v61 = vld [vmem:[#allocation9 + $0x1ec] sm:$0xf0] }
 0x975   : > { %6673 = vst.msk [vmem:[#allocation3 + $0x80] sm:$0xf] %vm4414_vm0, %v6636_v4  ;;  %v10317_v2 = vld [vmem:[#allocation3 + $0x88] sm:$0xf0]  ;;  %v9893_v4 = vld [vmem:[#allocation9 + $0x21c] sm:$0xf0] }
 0x976   : > { %v9896_v21 = vor.u32 %v10390_v34, %v9893_v4  ;;  %7720 = vmatpush.bf16.msrb.mxu3 %v9900_v43  ;;  %v14211_v39 = vld [vmem:[#allocation23_spill] sm:$0xff]  ;;  %v9863_v4 = vld [vmem:[#allocation9 + $0x1d0] sm:$0xf] }
 0x978   : > { %v7451_v20 = vpop.f32.mrf.mxu1  ;;  %7573 = vmatpush.bf16.msrb.mxu0 %v9896_v21 }
 0x979   : > { %v7452_v13 = vadd.f32 %v7451_v20, %v7403_v57  ;;  %v9708_v57 = vor.u32 %v10344_v47, %v9707_v14  ;;  %v13742_v20 = vpop.f32.mrf.mxu2 }
 0x97a   : > { %5890 = vadd.xlane.f32.xlu0 %v14209_v32  ;;  %7721 = vmatpush.bf16.msrb.mxu3 %v9888_v0  ;;  %v10335_v0 = vld [vmem:[#allocation9 + $0x58] sm:$0xf0] }
 0x97b   : > { %7789 = vst [vmem:[%s13634_s13 + $0xa8] sm:$0xff] %v7452_v13  ;;  %7622 = vmatpush.bf16.msrb.mxu1 %v9708_v57  ;;  %v10341_v13 = vld [vmem:[#allocation9 + $0x88] sm:$0xf0]  ;;  %v9671_v57 = vld [vmem:[#allocation9 + $0x50] sm:$0xf] }
 0x97c   : > { %v9599_v3 = vld [vmem:[#allocation3 + $0x80] sm:$0xf]  ;;  %v9696_v51 = vor.u32 %v10341_v13, %v9695_v11  ;;  %v9857_v11 = vld [vmem:[#allocation9 + $0x1d4] sm:$0xf0] }
 0x97d   : > { %v13732_v17 = vor.u32 %v10317_v2, %v9599_v3  ;;  %v10387_v2 = vld [vmem:[#allocation9 + $0x1fc] sm:$0xf] }
 0x97e   : > { %v9884_v37 = vor.u32 %v10387_v2, %v9881_v40 }
 0x97f   : > { %7458 = vmatmul.bf16.gmra.mxu1 %v13732_v17 }
 0x980   : > { %7623 = vmatpush.bf16.msrb.mxu1 %v9696_v51  ;;  %7574 = vmatpush.bf16.msrb.mxu0 %v9884_v37 }
 0x981   : > { %v7503_v58 = vpop.f32.mrf.mxu2 }
 0x982   : > { %v7504_v21 = vadd.f32 %v7503_v58, %v13557_v7 }
 0x989   : > { %v7505_v58 = vpop.f32.mrf.mxu2 }
 0x98b   : > { %v4767_v50 = vpop.xlane.xlu1 %4766 }
 0x98c   : > { %10856 = vrcp.f32 %v4767_v50  ;;  %5521 = vrot.lane.b32.xlu2 %v5474_v44, %s11074_s21  ;;  %v9683_v50 = vld [vmem:[#allocation9 + $0x68] sm:$0xf] }
 0x98e   : > { %6643 = vrot.lane.b32.xlu0 %v6597_v62, %s11074_s21 }
 0x992   : > { %v10857_v42 = vpop.eup %10856 }
 0x993   : > { %v4904_v23 = vmul.f32 %v10857_v42, %v14210_v35  ;;  %v9876_v42 = vor.u32 %v10386_v38, %v9875_v10  ;;  %v10338_v35 = vld [vmem:[#allocation9 + $0x70] sm:$0xf0]  ;;  %v7506_v38 = vadd.f32 %v7505_v58, %v13557_v7  ;;  %v10377_v58 = vld [vmem:[#allocation9 + $0x1a8] sm:$0xf0] }
 0x994   : > { %v9684_v47 = vor.u32 %v10338_v35, %v9683_v50 }
 0x995   : > { %v4920_v59 = vpack.c.bf16 %v4904_v23, %v4904_v23  ;;  %v10384_v23 = vld [vmem:[#allocation9 + $0x1e4] sm:$0xf]  ;;  %7722 = vmatpush.bf16.msrb.mxu3 %v9876_v42 }
 0x996   : > { %v9872_v34 = vor.u32 %v10384_v23, %v9869_v61  ;;  %7624 = vmatpush.bf16.msrb.mxu1 %v9684_v47  ;;  %v9605_v61 = vld [vmem:[#allocation3 + $0x9c] sm:$0xf0] }
 0x997   : > { %4936 = vst.msk [vmem:[#allocation3 + $0xb8] sm:$0xf] %vm3795_vm2, %v4920_v59  ;;  %v10383_v59 = vld [vmem:[#allocation9 + $0x1d8] sm:$0xf0] }
 0x998   : > { %v9864_v15 = vor.u32 %v10383_v59, %v9863_v4  ;;  %7575 = vmatpush.bf16.msrb.mxu0 %v9872_v34  ;;  %v7359_v34 = vadd.f32 %v13499_v52, %v13622_v12  ;;  %v10378_v52 = vld [vmem:[#allocation9 + $0x1b4] sm:$0xf] }
 0x99a   : > { %7723 = vmatpush.bf16.msrb.mxu3 %v9864_v15 }
 0x99e   : > { %v5885_v32 = vpop.xlane.xlu2 %5884 }
 0x99f   : > { %10858 = vrcp.f32 %v5885_v32  ;;  %v4761_v3 = vpop.xlane.xlu0 %4760  ;;  %v9672_v32 = vor.u32 %v10335_v0, %v9671_v57  ;;  %v9851_v0 = vld [vmem:[#allocation9 + $0x1b8] sm:$0xf] }
 0x9a0   : > { %10860 = vrcp.f32 %v4761_v3 }
 0x9a1   : > { %7625 = vmatpush.bf16.msrb.mxu1 %v9672_v32 }
 0x9a4   : > { %v7405_v10 = vpop.f32.mrf.mxu0 }
 0x9a5   : > { %v10859_v44 = vpop.eup %10858 }
 0x9a6   : > { %v10861_v33 = vpop.eup %10860  ;;  %v6025_v62 = vmul.f32 %v10859_v44, %v13599_v6  ;;  %v10381_v6 = vld [vmem:[#allocation9 + $0x1cc] sm:$0xf]  ;;  %v5516_v51 = vpop.permute.xlu2 %5515 }
 0x9a7   : > { %v4901_v14 = vmul.f32 %v10861_v33, %v14211_v39  ;;  %v5887_v43 = vpop.xlane.xlu0 %5886  ;;  %v9860_v3 = vor.u32 %v10381_v6, %v9857_v11  ;;  %v10380_v6 = vld [vmem:[#allocation9 + $0x1c0] sm:$0xf0]  ;;  %v9659_v11 = vld [vmem:[#allocation9 + $0x38] sm:$0xf] }
 0x9a8   : > { %v6041_v48 = vpack.c.bf16 %v6025_v62, %v6025_v62  ;;  %10862 = vrcp.f32 %v5887_v43  ;;  %v7357_v62 = vadd.f32 %v13493_v16, %v13622_v12 }
 0x9a9   : > { %v4917_v13 = vpack.c.bf16 %v4901_v14, %v4901_v14  ;;  %7576 = vmatpush.bf16.msrb.mxu0 %v9860_v3  ;;  %v9845_v3 = vld [vmem:[#allocation9 + $0x1bc] sm:$0xf0] }
 0x9aa   : > { %6057 = vst.msk [vmem:[#allocation3 + $0x98] sm:$0xf] %vm3795_vm2, %v6041_v48  ;;  %v7552_v2 = vpop.f32.mrf.mxu3  ;;  %v7406_v39 = vadd.f32 %v7405_v10, %v7357_v62  ;;  %v9647_v10 = vld [vmem:[#allocation9 + $0x20] sm:$0xf]  ;;  %v9833_v62 = vld [vmem:[#allocation9 + $0x1a4] sm:$0xf0] }
 0x9ab   : > { %4933 = vst.msk [vmem:[#allocation3 + $0x94] sm:$0xf] %vm3795_vm2, %v4917_v13  ;;  %v13751_v40 = vadd.f32 %v7552_v2, %v7504_v21  ;;  %v9852_v13 = vor.u32 %v10380_v6, %v9851_v0  ;;  %v9839_v2 = vld [vmem:[#allocation9 + $0x1a0] sm:$0xf] }
 0x9ac   : > { %5551 = vst.msk [vmem:[#allocation3 + $0x94] sm:$0xf] %vm4414_vm0, %v5516_v51  ;;  %v7407_v47 = vpop.f32.mrf.mxu0  ;;  %v10332_v51 = vld [vmem:[#allocation9 + $0x40] sm:$0xf0] }
 0x9ad   : > { %v7408_v4 = vadd.f32 %v7407_v47, %v7359_v34  ;;  %v9660_v32 = vor.u32 %v10332_v51, %v9659_v11  ;;  %7724 = vmatpush.bf16.msrb.mxu3 %v9852_v13  ;;  %v10374_v47 = vld [vmem:[#allocation9 + $0x190] sm:$0xf0]  ;;  %v9635_v34 = vld [vmem:[#allocation9 + $0x8] sm:$0xf]  ;;  %v5520_v13 = vpop.permute.xlu1 %5519 }
 0x9ae   : > { %v10863_v37 = vpop.eup %10862  ;;  %v6642_v42 = vpop.permute.xlu2 %6641 }
 0x9af   : > { %v6026_v44 = vmul.f32 %v10863_v37, %v13608_v9  ;;  %7626 = vmatpush.bf16.msrb.mxu1 %v9660_v32  ;;  %v9848_v37 = vor.u32 %v10378_v52, %v9845_v3 }
 0x9b1   : > { %v6042_v50 = vpack.c.bf16 %v6026_v44, %v6026_v44  ;;  %v9840_v44 = vor.u32 %v10377_v58, %v9839_v2  ;;  %7577 = vmatpush.bf16.msrb.mxu0 %v9848_v37 }
 0x9b2   : > { %v7554_v33 = vpop.f32.mrf.mxu3 }
 0x9b3   : > { %6058 = vst.msk [vmem:[#allocation3 + $0xa4] sm:$0xf] %vm3795_vm2, %v6042_v50  ;;  %v13759_v35 = vadd.f32 %v7554_v33, %v7506_v38  ;;  %v10318_v23 = vld [vmem:[#allocation3 + $0x94] sm:$0xf]  ;;  %v10329_v38 = vld [vmem:[#allocation9 + $0x28] sm:$0xf0]  ;;  %7725 = vmatpush.bf16.msrb.mxu3 %v9840_v44 }
 0x9b4   : > { %6676 = vst.msk [vmem:[#allocation3 + $0xa4] sm:$0xf] %vm4414_vm0, %v6642_v42  ;;  %v9608_v9 = vor.u32 %v10318_v23, %v9605_v61  ;;  %v9648_v50 = vor.u32 %v10329_v38, %v9647_v10  ;;  %v10375_v33 = vld [vmem:[#allocation9 + $0x19c] sm:$0xf] }
 0x9b5   : > { %v9836_v42 = vor.u32 %v10375_v33, %v9833_v62  ;;  %v7362_v33 = vadd.f32 %v13505_v31, %v13622_v12  ;;  %v6646_v62 = vpop.permute.xlu1 %6645 }
 0x9b6   : > { %7414 = vmatmul.bf16.gmra.mxu0 %v9608_v9  ;;  %v7454_v14 = vpop.f32.mrf.mxu1  ;;  %7561 = vmatmul.bf16.gmra.mxu3 %v9608_v9 }
 0x9b7   : > { %v7455_v43 = vadd.f32 %v7454_v14, %v7406_v39  ;;  %7708 = vmatmul.bf16.gmra.mxu2 %v9608_v9  ;;  %7627 = vmatpush.bf16.msrb.mxu1 %v9648_v50  ;;  %v10372_v9 = vld [vmem:[#allocation9 + $0x184] sm:$0xf]  ;;  %v9821_v39 = vld [vmem:[#allocation9 + $0x18c] sm:$0xf0]  ;;  %v9827_v14 = vld [vmem:[#allocation9 + $0x188] sm:$0xf] }
 0x9b8   : > { %7578 = vmatpush.bf16.msrb.mxu0 %v9836_v42 }
 0x9b9   : > { %7792 = vst [vmem:[%s13634_s13 + $0xc0] sm:$0xff] %v7455_v43  ;;  %v9824_v43 = vor.u32 %v10372_v9, %v9821_v39 }
 0x9ba   : > { %v6640_v16 = vpop.permute.xlu0 %6639 }
 0x9bb   : > { %6675 = vst.msk [vmem:[#allocation3 + $0x98] sm:$0xf] %vm4414_vm0, %v6640_v16  ;;  %v10320_v48 = vld [vmem:[#allocation3 + $0xa0] sm:$0xf0]  ;;  %v9828_v16 = vor.u32 %v10374_v47, %v9827_v14 }
 0x9bc   : > { %7579 = vmatpush.bf16.msrb.mxu0 %v9824_v43 }
 0x9bd   : > { %7726 = vmatpush.bf16.msrb.mxu3 %v9828_v16 }
 0x9be   : > { %v7456_v59 = vpop.f32.mrf.mxu1 }
 0x9bf   : > { %v7457_v57 = vadd.f32 %v7456_v59, %v7408_v4  ;;  %v10326_v4 = vld [vmem:[#allocation9 + $0x10] sm:$0xf0] }
 0x9c1   : > { %7795 = vst [vmem:[%s13634_s13 + $0xd8] sm:$0xff] %v7457_v57  ;;  %v9636_v57 = vor.u32 %v10326_v4, %v9635_v34  ;;  %v7364_v34 = vadd.f32 %v13511_v60, %v13622_v12 }
 0x9c2   : > { %v9611_v21 = vld [vmem:[#allocation3 + $0x98] sm:$0xf] }
 0x9c3   : > { %v13767_v15 = vor.u32 %v10320_v48, %v9611_v21  ;;  %v7508_v21 = vpop.f32.mrf.mxu2  ;;  %v14212_v48 = vld [vmem:[#allocation26_spill] sm:$0xff]  ;;  %7628 = vmatpush.bf16.msrb.mxu1 %v9636_v57 }
 0x9c4   : > { %v7509_v2 = vadd.f32 %v7508_v21, %v13557_v7 }
 0x9c5   : > { %7463 = vmatmul.bf16.gmra.mxu1 %v13767_v15 }
 0x9e5   : > { %v4765_v23 = vpop.xlane.xlu0 %4764 }
 0x9e6   : > { %10864 = vrcp.f32 %v4765_v23 }
 0x9e7   : > { %v5889_v61 = vpop.xlane.xlu2 %5888 }
 0x9e8   : > { %10866 = vrcp.f32 %v5889_v61 }
 0x9ec   : > { %v10865_v59 = vpop.eup %10864 }
 0x9ed   : > { %v4903_v0 = vmul.f32 %v10865_v59, %v14212_v48  ;;  %v5891_v6 = vpop.xlane.xlu0 %5890  ;;  %v7410_v38 = vpop.f32.mrf.mxu0 }
 0x9ee   : > { %v10867_v11 = vpop.eup %10866  ;;  %10868 = vrcp.f32 %v5891_v6  ;;  %v7411_v39 = vadd.f32 %v7410_v38, %v7362_v33 }
 0x9ef   : > { %v4919_v51 = vpack.c.bf16 %v4903_v0, %v4903_v0  ;;  %v6027_v32 = vmul.f32 %v10867_v11, %v13611_v46  ;;  %v5522_v52 = vpop.permute.xlu2 %5521  ;;  %v7510_v46 = vpop.f32.mrf.mxu2 }
 0x9f0   : > { %5554 = vst.msk [vmem:[#allocation3 + $0xb8] sm:$0xf] %vm4414_vm0, %v5522_v52  ;;  %v7511_v61 = vadd.f32 %v7510_v46, %v13557_v7 }
 0x9f1   : > { %4935 = vst.msk [vmem:[#allocation3 + $0xac] sm:$0xf] %vm3795_vm2, %v4919_v51  ;;  %v6043_v3 = vpack.c.bf16 %v6027_v32, %v6027_v32 }
 0x9f2   : > { %5553 = vst.msk [vmem:[#allocation3 + $0xac] sm:$0xf] %vm4414_vm0, %v5520_v13 }
 0x9f3   : > { %6059 = vst.msk [vmem:[#allocation3 + $0xb0] sm:$0xf] %vm3795_vm2, %v6043_v3  ;;  %v7557_v37 = vpop.f32.mrf.mxu3 }
 0x9f4   : > { %v10869_v58 = vpop.eup %10868  ;;  %v13777_v44 = vadd.f32 %v7557_v37, %v7509_v2  ;;  %v7369_v2 = vadd.f32 %v13535_v8, %v13622_v12 }
 0x9f5   : > { %v6028_v10 = vmul.f32 %v10869_v58, %v13615_v36  ;;  %v7412_v47 = vpop.f32.mrf.mxu0 }
 0x9f6   : > { %v7413_v4 = vadd.f32 %v7412_v47, %v7364_v34  ;;  %v14217_v47 = vld [vmem:[#allocation17_spill] sm:$0xff] }
 0x9f7   : > { %v6044_v50 = vpack.c.bf16 %v6028_v10, %v6028_v10  ;;  %v9617_v23 = vld [vmem:[#allocation3 + $0xb4] sm:$0xf0]  ;;  %v7513_v60 = vpop.f32.mrf.mxu2  ;;  %v14218_v34 = vld [vmem:[#allocation29_spill] sm:$0xff] }
 0x9f8   : > { %v7514_v6 = vadd.f32 %v7513_v60, %v13557_v7 }
 0x9f9   : > { %6060 = vst.msk [vmem:[#allocation3 + $0xbc] sm:$0xf] %vm3795_vm2, %v6044_v50  ;;  %v10321_v42 = vld [vmem:[#allocation3 + $0xac] sm:$0xf] }
 0x9fa   : > { %6678 = vst.msk [vmem:[#allocation3 + $0xbc] sm:$0xf] %vm4414_vm0, %v6646_v62  ;;  %v9620_v9 = vor.u32 %v10321_v42, %v9617_v23  ;;  %v14215_v50 = vld [vmem:[#allocation18_spill] sm:$0xff] }
 0x9fb   : > { %v7559_v36 = vpop.f32.mrf.mxu3  ;;  %v7372_v33 = vadd.f32 %v14215_v50, %v13622_v12 }
 0x9fc   : > { %v13785_v14 = vadd.f32 %v7559_v36, %v7511_v61  ;;  %7419 = vmatmul.bf16.gmra.mxu0 %v9620_v9  ;;  %v7459_v43 = vpop.f32.mrf.mxu1  ;;  %7566 = vmatmul.bf16.gmra.mxu3 %v9620_v9 }
 0x9fd   : > { %v7460_v31 = vadd.f32 %v7459_v43, %v7411_v39  ;;  %7713 = vmatmul.bf16.gmra.mxu2 %v9620_v9 }
 0x9ff   : > { %7798 = vst [vmem:[%s13634_s13 + $0xf0] sm:$0xff] %v7460_v31  ;;  %v14216_v31 = vld [vmem:[#allocation42_spill] sm:$0xff] }
 0xa00   : > { %v6644_v16 = vpop.permute.xlu0 %6643 }
 0xa01   : > { %6677 = vst.msk [vmem:[#allocation3 + $0xb0] sm:$0xf] %vm4414_vm0, %v6644_v16  ;;  %v10323_v48 = vld [vmem:[#allocation3 + $0xb8] sm:$0xf0]  ;;  %v7374_v16 = vadd.f32 %v14217_v47, %v13622_v12 }
 0xa04   : > { %v7461_v59 = vpop.f32.mrf.mxu1 }
 0xa05   : > { %v7462_v57 = vadd.f32 %v7461_v59, %v7413_v4  ;;  %v7486_v4 = vadd.f32 %v14218_v34, %v13557_v7 }
 0xa07   : > { %7801 = vst [vmem:[%s13634_s13 + $0x108] sm:$0xff] %v7462_v57 }
 0xa08   : > { %v9623_v21 = vld [vmem:[#allocation3 + $0xb0] sm:$0xf] }
 0xa09   : > { %v9624_v0 = vor.u32 %v10323_v48, %v9623_v21  ;;  %v7535_v21 = vadd.f32 %v13591_v26, %v7486_v4 }
 0xa0b   : > { %7468 = vmatmul.bf16.gmra.mxu1 %v9624_v0 }
 0xa0c   : > { %7580 = vmatmul.bf16.vlgmr.msrb.gmra.mxu0 %v13545_v45  ;;  %7727 = vmatmul.bf16.vlgmr.msrb.gmra.mxu3 %v13545_v45  ;;  %v7515_v45 = vpop.f32.mrf.mxu2 }
 0xa14   : > { %v7518_v8 = vpop.f32.mrf.mxu2 }
 0xa1b   : > { %7629 = vmatmul.bf16.vlgmr.msrb.gmra.mxu1 %v13176_v1 }
 0xa1c   : > { %7585 = vmatmul.bf16.gmra.mxu0 %v13563_v27  ;;  %7732 = vmatmul.bf16.gmra.mxu3 %v13563_v27  ;;  %v7516_v27 = vadd.f32 %v7515_v45, %v13557_v7 }
 0xa2b   : > { %7634 = vmatmul.bf16.gmra.mxu1 %v13263_v63  ;;  %v7367_v63 = vadd.f32 %v13524_v30, %v13622_v12  ;;  %v14213_v30 = vld [vmem:[#allocation25_spill] sm:$0xff] }
 0xa2c   : > { %7590 = vmatmul.bf16.gmra.mxu0 %v13582_v22  ;;  %7737 = vmatmul.bf16.gmra.mxu3 %v13582_v22 }
 0xa33   : > { %v7415_v1 = vpop.f32.mrf.mxu0 }
 0xa34   : > { %v7416_v22 = vadd.f32 %v7415_v1, %v7367_v63 }
 0xa39   : > { %v7562_v11 = vpop.f32.mrf.mxu3 }
 0xa3a   : > { %v13801_v13 = vadd.f32 %v7562_v11, %v7514_v6  ;;  %v10870_v11 = vld [vmem:[#allocation10] sm:$0x7] }
 0xa3b   : > { %7639 = vmatmul.bf16.gmra.mxu1 %v13273_v41  ;;  %v7417_v41 = vpop.f32.mrf.mxu0  ;;  %v13844_v1 = vperm.slane %v10870_v11, 2 }
 0xa3c   : > { %7595 = vmatmul.bf16.gmra.mxu0 %v13637_v55  ;;  %7742 = vmatmul.bf16.gmra.mxu3 %v13637_v55  ;;  %v7418_v37 = vadd.f32 %v7417_v41, %v7369_v2  ;;  %v7491_v41 = vadd.f32 %v13644_v53, %v13557_v7 }
 0xa41   : > { %v7564_v51 = vpop.f32.mrf.mxu3 }
 0xa42   : > { %v13809_v32 = vadd.f32 %v7564_v51, %v7516_v27  ;;  %v7464_v52 = vpop.f32.mrf.mxu1 }
 0xa43   : > { %v7465_v3 = vadd.f32 %v7464_v52, %v7416_v22  ;;  %v14219_v22 = vld [vmem:[#allocation27_spill] sm:$0xff] }
 0xa45   : > { %7804 = vst [vmem:[%s13634_s13 + $0x120] sm:$0xff] %v7465_v3 }
 0xa4a   : > { %v7466_v55 = vpop.f32.mrf.mxu1 }
 0xa4b   : > { %v7467_v58 = vadd.f32 %v7466_v55, %v7418_v37  ;;  %7644 = vmatmul.bf16.gmra.mxu1 %v13322_v19  ;;  %v14214_v19 = vld [vmem:[#allocation43_spill] sm:$0xff]  ;;  %v7540_v37 = vadd.f32 %v13649_v25, %v7491_v41 }
 0xa4c   : > { %7600 = vmatmul.bf16.gmra.mxu0 %v13689_v54  ;;  %7747 = vmatmul.bf16.gmra.mxu3 %v13689_v54  ;;  %v7520_v54 = vpop.f32.mrf.mxu2 }
 0xa4d   : > { %7807 = vst [vmem:[%s13634_s13 + $0x138] sm:$0xff] %v7467_v58 }
 0xa54   : > { %v7679_v62 = vpop.f32.mrf.mxu2 }
 0xa5b   : > { %7649 = vmatmul.bf16.gmra.mxu1 %v13334_v49  ;;  %v7519_v49 = vadd.f32 %v7518_v8, %v13557_v7 }
 0xa5c   : > { %7605 = vmatmul.bf16.gmra.mxu0 %v13732_v17  ;;  %7752 = vmatmul.bf16.gmra.mxu3 %v13732_v17 }
 0xa6b   : > { %7654 = vmatmul.bf16.gmra.mxu1 %v14213_v30 }
 0xa6c   : > { %7610 = vmatmul.bf16.gmra.mxu0 %v13767_v15  ;;  %7757 = vmatmul.bf16.gmra.mxu3 %v13767_v15  ;;  %v7521_v15 = vadd.f32 %v7520_v54, %v13557_v7 }
 0xa79   : > { %v7420_v10 = vpop.f32.mrf.mxu0 }
 0xa7a   : > { %v7421_v42 = vadd.f32 %v7420_v10, %v7372_v33 }
 0xa7b   : > { %7659 = vmatmul.bf16.gmra.mxu1 %v14214_v19 }
 0xa7c   : > { %7615 = vmatmul.bf16.gmra.mxu0 %v9624_v0  ;;  %7762 = vmatmul.bf16.gmra.mxu3 %v9624_v0  ;;  %v7681_v0 = vpop.f32.mrf.mxu2 }
 0xa7f   : > { %v7567_v38 = vpop.f32.mrf.mxu3 }
 0xa80   : > { %v13826_v46 = vadd.f32 %v7567_v38, %v7519_v49 }
 0xa81   : > { %v7422_v17 = vpop.f32.mrf.mxu0 }
 0xa82   : > { %v7423_v59 = vadd.f32 %v7422_v17, %v7374_v16 }
 0xa84   : > { %v7684_v51 = vpop.f32.mrf.mxu2 }
 0xa87   : > { %v7569_v23 = vpop.f32.mrf.mxu3 }
 0xa88   : > { %v13831_v61 = vadd.f32 %v7569_v23, %v7521_v15  ;;  %v7469_v9 = vpop.f32.mrf.mxu1 }
 0xa89   : > { %v7470_v39 = vadd.f32 %v7469_v9, %v7421_v42  ;;  %v7581_v36 = vpop.f32.mrf.mxu0 }
 0xa8a   : > { %v7582_v43 = vadd.f32 %v7581_v36, %v13561_v56 }
 0xa8b   : > { %7810 = vst [vmem:[%s13634_s13 + $0x150] sm:$0xff] %v7470_v39  ;;  %7664 = vmatmul.bf16.gmra.mxu1 %v14216_v31 }
 0xa8c   : > { %7769 = vst [vmem:[%s13634_s13 + $0x8] sm:$0xff] %v7582_v43  ;;  %v7686_v19 = vpop.f32.mrf.mxu2 }
 0xa8f   : > { %v7728_v57 = vpop.f32.mrf.mxu3 }
 0xa90   : > { %v7471_v48 = vpop.f32.mrf.mxu1 }
 0xa91   : > { %v7472_v60 = vadd.f32 %v7471_v48, %v7423_v59  ;;  %v7583_v6 = vpop.f32.mrf.mxu0 }
 0xa92   : > { %v7584_v56 = vadd.f32 %v7583_v6, %v7535_v21  ;;  %v7501_v21 = vadd.f32 %v13742_v20, %v13557_v7 }
 0xa93   : > { %7813 = vst [vmem:[%s13634_s13 + $0x168] sm:$0xff] %v7472_v60 }
 0xa94   : > { %7772 = vst [vmem:[%s13634_s13 + $0x20] sm:$0xff] %v7584_v56  ;;  %v7689_v33 = vpop.f32.mrf.mxu2  ;;  %v7550_v60 = vadd.f32 %v13744_v5, %v7501_v21 }
 0xa97   : > { %v7730_v12 = vpop.f32.mrf.mxu3 }
 0xa98   : > { %v7630_v45 = vpop.f32.mrf.mxu1 }
 0xa99   : > { %v7631_v63 = vadd.f32 %v7630_v45, %v13844_v1  ;;  %v7586_v27 = vpop.f32.mrf.mxu0 }
 0xa9a   : > { %v7587_v26 = vadd.f32 %v7586_v27, %v14219_v22 }
 0xa9b   : > { %v7680_v52 = vadd.f32 %v7679_v62, %v7631_v63  ;;  %v7496_v62 = vadd.f32 %v13701_v28, %v13557_v7 }
 0xa9c   : > { %7775 = vst [vmem:[%s13634_s13 + $0x38] sm:$0xff] %v7587_v26  ;;  %v7691_v47 = vpop.f32.mrf.mxu2 }
 0xa9d   : > { %v7729_v3 = vadd.f32 %v7728_v57, %v7680_v52  ;;  %v7545_v23 = vadd.f32 %v13705_v24, %v7496_v62 }
 0xa9f   : > { %7770 = vst [vmem:[%s13634_s13 + $0x10] sm:$0xff] %v7729_v3  ;;  %v7733_v2 = vpop.f32.mrf.mxu3 }
 0xaa0   : > { %v7632_v55 = vpop.f32.mrf.mxu1 }
 0xaa1   : > { %v7633_v58 = vadd.f32 %v7632_v55, %v13844_v1  ;;  %v7588_v30 = vpop.f32.mrf.mxu0 }
 0xaa2   : > { %v7589_v8 = vadd.f32 %v7588_v30, %v7540_v37 }
 0xaa3   : > { %v7682_v10 = vadd.f32 %v7681_v0, %v7633_v58 }
 0xaa4   : > { %7778 = vst [vmem:[%s13634_s13 + $0x50] sm:$0xff] %v7589_v8  ;;  %v7694_v48 = vpop.f32.mrf.mxu2 }
 0xaa5   : > { %v7731_v54 = vadd.f32 %v7730_v12, %v7682_v10 }
 0xaa7   : > { %7773 = vst [vmem:[%s13634_s13 + $0x28] sm:$0xff] %v7731_v54  ;;  %v7735_v49 = vpop.f32.mrf.mxu3 }
 0xaa8   : > { %v7635_v38 = vpop.f32.mrf.mxu1 }
 0xaa9   : > { %v7636_v53 = vadd.f32 %v7635_v38, %v13844_v1  ;;  %v7591_v17 = vpop.f32.mrf.mxu0 }
 0xaaa   : > { %v7592_v25 = vadd.f32 %v7591_v17, %v13662_v29 }
 0xaab   : > { %v7685_v50 = vadd.f32 %v7684_v51, %v7636_v53 }
 0xaac   : > { %7781 = vst [vmem:[%s13634_s13 + $0x68] sm:$0xff] %v7592_v25  ;;  %v7696_v7 = vpop.f32.mrf.mxu2 }
 0xaad   : > { %v7734_v15 = vadd.f32 %v7733_v2, %v7685_v50 }
 0xaaf   : > { %7776 = vst [vmem:[%s13634_s13 + $0x40] sm:$0xff] %v7734_v15  ;;  %v7738_v42 = vpop.f32.mrf.mxu3 }
 0xab0   : > { %v7637_v9 = vpop.f32.mrf.mxu1 }
 0xab1   : > { %v7638_v39 = vadd.f32 %v7637_v9, %v13844_v1  ;;  %v7593_v36 = vpop.f32.mrf.mxu0 }
 0xab2   : > { %v7594_v43 = vadd.f32 %v7593_v36, %v7545_v23 }
 0xab3   : > { %v7687_v29 = vadd.f32 %v7686_v19, %v7638_v39 }
 0xab4   : > { %7784 = vst [vmem:[%s13634_s13 + $0x80] sm:$0xff] %v7594_v43  ;;  %v7699_v41 = vpop.f32.mrf.mxu2 }
 0xab5   : > { %v7736_v31 = vadd.f32 %v7735_v49, %v7687_v29 }
 0xab7   : > { %7779 = vst [vmem:[%s13634_s13 + $0x58] sm:$0xff] %v7736_v31  ;;  %v7740_v16 = vpop.f32.mrf.mxu3 }
 0xab8   : > { %v7640_v34 = vpop.f32.mrf.mxu1 }
 0xab9   : > { %v7641_v28 = vadd.f32 %v7640_v34, %v13844_v1  ;;  %v7596_v4 = vpop.f32.mrf.mxu0 }
 0xaba   : > { %v7597_v24 = vadd.f32 %v7596_v4, %v13709_v18 }
 0xabb   : > { %v7690_v59 = vadd.f32 %v7689_v33, %v7641_v28 }
 0xabc   : > { %7787 = vst [vmem:[%s13634_s13 + $0x98] sm:$0xff] %v7597_v24  ;;  %v7701_v49 = vpop.f32.mrf.mxu2 }
 0xabd   : > { %v7739_v57 = vadd.f32 %v7738_v42, %v7690_v59 }
 0xabf   : > { %7782 = vst [vmem:[%s13634_s13 + $0x70] sm:$0xff] %v7739_v57  ;;  %v7743_v0 = vpop.f32.mrf.mxu3 }
 0xac0   : > { %v7642_v6 = vpop.f32.mrf.mxu1 }
 0xac1   : > { %v7643_v56 = vadd.f32 %v7642_v6, %v13844_v1  ;;  %v7598_v11 = vpop.f32.mrf.mxu0 }
 0xac2   : > { %v7599_v12 = vadd.f32 %v7598_v11, %v7550_v60 }
 0xac3   : > { %v7692_v18 = vadd.f32 %v7691_v47, %v7643_v56 }
 0xac4   : > { %7790 = vst [vmem:[%s13634_s13 + $0xb0] sm:$0xff] %v7599_v12  ;;  %v7704_v15 = vpop.f32.mrf.mxu2 }
 0xac5   : > { %v7741_v45 = vadd.f32 %v7740_v16, %v7692_v18 }
 0xac7   : > { %7785 = vst [vmem:[%s13634_s13 + $0x88] sm:$0xff] %v7741_v45  ;;  %v7745_v63 = vpop.f32.mrf.mxu3 }
 0xac8   : > { %v7645_v27 = vpop.f32.mrf.mxu1 }
 0xac9   : > { %v7646_v20 = vadd.f32 %v7645_v27, %v13844_v1  ;;  %v7601_v22 = vpop.f32.mrf.mxu0 }
 0xaca   : > { %v7602_v5 = vadd.f32 %v7601_v22, %v13751_v40 }
 0xacb   : > { %v7695_v26 = vadd.f32 %v7694_v48, %v7646_v20 }
 0xacc   : > { %7793 = vst [vmem:[%s13634_s13 + $0xc8] sm:$0xff] %v7602_v5  ;;  %v7706_v29 = vpop.f32.mrf.mxu2 }
 0xacd   : > { %v7744_v51 = vadd.f32 %v7743_v0, %v7695_v26 }
 0xacf   : > { %7788 = vst [vmem:[%s13634_s13 + $0xa0] sm:$0xff] %v7744_v51  ;;  %v7748_v52 = vpop.f32.mrf.mxu3 }
 0xad0   : > { %v7647_v3 = vpop.f32.mrf.mxu1 }
 0xad1   : > { %v7648_v2 = vadd.f32 %v7647_v3, %v13844_v1  ;;  %v7603_v37 = vpop.f32.mrf.mxu0 }
 0xad2   : > { %v7604_v55 = vadd.f32 %v7603_v37, %v13759_v35 }
 0xad3   : > { %v7697_v58 = vadd.f32 %v7696_v7, %v7648_v2 }
 0xad4   : > { %7796 = vst [vmem:[%s13634_s13 + $0xe0] sm:$0xff] %v7604_v55  ;;  %v7709_v4 = vpop.f32.mrf.mxu2 }
 0xad5   : > { %v7746_v30 = vadd.f32 %v7745_v63, %v7697_v58 }
 0xad7   : > { %7791 = vst [vmem:[%s13634_s13 + $0xb8] sm:$0xff] %v7746_v30  ;;  %v7750_v8 = vpop.f32.mrf.mxu3 }
 0xad8   : > { %v7650_v40 = vpop.f32.mrf.mxu1 }
 0xad9   : > { %v7651_v10 = vadd.f32 %v7650_v40, %v13844_v1  ;;  %v7606_v19 = vpop.f32.mrf.mxu0 }
 0xada   : > { %v7607_v54 = vadd.f32 %v7606_v19, %v13777_v44 }
 0xadb   : > { %v7700_v38 = vadd.f32 %v7699_v41, %v7651_v10 }
 0xadc   : > { %7799 = vst [vmem:[%s13634_s13 + $0xf8] sm:$0xff] %v7607_v54  ;;  %v7711_v6 = vpop.f32.mrf.mxu2 }
 0xadd   : > { %v7749_v53 = vadd.f32 %v7748_v52, %v7700_v38 }
 0xadf   : > { %7794 = vst [vmem:[%s13634_s13 + $0xd0] sm:$0xff] %v7749_v53  ;;  %v7753_v50 = vpop.f32.mrf.mxu3 }
 0xae0   : > { %v7652_v17 = vpop.f32.mrf.mxu1 }
 0xae1   : > { %v7653_v35 = vadd.f32 %v7652_v17, %v13844_v1  ;;  %v7608_v25 = vpop.f32.mrf.mxu0 }
 0xae2   : > { %v7609_v33 = vadd.f32 %v7608_v25, %v13785_v14 }
 0xae3   : > { %v7702_v62 = vadd.f32 %v7701_v49, %v7653_v35 }
 0xae4   : > { %7802 = vst [vmem:[%s13634_s13 + $0x110] sm:$0xff] %v7609_v33 }
 0xae5   : > { %v7751_v42 = vadd.f32 %v7750_v8, %v7702_v62 }
 0xae7   : > { %7797 = vst [vmem:[%s13634_s13 + $0xe8] sm:$0xff] %v7751_v42  ;;  %v7755_v43 = vpop.f32.mrf.mxu3 }
 0xae8   : > { %v7655_v44 = vpop.f32.mrf.mxu1 }
 0xae9   : > { %v7656_v23 = vadd.f32 %v7655_v44, %v13844_v1  ;;  %v7611_v9 = vpop.f32.mrf.mxu0 }
 0xaea   : > { %v7612_v39 = vadd.f32 %v7611_v9, %v13801_v13 }
 0xaeb   : > { %v7705_v36 = vadd.f32 %v7704_v15, %v7656_v23 }
 0xaec   : > { %7805 = vst [vmem:[%s13634_s13 + $0x128] sm:$0xff] %v7612_v39 }
 0xaed   : > { %v7754_v31 = vadd.f32 %v7753_v50, %v7705_v36 }
 0xaef   : > { %7800 = vst [vmem:[%s13634_s13 + $0x100] sm:$0xff] %v7754_v31  ;;  %v7758_v13 = vpop.f32.mrf.mxu3 }
 0xaf0   : > { %v7657_v14 = vpop.f32.mrf.mxu1 }
 0xaf1   : > { %v7658_v47 = vadd.f32 %v7657_v14, %v13844_v1  ;;  %v7613_v16 = vpop.f32.mrf.mxu0 }
 0xaf2   : > { %v7614_v34 = vadd.f32 %v7613_v16, %v13809_v32 }
 0xaf3   : > { %v7707_v28 = vadd.f32 %v7706_v29, %v7658_v47 }
 0xaf4   : > { %7808 = vst [vmem:[%s13634_s13 + $0x140] sm:$0xff] %v7614_v34 }
 0xaf5   : > { %v7756_v24 = vadd.f32 %v7755_v43, %v7707_v28 }
 0xaf7   : > { %7803 = vst [vmem:[%s13634_s13 + $0x118] sm:$0xff] %v7756_v24  ;;  %v7760_v32 = vpop.f32.mrf.mxu3 }
 0xaf8   : > { %v7660_v59 = vpop.f32.mrf.mxu1 }
 0xaf9   : > { %v7661_v57 = vadd.f32 %v7660_v59, %v13844_v1  ;;  %v7616_v21 = vpop.f32.mrf.mxu0 }
 0xafa   : > { %v7617_v48 = vadd.f32 %v7616_v21, %v13826_v46  ;;  %v7714_v46 = vpop.f32.mrf.mxu2 }
 0xafb   : > { %v7710_v0 = vadd.f32 %v7709_v4, %v7661_v57 }
 0xafc   : > { %7811 = vst [vmem:[%s13634_s13 + $0x158] sm:$0xff] %v7617_v48 }
 0xafd   : > { %v7759_v60 = vadd.f32 %v7758_v13, %v7710_v0 }
 0xaff   : > { %7806 = vst [vmem:[%s13634_s13 + $0x130] sm:$0xff] %v7759_v60  ;;  %v7763_v20 = vpop.f32.mrf.mxu3 }
 0xb00   : > { %v7662_v56 = vpop.f32.mrf.mxu1 }
 0xb01   : > { %v7663_v11 = vadd.f32 %v7662_v56, %v13844_v1  ;;  %v7618_v12 = vpop.f32.mrf.mxu0 }
 0xb02   : > { %v7619_v18 = vadd.f32 %v7618_v12, %v13831_v61  ;;  %v7716_v51 = vpop.f32.mrf.mxu2 }
 0xb03   : > { %v7712_v45 = vadd.f32 %v7711_v6, %v7663_v11 }
 0xb04   : > { %7814 = vst [vmem:[%s13634_s13 + $0x170] sm:$0xff] %v7619_v18 }
 0xb05   : > { %v7761_v63 = vadd.f32 %v7760_v32, %v7712_v45 }
 0xb07   : > { %7809 = vst [vmem:[%s13634_s13 + $0x148] sm:$0xff] %v7761_v63  ;;  %v7765_v3 = vpop.f32.mrf.mxu3 }
 0xb08   : > { %v7665_v27 = vpop.f32.mrf.mxu1 }
 0xb09   : > { %v7666_v7 = vadd.f32 %v7665_v27, %v13844_v1 }
 0xb0b   : > { %v7715_v22 = vadd.f32 %v7714_v46, %v7666_v7 }
 0xb0d   : > { %v7764_v5 = vadd.f32 %v7763_v20, %v7715_v22 }
 0xb0f   : > { %7812 = vst [vmem:[%s13634_s13 + $0x160] sm:$0xff] %v7764_v5 }
 0xb10   : > { %v7667_v61 = vpop.f32.mrf.mxu1 }
 0xb11   : > { %v7668_v26 = vadd.f32 %v7667_v61, %v13844_v1 }
 0xb13   : > { %v7717_v52 = vadd.f32 %v7716_v51, %v7668_v26 }
 0xb15   : > { %v7766_v41 = vadd.f32 %v7765_v3, %v7717_v52 }
 0xb17   : > { %7815 = vst [vmem:[%s13634_s13 + $0x178] sm:$0xff] %v7766_v41 }
 0xb18   : > { %11018 = shalt.err (!%p11015_p10)
}
 0xb19   : > { %s11076_s10 = smov 384   ;;  %s11077_s21 = smov 24  }
 0xb1a   : > { %10415 = dma.vmem_to_hbm [thread:$0]  (%p11189_p7), %s7830_s28, 6144, %s7832_s29, %s7817_s19, %s11076_s10, %s11076_s10, %s11077_s21  }
 0xb1b PF: > { %s7846_s26 = sand.u32 1, %s11053_s15   ;;  %p14220_p12 = scmp.ge.s32.totalorder %s11065_s18, 2 }
 0xb1c   : > { %s7847_s13 = scalar_lea.sflag [#allocation6], %s7846_s26 }
 0xb1d   : > { %p10432_p13 = pnand %p14220_p12, %p11138_p6 }
 0xb1f   : > { %p10433_p0 = pneg %p10432_p13 }
 0xb21   : > { %11048 = dma.done.wait (%p10433_p0), %s7847_s13, 6144  }
 0xb22   : > { %11050 = vsyncadd (%p10433_p0), %s7847_s13, 4294961152  ;;  %p19_p3 = scmp.ge.s32.totalorder %s11175_s25, 4   ;;  %s14221_s15 = smov %s11057_s16 }
 0xb23   : > { %s14222_s16 = smov %s11061_s17  ;;  %s14223_s17 = smov %s11185_s30 }
 0xb24   : > { %s14224_s18 = smov %s11175_s25  ;;  %21 = sbr.rel (!%p19_p3) target bundleno = 7 (0x7), region = 93 }
 0xb29   :  { %7853 = vsyncpa [#allocation5], 1 }
 0xb2a   :  { %7855 = vsyncpa [#allocation5 + $0x1], 1 }
 0xb2b   :  { %7856 = vsyncpa [#allocation8], 1 }
 0xb2c   :  { %7857 = vsyncpa [#allocation11], 1 }
 0xb2d   :  { %7858 = vsyncpa [#allocation6], 1 }
 0xb2e   :  { %7860 = vsyncpa [#allocation6 + $0x1], 1 }

</bundles_post_ra>
